<compile_context>
chip_gen: v7x
topology: tpu7x:2x2x1
jax: 0.10.0
libtpu: 0.0.40
codegen_flags: <defaults>
</compile_context>

<pallas_src>
import dataclasses
import functools

import numpy as np

import jax
import jax.numpy as jnp
from jax.experimental import pallas as pl
from jax.experimental.pallas import tpu as pltpu


def _round_up(x, m):
    return (x + m - 1) // m * m


# ----------------------------------------------------------------------------
# Tile-size selection (per matmul, all multiples of (8, 128))
# ----------------------------------------------------------------------------
_TM_CAP = 640      # rows (spatial positions) per tile
_TM_FLOOR = 256
_TN_CAP = 512      # output channels per tile
_TK_CAP = 512      # reduction tile (keeps double-buffered VMEM v7x-safe)


def _pick_tm(M):
    """Largest reasonable row tile; prefer tiles that divide M exactly."""
    M8 = _round_up(M, 8)
    if M8 <= _TM_CAP:
        return M8
    best_tm, best_pad = _TM_FLOOR, _round_up(M, _TM_FLOOR)
    for tm in range(_TM_FLOOR, _TM_CAP + 1, 8):
        pad = _round_up(M, tm)
        if pad < best_pad or (pad == best_pad and tm > best_tm):
            best_tm, best_pad = tm, pad
    return best_tm


def _pick_tn(N):
    Np = _round_up(N, 128)
    if Np <= _TN_CAP:
        return Np, Np
    for tn in range(_TN_CAP, 127, -128):
        if Np % tn == 0:
            return Np, tn
    return Np, 128


def _pick_tk(K):
    Kp = _round_up(K, 128)
    for tk in range(min(_TK_CAP, Kp), 127, -128):
        if Kp % tk == 0:
            return Kp, tk
    return Kp, 128


# ----------------------------------------------------------------------------
# Pallas kernels: fused matmul + BN scale/bias (+ residual) (+ ReLU)
# ----------------------------------------------------------------------------
def _mm_kernel(a_ref, b_ref, sb_ref, o_ref, acc_ref, *, relu):
    k = pl.program_id(2)

    @pl.when(k == 0)
    def _():
        acc_ref[...] = jnp.zeros_like(acc_ref)

    acc_ref[...] += jnp.dot(a_ref[...], b_ref[...],
                            preferred_element_type=jnp.float32)

    @pl.when(k == pl.num_programs(2) - 1)
    def _():
        y = acc_ref[...] * sb_ref[0:1, :] + sb_ref[1:2, :]
        if relu:
            y = jnp.maximum(y, 0.0)
        o_ref[...] = y


def _mm_res_kernel(a_ref, b_ref, sb_ref, r_ref, o_ref, acc_ref, *, relu):
    k = pl.program_id(2)

    @pl.when(k == 0)
    def _():
        acc_ref[...] = jnp.zeros_like(acc_ref)

    acc_ref[...] += jnp.dot(a_ref[...], b_ref[...],
                            preferred_element_type=jnp.float32)

    @pl.when(k == pl.num_programs(2) - 1)
    def _():
        y = acc_ref[...] * sb_ref[0:1, :] + sb_ref[1:2, :] + r_ref[...]
        if relu:
            y = jnp.maximum(y, 0.0)
        o_ref[...] = y


# ----------------------------------------------------------------------------
# pallas_call constructors (cached per unique padded shape / tiling so each
# distinct matmul shape is Mosaic-compiled exactly once)
# ----------------------------------------------------------------------------
_MM_CACHE = {}


def _get_mm_fn(Mp, Kp, Np, TM, TN, TK, relu, has_res):
    key = (Mp, Kp, Np, TM, TN, TK, relu, has_res)
    fn = _MM_CACHE.get(key)
    if fn is not None:
        return fn

    grid = (Mp // TM, Np // TN, Kp // TK)
    a_spec = pl.BlockSpec((TM, TK), lambda i, j, k: (i, k))
    b_spec = pl.BlockSpec((TK, TN), lambda i, j, k: (k, j))
    sb_spec = pl.BlockSpec((8, TN), lambda i, j, k: (0, j))
    o_spec = pl.BlockSpec((TM, TN), lambda i, j, k: (i, j))

    in_specs = [a_spec, b_spec, sb_spec]
    kernel = _mm_kernel
    bytes_accessed = Mp * Kp * 2 + Kp * Np * 2 + Mp * Np * 4 + 8 * Np * 4
    if has_res:
        in_specs.append(pl.BlockSpec((TM, TN), lambda i, j, k: (i, j)))
        kernel = _mm_res_kernel
        bytes_accessed += Mp * Np * 4

    fn = pl.pallas_call(
        functools.partial(kernel, relu=relu),
        out_shape=jax.ShapeDtypeStruct((Mp, Np), jnp.float32),
        grid_spec=pltpu.PrefetchScalarGridSpec(
            num_scalar_prefetch=0,
            grid=grid,
            in_specs=in_specs,
            out_specs=o_spec,
            scratch_shapes=[pltpu.VMEM((TM, TN), jnp.float32)]),
        compiler_params=pltpu.CompilerParams(
            dimension_semantics=("parallel", "parallel", "arbitrary"),
            vmem_limit_bytes=48 * 1024 * 1024),
        cost_estimate=pl.CostEstimate(
            flops=2 * Mp * Kp * Np,
            transcendentals=0,
            bytes_accessed=bytes_accessed),
    )
    _MM_CACHE[key] = fn
    return fn


def fused_matmul(A, B, scale, bias, *, relu, residual=None):
    """out = [relu]((A @ B) * scale + bias [+ residual]).

    A:(M,K), B:(K,N).  Operands go to the MXU as bf16; accumulation and the
    BN/residual/ReLU epilogue are f32.
    """
    M, K = A.shape
    _, N = B.shape
    TM = _pick_tm(M)
    Kp, TK = _pick_tk(K)
    Np, TN = _pick_tn(N)
    Mp = _round_up(M, TM)

    Ap = jnp.pad(A.astype(jnp.bfloat16), ((0, Mp - M), (0, Kp - K)))
    Bp = jnp.pad(B.astype(jnp.bfloat16), ((0, Kp - K), (0, Np - N)))
    sb = jnp.zeros((8, Np), jnp.float32)
    sb = sb.at[0, :N].set(scale.astype(jnp.float32))
    sb = sb.at[1, :N].set(bias.astype(jnp.float32))

    args = [Ap, Bp, sb]
    if residual is not None:
        r = residual.astype(jnp.float32)
        if (Mp - M) or (Np - N):
            r = jnp.pad(r, ((0, Mp - M), (0, Np - N)))
        args.append(r)

    fn = _get_mm_fn(Mp, Kp, Np, TM, TN, TK, relu, residual is not None)
    out = fn(*args)
    return out[:M, :N]


# ----------------------------------------------------------------------------
# Plain-JAX glue (fused by the single surrounding jit)
# ----------------------------------------------------------------------------
def conv2d(x, w, scale, bias, *, stride=1, padding=0, dilation=1,
           relu=False, residual=None):
    """x: NHWC f32, w: (KH,KW,Cin,Cout). BN/bias/ReLU/residual fused in-kernel."""
    N, H, W, Cin = x.shape
    KH, KW, _, Cout = w.shape
    Ho = (H + 2 * padding - dilation * (KH - 1) - 1) // stride + 1
    Wo = (W + 2 * padding - dilation * (KW - 1) - 1) // stride + 1

    xb = x.astype(jnp.bfloat16)   # halve the patch-matrix footprint/traffic
    if KH == 1 and KW == 1 and padding == 0:
        A = xb[:, ::stride, ::stride, :].reshape(N * Ho * Wo, Cin)
        B = w.reshape(Cin, Cout)
    else:
        # TODO(synk): the KHxKW patch matrix is still materialized (now bf16);
        # a fully direct conv (tap offsets folded into the K grid axis via
        # element-offset BlockSpecs) would remove the remaining blow-up.
        xp = jnp.pad(xb, ((0, 0), (padding, padding), (padding, padding), (0, 0)))
        taps = []
        for ky in range(KH):
            for kx in range(KW):
                taps.append(
                    xp[:, ky * dilation: ky * dilation + stride * (Ho - 1) + 1: stride,
                       kx * dilation: kx * dilation + stride * (Wo - 1) + 1: stride, :])
        A = jnp.stack(taps, axis=3).reshape(N * Ho * Wo, KH * KW * Cin)
        B = w.reshape(KH * KW * Cin, Cout)

    res = residual.reshape(N * Ho * Wo, Cout) if residual is not None else None
    out = fused_matmul(A, B, scale, bias, relu=relu, residual=res)
    return out.reshape(N, Ho, Wo, Cout)


def maxpool_3x3_s2_p1(x):
    """MaxPool2d(kernel_size=3, stride=2, padding=1) on NHWC (fused by XLA)."""
    return jax.lax.reduce_window(
        x, jnp.array(-jnp.inf, x.dtype), jax.lax.max,
        window_dimensions=(1, 3, 3, 1),
        window_strides=(1, 2, 2, 1),
        padding=((0, 0), (1, 1), (1, 1), (0, 0)))


def bn_scale_bias(bn, eps=1e-5):
    gamma, beta, mean, var = bn
    s = gamma / jnp.sqrt(var + eps)
    return s, beta - mean * s


def _interp_matrix(n_in, n_out):
    # torch nn.Upsample(mode='bilinear', align_corners=False) coordinates.
    scale = n_in / n_out
    coords = (np.arange(n_out) + 0.5) * scale - 0.5
    coords = np.clip(coords, 0.0, n_in - 1)
    lo = np.floor(coords).astype(np.int64)
    hi = np.minimum(lo + 1, n_in - 1)
    w_hi = (coords - lo).astype(np.float32)
    w_lo = 1.0 - w_hi
    m = np.zeros((n_out, n_in), np.float32)
    m[np.arange(n_out), lo] += w_lo
    m[np.arange(n_out), hi] += w_hi
    return jnp.asarray(m)


def bilinear_resize(x, out_h, out_w):
    _, H, W, _ = x.shape
    Ah = _interp_matrix(H, out_h)
    Aw = _interp_matrix(W, out_w)
    y = jnp.einsum('oh,nhwc->nowc', Ah, x)
    y = jnp.einsum('pw,nowc->nopc', Aw, y)
    return y


# ----------------------------------------------------------------------------
# Model configuration & synthetic parameters
# ----------------------------------------------------------------------------
@dataclasses.dataclass(frozen=True)
class PSPNetConfig:
    input_size: int
    stem: tuple          # stem conv channels (c1, c2, c3)
    planes: tuple        # bottleneck planes for layers 2..5
    blocks: tuple        # block counts for layers 2..5
    pool_sizes: tuple    # PPM avg-pool kernel/stride (ratios 1:2:3:6)
    num_classes: int = 21


def pspnet101_voc2012_config():
    """Exact sizes of the PyTorch reference: 473x473 input, ResNet-101 body."""
    return PSPNetConfig(input_size=473, stem=(64, 64, 128),
                        planes=(64, 128, 256, 512), blocks=(3, 4, 23, 3),
                        pool_sizes=(60, 30, 20, 10), num_classes=21)


def smoke_test_config():
    """Same topology at reduced width/depth/resolution (6x6 PPM features)."""
    return PSPNetConfig(input_size=41, stem=(16, 16, 32),
                        planes=(16, 32, 64, 128), blocks=(2, 2, 2, 2),
                        pool_sizes=(6, 3, 2, 1), num_classes=21)


class KeyGen:
    def __init__(self, key):
        self.key = key

    def __call__(self):
        self.key, sub = jax.random.split(self.key)
        return sub


def init_conv(kg, kh, kw, cin, cout):
    fan_in = kh * kw * cin
    return jax.random.normal(kg(), (kh, kw, cin, cout), jnp.float32) * (0.5 / np.sqrt(fan_in))


def init_bn(kg, c):
    gamma = 1.0 + 0.1 * jax.random.normal(kg(), (c,), jnp.float32)
    beta = 0.1 * jax.random.normal(kg(), (c,), jnp.float32)
    mean = 0.1 * jax.random.normal(kg(), (c,), jnp.float32)
    var = 1.0 + 0.1 * jax.random.uniform(kg(), (c,), jnp.float32)
    return (gamma, beta, mean, var)


def init_bottleneck(kg, inplanes, planes, has_ds):
    p = {
        'w1': init_conv(kg, 1, 1, inplanes, planes), 'bn1': init_bn(kg, planes),
        'w2': init_conv(kg, 3, 3, planes, planes), 'bn2': init_bn(kg, planes),
        'w3': init_conv(kg, 1, 1, planes, planes * 4), 'bn3': init_bn(kg, planes * 4),
    }
    if has_ds:
        p['ds_w'] = init_conv(kg, 1, 1, inplanes, planes * 4)
        p['ds_bn'] = init_bn(kg, planes * 4)
    return p


def init_layer(kg, inplanes, planes, num_blocks):
    blocks = [init_bottleneck(kg, inplanes, planes, True)]
    for _ in range(num_blocks - 1):
        blocks.append(init_bottleneck(kg, planes * 4, planes, False))
    return blocks


def init_pspnet(key, cfg):
    kg = KeyGen(key)
    c1, c2, c3 = cfg.stem
    params = {}
    params['layer1'] = {
        'w1': init_conv(kg, 3, 3, 3, c1), 'bn1': init_bn(kg, c1),
        'w2': init_conv(kg, 3, 3, c1, c2), 'bn2': init_bn(kg, c2),
        'w3': init_conv(kg, 3, 3, c2, c3), 'bn3': init_bn(kg, c3),
    }
    params['layer2'] = init_layer(kg, c3, cfg.planes[0], cfg.blocks[0])
    params['layer3'] = init_layer(kg, cfg.planes[0] * 4, cfg.planes[1], cfg.blocks[1])
    params['layer4'] = init_layer(kg, cfg.planes[1] * 4, cfg.planes[2], cfg.blocks[2])
    params['layer5'] = init_layer(kg, cfg.planes[2] * 4, cfg.planes[3], cfg.blocks[3])

    backbone_out = cfg.planes[3] * 4
    ppm_ch = backbone_out // 4
    params['ppm'] = [{'w': init_conv(kg, 1, 1, backbone_out, ppm_ch),
                      'bn': init_bn(kg, ppm_ch)} for _ in range(4)]
    pred_in = backbone_out + 4 * ppm_ch
    pred_mid = cfg.planes[3]
    params['pred'] = {
        'w1': init_conv(kg, 3, 3, pred_in, pred_mid), 'bn1': init_bn(kg, pred_mid),
        'w2': init_conv(kg, 1, 1, pred_mid, cfg.num_classes),
        'b2': 0.1 * jax.random.normal(kg(), (cfg.num_classes,), jnp.float32),
    }
    return params


# ----------------------------------------------------------------------------
# Forward pass
# ----------------------------------------------------------------------------
def bottleneck_fwd(x, p, stride, padding, dilation):
    if 'ds_w' in p:
        residual = conv2d(x, p['ds_w'], *bn_scale_bias(p['ds_bn']),
                          stride=stride, relu=False)
    else:
        residual = x
    out = conv2d(x, p['w1'], *bn_scale_bias(p['bn1']), relu=True)
    out = conv2d(out, p['w2'], *bn_scale_bias(p['bn2']), stride=stride,
                 padding=padding, dilation=dilation, relu=True)
    # conv3 + bn3 + residual-add + relu fused into one Pallas kernel
    out = conv2d(out, p['w3'], *bn_scale_bias(p['bn3']), relu=True,
                 residual=residual)
    return out


def layer_fwd(x, blocks, stride, dilation):
    padding = dilation
    x = bottleneck_fwd(x, blocks[0], stride, padding, dilation)
    for p in blocks[1:]:
        x = bottleneck_fwd(x, p, 1, padding, dilation)
    return x


def ppm_fwd(x, pp, pool_sizes):
    N, H, W, C = x.shape
    results = []
    for p, k in zip(pp, pool_sizes):
        # AvgPool2d(kernel=stride=k) with exact tiling -> reshape + mean (glue)
        y = x.reshape(N, H // k, k, W // k, k, C).mean(axis=(2, 4))
        y = conv2d(y, p['w'], *bn_scale_bias(p['bn']), relu=False)
        y = bilinear_resize(y, H, W)
        results.append(y)
    results.append(x)
    results.reverse()          # [x, p4, p3, p2, p1]
    return jnp.concatenate(results, axis=-1)   # channel dim in NHWC


def pspnet_forward(params, x_nchw, *, pool_sizes, out_size):
    x = jnp.transpose(x_nchw, (0, 2, 3, 1))  # NCHW -> NHWC
    p1 = params['layer1']
    x = conv2d(x, p1['w1'], *bn_scale_bias(p1['bn1']), stride=2, padding=1, relu=True)
    x = conv2d(x, p1['w2'], *bn_scale_bias(p1['bn2']), stride=1, padding=1, relu=True)
    x = conv2d(x, p1['w3'], *bn_scale_bias(p1['bn3']), stride=1, padding=1, relu=True)
    x = maxpool_3x3_s2_p1(x)

    x = layer_fwd(x, params['layer2'], stride=1, dilation=1)
    x = layer_fwd(x, params['layer3'], stride=2, dilation=1)
    x = layer_fwd(x, params['layer4'], stride=1, dilation=2)
    x = layer_fwd(x, params['layer5'], stride=1, dilation=4)

    x = ppm_fwd(x, params['ppm'], pool_sizes)

    pp = params['pred']
    x = conv2d(x, pp['w1'], *bn_scale_bias(pp['bn1']), stride=1, padding=1, relu=True)
    # TODO(synk): Dropout(p=0.5) implemented as eval-mode identity (inference).
    ones = jnp.ones((pp['b2'].shape[0],), jnp.float32)
    x = conv2d(x, pp['w2'], ones, pp['b2'], relu=False)     # conv with bias
    x = bilinear_resize(x, out_size, out_size)
    return jnp.transpose(x, (0, 3, 1, 2))  # NHWC -> NCHW


# ----------------------------------------------------------------------------
if __name__ == "__main__":
    # Scaled-down smoke-test config (same topology / strides / dilations /
    # pool-size ratios as the PyTorch module) so compile + run fits the
    # sandbox timeout.  For the full model use: cfg = pspnet101_voc2012_config()
    cfg = smoke_test_config()

    key = jax.random.PRNGKey(0)
    pkey, xkey = jax.random.split(key)
    params = init_pspnet(pkey, cfg)
    x = jax.random.normal(xkey, (1, 3, cfg.input_size, cfg.input_size), jnp.float32)

    fwd = jax.jit(functools.partial(pspnet_forward,
                                    pool_sizes=cfg.pool_sizes,
                                    out_size=cfg.input_size))
    out = jax.block_until_ready(fwd(params, x))

    assert out.shape == (1, cfg.num_classes, cfg.input_size, cfg.input_size), out.shape
    assert bool(jnp.all(jnp.isfinite(out)))
    print("KERNEL_OK")
</pallas_src>

<mosaic_0001>
module attributes {stable_mosaic.version = 11 : i64} {
  func.func @_mm_kernel(%arg0: i32, %arg1: i32, %arg2: i32, %arg3: memref<448x128xbf16, #tpu.memory_space<vmem>>, %arg4: memref<128x128xbf16, #tpu.memory_space<vmem>>, %arg5: memref<8x128xf32, #tpu.memory_space<vmem>>, %arg6: memref<448x128xf32, #tpu.memory_space<vmem>>, %arg7: memref<448x128xf32, #tpu.memory_space<vmem>>) attributes {dimension_semantics = [#tpu.dimension_semantics<parallel>, #tpu.dimension_semantics<parallel>, #tpu.dimension_semantics<arbitrary>], iteration_bounds = array<i64: 1, 1, 1>, scalar_prefetch = 0 : i64, scratch_operands = 1 : i64, tpu.core_type = #tpu.core_type<tc>, window_params = [{transform_indices = @transform_0, window_bounds = array<i64: 448, 128>}, {transform_indices = @transform_1, window_bounds = array<i64: 128, 128>}, {transform_indices = @transform_2, window_bounds = array<i64: 8, 128>}, {transform_indices = @transform_3, window_bounds = array<i64: 448, 128>}]} {
    %c0_i32 = arith.constant 0 : i32
    %0 = arith.cmpi eq, %arg2, %c0_i32 : i32
    %1 = arith.extui %0 : i1 to i32
    %c0_i32_0 = arith.constant 0 : i32
    %2 = arith.cmpi ne, %1, %c0_i32_0 : i32
    scf.if %2 {
      %cst_10 = arith.constant 0.000000e+00 : f32
      %12 = vector.broadcast %cst_10 : f32 to vector<448x128xf32>
      %c0_11 = arith.constant 0 : index
      %c0_12 = arith.constant 0 : index
      %13 = vector.load %arg7[%c0_11, %c0_12] : memref<448x128xf32, #tpu.memory_space<vmem>>, vector<448x128xf32>
      tpu.vector_store %arg7[%c0_11, %c0_12], %12 {strides = array<i32>} : memref<448x128xf32, #tpu.memory_space<vmem>>, vector<448x128xf32>,
    } else {
    }
    %c0 = arith.constant 0 : index
    %c0_1 = arith.constant 0 : index
    %3 = vector.load %arg7[%c0, %c0_1] : memref<448x128xf32, #tpu.memory_space<vmem>>, vector<448x128xf32>
    %c0_2 = arith.constant 0 : index
    %c0_3 = arith.constant 0 : index
    %4 = vector.load %arg3[%c0_2, %c0_3] : memref<448x128xbf16, #tpu.memory_space<vmem>>, vector<448x128xbf16>
    %c0_4 = arith.constant 0 : index
    %c0_5 = arith.constant 0 : index
    %5 = vector.load %arg4[%c0_4, %c0_5] : memref<128x128xbf16, #tpu.memory_space<vmem>>, vector<128x128xbf16>
    %cst = arith.constant dense<0.000000e+00> : vector<448x128xf32>
    %6 = tpu.matmul %4, %5, %cst {dimension_numbers = #tpu.dot_dimension_numbers<[1], [0], [0], [1], [0, 0, 1, 1], [], []>} : vector<448x128xbf16>, vector<128x128xbf16>, vector<448x128xf32> -> vector<448x128xf32>
    %7 = arith.addf %3, %6 : vector<448x128xf32>
    %c0_6 = arith.constant 0 : index
    %c0_7 = arith.constant 0 : index
    %8 = vector.load %arg7[%c0_6, %c0_7] : memref<448x128xf32, #tpu.memory_space<vmem>>, vector<448x128xf32>
    tpu.vector_store %arg7[%c0_6, %c0_7], %7 {strides = array<i32>} : memref<448x128xf32, #tpu.memory_space<vmem>>, vector<448x128xf32>,
    %c0_i32_8 = arith.constant 0 : i32
    %9 = arith.cmpi eq, %arg2, %c0_i32_8 : i32
    %10 = arith.extui %9 : i1 to i32
    %c0_i32_9 = arith.constant 0 : i32
    %11 = arith.cmpi ne, %10, %c0_i32_9 : i32
    scf.if %11 {
      %c0_10 = arith.constant 0 : index
      %c0_11 = arith.constant 0 : index
      %12 = vector.load %arg7[%c0_10, %c0_11] : memref<448x128xf32, #tpu.memory_space<vmem>>, vector<448x128xf32>
      %c0_12 = arith.constant 0 : index
      %c0_13 = arith.constant 0 : index
      %13 = vector.load %arg5[%c0_12, %c0_13] : memref<8x128xf32, #tpu.memory_space<vmem>>, vector<1x128xf32>
      %14 = vector.broadcast %13 : vector<1x128xf32> to vector<448x128xf32>
      %15 = arith.mulf %12, %14 : vector<448x128xf32>
      %c1 = arith.constant 1 : index
      %c0_14 = arith.constant 0 : index
      %16 = vector.load %arg5[%c1, %c0_14] : memref<8x128xf32, #tpu.memory_space<vmem>>, vector<1x128xf32>
      %17 = vector.broadcast %16 : vector<1x128xf32> to vector<448x128xf32>
      %18 = arith.addf %15, %17 : vector<448x128xf32>
      %cst_15 = arith.constant 0.000000e+00 : f32
      %19 = vector.broadcast %cst_15 : f32 to vector<448x128xf32>
      %20 = arith.maximumf %18, %19 : vector<448x128xf32>
      %c0_16 = arith.constant 0 : index
      %c0_17 = arith.constant 0 : index
      %21 = vector.load %arg6[%c0_16, %c0_17] : memref<448x128xf32, #tpu.memory_space<vmem>>, vector<448x128xf32>
      tpu.vector_store %arg6[%c0_16, %c0_17], %20 {strides = array<i32>} : memref<448x128xf32, #tpu.memory_space<vmem>>, vector<448x128xf32>,
    } else {
    }
    return
  }
  func.func @transform_0(%arg0: i32, %arg1: i32, %arg2: i32) -> (i32, i32) {
    %c0_i32 = arith.constant 0 : i32
    return %arg0, %arg2 : i32, i32
  }
  func.func @transform_1(%arg0: i32, %arg1: i32, %arg2: i32) -> (i32, i32) {
    %c0_i32 = arith.constant 0 : i32
    return %arg2, %arg1 : i32, i32
  }
  func.func @transform_2(%arg0: i32, %arg1: i32, %arg2: i32) -> (i32, i32) {
    %c0_i32 = arith.constant 0 : i32
    %c0_i32_0 = arith.constant 0 : i32
    return %c0_i32, %arg1 : i32, i32
  }
  func.func @transform_3(%arg0: i32, %arg1: i32, %arg2: i32) -> (i32, i32) {
    %c0_i32 = arith.constant 0 : i32
    return %arg0, %arg1 : i32, i32
  }
}

module attributes {stable_mosaic.version = 11 : i64} {
  func.func @_mm_kernel(%arg0: i32, %arg1: i32, %arg2: i32, %arg3: memref<448x256xbf16, #tpu.memory_space<vmem>>, %arg4: memref<256x128xbf16, #tpu.memory_space<vmem>>, %arg5: memref<8x128xf32, #tpu.memory_space<vmem>>, %arg6: memref<448x128xf32, #tpu.memory_space<vmem>>, %arg7: memref<448x128xf32, #tpu.memory_space<vmem>>) attributes {dimension_semantics = [#tpu.dimension_semantics<parallel>, #tpu.dimension_semantics<parallel>, #tpu.dimension_semantics<arbitrary>], iteration_bounds = array<i64: 1, 1, 1>, scalar_prefetch = 0 : i64, scratch_operands = 1 : i64, tpu.core_type = #tpu.core_type<tc>, window_params = [{transform_indices = @transform_0, window_bounds = array<i64: 448, 256>}, {transform_indices = @transform_1, window_bounds = array<i64: 256, 128>}, {transform_indices = @transform_2, window_bounds = array<i64: 8, 128>}, {transform_indices = @transform_3, window_bounds = array<i64: 448, 128>}]} {
    %c0_i32 = arith.constant 0 : i32
    %0 = arith.cmpi eq, %arg2, %c0_i32 : i32
    %1 = arith.extui %0 : i1 to i32
    %c0_i32_0 = arith.constant 0 : i32
    %2 = arith.cmpi ne, %1, %c0_i32_0 : i32
    scf.if %2 {
      %cst_10 = arith.constant 0.000000e+00 : f32
      %12 = vector.broadcast %cst_10 : f32 to vector<448x128xf32>
      %c0_11 = arith.constant 0 : index
      %c0_12 = arith.constant 0 : index
      %13 = vector.load %arg7[%c0_11, %c0_12] : memref<448x128xf32, #tpu.memory_space<vmem>>, vector<448x128xf32>
      tpu.vector_store %arg7[%c0_11, %c0_12], %12 {strides = array<i32>} : memref<448x128xf32, #tpu.memory_space<vmem>>, vector<448x128xf32>,
    } else {
    }
    %c0 = arith.constant 0 : index
    %c0_1 = arith.constant 0 : index
    %3 = vector.load %arg7[%c0, %c0_1] : memref<448x128xf32, #tpu.memory_space<vmem>>, vector<448x128xf32>
    %c0_2 = arith.constant 0 : index
    %c0_3 = arith.constant 0 : index
    %4 = vector.load %arg3[%c0_2, %c0_3] : memref<448x256xbf16, #tpu.memory_space<vmem>>, vector<448x256xbf16>
    %c0_4 = arith.constant 0 : index
    %c0_5 = arith.constant 0 : index
    %5 = vector.load %arg4[%c0_4, %c0_5] : memref<256x128xbf16, #tpu.memory_space<vmem>>, vector<256x128xbf16>
    %cst = arith.constant dense<0.000000e+00> : vector<448x128xf32>
    %6 = tpu.matmul %4, %5, %cst {dimension_numbers = #tpu.dot_dimension_numbers<[1], [0], [0], [1], [0, 0, 1, 1], [], []>} : vector<448x256xbf16>, vector<256x128xbf16>, vector<448x128xf32> -> vector<448x128xf32>
    %7 = arith.addf %3, %6 : vector<448x128xf32>
    %c0_6 = arith.constant 0 : index
    %c0_7 = arith.constant 0 : index
    %8 = vector.load %arg7[%c0_6, %c0_7] : memref<448x128xf32, #tpu.memory_space<vmem>>, vector<448x128xf32>
    tpu.vector_store %arg7[%c0_6, %c0_7], %7 {strides = array<i32>} : memref<448x128xf32, #tpu.memory_space<vmem>>, vector<448x128xf32>,
    %c0_i32_8 = arith.constant 0 : i32
    %9 = arith.cmpi eq, %arg2, %c0_i32_8 : i32
    %10 = arith.extui %9 : i1 to i32
    %c0_i32_9 = arith.constant 0 : i32
    %11 = arith.cmpi ne, %10, %c0_i32_9 : i32
    scf.if %11 {
      %c0_10 = arith.constant 0 : index
      %c0_11 = arith.constant 0 : index
      %12 = vector.load %arg7[%c0_10, %c0_11] : memref<448x128xf32, #tpu.memory_space<vmem>>, vector<448x128xf32>
      %c0_12 = arith.constant 0 : index
      %c0_13 = arith.constant 0 : index
      %13 = vector.load %arg5[%c0_12, %c0_13] : memref<8x128xf32, #tpu.memory_space<vmem>>, vector<1x128xf32>
      %14 = vector.broadcast %13 : vector<1x128xf32> to vector<448x128xf32>
      %15 = arith.mulf %12, %14 : vector<448x128xf32>
      %c1 = arith.constant 1 : index
      %c0_14 = arith.constant 0 : index
      %16 = vector.load %arg5[%c1, %c0_14] : memref<8x128xf32, #tpu.memory_space<vmem>>, vector<1x128xf32>
      %17 = vector.broadcast %16 : vector<1x128xf32> to vector<448x128xf32>
      %18 = arith.addf %15, %17 : vector<448x128xf32>
      %cst_15 = arith.constant 0.000000e+00 : f32
      %19 = vector.broadcast %cst_15 : f32 to vector<448x128xf32>
      %20 = arith.maximumf %18, %19 : vector<448x128xf32>
      %c0_16 = arith.constant 0 : index
      %c0_17 = arith.constant 0 : index
      %21 = vector.load %arg6[%c0_16, %c0_17] : memref<448x128xf32, #tpu.memory_space<vmem>>, vector<448x128xf32>
      tpu.vector_store %arg6[%c0_16, %c0_17], %20 {strides = array<i32>} : memref<448x128xf32, #tpu.memory_space<vmem>>, vector<448x128xf32>,
    } else {
    }
    return
  }
  func.func @transform_0(%arg0: i32, %arg1: i32, %arg2: i32) -> (i32, i32) {
    %c0_i32 = arith.constant 0 : i32
    return %arg0, %arg2 : i32, i32
  }
  func.func @transform_1(%arg0: i32, %arg1: i32, %arg2: i32) -> (i32, i32) {
    %c0_i32 = arith.constant 0 : i32
    return %arg2, %arg1 : i32, i32
  }
  func.func @transform_2(%arg0: i32, %arg1: i32, %arg2: i32) -> (i32, i32) {
    %c0_i32 = arith.constant 0 : i32
    %c0_i32_0 = arith.constant 0 : i32
    return %c0_i32, %arg1 : i32, i32
  }
  func.func @transform_3(%arg0: i32, %arg1: i32, %arg2: i32) -> (i32, i32) {
    %c0_i32 = arith.constant 0 : i32
    return %arg0, %arg1 : i32, i32
  }
}

module attributes {stable_mosaic.version = 11 : i64} {
  func.func @_mm_kernel(%arg0: i32, %arg1: i32, %arg2: i32, %arg3: memref<128x128xbf16, #tpu.memory_space<vmem>>, %arg4: memref<128x128xbf16, #tpu.memory_space<vmem>>, %arg5: memref<8x128xf32, #tpu.memory_space<vmem>>, %arg6: memref<128x128xf32, #tpu.memory_space<vmem>>, %arg7: memref<128x128xf32, #tpu.memory_space<vmem>>) attributes {dimension_semantics = [#tpu.dimension_semantics<parallel>, #tpu.dimension_semantics<parallel>, #tpu.dimension_semantics<arbitrary>], iteration_bounds = array<i64: 1, 1, 1>, scalar_prefetch = 0 : i64, scratch_operands = 1 : i64, tpu.core_type = #tpu.core_type<tc>, window_params = [{transform_indices = @transform_0, window_bounds = array<i64: 128, 128>}, {transform_indices = @transform_1, window_bounds = array<i64: 128, 128>}, {transform_indices = @transform_2, window_bounds = array<i64: 8, 128>}, {transform_indices = @transform_3, window_bounds = array<i64: 128, 128>}]} {
    %c0_i32 = arith.constant 0 : i32
    %0 = arith.cmpi eq, %arg2, %c0_i32 : i32
    %1 = arith.extui %0 : i1 to i32
    %c0_i32_0 = arith.constant 0 : i32
    %2 = arith.cmpi ne, %1, %c0_i32_0 : i32
    scf.if %2 {
      %cst_10 = arith.constant 0.000000e+00 : f32
      %12 = vector.broadcast %cst_10 : f32 to vector<128x128xf32>
      %c0_11 = arith.constant 0 : index
      %c0_12 = arith.constant 0 : index
      %13 = vector.load %arg7[%c0_11, %c0_12] : memref<128x128xf32, #tpu.memory_space<vmem>>, vector<128x128xf32>
      tpu.vector_store %arg7[%c0_11, %c0_12], %12 {strides = array<i32>} : memref<128x128xf32, #tpu.memory_space<vmem>>, vector<128x128xf32>,
    } else {
    }
    %c0 = arith.constant 0 : index
    %c0_1 = arith.constant 0 : index
    %3 = vector.load %arg7[%c0, %c0_1] : memref<128x128xf32, #tpu.memory_space<vmem>>, vector<128x128xf32>
    %c0_2 = arith.constant 0 : index
    %c0_3 = arith.constant 0 : index
    %4 = vector.load %arg3[%c0_2, %c0_3] : memref<128x128xbf16, #tpu.memory_space<vmem>>, vector<128x128xbf16>
    %c0_4 = arith.constant 0 : index
    %c0_5 = arith.constant 0 : index
    %5 = vector.load %arg4[%c0_4, %c0_5] : memref<128x128xbf16, #tpu.memory_space<vmem>>, vector<128x128xbf16>
    %cst = arith.constant dense<0.000000e+00> : vector<128x128xf32>
    %6 = tpu.matmul %4, %5, %cst {dimension_numbers = #tpu.dot_dimension_numbers<[1], [0], [0], [1], [0, 0, 1, 1], [], []>} : vector<128x128xbf16>, vector<128x128xbf16>, vector<128x128xf32> -> vector<128x128xf32>
    %7 = arith.addf %3, %6 : vector<128x128xf32>
    %c0_6 = arith.constant 0 : index
    %c0_7 = arith.constant 0 : index
    %8 = vector.load %arg7[%c0_6, %c0_7] : memref<128x128xf32, #tpu.memory_space<vmem>>, vector<128x128xf32>
    tpu.vector_store %arg7[%c0_6, %c0_7], %7 {strides = array<i32>} : memref<128x128xf32, #tpu.memory_space<vmem>>, vector<128x128xf32>,
    %c0_i32_8 = arith.constant 0 : i32
    %9 = arith.cmpi eq, %arg2, %c0_i32_8 : i32
    %10 = arith.extui %9 : i1 to i32
    %c0_i32_9 = arith.constant 0 : i32
    %11 = arith.cmpi ne, %10, %c0_i32_9 : i32
    scf.if %11 {
      %c0_10 = arith.constant 0 : index
      %c0_11 = arith.constant 0 : index
      %12 = vector.load %arg7[%c0_10, %c0_11] : memref<128x128xf32, #tpu.memory_space<vmem>>, vector<128x128xf32>
      %c0_12 = arith.constant 0 : index
      %c0_13 = arith.constant 0 : index
      %13 = vector.load %arg5[%c0_12, %c0_13] : memref<8x128xf32, #tpu.memory_space<vmem>>, vector<1x128xf32>
      %14 = vector.broadcast %13 : vector<1x128xf32> to vector<128x128xf32>
      %15 = arith.mulf %12, %14 : vector<128x128xf32>
      %c1 = arith.constant 1 : index
      %c0_14 = arith.constant 0 : index
      %16 = vector.load %arg5[%c1, %c0_14] : memref<8x128xf32, #tpu.memory_space<vmem>>, vector<1x128xf32>
      %17 = vector.broadcast %16 : vector<1x128xf32> to vector<128x128xf32>
      %18 = arith.addf %15, %17 : vector<128x128xf32>
      %cst_15 = arith.constant 0.000000e+00 : f32
      %19 = vector.broadcast %cst_15 : f32 to vector<128x128xf32>
      %20 = arith.maximumf %18, %19 : vector<128x128xf32>
      %c0_16 = arith.constant 0 : index
      %c0_17 = arith.constant 0 : index
      %21 = vector.load %arg6[%c0_16, %c0_17] : memref<128x128xf32, #tpu.memory_space<vmem>>, vector<128x128xf32>
      tpu.vector_store %arg6[%c0_16, %c0_17], %20 {strides = array<i32>} : memref<128x128xf32, #tpu.memory_space<vmem>>, vector<128x128xf32>,
    } else {
    }
    return
  }
  func.func @transform_0(%arg0: i32, %arg1: i32, %arg2: i32) -> (i32, i32) {
    %c0_i32 = arith.constant 0 : i32
    return %arg0, %arg2 : i32, i32
  }
  func.func @transform_1(%arg0: i32, %arg1: i32, %arg2: i32) -> (i32, i32) {
    %c0_i32 = arith.constant 0 : i32
    return %arg2, %arg1 : i32, i32
  }
  func.func @transform_2(%arg0: i32, %arg1: i32, %arg2: i32) -> (i32, i32) {
    %c0_i32 = arith.constant 0 : i32
    %c0_i32_0 = arith.constant 0 : i32
    return %c0_i32, %arg1 : i32, i32
  }
  func.func @transform_3(%arg0: i32, %arg1: i32, %arg2: i32) -> (i32, i32) {
    %c0_i32 = arith.constant 0 : i32
    return %arg0, %arg1 : i32, i32
  }
}

module attributes {stable_mosaic.version = 11 : i64} {
  func.func @_mm_kernel(%arg0: i32, %arg1: i32, %arg2: i32, %arg3: memref<128x256xbf16, #tpu.memory_space<vmem>>, %arg4: memref<256x128xbf16, #tpu.memory_space<vmem>>, %arg5: memref<8x128xf32, #tpu.memory_space<vmem>>, %arg6: memref<128x128xf32, #tpu.memory_space<vmem>>, %arg7: memref<128x128xf32, #tpu.memory_space<vmem>>) attributes {dimension_semantics = [#tpu.dimension_semantics<parallel>, #tpu.dimension_semantics<parallel>, #tpu.dimension_semantics<arbitrary>], iteration_bounds = array<i64: 1, 1, 1>, scalar_prefetch = 0 : i64, scratch_operands = 1 : i64, tpu.core_type = #tpu.core_type<tc>, window_params = [{transform_indices = @transform_0, window_bounds = array<i64: 128, 256>}, {transform_indices = @transform_1, window_bounds = array<i64: 256, 128>}, {transform_indices = @transform_2, window_bounds = array<i64: 8, 128>}, {transform_indices = @transform_3, window_bounds = array<i64: 128, 128>}]} {
    %c0_i32 = arith.constant 0 : i32
    %0 = arith.cmpi eq, %arg2, %c0_i32 : i32
    %1 = arith.extui %0 : i1 to i32
    %c0_i32_0 = arith.constant 0 : i32
    %2 = arith.cmpi ne, %1, %c0_i32_0 : i32
    scf.if %2 {
      %cst_10 = arith.constant 0.000000e+00 : f32
      %12 = vector.broadcast %cst_10 : f32 to vector<128x128xf32>
      %c0_11 = arith.constant 0 : index
      %c0_12 = arith.constant 0 : index
      %13 = vector.load %arg7[%c0_11, %c0_12] : memref<128x128xf32, #tpu.memory_space<vmem>>, vector<128x128xf32>
      tpu.vector_store %arg7[%c0_11, %c0_12], %12 {strides = array<i32>} : memref<128x128xf32, #tpu.memory_space<vmem>>, vector<128x128xf32>,
    } else {
    }
    %c0 = arith.constant 0 : index
    %c0_1 = arith.constant 0 : index
    %3 = vector.load %arg7[%c0, %c0_1] : memref<128x128xf32, #tpu.memory_space<vmem>>, vector<128x128xf32>
    %c0_2 = arith.constant 0 : index
    %c0_3 = arith.constant 0 : index
    %4 = vector.load %arg3[%c0_2, %c0_3] : memref<128x256xbf16, #tpu.memory_space<vmem>>, vector<128x256xbf16>
    %c0_4 = arith.constant 0 : index
    %c0_5 = arith.constant 0 : index
    %5 = vector.load %arg4[%c0_4, %c0_5] : memref<256x128xbf16, #tpu.memory_space<vmem>>, vector<256x128xbf16>
    %cst = arith.constant dense<0.000000e+00> : vector<128x128xf32>
    %6 = tpu.matmul %4, %5, %cst {dimension_numbers = #tpu.dot_dimension_numbers<[1], [0], [0], [1], [0, 0, 1, 1], [], []>} : vector<128x256xbf16>, vector<256x128xbf16>, vector<128x128xf32> -> vector<128x128xf32>
    %7 = arith.addf %3, %6 : vector<128x128xf32>
    %c0_6 = arith.constant 0 : index
    %c0_7 = arith.constant 0 : index
    %8 = vector.load %arg7[%c0_6, %c0_7] : memref<128x128xf32, #tpu.memory_space<vmem>>, vector<128x128xf32>
    tpu.vector_store %arg7[%c0_6, %c0_7], %7 {strides = array<i32>} : memref<128x128xf32, #tpu.memory_space<vmem>>, vector<128x128xf32>,
    %c0_i32_8 = arith.constant 0 : i32
    %9 = arith.cmpi eq, %arg2, %c0_i32_8 : i32
    %10 = arith.extui %9 : i1 to i32
    %c0_i32_9 = arith.constant 0 : i32
    %11 = arith.cmpi ne, %10, %c0_i32_9 : i32
    scf.if %11 {
      %c0_10 = arith.constant 0 : index
      %c0_11 = arith.constant 0 : index
      %12 = vector.load %arg7[%c0_10, %c0_11] : memref<128x128xf32, #tpu.memory_space<vmem>>, vector<128x128xf32>
      %c0_12 = arith.constant 0 : index
      %c0_13 = arith.constant 0 : index
      %13 = vector.load %arg5[%c0_12, %c0_13] : memref<8x128xf32, #tpu.memory_space<vmem>>, vector<1x128xf32>
      %14 = vector.broadcast %13 : vector<1x128xf32> to vector<128x128xf32>
      %15 = arith.mulf %12, %14 : vector<128x128xf32>
      %c1 = arith.constant 1 : index
      %c0_14 = arith.constant 0 : index
      %16 = vector.load %arg5[%c1, %c0_14] : memref<8x128xf32, #tpu.memory_space<vmem>>, vector<1x128xf32>
      %17 = vector.broadcast %16 : vector<1x128xf32> to vector<128x128xf32>
      %18 = arith.addf %15, %17 : vector<128x128xf32>
      %cst_15 = arith.constant 0.000000e+00 : f32
      %19 = vector.broadcast %cst_15 : f32 to vector<128x128xf32>
      %20 = arith.maximumf %18, %19 : vector<128x128xf32>
      %c0_16 = arith.constant 0 : index
      %c0_17 = arith.constant 0 : index
      %21 = vector.load %arg6[%c0_16, %c0_17] : memref<128x128xf32, #tpu.memory_space<vmem>>, vector<128x128xf32>
      tpu.vector_store %arg6[%c0_16, %c0_17], %20 {strides = array<i32>} : memref<128x128xf32, #tpu.memory_space<vmem>>, vector<128x128xf32>,
    } else {
    }
    return
  }
  func.func @transform_0(%arg0: i32, %arg1: i32, %arg2: i32) -> (i32, i32) {
    %c0_i32 = arith.constant 0 : i32
    return %arg0, %arg2 : i32, i32
  }
  func.func @transform_1(%arg0: i32, %arg1: i32, %arg2: i32) -> (i32, i32) {
    %c0_i32 = arith.constant 0 : i32
    return %arg2, %arg1 : i32, i32
  }
  func.func @transform_2(%arg0: i32, %arg1: i32, %arg2: i32) -> (i32, i32) {
    %c0_i32 = arith.constant 0 : i32
    %c0_i32_0 = arith.constant 0 : i32
    return %c0_i32, %arg1 : i32, i32
  }
  func.func @transform_3(%arg0: i32, %arg1: i32, %arg2: i32) -> (i32, i32) {
    %c0_i32 = arith.constant 0 : i32
    return %arg0, %arg1 : i32, i32
  }
}

module attributes {stable_mosaic.version = 11 : i64} {
  func.func @_mm_kernel(%arg0: i32, %arg1: i32, %arg2: i32, %arg3: memref<128x128xbf16, #tpu.memory_space<vmem>>, %arg4: memref<128x128xbf16, #tpu.memory_space<vmem>>, %arg5: memref<8x128xf32, #tpu.memory_space<vmem>>, %arg6: memref<128x128xf32, #tpu.memory_space<vmem>>, %arg7: memref<128x128xf32, #tpu.memory_space<vmem>>) attributes {dimension_semantics = [#tpu.dimension_semantics<parallel>, #tpu.dimension_semantics<parallel>, #tpu.dimension_semantics<arbitrary>], iteration_bounds = array<i64: 1, 1, 1>, scalar_prefetch = 0 : i64, scratch_operands = 1 : i64, tpu.core_type = #tpu.core_type<tc>, window_params = [{transform_indices = @transform_0, window_bounds = array<i64: 128, 128>}, {transform_indices = @transform_1, window_bounds = array<i64: 128, 128>}, {transform_indices = @transform_2, window_bounds = array<i64: 8, 128>}, {transform_indices = @transform_3, window_bounds = array<i64: 128, 128>}]} {
    %c0_i32 = arith.constant 0 : i32
    %0 = arith.cmpi eq, %arg2, %c0_i32 : i32
    %1 = arith.extui %0 : i1 to i32
    %c0_i32_0 = arith.constant 0 : i32
    %2 = arith.cmpi ne, %1, %c0_i32_0 : i32
    scf.if %2 {
      %cst_10 = arith.constant 0.000000e+00 : f32
      %12 = vector.broadcast %cst_10 : f32 to vector<128x128xf32>
      %c0_11 = arith.constant 0 : index
      %c0_12 = arith.constant 0 : index
      %13 = vector.load %arg7[%c0_11, %c0_12] : memref<128x128xf32, #tpu.memory_space<vmem>>, vector<128x128xf32>
      tpu.vector_store %arg7[%c0_11, %c0_12], %12 {strides = array<i32>} : memref<128x128xf32, #tpu.memory_space<vmem>>, vector<128x128xf32>,
    } else {
    }
    %c0 = arith.constant 0 : index
    %c0_1 = arith.constant 0 : index
    %3 = vector.load %arg7[%c0, %c0_1] : memref<128x128xf32, #tpu.memory_space<vmem>>, vector<128x128xf32>
    %c0_2 = arith.constant 0 : index
    %c0_3 = arith.constant 0 : index
    %4 = vector.load %arg3[%c0_2, %c0_3] : memref<128x128xbf16, #tpu.memory_space<vmem>>, vector<128x128xbf16>
    %c0_4 = arith.constant 0 : index
    %c0_5 = arith.constant 0 : index
    %5 = vector.load %arg4[%c0_4, %c0_5] : memref<128x128xbf16, #tpu.memory_space<vmem>>, vector<128x128xbf16>
    %cst = arith.constant dense<0.000000e+00> : vector<128x128xf32>
    %6 = tpu.matmul %4, %5, %cst {dimension_numbers = #tpu.dot_dimension_numbers<[1], [0], [0], [1], [0, 0, 1, 1], [], []>} : vector<128x128xbf16>, vector<128x128xbf16>, vector<128x128xf32> -> vector<128x128xf32>
    %7 = arith.addf %3, %6 : vector<128x128xf32>
    %c0_6 = arith.constant 0 : index
    %c0_7 = arith.constant 0 : index
    %8 = vector.load %arg7[%c0_6, %c0_7] : memref<128x128xf32, #tpu.memory_space<vmem>>, vector<128x128xf32>
    tpu.vector_store %arg7[%c0_6, %c0_7], %7 {strides = array<i32>} : memref<128x128xf32, #tpu.memory_space<vmem>>, vector<128x128xf32>,
    %c0_i32_8 = arith.constant 0 : i32
    %9 = arith.cmpi eq, %arg2, %c0_i32_8 : i32
    %10 = arith.extui %9 : i1 to i32
    %c0_i32_9 = arith.constant 0 : i32
    %11 = arith.cmpi ne, %10, %c0_i32_9 : i32
    scf.if %11 {
      %c0_10 = arith.constant 0 : index
      %c0_11 = arith.constant 0 : index
      %12 = vector.load %arg7[%c0_10, %c0_11] : memref<128x128xf32, #tpu.memory_space<vmem>>, vector<128x128xf32>
      %c0_12 = arith.constant 0 : index
      %c0_13 = arith.constant 0 : index
      %13 = vector.load %arg5[%c0_12, %c0_13] : memref<8x128xf32, #tpu.memory_space<vmem>>, vector<1x128xf32>
      %14 = vector.broadcast %13 : vector<1x128xf32> to vector<128x128xf32>
      %15 = arith.mulf %12, %14 : vector<128x128xf32>
      %c1 = arith.constant 1 : index
      %c0_14 = arith.constant 0 : index
      %16 = vector.load %arg5[%c1, %c0_14] : memref<8x128xf32, #tpu.memory_space<vmem>>, vector<1x128xf32>
      %17 = vector.broadcast %16 : vector<1x128xf32> to vector<128x128xf32>
      %18 = arith.addf %15, %17 : vector<128x128xf32>
      %c0_15 = arith.constant 0 : index
      %c0_16 = arith.constant 0 : index
      %19 = vector.load %arg6[%c0_15, %c0_16] : memref<128x128xf32, #tpu.memory_space<vmem>>, vector<128x128xf32>
      tpu.vector_store %arg6[%c0_15, %c0_16], %18 {strides = array<i32>} : memref<128x128xf32, #tpu.memory_space<vmem>>, vector<128x128xf32>,
    } else {
    }
    return
  }
  func.func @transform_0(%arg0: i32, %arg1: i32, %arg2: i32) -> (i32, i32) {
    %c0_i32 = arith.constant 0 : i32
    return %arg0, %arg2 : i32, i32
  }
  func.func @transform_1(%arg0: i32, %arg1: i32, %arg2: i32) -> (i32, i32) {
    %c0_i32 = arith.constant 0 : i32
    return %arg2, %arg1 : i32, i32
  }
  func.func @transform_2(%arg0: i32, %arg1: i32, %arg2: i32) -> (i32, i32) {
    %c0_i32 = arith.constant 0 : i32
    %c0_i32_0 = arith.constant 0 : i32
    return %c0_i32, %arg1 : i32, i32
  }
  func.func @transform_3(%arg0: i32, %arg1: i32, %arg2: i32) -> (i32, i32) {
    %c0_i32 = arith.constant 0 : i32
    return %arg0, %arg1 : i32, i32
  }
}

module attributes {stable_mosaic.version = 11 : i64} {
  func.func @_mm_res_kernel(%arg0: i32, %arg1: i32, %arg2: i32, %arg3: memref<128x128xbf16, #tpu.memory_space<vmem>>, %arg4: memref<128x128xbf16, #tpu.memory_space<vmem>>, %arg5: memref<8x128xf32, #tpu.memory_space<vmem>>, %arg6: memref<128x128xf32, #tpu.memory_space<vmem>>, %arg7: memref<128x128xf32, #tpu.memory_space<vmem>>, %arg8: memref<128x128xf32, #tpu.memory_space<vmem>>) attributes {dimension_semantics = [#tpu.dimension_semantics<parallel>, #tpu.dimension_semantics<parallel>, #tpu.dimension_semantics<arbitrary>], iteration_bounds = array<i64: 1, 1, 1>, scalar_prefetch = 0 : i64, scratch_operands = 1 : i64, tpu.core_type = #tpu.core_type<tc>, window_params = [{transform_indices = @transform_0, window_bounds = array<i64: 128, 128>}, {transform_indices = @transform_1, window_bounds = array<i64: 128, 128>}, {transform_indices = @transform_2, window_bounds = array<i64: 8, 128>}, {transform_indices = @transform_3, window_bounds = array<i64: 128, 128>}, {transform_indices = @transform_4, window_bounds = array<i64: 128, 128>}]} {
    %c0_i32 = arith.constant 0 : i32
    %0 = arith.cmpi eq, %arg2, %c0_i32 : i32
    %1 = arith.extui %0 : i1 to i32
    %c0_i32_0 = arith.constant 0 : i32
    %2 = arith.cmpi ne, %1, %c0_i32_0 : i32
    scf.if %2 {
      %cst_10 = arith.constant 0.000000e+00 : f32
      %12 = vector.broadcast %cst_10 : f32 to vector<128x128xf32>
      %c0_11 = arith.constant 0 : index
      %c0_12 = arith.constant 0 : index
      %13 = vector.load %arg8[%c0_11, %c0_12] : memref<128x128xf32, #tpu.memory_space<vmem>>, vector<128x128xf32>
      tpu.vector_store %arg8[%c0_11, %c0_12], %12 {strides = array<i32>} : memref<128x128xf32, #tpu.memory_space<vmem>>, vector<128x128xf32>,
    } else {
    }
    %c0 = arith.constant 0 : index
    %c0_1 = arith.constant 0 : index
    %3 = vector.load %arg8[%c0, %c0_1] : memref<128x128xf32, #tpu.memory_space<vmem>>, vector<128x128xf32>
    %c0_2 = arith.constant 0 : index
    %c0_3 = arith.constant 0 : index
    %4 = vector.load %arg3[%c0_2, %c0_3] : memref<128x128xbf16, #tpu.memory_space<vmem>>, vector<128x128xbf16>
    %c0_4 = arith.constant 0 : index
    %c0_5 = arith.constant 0 : index
    %5 = vector.load %arg4[%c0_4, %c0_5] : memref<128x128xbf16, #tpu.memory_space<vmem>>, vector<128x128xbf16>
    %cst = arith.constant dense<0.000000e+00> : vector<128x128xf32>
    %6 = tpu.matmul %4, %5, %cst {dimension_numbers = #tpu.dot_dimension_numbers<[1], [0], [0], [1], [0, 0, 1, 1], [], []>} : vector<128x128xbf16>, vector<128x128xbf16>, vector<128x128xf32> -> vector<128x128xf32>
    %7 = arith.addf %3, %6 : vector<128x128xf32>
    %c0_6 = arith.constant 0 : index
    %c0_7 = arith.constant 0 : index
    %8 = vector.load %arg8[%c0_6, %c0_7] : memref<128x128xf32, #tpu.memory_space<vmem>>, vector<128x128xf32>
    tpu.vector_store %arg8[%c0_6, %c0_7], %7 {strides = array<i32>} : memref<128x128xf32, #tpu.memory_space<vmem>>, vector<128x128xf32>,
    %c0_i32_8 = arith.constant 0 : i32
    %9 = arith.cmpi eq, %arg2, %c0_i32_8 : i32
    %10 = arith.extui %9 : i1 to i32
    %c0_i32_9 = arith.constant 0 : i32
    %11 = arith.cmpi ne, %10, %c0_i32_9 : i32
    scf.if %11 {
      %c0_10 = arith.constant 0 : index
      %c0_11 = arith.constant 0 : index
      %12 = vector.load %arg8[%c0_10, %c0_11] : memref<128x128xf32, #tpu.memory_space<vmem>>, vector<128x128xf32>
      %c0_12 = arith.constant 0 : index
      %c0_13 = arith.constant 0 : index
      %13 = vector.load %arg5[%c0_12, %c0_13] : memref<8x128xf32, #tpu.memory_space<vmem>>, vector<1x128xf32>
      %14 = vector.broadcast %13 : vector<1x128xf32> to vector<128x128xf32>
      %15 = arith.mulf %12, %14 : vector<128x128xf32>
      %c1 = arith.constant 1 : index
      %c0_14 = arith.constant 0 : index
      %16 = vector.load %arg5[%c1, %c0_14] : memref<8x128xf32, #tpu.memory_space<vmem>>, vector<1x128xf32>
      %17 = vector.broadcast %16 : vector<1x128xf32> to vector<128x128xf32>
      %18 = arith.addf %15, %17 : vector<128x128xf32>
      %c0_15 = arith.constant 0 : index
      %c0_16 = arith.constant 0 : index
      %19 = vector.load %arg6[%c0_15, %c0_16] : memref<128x128xf32, #tpu.memory_space<vmem>>, vector<128x128xf32>
      %20 = arith.addf %18, %19 : vector<128x128xf32>
      %cst_17 = arith.constant 0.000000e+00 : f32
      %21 = vector.broadcast %cst_17 : f32 to vector<128x128xf32>
      %22 = arith.maximumf %20, %21 : vector<128x128xf32>
      %c0_18 = arith.constant 0 : index
      %c0_19 = arith.constant 0 : index
      %23 = vector.load %arg7[%c0_18, %c0_19] : memref<128x128xf32, #tpu.memory_space<vmem>>, vector<128x128xf32>
      tpu.vector_store %arg7[%c0_18, %c0_19], %22 {strides = array<i32>} : memref<128x128xf32, #tpu.memory_space<vmem>>, vector<128x128xf32>,
    } else {
    }
    return
  }
  func.func @transform_0(%arg0: i32, %arg1: i32, %arg2: i32) -> (i32, i32) {
    %c0_i32 = arith.constant 0 : i32
    return %arg0, %arg2 : i32, i32
  }
  func.func @transform_1(%arg0: i32, %arg1: i32, %arg2: i32) -> (i32, i32) {
    %c0_i32 = arith.constant 0 : i32
    return %arg2, %arg1 : i32, i32
  }
  func.func @transform_2(%arg0: i32, %arg1: i32, %arg2: i32) -> (i32, i32) {
    %c0_i32 = arith.constant 0 : i32
    %c0_i32_0 = arith.constant 0 : i32
    return %c0_i32, %arg1 : i32, i32
  }
  func.func @transform_3(%arg0: i32, %arg1: i32, %arg2: i32) -> (i32, i32) {
    %c0_i32 = arith.constant 0 : i32
    return %arg0, %arg1 : i32, i32
  }
  func.func @transform_4(%arg0: i32, %arg1: i32, %arg2: i32) -> (i32, i32) {
    %c0_i32 = arith.constant 0 : i32
    return %arg0, %arg1 : i32, i32
  }
}

module attributes {stable_mosaic.version = 11 : i64} {
  func.func @_mm_kernel(%arg0: i32, %arg1: i32, %arg2: i32, %arg3: memref<40x384xbf16, #tpu.memory_space<vmem>>, %arg4: memref<384x128xbf16, #tpu.memory_space<vmem>>, %arg5: memref<8x128xf32, #tpu.memory_space<vmem>>, %arg6: memref<40x128xf32, #tpu.memory_space<vmem>>, %arg7: memref<40x128xf32, #tpu.memory_space<vmem>>) attributes {dimension_semantics = [#tpu.dimension_semantics<parallel>, #tpu.dimension_semantics<parallel>, #tpu.dimension_semantics<arbitrary>], iteration_bounds = array<i64: 1, 1, 1>, scalar_prefetch = 0 : i64, scratch_operands = 1 : i64, tpu.core_type = #tpu.core_type<tc>, window_params = [{transform_indices = @transform_0, window_bounds = array<i64: 40, 384>}, {transform_indices = @transform_1, window_bounds = array<i64: 384, 128>}, {transform_indices = @transform_2, window_bounds = array<i64: 8, 128>}, {transform_indices = @transform_3, window_bounds = array<i64: 40, 128>}]} {
    %c0_i32 = arith.constant 0 : i32
    %0 = arith.cmpi eq, %arg2, %c0_i32 : i32
    %1 = arith.extui %0 : i1 to i32
    %c0_i32_0 = arith.constant 0 : i32
    %2 = arith.cmpi ne, %1, %c0_i32_0 : i32
    scf.if %2 {
      %cst_10 = arith.constant 0.000000e+00 : f32
      %12 = vector.broadcast %cst_10 : f32 to vector<40x128xf32>
      %c0_11 = arith.constant 0 : index
      %c0_12 = arith.constant 0 : index
      %13 = vector.load %arg7[%c0_11, %c0_12] : memref<40x128xf32, #tpu.memory_space<vmem>>, vector<40x128xf32>
      tpu.vector_store %arg7[%c0_11, %c0_12], %12 {strides = array<i32>} : memref<40x128xf32, #tpu.memory_space<vmem>>, vector<40x128xf32>,
    } else {
    }
    %c0 = arith.constant 0 : index
    %c0_1 = arith.constant 0 : index
    %3 = vector.load %arg7[%c0, %c0_1] : memref<40x128xf32, #tpu.memory_space<vmem>>, vector<40x128xf32>
    %c0_2 = arith.constant 0 : index
    %c0_3 = arith.constant 0 : index
    %4 = vector.load %arg3[%c0_2, %c0_3] : memref<40x384xbf16, #tpu.memory_space<vmem>>, vector<40x384xbf16>
    %c0_4 = arith.constant 0 : index
    %c0_5 = arith.constant 0 : index
    %5 = vector.load %arg4[%c0_4, %c0_5] : memref<384x128xbf16, #tpu.memory_space<vmem>>, vector<384x128xbf16>
    %cst = arith.constant dense<0.000000e+00> : vector<40x128xf32>
    %6 = tpu.matmul %4, %5, %cst {dimension_numbers = #tpu.dot_dimension_numbers<[1], [0], [0], [1], [0, 0, 1, 1], [], []>} : vector<40x384xbf16>, vector<384x128xbf16>, vector<40x128xf32> -> vector<40x128xf32>
    %7 = arith.addf %3, %6 : vector<40x128xf32>
    %c0_6 = arith.constant 0 : index
    %c0_7 = arith.constant 0 : index
    %8 = vector.load %arg7[%c0_6, %c0_7] : memref<40x128xf32, #tpu.memory_space<vmem>>, vector<40x128xf32>
    tpu.vector_store %arg7[%c0_6, %c0_7], %7 {strides = array<i32>} : memref<40x128xf32, #tpu.memory_space<vmem>>, vector<40x128xf32>,
    %c0_i32_8 = arith.constant 0 : i32
    %9 = arith.cmpi eq, %arg2, %c0_i32_8 : i32
    %10 = arith.extui %9 : i1 to i32
    %c0_i32_9 = arith.constant 0 : i32
    %11 = arith.cmpi ne, %10, %c0_i32_9 : i32
    scf.if %11 {
      %c0_10 = arith.constant 0 : index
      %c0_11 = arith.constant 0 : index
      %12 = vector.load %arg7[%c0_10, %c0_11] : memref<40x128xf32, #tpu.memory_space<vmem>>, vector<40x128xf32>
      %c0_12 = arith.constant 0 : index
      %c0_13 = arith.constant 0 : index
      %13 = vector.load %arg5[%c0_12, %c0_13] : memref<8x128xf32, #tpu.memory_space<vmem>>, vector<1x128xf32>
      %14 = vector.broadcast %13 : vector<1x128xf32> to vector<40x128xf32>
      %15 = arith.mulf %12, %14 : vector<40x128xf32>
      %c1 = arith.constant 1 : index
      %c0_14 = arith.constant 0 : index
      %16 = vector.load %arg5[%c1, %c0_14] : memref<8x128xf32, #tpu.memory_space<vmem>>, vector<1x128xf32>
      %17 = vector.broadcast %16 : vector<1x128xf32> to vector<40x128xf32>
      %18 = arith.addf %15, %17 : vector<40x128xf32>
      %cst_15 = arith.constant 0.000000e+00 : f32
      %19 = vector.broadcast %cst_15 : f32 to vector<40x128xf32>
      %20 = arith.maximumf %18, %19 : vector<40x128xf32>
      %c0_16 = arith.constant 0 : index
      %c0_17 = arith.constant 0 : index
      %21 = vector.load %arg6[%c0_16, %c0_17] : memref<40x128xf32, #tpu.memory_space<vmem>>, vector<40x128xf32>
      tpu.vector_store %arg6[%c0_16, %c0_17], %20 {strides = array<i32>} : memref<40x128xf32, #tpu.memory_space<vmem>>, vector<40x128xf32>,
    } else {
    }
    return
  }
  func.func @transform_0(%arg0: i32, %arg1: i32, %arg2: i32) -> (i32, i32) {
    %c0_i32 = arith.constant 0 : i32
    return %arg0, %arg2 : i32, i32
  }
  func.func @transform_1(%arg0: i32, %arg1: i32, %arg2: i32) -> (i32, i32) {
    %c0_i32 = arith.constant 0 : i32
    return %arg2, %arg1 : i32, i32
  }
  func.func @transform_2(%arg0: i32, %arg1: i32, %arg2: i32) -> (i32, i32) {
    %c0_i32 = arith.constant 0 : i32
    %c0_i32_0 = arith.constant 0 : i32
    return %c0_i32, %arg1 : i32, i32
  }
  func.func @transform_3(%arg0: i32, %arg1: i32, %arg2: i32) -> (i32, i32) {
    %c0_i32 = arith.constant 0 : i32
    return %arg0, %arg1 : i32, i32
  }
}

module attributes {stable_mosaic.version = 11 : i64} {
  func.func @_mm_kernel(%arg0: i32, %arg1: i32, %arg2: i32, %arg3: memref<40x128xbf16, #tpu.memory_space<vmem>>, %arg4: memref<128x128xbf16, #tpu.memory_space<vmem>>, %arg5: memref<8x128xf32, #tpu.memory_space<vmem>>, %arg6: memref<40x128xf32, #tpu.memory_space<vmem>>, %arg7: memref<40x128xf32, #tpu.memory_space<vmem>>) attributes {dimension_semantics = [#tpu.dimension_semantics<parallel>, #tpu.dimension_semantics<parallel>, #tpu.dimension_semantics<arbitrary>], iteration_bounds = array<i64: 1, 1, 1>, scalar_prefetch = 0 : i64, scratch_operands = 1 : i64, tpu.core_type = #tpu.core_type<tc>, window_params = [{transform_indices = @transform_0, window_bounds = array<i64: 40, 128>}, {transform_indices = @transform_1, window_bounds = array<i64: 128, 128>}, {transform_indices = @transform_2, window_bounds = array<i64: 8, 128>}, {transform_indices = @transform_3, window_bounds = array<i64: 40, 128>}]} {
    %c0_i32 = arith.constant 0 : i32
    %0 = arith.cmpi eq, %arg2, %c0_i32 : i32
    %1 = arith.extui %0 : i1 to i32
    %c0_i32_0 = arith.constant 0 : i32
    %2 = arith.cmpi ne, %1, %c0_i32_0 : i32
    scf.if %2 {
      %cst_10 = arith.constant 0.000000e+00 : f32
      %12 = vector.broadcast %cst_10 : f32 to vector<40x128xf32>
      %c0_11 = arith.constant 0 : index
      %c0_12 = arith.constant 0 : index
      %13 = vector.load %arg7[%c0_11, %c0_12] : memref<40x128xf32, #tpu.memory_space<vmem>>, vector<40x128xf32>
      tpu.vector_store %arg7[%c0_11, %c0_12], %12 {strides = array<i32>} : memref<40x128xf32, #tpu.memory_space<vmem>>, vector<40x128xf32>,
    } else {
    }
    %c0 = arith.constant 0 : index
    %c0_1 = arith.constant 0 : index
    %3 = vector.load %arg7[%c0, %c0_1] : memref<40x128xf32, #tpu.memory_space<vmem>>, vector<40x128xf32>
    %c0_2 = arith.constant 0 : index
    %c0_3 = arith.constant 0 : index
    %4 = vector.load %arg3[%c0_2, %c0_3] : memref<40x128xbf16, #tpu.memory_space<vmem>>, vector<40x128xbf16>
    %c0_4 = arith.constant 0 : index
    %c0_5 = arith.constant 0 : index
    %5 = vector.load %arg4[%c0_4, %c0_5] : memref<128x128xbf16, #tpu.memory_space<vmem>>, vector<128x128xbf16>
    %cst = arith.constant dense<0.000000e+00> : vector<40x128xf32>
    %6 = tpu.matmul %4, %5, %cst {dimension_numbers = #tpu.dot_dimension_numbers<[1], [0], [0], [1], [0, 0, 1, 1], [], []>} : vector<40x128xbf16>, vector<128x128xbf16>, vector<40x128xf32> -> vector<40x128xf32>
    %7 = arith.addf %3, %6 : vector<40x128xf32>
    %c0_6 = arith.constant 0 : index
    %c0_7 = arith.constant 0 : index
    %8 = vector.load %arg7[%c0_6, %c0_7] : memref<40x128xf32, #tpu.memory_space<vmem>>, vector<40x128xf32>
    tpu.vector_store %arg7[%c0_6, %c0_7], %7 {strides = array<i32>} : memref<40x128xf32, #tpu.memory_space<vmem>>, vector<40x128xf32>,
    %c0_i32_8 = arith.constant 0 : i32
    %9 = arith.cmpi eq, %arg2, %c0_i32_8 : i32
    %10 = arith.extui %9 : i1 to i32
    %c0_i32_9 = arith.constant 0 : i32
    %11 = arith.cmpi ne, %10, %c0_i32_9 : i32
    scf.if %11 {
      %c0_10 = arith.constant 0 : index
      %c0_11 = arith.constant 0 : index
      %12 = vector.load %arg7[%c0_10, %c0_11] : memref<40x128xf32, #tpu.memory_space<vmem>>, vector<40x128xf32>
      %c0_12 = arith.constant 0 : index
      %c0_13 = arith.constant 0 : index
      %13 = vector.load %arg5[%c0_12, %c0_13] : memref<8x128xf32, #tpu.memory_space<vmem>>, vector<1x128xf32>
      %14 = vector.broadcast %13 : vector<1x128xf32> to vector<40x128xf32>
      %15 = arith.mulf %12, %14 : vector<40x128xf32>
      %c1 = arith.constant 1 : index
      %c0_14 = arith.constant 0 : index
      %16 = vector.load %arg5[%c1, %c0_14] : memref<8x128xf32, #tpu.memory_space<vmem>>, vector<1x128xf32>
      %17 = vector.broadcast %16 : vector<1x128xf32> to vector<40x128xf32>
      %18 = arith.addf %15, %17 : vector<40x128xf32>
      %c0_15 = arith.constant 0 : index
      %c0_16 = arith.constant 0 : index
      %19 = vector.load %arg6[%c0_15, %c0_16] : memref<40x128xf32, #tpu.memory_space<vmem>>, vector<40x128xf32>
      tpu.vector_store %arg6[%c0_15, %c0_16], %18 {strides = array<i32>} : memref<40x128xf32, #tpu.memory_space<vmem>>, vector<40x128xf32>,
    } else {
    }
    return
  }
  func.func @transform_0(%arg0: i32, %arg1: i32, %arg2: i32) -> (i32, i32) {
    %c0_i32 = arith.constant 0 : i32
    return %arg0, %arg2 : i32, i32
  }
  func.func @transform_1(%arg0: i32, %arg1: i32, %arg2: i32) -> (i32, i32) {
    %c0_i32 = arith.constant 0 : i32
    return %arg2, %arg1 : i32, i32
  }
  func.func @transform_2(%arg0: i32, %arg1: i32, %arg2: i32) -> (i32, i32) {
    %c0_i32 = arith.constant 0 : i32
    %c0_i32_0 = arith.constant 0 : i32
    return %c0_i32, %arg1 : i32, i32
  }
  func.func @transform_3(%arg0: i32, %arg1: i32, %arg2: i32) -> (i32, i32) {
    %c0_i32 = arith.constant 0 : i32
    return %arg0, %arg1 : i32, i32
  }
}

module attributes {stable_mosaic.version = 11 : i64} {
  func.func @_mm_res_kernel(%arg0: i32, %arg1: i32, %arg2: i32, %arg3: memref<40x128xbf16, #tpu.memory_space<vmem>>, %arg4: memref<128x128xbf16, #tpu.memory_space<vmem>>, %arg5: memref<8x128xf32, #tpu.memory_space<vmem>>, %arg6: memref<40x128xf32, #tpu.memory_space<vmem>>, %arg7: memref<40x128xf32, #tpu.memory_space<vmem>>, %arg8: memref<40x128xf32, #tpu.memory_space<vmem>>) attributes {dimension_semantics = [#tpu.dimension_semantics<parallel>, #tpu.dimension_semantics<parallel>, #tpu.dimension_semantics<arbitrary>], iteration_bounds = array<i64: 1, 1, 1>, scalar_prefetch = 0 : i64, scratch_operands = 1 : i64, tpu.core_type = #tpu.core_type<tc>, window_params = [{transform_indices = @transform_0, window_bounds = array<i64: 40, 128>}, {transform_indices = @transform_1, window_bounds = array<i64: 128, 128>}, {transform_indices = @transform_2, window_bounds = array<i64: 8, 128>}, {transform_indices = @transform_3, window_bounds = array<i64: 40, 128>}, {transform_indices = @transform_4, window_bounds = array<i64: 40, 128>}]} {
    %c0_i32 = arith.constant 0 : i32
    %0 = arith.cmpi eq, %arg2, %c0_i32 : i32
    %1 = arith.extui %0 : i1 to i32
    %c0_i32_0 = arith.constant 0 : i32
    %2 = arith.cmpi ne, %1, %c0_i32_0 : i32
    scf.if %2 {
      %cst_10 = arith.constant 0.000000e+00 : f32
      %12 = vector.broadcast %cst_10 : f32 to vector<40x128xf32>
      %c0_11 = arith.constant 0 : index
      %c0_12 = arith.constant 0 : index
      %13 = vector.load %arg8[%c0_11, %c0_12] : memref<40x128xf32, #tpu.memory_space<vmem>>, vector<40x128xf32>
      tpu.vector_store %arg8[%c0_11, %c0_12], %12 {strides = array<i32>} : memref<40x128xf32, #tpu.memory_space<vmem>>, vector<40x128xf32>,
    } else {
    }
    %c0 = arith.constant 0 : index
    %c0_1 = arith.constant 0 : index
    %3 = vector.load %arg8[%c0, %c0_1] : memref<40x128xf32, #tpu.memory_space<vmem>>, vector<40x128xf32>
    %c0_2 = arith.constant 0 : index
    %c0_3 = arith.constant 0 : index
    %4 = vector.load %arg3[%c0_2, %c0_3] : memref<40x128xbf16, #tpu.memory_space<vmem>>, vector<40x128xbf16>
    %c0_4 = arith.constant 0 : index
    %c0_5 = arith.constant 0 : index
    %5 = vector.load %arg4[%c0_4, %c0_5] : memref<128x128xbf16, #tpu.memory_space<vmem>>, vector<128x128xbf16>
    %cst = arith.constant dense<0.000000e+00> : vector<40x128xf32>
    %6 = tpu.matmul %4, %5, %cst {dimension_numbers = #tpu.dot_dimension_numbers<[1], [0], [0], [1], [0, 0, 1, 1], [], []>} : vector<40x128xbf16>, vector<128x128xbf16>, vector<40x128xf32> -> vector<40x128xf32>
    %7 = arith.addf %3, %6 : vector<40x128xf32>
    %c0_6 = arith.constant 0 : index
    %c0_7 = arith.constant 0 : index
    %8 = vector.load %arg8[%c0_6, %c0_7] : memref<40x128xf32, #tpu.memory_space<vmem>>, vector<40x128xf32>
    tpu.vector_store %arg8[%c0_6, %c0_7], %7 {strides = array<i32>} : memref<40x128xf32, #tpu.memory_space<vmem>>, vector<40x128xf32>,
    %c0_i32_8 = arith.constant 0 : i32
    %9 = arith.cmpi eq, %arg2, %c0_i32_8 : i32
    %10 = arith.extui %9 : i1 to i32
    %c0_i32_9 = arith.constant 0 : i32
    %11 = arith.cmpi ne, %10, %c0_i32_9 : i32
    scf.if %11 {
      %c0_10 = arith.constant 0 : index
      %c0_11 = arith.constant 0 : index
      %12 = vector.load %arg8[%c0_10, %c0_11] : memref<40x128xf32, #tpu.memory_space<vmem>>, vector<40x128xf32>
      %c0_12 = arith.constant 0 : index
      %c0_13 = arith.constant 0 : index
      %13 = vector.load %arg5[%c0_12, %c0_13] : memref<8x128xf32, #tpu.memory_space<vmem>>, vector<1x128xf32>
      %14 = vector.broadcast %13 : vector<1x128xf32> to vector<40x128xf32>
      %15 = arith.mulf %12, %14 : vector<40x128xf32>
      %c1 = arith.constant 1 : index
      %c0_14 = arith.constant 0 : index
      %16 = vector.load %arg5[%c1, %c0_14] : memref<8x128xf32, #tpu.memory_space<vmem>>, vector<1x128xf32>
      %17 = vector.broadcast %16 : vector<1x128xf32> to vector<40x128xf32>
      %18 = arith.addf %15, %17 : vector<40x128xf32>
      %c0_15 = arith.constant 0 : index
      %c0_16 = arith.constant 0 : index
      %19 = vector.load %arg6[%c0_15, %c0_16] : memref<40x128xf32, #tpu.memory_space<vmem>>, vector<40x128xf32>
      %20 = arith.addf %18, %19 : vector<40x128xf32>
      %cst_17 = arith.constant 0.000000e+00 : f32
      %21 = vector.broadcast %cst_17 : f32 to vector<40x128xf32>
      %22 = arith.maximumf %20, %21 : vector<40x128xf32>
      %c0_18 = arith.constant 0 : index
      %c0_19 = arith.constant 0 : index
      %23 = vector.load %arg7[%c0_18, %c0_19] : memref<40x128xf32, #tpu.memory_space<vmem>>, vector<40x128xf32>
      tpu.vector_store %arg7[%c0_18, %c0_19], %22 {strides = array<i32>} : memref<40x128xf32, #tpu.memory_space<vmem>>, vector<40x128xf32>,
    } else {
    }
    return
  }
  func.func @transform_0(%arg0: i32, %arg1: i32, %arg2: i32) -> (i32, i32) {
    %c0_i32 = arith.constant 0 : i32
    return %arg0, %arg2 : i32, i32
  }
  func.func @transform_1(%arg0: i32, %arg1: i32, %arg2: i32) -> (i32, i32) {
    %c0_i32 = arith.constant 0 : i32
    return %arg2, %arg1 : i32, i32
  }
  func.func @transform_2(%arg0: i32, %arg1: i32, %arg2: i32) -> (i32, i32) {
    %c0_i32 = arith.constant 0 : i32
    %c0_i32_0 = arith.constant 0 : i32
    return %c0_i32, %arg1 : i32, i32
  }
  func.func @transform_3(%arg0: i32, %arg1: i32, %arg2: i32) -> (i32, i32) {
    %c0_i32 = arith.constant 0 : i32
    return %arg0, %arg1 : i32, i32
  }
  func.func @transform_4(%arg0: i32, %arg1: i32, %arg2: i32) -> (i32, i32) {
    %c0_i32 = arith.constant 0 : i32
    return %arg0, %arg1 : i32, i32
  }
}

module attributes {stable_mosaic.version = 11 : i64} {
  func.func @_mm_kernel(%arg0: i32, %arg1: i32, %arg2: i32, %arg3: memref<40x128xbf16, #tpu.memory_space<vmem>>, %arg4: memref<128x128xbf16, #tpu.memory_space<vmem>>, %arg5: memref<8x128xf32, #tpu.memory_space<vmem>>, %arg6: memref<40x128xf32, #tpu.memory_space<vmem>>, %arg7: memref<40x128xf32, #tpu.memory_space<vmem>>) attributes {dimension_semantics = [#tpu.dimension_semantics<parallel>, #tpu.dimension_semantics<parallel>, #tpu.dimension_semantics<arbitrary>], iteration_bounds = array<i64: 1, 1, 1>, scalar_prefetch = 0 : i64, scratch_operands = 1 : i64, tpu.core_type = #tpu.core_type<tc>, window_params = [{transform_indices = @transform_0, window_bounds = array<i64: 40, 128>}, {transform_indices = @transform_1, window_bounds = array<i64: 128, 128>}, {transform_indices = @transform_2, window_bounds = array<i64: 8, 128>}, {transform_indices = @transform_3, window_bounds = array<i64: 40, 128>}]} {
    %c0_i32 = arith.constant 0 : i32
    %0 = arith.cmpi eq, %arg2, %c0_i32 : i32
    %1 = arith.extui %0 : i1 to i32
    %c0_i32_0 = arith.constant 0 : i32
    %2 = arith.cmpi ne, %1, %c0_i32_0 : i32
    scf.if %2 {
      %cst_10 = arith.constant 0.000000e+00 : f32
      %12 = vector.broadcast %cst_10 : f32 to vector<40x128xf32>
      %c0_11 = arith.constant 0 : index
      %c0_12 = arith.constant 0 : index
      %13 = vector.load %arg7[%c0_11, %c0_12] : memref<40x128xf32, #tpu.memory_space<vmem>>, vector<40x128xf32>
      tpu.vector_store %arg7[%c0_11, %c0_12], %12 {strides = array<i32>} : memref<40x128xf32, #tpu.memory_space<vmem>>, vector<40x128xf32>,
    } else {
    }
    %c0 = arith.constant 0 : index
    %c0_1 = arith.constant 0 : index
    %3 = vector.load %arg7[%c0, %c0_1] : memref<40x128xf32, #tpu.memory_space<vmem>>, vector<40x128xf32>
    %c0_2 = arith.constant 0 : index
    %c0_3 = arith.constant 0 : index
    %4 = vector.load %arg3[%c0_2, %c0_3] : memref<40x128xbf16, #tpu.memory_space<vmem>>, vector<40x128xbf16>
    %c0_4 = arith.constant 0 : index
    %c0_5 = arith.constant 0 : index
    %5 = vector.load %arg4[%c0_4, %c0_5] : memref<128x128xbf16, #tpu.memory_space<vmem>>, vector<128x128xbf16>
    %cst = arith.constant dense<0.000000e+00> : vector<40x128xf32>
    %6 = tpu.matmul %4, %5, %cst {dimension_numbers = #tpu.dot_dimension_numbers<[1], [0], [0], [1], [0, 0, 1, 1], [], []>} : vector<40x128xbf16>, vector<128x128xbf16>, vector<40x128xf32> -> vector<40x128xf32>
    %7 = arith.addf %3, %6 : vector<40x128xf32>
    %c0_6 = arith.constant 0 : index
    %c0_7 = arith.constant 0 : index
    %8 = vector.load %arg7[%c0_6, %c0_7] : memref<40x128xf32, #tpu.memory_space<vmem>>, vector<40x128xf32>
    tpu.vector_store %arg7[%c0_6, %c0_7], %7 {strides = array<i32>} : memref<40x128xf32, #tpu.memory_space<vmem>>, vector<40x128xf32>,
    %c0_i32_8 = arith.constant 0 : i32
    %9 = arith.cmpi eq, %arg2, %c0_i32_8 : i32
    %10 = arith.extui %9 : i1 to i32
    %c0_i32_9 = arith.constant 0 : i32
    %11 = arith.cmpi ne, %10, %c0_i32_9 : i32
    scf.if %11 {
      %c0_10 = arith.constant 0 : index
      %c0_11 = arith.constant 0 : index
      %12 = vector.load %arg7[%c0_10, %c0_11] : memref<40x128xf32, #tpu.memory_space<vmem>>, vector<40x128xf32>
      %c0_12 = arith.constant 0 : index
      %c0_13 = arith.constant 0 : index
      %13 = vector.load %arg5[%c0_12, %c0_13] : memref<8x128xf32, #tpu.memory_space<vmem>>, vector<1x128xf32>
      %14 = vector.broadcast %13 : vector<1x128xf32> to vector<40x128xf32>
      %15 = arith.mulf %12, %14 : vector<40x128xf32>
      %c1 = arith.constant 1 : index
      %c0_14 = arith.constant 0 : index
      %16 = vector.load %arg5[%c1, %c0_14] : memref<8x128xf32, #tpu.memory_space<vmem>>, vector<1x128xf32>
      %17 = vector.broadcast %16 : vector<1x128xf32> to vector<40x128xf32>
      %18 = arith.addf %15, %17 : vector<40x128xf32>
      %cst_15 = arith.constant 0.000000e+00 : f32
      %19 = vector.broadcast %cst_15 : f32 to vector<40x128xf32>
      %20 = arith.maximumf %18, %19 : vector<40x128xf32>
      %c0_16 = arith.constant 0 : index
      %c0_17 = arith.constant 0 : index
      %21 = vector.load %arg6[%c0_16, %c0_17] : memref<40x128xf32, #tpu.memory_space<vmem>>, vector<40x128xf32>
      tpu.vector_store %arg6[%c0_16, %c0_17], %20 {strides = array<i32>} : memref<40x128xf32, #tpu.memory_space<vmem>>, vector<40x128xf32>,
    } else {
    }
    return
  }
  func.func @transform_0(%arg0: i32, %arg1: i32, %arg2: i32) -> (i32, i32) {
    %c0_i32 = arith.constant 0 : i32
    return %arg0, %arg2 : i32, i32
  }
  func.func @transform_1(%arg0: i32, %arg1: i32, %arg2: i32) -> (i32, i32) {
    %c0_i32 = arith.constant 0 : i32
    return %arg2, %arg1 : i32, i32
  }
  func.func @transform_2(%arg0: i32, %arg1: i32, %arg2: i32) -> (i32, i32) {
    %c0_i32 = arith.constant 0 : i32
    %c0_i32_0 = arith.constant 0 : i32
    return %c0_i32, %arg1 : i32, i32
  }
  func.func @transform_3(%arg0: i32, %arg1: i32, %arg2: i32) -> (i32, i32) {
    %c0_i32 = arith.constant 0 : i32
    return %arg0, %arg1 : i32, i32
  }
}

module attributes {stable_mosaic.version = 11 : i64} {
  func.func @_mm_kernel(%arg0: i32, %arg1: i32, %arg2: i32, %arg3: memref<40x128xbf16, #tpu.memory_space<vmem>>, %arg4: memref<128x128xbf16, #tpu.memory_space<vmem>>, %arg5: memref<8x128xf32, #tpu.memory_space<vmem>>, %arg6: memref<40x128xf32, #tpu.memory_space<vmem>>, %arg7: memref<40x128xf32, #tpu.memory_space<vmem>>) attributes {dimension_semantics = [#tpu.dimension_semantics<parallel>, #tpu.dimension_semantics<parallel>, #tpu.dimension_semantics<arbitrary>], iteration_bounds = array<i64: 1, 1, 5>, scalar_prefetch = 0 : i64, scratch_operands = 1 : i64, tpu.core_type = #tpu.core_type<tc>, window_params = [{transform_indices = @transform_0, window_bounds = array<i64: 40, 128>}, {transform_indices = @transform_1, window_bounds = array<i64: 128, 128>}, {transform_indices = @transform_2, window_bounds = array<i64: 8, 128>}, {transform_indices = @transform_3, window_bounds = array<i64: 40, 128>}]} {
    %c0_i32 = arith.constant 0 : i32
    %0 = arith.cmpi eq, %arg2, %c0_i32 : i32
    %1 = arith.extui %0 : i1 to i32
    %c0_i32_0 = arith.constant 0 : i32
    %2 = arith.cmpi ne, %1, %c0_i32_0 : i32
    scf.if %2 {
      %cst_9 = arith.constant 0.000000e+00 : f32
      %12 = vector.broadcast %cst_9 : f32 to vector<40x128xf32>
      %c0_10 = arith.constant 0 : index
      %c0_11 = arith.constant 0 : index
      %13 = vector.load %arg7[%c0_10, %c0_11] : memref<40x128xf32, #tpu.memory_space<vmem>>, vector<40x128xf32>
      tpu.vector_store %arg7[%c0_10, %c0_11], %12 {strides = array<i32>} : memref<40x128xf32, #tpu.memory_space<vmem>>, vector<40x128xf32>,
    } else {
    }
    %c0 = arith.constant 0 : index
    %c0_1 = arith.constant 0 : index
    %3 = vector.load %arg7[%c0, %c0_1] : memref<40x128xf32, #tpu.memory_space<vmem>>, vector<40x128xf32>
    %c0_2 = arith.constant 0 : index
    %c0_3 = arith.constant 0 : index
    %4 = vector.load %arg3[%c0_2, %c0_3] : memref<40x128xbf16, #tpu.memory_space<vmem>>, vector<40x128xbf16>
    %c0_4 = arith.constant 0 : index
    %c0_5 = arith.constant 0 : index
    %5 = vector.load %arg4[%c0_4, %c0_5] : memref<128x128xbf16, #tpu.memory_space<vmem>>, vector<128x128xbf16>
    %cst = arith.constant dense<0.000000e+00> : vector<40x128xf32>
    %6 = tpu.matmul %4, %5, %cst {dimension_numbers = #tpu.dot_dimension_numbers<[1], [0], [0], [1], [0, 0, 1, 1], [], []>} : vector<40x128xbf16>, vector<128x128xbf16>, vector<40x128xf32> -> vector<40x128xf32>
    %7 = arith.addf %3, %6 : vector<40x128xf32>
    %c0_6 = arith.constant 0 : index
    %c0_7 = arith.constant 0 : index
    %8 = vector.load %arg7[%c0_6, %c0_7] : memref<40x128xf32, #tpu.memory_space<vmem>>, vector<40x128xf32>
    tpu.vector_store %arg7[%c0_6, %c0_7], %7 {strides = array<i32>} : memref<40x128xf32, #tpu.memory_space<vmem>>, vector<40x128xf32>,
    %c4_i32 = arith.constant 4 : i32
    %9 = arith.cmpi eq, %arg2, %c4_i32 : i32
    %10 = arith.extui %9 : i1 to i32
    %c0_i32_8 = arith.constant 0 : i32
    %11 = arith.cmpi ne, %10, %c0_i32_8 : i32
    scf.if %11 {
      %c0_9 = arith.constant 0 : index
      %c0_10 = arith.constant 0 : index
      %12 = vector.load %arg7[%c0_9, %c0_10] : memref<40x128xf32, #tpu.memory_space<vmem>>, vector<40x128xf32>
      %c0_11 = arith.constant 0 : index
      %c0_12 = arith.constant 0 : index
      %13 = vector.load %arg5[%c0_11, %c0_12] : memref<8x128xf32, #tpu.memory_space<vmem>>, vector<1x128xf32>
      %14 = vector.broadcast %13 : vector<1x128xf32> to vector<40x128xf32>
      %15 = arith.mulf %12, %14 : vector<40x128xf32>
      %c1 = arith.constant 1 : index
      %c0_13 = arith.constant 0 : index
      %16 = vector.load %arg5[%c1, %c0_13] : memref<8x128xf32, #tpu.memory_space<vmem>>, vector<1x128xf32>
      %17 = vector.broadcast %16 : vector<1x128xf32> to vector<40x128xf32>
      %18 = arith.addf %15, %17 : vector<40x128xf32>
      %cst_14 = arith.constant 0.000000e+00 : f32
      %19 = vector.broadcast %cst_14 : f32 to vector<40x128xf32>
      %20 = arith.maximumf %18, %19 : vector<40x128xf32>
      %c0_15 = arith.constant 0 : index
      %c0_16 = arith.constant 0 : index
      %21 = vector.load %arg6[%c0_15, %c0_16] : memref<40x128xf32, #tpu.memory_space<vmem>>, vector<40x128xf32>
      tpu.vector_store %arg6[%c0_15, %c0_16], %20 {strides = array<i32>} : memref<40x128xf32, #tpu.memory_space<vmem>>, vector<40x128xf32>,
    } else {
    }
    return
  }
  func.func @transform_0(%arg0: i32, %arg1: i32, %arg2: i32) -> (i32, i32) {
    %c0_i32 = arith.constant 0 : i32
    return %arg0, %arg2 : i32, i32
  }
  func.func @transform_1(%arg0: i32, %arg1: i32, %arg2: i32) -> (i32, i32) {
    %c0_i32 = arith.constant 0 : i32
    return %arg2, %arg1 : i32, i32
  }
  func.func @transform_2(%arg0: i32, %arg1: i32, %arg2: i32) -> (i32, i32) {
    %c0_i32 = arith.constant 0 : i32
    %c0_i32_0 = arith.constant 0 : i32
    return %c0_i32, %arg1 : i32, i32
  }
  func.func @transform_3(%arg0: i32, %arg1: i32, %arg2: i32) -> (i32, i32) {
    %c0_i32 = arith.constant 0 : i32
    return %arg0, %arg1 : i32, i32
  }
}

module attributes {stable_mosaic.version = 11 : i64} {
  func.func @_mm_kernel(%arg0: i32, %arg1: i32, %arg2: i32, %arg3: memref<40x128xbf16, #tpu.memory_space<vmem>>, %arg4: memref<128x256xbf16, #tpu.memory_space<vmem>>, %arg5: memref<8x256xf32, #tpu.memory_space<vmem>>, %arg6: memref<40x256xf32, #tpu.memory_space<vmem>>, %arg7: memref<40x256xf32, #tpu.memory_space<vmem>>) attributes {dimension_semantics = [#tpu.dimension_semantics<parallel>, #tpu.dimension_semantics<parallel>, #tpu.dimension_semantics<arbitrary>], iteration_bounds = array<i64: 1, 1, 1>, scalar_prefetch = 0 : i64, scratch_operands = 1 : i64, tpu.core_type = #tpu.core_type<tc>, window_params = [{transform_indices = @transform_0, window_bounds = array<i64: 40, 128>}, {transform_indices = @transform_1, window_bounds = array<i64: 128, 256>}, {transform_indices = @transform_2, window_bounds = array<i64: 8, 256>}, {transform_indices = @transform_3, window_bounds = array<i64: 40, 256>}]} {
    %c0_i32 = arith.constant 0 : i32
    %0 = arith.cmpi eq, %arg2, %c0_i32 : i32
    %1 = arith.extui %0 : i1 to i32
    %c0_i32_0 = arith.constant 0 : i32
    %2 = arith.cmpi ne, %1, %c0_i32_0 : i32
    scf.if %2 {
      %cst_10 = arith.constant 0.000000e+00 : f32
      %12 = vector.broadcast %cst_10 : f32 to vector<40x256xf32>
      %c0_11 = arith.constant 0 : index
      %c0_12 = arith.constant 0 : index
      %13 = vector.load %arg7[%c0_11, %c0_12] : memref<40x256xf32, #tpu.memory_space<vmem>>, vector<40x256xf32>
      tpu.vector_store %arg7[%c0_11, %c0_12], %12 {strides = array<i32>} : memref<40x256xf32, #tpu.memory_space<vmem>>, vector<40x256xf32>,
    } else {
    }
    %c0 = arith.constant 0 : index
    %c0_1 = arith.constant 0 : index
    %3 = vector.load %arg7[%c0, %c0_1] : memref<40x256xf32, #tpu.memory_space<vmem>>, vector<40x256xf32>
    %c0_2 = arith.constant 0 : index
    %c0_3 = arith.constant 0 : index
    %4 = vector.load %arg3[%c0_2, %c0_3] : memref<40x128xbf16, #tpu.memory_space<vmem>>, vector<40x128xbf16>
    %c0_4 = arith.constant 0 : index
    %c0_5 = arith.constant 0 : index
    %5 = vector.load %arg4[%c0_4, %c0_5] : memref<128x256xbf16, #tpu.memory_space<vmem>>, vector<128x256xbf16>
    %cst = arith.constant dense<0.000000e+00> : vector<40x256xf32>
    %6 = tpu.matmul %4, %5, %cst {dimension_numbers = #tpu.dot_dimension_numbers<[1], [0], [0], [1], [0, 0, 1, 1], [], []>} : vector<40x128xbf16>, vector<128x256xbf16>, vector<40x256xf32> -> vector<40x256xf32>
    %7 = arith.addf %3, %6 : vector<40x256xf32>
    %c0_6 = arith.constant 0 : index
    %c0_7 = arith.constant 0 : index
    %8 = vector.load %arg7[%c0_6, %c0_7] : memref<40x256xf32, #tpu.memory_space<vmem>>, vector<40x256xf32>
    tpu.vector_store %arg7[%c0_6, %c0_7], %7 {strides = array<i32>} : memref<40x256xf32, #tpu.memory_space<vmem>>, vector<40x256xf32>,
    %c0_i32_8 = arith.constant 0 : i32
    %9 = arith.cmpi eq, %arg2, %c0_i32_8 : i32
    %10 = arith.extui %9 : i1 to i32
    %c0_i32_9 = arith.constant 0 : i32
    %11 = arith.cmpi ne, %10, %c0_i32_9 : i32
    scf.if %11 {
      %c0_10 = arith.constant 0 : index
      %c0_11 = arith.constant 0 : index
      %12 = vector.load %arg7[%c0_10, %c0_11] : memref<40x256xf32, #tpu.memory_space<vmem>>, vector<40x256xf32>
      %c0_12 = arith.constant 0 : index
      %c0_13 = arith.constant 0 : index
      %13 = vector.load %arg5[%c0_12, %c0_13] : memref<8x256xf32, #tpu.memory_space<vmem>>, vector<1x256xf32>
      %14 = vector.broadcast %13 : vector<1x256xf32> to vector<40x256xf32>
      %15 = arith.mulf %12, %14 : vector<40x256xf32>
      %c1 = arith.constant 1 : index
      %c0_14 = arith.constant 0 : index
      %16 = vector.load %arg5[%c1, %c0_14] : memref<8x256xf32, #tpu.memory_space<vmem>>, vector<1x256xf32>
      %17 = vector.broadcast %16 : vector<1x256xf32> to vector<40x256xf32>
      %18 = arith.addf %15, %17 : vector<40x256xf32>
      %c0_15 = arith.constant 0 : index
      %c0_16 = arith.constant 0 : index
      %19 = vector.load %arg6[%c0_15, %c0_16] : memref<40x256xf32, #tpu.memory_space<vmem>>, vector<40x256xf32>
      tpu.vector_store %arg6[%c0_15, %c0_16], %18 {strides = array<i32>} : memref<40x256xf32, #tpu.memory_space<vmem>>, vector<40x256xf32>,
    } else {
    }
    return
  }
  func.func @transform_0(%arg0: i32, %arg1: i32, %arg2: i32) -> (i32, i32) {
    %c0_i32 = arith.constant 0 : i32
    return %arg0, %arg2 : i32, i32
  }
  func.func @transform_1(%arg0: i32, %arg1: i32, %arg2: i32) -> (i32, i32) {
    %c0_i32 = arith.constant 0 : i32
    return %arg2, %arg1 : i32, i32
  }
  func.func @transform_2(%arg0: i32, %arg1: i32, %arg2: i32) -> (i32, i32) {
    %c0_i32 = arith.constant 0 : i32
    %c0_i32_0 = arith.constant 0 : i32
    return %c0_i32, %arg1 : i32, i32
  }
  func.func @transform_3(%arg0: i32, %arg1: i32, %arg2: i32) -> (i32, i32) {
    %c0_i32 = arith.constant 0 : i32
    return %arg0, %arg1 : i32, i32
  }
}

module attributes {stable_mosaic.version = 11 : i64} {
  func.func @_mm_res_kernel(%arg0: i32, %arg1: i32, %arg2: i32, %arg3: memref<40x128xbf16, #tpu.memory_space<vmem>>, %arg4: memref<128x256xbf16, #tpu.memory_space<vmem>>, %arg5: memref<8x256xf32, #tpu.memory_space<vmem>>, %arg6: memref<40x256xf32, #tpu.memory_space<vmem>>, %arg7: memref<40x256xf32, #tpu.memory_space<vmem>>, %arg8: memref<40x256xf32, #tpu.memory_space<vmem>>) attributes {dimension_semantics = [#tpu.dimension_semantics<parallel>, #tpu.dimension_semantics<parallel>, #tpu.dimension_semantics<arbitrary>], iteration_bounds = array<i64: 1, 1, 1>, scalar_prefetch = 0 : i64, scratch_operands = 1 : i64, tpu.core_type = #tpu.core_type<tc>, window_params = [{transform_indices = @transform_0, window_bounds = array<i64: 40, 128>}, {transform_indices = @transform_1, window_bounds = array<i64: 128, 256>}, {transform_indices = @transform_2, window_bounds = array<i64: 8, 256>}, {transform_indices = @transform_3, window_bounds = array<i64: 40, 256>}, {transform_indices = @transform_4, window_bounds = array<i64: 40, 256>}]} {
    %c0_i32 = arith.constant 0 : i32
    %0 = arith.cmpi eq, %arg2, %c0_i32 : i32
    %1 = arith.extui %0 : i1 to i32
    %c0_i32_0 = arith.constant 0 : i32
    %2 = arith.cmpi ne, %1, %c0_i32_0 : i32
    scf.if %2 {
      %cst_10 = arith.constant 0.000000e+00 : f32
      %12 = vector.broadcast %cst_10 : f32 to vector<40x256xf32>
      %c0_11 = arith.constant 0 : index
      %c0_12 = arith.constant 0 : index
      %13 = vector.load %arg8[%c0_11, %c0_12] : memref<40x256xf32, #tpu.memory_space<vmem>>, vector<40x256xf32>
      tpu.vector_store %arg8[%c0_11, %c0_12], %12 {strides = array<i32>} : memref<40x256xf32, #tpu.memory_space<vmem>>, vector<40x256xf32>,
    } else {
    }
    %c0 = arith.constant 0 : index
    %c0_1 = arith.constant 0 : index
    %3 = vector.load %arg8[%c0, %c0_1] : memref<40x256xf32, #tpu.memory_space<vmem>>, vector<40x256xf32>
    %c0_2 = arith.constant 0 : index
    %c0_3 = arith.constant 0 : index
    %4 = vector.load %arg3[%c0_2, %c0_3] : memref<40x128xbf16, #tpu.memory_space<vmem>>, vector<40x128xbf16>
    %c0_4 = arith.constant 0 : index
    %c0_5 = arith.constant 0 : index
    %5 = vector.load %arg4[%c0_4, %c0_5] : memref<128x256xbf16, #tpu.memory_space<vmem>>, vector<128x256xbf16>
    %cst = arith.constant dense<0.000000e+00> : vector<40x256xf32>
    %6 = tpu.matmul %4, %5, %cst {dimension_numbers = #tpu.dot_dimension_numbers<[1], [0], [0], [1], [0, 0, 1, 1], [], []>} : vector<40x128xbf16>, vector<128x256xbf16>, vector<40x256xf32> -> vector<40x256xf32>
    %7 = arith.addf %3, %6 : vector<40x256xf32>
    %c0_6 = arith.constant 0 : index
    %c0_7 = arith.constant 0 : index
    %8 = vector.load %arg8[%c0_6, %c0_7] : memref<40x256xf32, #tpu.memory_space<vmem>>, vector<40x256xf32>
    tpu.vector_store %arg8[%c0_6, %c0_7], %7 {strides = array<i32>} : memref<40x256xf32, #tpu.memory_space<vmem>>, vector<40x256xf32>,
    %c0_i32_8 = arith.constant 0 : i32
    %9 = arith.cmpi eq, %arg2, %c0_i32_8 : i32
    %10 = arith.extui %9 : i1 to i32
    %c0_i32_9 = arith.constant 0 : i32
    %11 = arith.cmpi ne, %10, %c0_i32_9 : i32
    scf.if %11 {
      %c0_10 = arith.constant 0 : index
      %c0_11 = arith.constant 0 : index
      %12 = vector.load %arg8[%c0_10, %c0_11] : memref<40x256xf32, #tpu.memory_space<vmem>>, vector<40x256xf32>
      %c0_12 = arith.constant 0 : index
      %c0_13 = arith.constant 0 : index
      %13 = vector.load %arg5[%c0_12, %c0_13] : memref<8x256xf32, #tpu.memory_space<vmem>>, vector<1x256xf32>
      %14 = vector.broadcast %13 : vector<1x256xf32> to vector<40x256xf32>
      %15 = arith.mulf %12, %14 : vector<40x256xf32>
      %c1 = arith.constant 1 : index
      %c0_14 = arith.constant 0 : index
      %16 = vector.load %arg5[%c1, %c0_14] : memref<8x256xf32, #tpu.memory_space<vmem>>, vector<1x256xf32>
      %17 = vector.broadcast %16 : vector<1x256xf32> to vector<40x256xf32>
      %18 = arith.addf %15, %17 : vector<40x256xf32>
      %c0_15 = arith.constant 0 : index
      %c0_16 = arith.constant 0 : index
      %19 = vector.load %arg6[%c0_15, %c0_16] : memref<40x256xf32, #tpu.memory_space<vmem>>, vector<40x256xf32>
      %20 = arith.addf %18, %19 : vector<40x256xf32>
      %cst_17 = arith.constant 0.000000e+00 : f32
      %21 = vector.broadcast %cst_17 : f32 to vector<40x256xf32>
      %22 = arith.maximumf %20, %21 : vector<40x256xf32>
      %c0_18 = arith.constant 0 : index
      %c0_19 = arith.constant 0 : index
      %23 = vector.load %arg7[%c0_18, %c0_19] : memref<40x256xf32, #tpu.memory_space<vmem>>, vector<40x256xf32>
      tpu.vector_store %arg7[%c0_18, %c0_19], %22 {strides = array<i32>} : memref<40x256xf32, #tpu.memory_space<vmem>>, vector<40x256xf32>,
    } else {
    }
    return
  }
  func.func @transform_0(%arg0: i32, %arg1: i32, %arg2: i32) -> (i32, i32) {
    %c0_i32 = arith.constant 0 : i32
    return %arg0, %arg2 : i32, i32
  }
  func.func @transform_1(%arg0: i32, %arg1: i32, %arg2: i32) -> (i32, i32) {
    %c0_i32 = arith.constant 0 : i32
    return %arg2, %arg1 : i32, i32
  }
  func.func @transform_2(%arg0: i32, %arg1: i32, %arg2: i32) -> (i32, i32) {
    %c0_i32 = arith.constant 0 : i32
    %c0_i32_0 = arith.constant 0 : i32
    return %c0_i32, %arg1 : i32, i32
  }
  func.func @transform_3(%arg0: i32, %arg1: i32, %arg2: i32) -> (i32, i32) {
    %c0_i32 = arith.constant 0 : i32
    return %arg0, %arg1 : i32, i32
  }
  func.func @transform_4(%arg0: i32, %arg1: i32, %arg2: i32) -> (i32, i32) {
    %c0_i32 = arith.constant 0 : i32
    return %arg0, %arg1 : i32, i32
  }
}

module attributes {stable_mosaic.version = 11 : i64} {
  func.func @_mm_kernel(%arg0: i32, %arg1: i32, %arg2: i32, %arg3: memref<40x256xbf16, #tpu.memory_space<vmem>>, %arg4: memref<256x128xbf16, #tpu.memory_space<vmem>>, %arg5: memref<8x128xf32, #tpu.memory_space<vmem>>, %arg6: memref<40x128xf32, #tpu.memory_space<vmem>>, %arg7: memref<40x128xf32, #tpu.memory_space<vmem>>) attributes {dimension_semantics = [#tpu.dimension_semantics<parallel>, #tpu.dimension_semantics<parallel>, #tpu.dimension_semantics<arbitrary>], iteration_bounds = array<i64: 1, 1, 1>, scalar_prefetch = 0 : i64, scratch_operands = 1 : i64, tpu.core_type = #tpu.core_type<tc>, window_params = [{transform_indices = @transform_0, window_bounds = array<i64: 40, 256>}, {transform_indices = @transform_1, window_bounds = array<i64: 256, 128>}, {transform_indices = @transform_2, window_bounds = array<i64: 8, 128>}, {transform_indices = @transform_3, window_bounds = array<i64: 40, 128>}]} {
    %c0_i32 = arith.constant 0 : i32
    %0 = arith.cmpi eq, %arg2, %c0_i32 : i32
    %1 = arith.extui %0 : i1 to i32
    %c0_i32_0 = arith.constant 0 : i32
    %2 = arith.cmpi ne, %1, %c0_i32_0 : i32
    scf.if %2 {
      %cst_10 = arith.constant 0.000000e+00 : f32
      %12 = vector.broadcast %cst_10 : f32 to vector<40x128xf32>
      %c0_11 = arith.constant 0 : index
      %c0_12 = arith.constant 0 : index
      %13 = vector.load %arg7[%c0_11, %c0_12] : memref<40x128xf32, #tpu.memory_space<vmem>>, vector<40x128xf32>
      tpu.vector_store %arg7[%c0_11, %c0_12], %12 {strides = array<i32>} : memref<40x128xf32, #tpu.memory_space<vmem>>, vector<40x128xf32>,
    } else {
    }
    %c0 = arith.constant 0 : index
    %c0_1 = arith.constant 0 : index
    %3 = vector.load %arg7[%c0, %c0_1] : memref<40x128xf32, #tpu.memory_space<vmem>>, vector<40x128xf32>
    %c0_2 = arith.constant 0 : index
    %c0_3 = arith.constant 0 : index
    %4 = vector.load %arg3[%c0_2, %c0_3] : memref<40x256xbf16, #tpu.memory_space<vmem>>, vector<40x256xbf16>
    %c0_4 = arith.constant 0 : index
    %c0_5 = arith.constant 0 : index
    %5 = vector.load %arg4[%c0_4, %c0_5] : memref<256x128xbf16, #tpu.memory_space<vmem>>, vector<256x128xbf16>
    %cst = arith.constant dense<0.000000e+00> : vector<40x128xf32>
    %6 = tpu.matmul %4, %5, %cst {dimension_numbers = #tpu.dot_dimension_numbers<[1], [0], [0], [1], [0, 0, 1, 1], [], []>} : vector<40x256xbf16>, vector<256x128xbf16>, vector<40x128xf32> -> vector<40x128xf32>
    %7 = arith.addf %3, %6 : vector<40x128xf32>
    %c0_6 = arith.constant 0 : index
    %c0_7 = arith.constant 0 : index
    %8 = vector.load %arg7[%c0_6, %c0_7] : memref<40x128xf32, #tpu.memory_space<vmem>>, vector<40x128xf32>
    tpu.vector_store %arg7[%c0_6, %c0_7], %7 {strides = array<i32>} : memref<40x128xf32, #tpu.memory_space<vmem>>, vector<40x128xf32>,
    %c0_i32_8 = arith.constant 0 : i32
    %9 = arith.cmpi eq, %arg2, %c0_i32_8 : i32
    %10 = arith.extui %9 : i1 to i32
    %c0_i32_9 = arith.constant 0 : i32
    %11 = arith.cmpi ne, %10, %c0_i32_9 : i32
    scf.if %11 {
      %c0_10 = arith.constant 0 : index
      %c0_11 = arith.constant 0 : index
      %12 = vector.load %arg7[%c0_10, %c0_11] : memref<40x128xf32, #tpu.memory_space<vmem>>, vector<40x128xf32>
      %c0_12 = arith.constant 0 : index
      %c0_13 = arith.constant 0 : index
      %13 = vector.load %arg5[%c0_12, %c0_13] : memref<8x128xf32, #tpu.memory_space<vmem>>, vector<1x128xf32>
      %14 = vector.broadcast %13 : vector<1x128xf32> to vector<40x128xf32>
      %15 = arith.mulf %12, %14 : vector<40x128xf32>
      %c1 = arith.constant 1 : index
      %c0_14 = arith.constant 0 : index
      %16 = vector.load %arg5[%c1, %c0_14] : memref<8x128xf32, #tpu.memory_space<vmem>>, vector<1x128xf32>
      %17 = vector.broadcast %16 : vector<1x128xf32> to vector<40x128xf32>
      %18 = arith.addf %15, %17 : vector<40x128xf32>
      %cst_15 = arith.constant 0.000000e+00 : f32
      %19 = vector.broadcast %cst_15 : f32 to vector<40x128xf32>
      %20 = arith.maximumf %18, %19 : vector<40x128xf32>
      %c0_16 = arith.constant 0 : index
      %c0_17 = arith.constant 0 : index
      %21 = vector.load %arg6[%c0_16, %c0_17] : memref<40x128xf32, #tpu.memory_space<vmem>>, vector<40x128xf32>
      tpu.vector_store %arg6[%c0_16, %c0_17], %20 {strides = array<i32>} : memref<40x128xf32, #tpu.memory_space<vmem>>, vector<40x128xf32>,
    } else {
    }
    return
  }
  func.func @transform_0(%arg0: i32, %arg1: i32, %arg2: i32) -> (i32, i32) {
    %c0_i32 = arith.constant 0 : i32
    return %arg0, %arg2 : i32, i32
  }
  func.func @transform_1(%arg0: i32, %arg1: i32, %arg2: i32) -> (i32, i32) {
    %c0_i32 = arith.constant 0 : i32
    return %arg2, %arg1 : i32, i32
  }
  func.func @transform_2(%arg0: i32, %arg1: i32, %arg2: i32) -> (i32, i32) {
    %c0_i32 = arith.constant 0 : i32
    %c0_i32_0 = arith.constant 0 : i32
    return %c0_i32, %arg1 : i32, i32
  }
  func.func @transform_3(%arg0: i32, %arg1: i32, %arg2: i32) -> (i32, i32) {
    %c0_i32 = arith.constant 0 : i32
    return %arg0, %arg1 : i32, i32
  }
}

module attributes {stable_mosaic.version = 11 : i64} {
  func.func @_mm_kernel(%arg0: i32, %arg1: i32, %arg2: i32, %arg3: memref<40x384xbf16, #tpu.memory_space<vmem>>, %arg4: memref<384x128xbf16, #tpu.memory_space<vmem>>, %arg5: memref<8x128xf32, #tpu.memory_space<vmem>>, %arg6: memref<40x128xf32, #tpu.memory_space<vmem>>, %arg7: memref<40x128xf32, #tpu.memory_space<vmem>>) attributes {dimension_semantics = [#tpu.dimension_semantics<parallel>, #tpu.dimension_semantics<parallel>, #tpu.dimension_semantics<arbitrary>], iteration_bounds = array<i64: 1, 1, 3>, scalar_prefetch = 0 : i64, scratch_operands = 1 : i64, tpu.core_type = #tpu.core_type<tc>, window_params = [{transform_indices = @transform_0, window_bounds = array<i64: 40, 384>}, {transform_indices = @transform_1, window_bounds = array<i64: 384, 128>}, {transform_indices = @transform_2, window_bounds = array<i64: 8, 128>}, {transform_indices = @transform_3, window_bounds = array<i64: 40, 128>}]} {
    %c0_i32 = arith.constant 0 : i32
    %0 = arith.cmpi eq, %arg2, %c0_i32 : i32
    %1 = arith.extui %0 : i1 to i32
    %c0_i32_0 = arith.constant 0 : i32
    %2 = arith.cmpi ne, %1, %c0_i32_0 : i32
    scf.if %2 {
      %cst_9 = arith.constant 0.000000e+00 : f32
      %12 = vector.broadcast %cst_9 : f32 to vector<40x128xf32>
      %c0_10 = arith.constant 0 : index
      %c0_11 = arith.constant 0 : index
      %13 = vector.load %arg7[%c0_10, %c0_11] : memref<40x128xf32, #tpu.memory_space<vmem>>, vector<40x128xf32>
      tpu.vector_store %arg7[%c0_10, %c0_11], %12 {strides = array<i32>} : memref<40x128xf32, #tpu.memory_space<vmem>>, vector<40x128xf32>,
    } else {
    }
    %c0 = arith.constant 0 : index
    %c0_1 = arith.constant 0 : index
    %3 = vector.load %arg7[%c0, %c0_1] : memref<40x128xf32, #tpu.memory_space<vmem>>, vector<40x128xf32>
    %c0_2 = arith.constant 0 : index
    %c0_3 = arith.constant 0 : index
    %4 = vector.load %arg3[%c0_2, %c0_3] : memref<40x384xbf16, #tpu.memory_space<vmem>>, vector<40x384xbf16>
    %c0_4 = arith.constant 0 : index
    %c0_5 = arith.constant 0 : index
    %5 = vector.load %arg4[%c0_4, %c0_5] : memref<384x128xbf16, #tpu.memory_space<vmem>>, vector<384x128xbf16>
    %cst = arith.constant dense<0.000000e+00> : vector<40x128xf32>
    %6 = tpu.matmul %4, %5, %cst {dimension_numbers = #tpu.dot_dimension_numbers<[1], [0], [0], [1], [0, 0, 1, 1], [], []>} : vector<40x384xbf16>, vector<384x128xbf16>, vector<40x128xf32> -> vector<40x128xf32>
    %7 = arith.addf %3, %6 : vector<40x128xf32>
    %c0_6 = arith.constant 0 : index
    %c0_7 = arith.constant 0 : index
    %8 = vector.load %arg7[%c0_6, %c0_7] : memref<40x128xf32, #tpu.memory_space<vmem>>, vector<40x128xf32>
    tpu.vector_store %arg7[%c0_6, %c0_7], %7 {strides = array<i32>} : memref<40x128xf32, #tpu.memory_space<vmem>>, vector<40x128xf32>,
    %c2_i32 = arith.constant 2 : i32
    %9 = arith.cmpi eq, %arg2, %c2_i32 : i32
    %10 = arith.extui %9 : i1 to i32
    %c0_i32_8 = arith.constant 0 : i32
    %11 = arith.cmpi ne, %10, %c0_i32_8 : i32
    scf.if %11 {
      %c0_9 = arith.constant 0 : index
      %c0_10 = arith.constant 0 : index
      %12 = vector.load %arg7[%c0_9, %c0_10] : memref<40x128xf32, #tpu.memory_space<vmem>>, vector<40x128xf32>
      %c0_11 = arith.constant 0 : index
      %c0_12 = arith.constant 0 : index
      %13 = vector.load %arg5[%c0_11, %c0_12] : memref<8x128xf32, #tpu.memory_space<vmem>>, vector<1x128xf32>
      %14 = vector.broadcast %13 : vector<1x128xf32> to vector<40x128xf32>
      %15 = arith.mulf %12, %14 : vector<40x128xf32>
      %c1 = arith.constant 1 : index
      %c0_13 = arith.constant 0 : index
      %16 = vector.load %arg5[%c1, %c0_13] : memref<8x128xf32, #tpu.memory_space<vmem>>, vector<1x128xf32>
      %17 = vector.broadcast %16 : vector<1x128xf32> to vector<40x128xf32>
      %18 = arith.addf %15, %17 : vector<40x128xf32>
      %cst_14 = arith.constant 0.000000e+00 : f32
      %19 = vector.broadcast %cst_14 : f32 to vector<40x128xf32>
      %20 = arith.maximumf %18, %19 : vector<40x128xf32>
      %c0_15 = arith.constant 0 : index
      %c0_16 = arith.constant 0 : index
      %21 = vector.load %arg6[%c0_15, %c0_16] : memref<40x128xf32, #tpu.memory_space<vmem>>, vector<40x128xf32>
      tpu.vector_store %arg6[%c0_15, %c0_16], %20 {strides = array<i32>} : memref<40x128xf32, #tpu.memory_space<vmem>>, vector<40x128xf32>,
    } else {
    }
    return
  }
  func.func @transform_0(%arg0: i32, %arg1: i32, %arg2: i32) -> (i32, i32) {
    %c0_i32 = arith.constant 0 : i32
    return %arg0, %arg2 : i32, i32
  }
  func.func @transform_1(%arg0: i32, %arg1: i32, %arg2: i32) -> (i32, i32) {
    %c0_i32 = arith.constant 0 : i32
    return %arg2, %arg1 : i32, i32
  }
  func.func @transform_2(%arg0: i32, %arg1: i32, %arg2: i32) -> (i32, i32) {
    %c0_i32 = arith.constant 0 : i32
    %c0_i32_0 = arith.constant 0 : i32
    return %c0_i32, %arg1 : i32, i32
  }
  func.func @transform_3(%arg0: i32, %arg1: i32, %arg2: i32) -> (i32, i32) {
    %c0_i32 = arith.constant 0 : i32
    return %arg0, %arg1 : i32, i32
  }
}

module attributes {stable_mosaic.version = 11 : i64} {
  func.func @_mm_kernel(%arg0: i32, %arg1: i32, %arg2: i32, %arg3: memref<40x256xbf16, #tpu.memory_space<vmem>>, %arg4: memref<256x512xbf16, #tpu.memory_space<vmem>>, %arg5: memref<8x512xf32, #tpu.memory_space<vmem>>, %arg6: memref<40x512xf32, #tpu.memory_space<vmem>>, %arg7: memref<40x512xf32, #tpu.memory_space<vmem>>) attributes {dimension_semantics = [#tpu.dimension_semantics<parallel>, #tpu.dimension_semantics<parallel>, #tpu.dimension_semantics<arbitrary>], iteration_bounds = array<i64: 1, 1, 1>, scalar_prefetch = 0 : i64, scratch_operands = 1 : i64, tpu.core_type = #tpu.core_type<tc>, window_params = [{transform_indices = @transform_0, window_bounds = array<i64: 40, 256>}, {transform_indices = @transform_1, window_bounds = array<i64: 256, 512>}, {transform_indices = @transform_2, window_bounds = array<i64: 8, 512>}, {transform_indices = @transform_3, window_bounds = array<i64: 40, 512>}]} {
    %c0_i32 = arith.constant 0 : i32
    %0 = arith.cmpi eq, %arg2, %c0_i32 : i32
    %1 = arith.extui %0 : i1 to i32
    %c0_i32_0 = arith.constant 0 : i32
    %2 = arith.cmpi ne, %1, %c0_i32_0 : i32
    scf.if %2 {
      %cst_10 = arith.constant 0.000000e+00 : f32
      %12 = vector.broadcast %cst_10 : f32 to vector<40x512xf32>
      %c0_11 = arith.constant 0 : index
      %c0_12 = arith.constant 0 : index
      %13 = vector.load %arg7[%c0_11, %c0_12] : memref<40x512xf32, #tpu.memory_space<vmem>>, vector<40x512xf32>
      tpu.vector_store %arg7[%c0_11, %c0_12], %12 {strides = array<i32>} : memref<40x512xf32, #tpu.memory_space<vmem>>, vector<40x512xf32>,
    } else {
    }
    %c0 = arith.constant 0 : index
    %c0_1 = arith.constant 0 : index
    %3 = vector.load %arg7[%c0, %c0_1] : memref<40x512xf32, #tpu.memory_space<vmem>>, vector<40x512xf32>
    %c0_2 = arith.constant 0 : index
    %c0_3 = arith.constant 0 : index
    %4 = vector.load %arg3[%c0_2, %c0_3] : memref<40x256xbf16, #tpu.memory_space<vmem>>, vector<40x256xbf16>
    %c0_4 = arith.constant 0 : index
    %c0_5 = arith.constant 0 : index
    %5 = vector.load %arg4[%c0_4, %c0_5] : memref<256x512xbf16, #tpu.memory_space<vmem>>, vector<256x512xbf16>
    %cst = arith.constant dense<0.000000e+00> : vector<40x512xf32>
    %6 = tpu.matmul %4, %5, %cst {dimension_numbers = #tpu.dot_dimension_numbers<[1], [0], [0], [1], [0, 0, 1, 1], [], []>} : vector<40x256xbf16>, vector<256x512xbf16>, vector<40x512xf32> -> vector<40x512xf32>
    %7 = arith.addf %3, %6 : vector<40x512xf32>
    %c0_6 = arith.constant 0 : index
    %c0_7 = arith.constant 0 : index
    %8 = vector.load %arg7[%c0_6, %c0_7] : memref<40x512xf32, #tpu.memory_space<vmem>>, vector<40x512xf32>
    tpu.vector_store %arg7[%c0_6, %c0_7], %7 {strides = array<i32>} : memref<40x512xf32, #tpu.memory_space<vmem>>, vector<40x512xf32>,
    %c0_i32_8 = arith.constant 0 : i32
    %9 = arith.cmpi eq, %arg2, %c0_i32_8 : i32
    %10 = arith.extui %9 : i1 to i32
    %c0_i32_9 = arith.constant 0 : i32
    %11 = arith.cmpi ne, %10, %c0_i32_9 : i32
    scf.if %11 {
      %c0_10 = arith.constant 0 : index
      %c0_11 = arith.constant 0 : index
      %12 = vector.load %arg7[%c0_10, %c0_11] : memref<40x512xf32, #tpu.memory_space<vmem>>, vector<40x512xf32>
      %c0_12 = arith.constant 0 : index
      %c0_13 = arith.constant 0 : index
      %13 = vector.load %arg5[%c0_12, %c0_13] : memref<8x512xf32, #tpu.memory_space<vmem>>, vector<1x512xf32>
      %14 = vector.broadcast %13 : vector<1x512xf32> to vector<40x512xf32>
      %15 = arith.mulf %12, %14 : vector<40x512xf32>
      %c1 = arith.constant 1 : index
      %c0_14 = arith.constant 0 : index
      %16 = vector.load %arg5[%c1, %c0_14] : memref<8x512xf32, #tpu.memory_space<vmem>>, vector<1x512xf32>
      %17 = vector.broadcast %16 : vector<1x512xf32> to vector<40x512xf32>
      %18 = arith.addf %15, %17 : vector<40x512xf32>
      %c0_15 = arith.constant 0 : index
      %c0_16 = arith.constant 0 : index
      %19 = vector.load %arg6[%c0_15, %c0_16] : memref<40x512xf32, #tpu.memory_space<vmem>>, vector<40x512xf32>
      tpu.vector_store %arg6[%c0_15, %c0_16], %18 {strides = array<i32>} : memref<40x512xf32, #tpu.memory_space<vmem>>, vector<40x512xf32>,
    } else {
    }
    return
  }
  func.func @transform_0(%arg0: i32, %arg1: i32, %arg2: i32) -> (i32, i32) {
    %c0_i32 = arith.constant 0 : i32
    return %arg0, %arg2 : i32, i32
  }
  func.func @transform_1(%arg0: i32, %arg1: i32, %arg2: i32) -> (i32, i32) {
    %c0_i32 = arith.constant 0 : i32
    return %arg2, %arg1 : i32, i32
  }
  func.func @transform_2(%arg0: i32, %arg1: i32, %arg2: i32) -> (i32, i32) {
    %c0_i32 = arith.constant 0 : i32
    %c0_i32_0 = arith.constant 0 : i32
    return %c0_i32, %arg1 : i32, i32
  }
  func.func @transform_3(%arg0: i32, %arg1: i32, %arg2: i32) -> (i32, i32) {
    %c0_i32 = arith.constant 0 : i32
    return %arg0, %arg1 : i32, i32
  }
}

module attributes {stable_mosaic.version = 11 : i64} {
  func.func @_mm_res_kernel(%arg0: i32, %arg1: i32, %arg2: i32, %arg3: memref<40x128xbf16, #tpu.memory_space<vmem>>, %arg4: memref<128x512xbf16, #tpu.memory_space<vmem>>, %arg5: memref<8x512xf32, #tpu.memory_space<vmem>>, %arg6: memref<40x512xf32, #tpu.memory_space<vmem>>, %arg7: memref<40x512xf32, #tpu.memory_space<vmem>>, %arg8: memref<40x512xf32, #tpu.memory_space<vmem>>) attributes {dimension_semantics = [#tpu.dimension_semantics<parallel>, #tpu.dimension_semantics<parallel>, #tpu.dimension_semantics<arbitrary>], iteration_bounds = array<i64: 1, 1, 1>, scalar_prefetch = 0 : i64, scratch_operands = 1 : i64, tpu.core_type = #tpu.core_type<tc>, window_params = [{transform_indices = @transform_0, window_bounds = array<i64: 40, 128>}, {transform_indices = @transform_1, window_bounds = array<i64: 128, 512>}, {transform_indices = @transform_2, window_bounds = array<i64: 8, 512>}, {transform_indices = @transform_3, window_bounds = array<i64: 40, 512>}, {transform_indices = @transform_4, window_bounds = array<i64: 40, 512>}]} {
    %c0_i32 = arith.constant 0 : i32
    %0 = arith.cmpi eq, %arg2, %c0_i32 : i32
    %1 = arith.extui %0 : i1 to i32
    %c0_i32_0 = arith.constant 0 : i32
    %2 = arith.cmpi ne, %1, %c0_i32_0 : i32
    scf.if %2 {
      %cst_10 = arith.constant 0.000000e+00 : f32
      %12 = vector.broadcast %cst_10 : f32 to vector<40x512xf32>
      %c0_11 = arith.constant 0 : index
      %c0_12 = arith.constant 0 : index
      %13 = vector.load %arg8[%c0_11, %c0_12] : memref<40x512xf32, #tpu.memory_space<vmem>>, vector<40x512xf32>
      tpu.vector_store %arg8[%c0_11, %c0_12], %12 {strides = array<i32>} : memref<40x512xf32, #tpu.memory_space<vmem>>, vector<40x512xf32>,
    } else {
    }
    %c0 = arith.constant 0 : index
    %c0_1 = arith.constant 0 : index
    %3 = vector.load %arg8[%c0, %c0_1] : memref<40x512xf32, #tpu.memory_space<vmem>>, vector<40x512xf32>
    %c0_2 = arith.constant 0 : index
    %c0_3 = arith.constant 0 : index
    %4 = vector.load %arg3[%c0_2, %c0_3] : memref<40x128xbf16, #tpu.memory_space<vmem>>, vector<40x128xbf16>
    %c0_4 = arith.constant 0 : index
    %c0_5 = arith.constant 0 : index
    %5 = vector.load %arg4[%c0_4, %c0_5] : memref<128x512xbf16, #tpu.memory_space<vmem>>, vector<128x512xbf16>
    %cst = arith.constant dense<0.000000e+00> : vector<40x512xf32>
    %6 = tpu.matmul %4, %5, %cst {dimension_numbers = #tpu.dot_dimension_numbers<[1], [0], [0], [1], [0, 0, 1, 1], [], []>} : vector<40x128xbf16>, vector<128x512xbf16>, vector<40x512xf32> -> vector<40x512xf32>
    %7 = arith.addf %3, %6 : vector<40x512xf32>
    %c0_6 = arith.constant 0 : index
    %c0_7 = arith.constant 0 : index
    %8 = vector.load %arg8[%c0_6, %c0_7] : memref<40x512xf32, #tpu.memory_space<vmem>>, vector<40x512xf32>
    tpu.vector_store %arg8[%c0_6, %c0_7], %7 {strides = array<i32>} : memref<40x512xf32, #tpu.memory_space<vmem>>, vector<40x512xf32>,
    %c0_i32_8 = arith.constant 0 : i32
    %9 = arith.cmpi eq, %arg2, %c0_i32_8 : i32
    %10 = arith.extui %9 : i1 to i32
    %c0_i32_9 = arith.constant 0 : i32
    %11 = arith.cmpi ne, %10, %c0_i32_9 : i32
    scf.if %11 {
      %c0_10 = arith.constant 0 : index
      %c0_11 = arith.constant 0 : index
      %12 = vector.load %arg8[%c0_10, %c0_11] : memref<40x512xf32, #tpu.memory_space<vmem>>, vector<40x512xf32>
      %c0_12 = arith.constant 0 : index
      %c0_13 = arith.constant 0 : index
      %13 = vector.load %arg5[%c0_12, %c0_13] : memref<8x512xf32, #tpu.memory_space<vmem>>, vector<1x512xf32>
      %14 = vector.broadcast %13 : vector<1x512xf32> to vector<40x512xf32>
      %15 = arith.mulf %12, %14 : vector<40x512xf32>
      %c1 = arith.constant 1 : index
      %c0_14 = arith.constant 0 : index
      %16 = vector.load %arg5[%c1, %c0_14] : memref<8x512xf32, #tpu.memory_space<vmem>>, vector<1x512xf32>
      %17 = vector.broadcast %16 : vector<1x512xf32> to vector<40x512xf32>
      %18 = arith.addf %15, %17 : vector<40x512xf32>
      %c0_15 = arith.constant 0 : index
      %c0_16 = arith.constant 0 : index
      %19 = vector.load %arg6[%c0_15, %c0_16] : memref<40x512xf32, #tpu.memory_space<vmem>>, vector<40x512xf32>
      %20 = arith.addf %18, %19 : vector<40x512xf32>
      %cst_17 = arith.constant 0.000000e+00 : f32
      %21 = vector.broadcast %cst_17 : f32 to vector<40x512xf32>
      %22 = arith.maximumf %20, %21 : vector<40x512xf32>
      %c0_18 = arith.constant 0 : index
      %c0_19 = arith.constant 0 : index
      %23 = vector.load %arg7[%c0_18, %c0_19] : memref<40x512xf32, #tpu.memory_space<vmem>>, vector<40x512xf32>
      tpu.vector_store %arg7[%c0_18, %c0_19], %22 {strides = array<i32>} : memref<40x512xf32, #tpu.memory_space<vmem>>, vector<40x512xf32>,
    } else {
    }
    return
  }
  func.func @transform_0(%arg0: i32, %arg1: i32, %arg2: i32) -> (i32, i32) {
    %c0_i32 = arith.constant 0 : i32
    return %arg0, %arg2 : i32, i32
  }
  func.func @transform_1(%arg0: i32, %arg1: i32, %arg2: i32) -> (i32, i32) {
    %c0_i32 = arith.constant 0 : i32
    return %arg2, %arg1 : i32, i32
  }
  func.func @transform_2(%arg0: i32, %arg1: i32, %arg2: i32) -> (i32, i32) {
    %c0_i32 = arith.constant 0 : i32
    %c0_i32_0 = arith.constant 0 : i32
    return %c0_i32, %arg1 : i32, i32
  }
  func.func @transform_3(%arg0: i32, %arg1: i32, %arg2: i32) -> (i32, i32) {
    %c0_i32 = arith.constant 0 : i32
    return %arg0, %arg1 : i32, i32
  }
  func.func @transform_4(%arg0: i32, %arg1: i32, %arg2: i32) -> (i32, i32) {
    %c0_i32 = arith.constant 0 : i32
    return %arg0, %arg1 : i32, i32
  }
}

module attributes {stable_mosaic.version = 11 : i64} {
  func.func @_mm_kernel(%arg0: i32, %arg1: i32, %arg2: i32, %arg3: memref<40x512xbf16, #tpu.memory_space<vmem>>, %arg4: memref<512x128xbf16, #tpu.memory_space<vmem>>, %arg5: memref<8x128xf32, #tpu.memory_space<vmem>>, %arg6: memref<40x128xf32, #tpu.memory_space<vmem>>, %arg7: memref<40x128xf32, #tpu.memory_space<vmem>>) attributes {dimension_semantics = [#tpu.dimension_semantics<parallel>, #tpu.dimension_semantics<parallel>, #tpu.dimension_semantics<arbitrary>], iteration_bounds = array<i64: 1, 1, 1>, scalar_prefetch = 0 : i64, scratch_operands = 1 : i64, tpu.core_type = #tpu.core_type<tc>, window_params = [{transform_indices = @transform_0, window_bounds = array<i64: 40, 512>}, {transform_indices = @transform_1, window_bounds = array<i64: 512, 128>}, {transform_indices = @transform_2, window_bounds = array<i64: 8, 128>}, {transform_indices = @transform_3, window_bounds = array<i64: 40, 128>}]} {
    %c0_i32 = arith.constant 0 : i32
    %0 = arith.cmpi eq, %arg2, %c0_i32 : i32
    %1 = arith.extui %0 : i1 to i32
    %c0_i32_0 = arith.constant 0 : i32
    %2 = arith.cmpi ne, %1, %c0_i32_0 : i32
    scf.if %2 {
      %cst_10 = arith.constant 0.000000e+00 : f32
      %12 = vector.broadcast %cst_10 : f32 to vector<40x128xf32>
      %c0_11 = arith.constant 0 : index
      %c0_12 = arith.constant 0 : index
      %13 = vector.load %arg7[%c0_11, %c0_12] : memref<40x128xf32, #tpu.memory_space<vmem>>, vector<40x128xf32>
      tpu.vector_store %arg7[%c0_11, %c0_12], %12 {strides = array<i32>} : memref<40x128xf32, #tpu.memory_space<vmem>>, vector<40x128xf32>,
    } else {
    }
    %c0 = arith.constant 0 : index
    %c0_1 = arith.constant 0 : index
    %3 = vector.load %arg7[%c0, %c0_1] : memref<40x128xf32, #tpu.memory_space<vmem>>, vector<40x128xf32>
    %c0_2 = arith.constant 0 : index
    %c0_3 = arith.constant 0 : index
    %4 = vector.load %arg3[%c0_2, %c0_3] : memref<40x512xbf16, #tpu.memory_space<vmem>>, vector<40x512xbf16>
    %c0_4 = arith.constant 0 : index
    %c0_5 = arith.constant 0 : index
    %5 = vector.load %arg4[%c0_4, %c0_5] : memref<512x128xbf16, #tpu.memory_space<vmem>>, vector<512x128xbf16>
    %cst = arith.constant dense<0.000000e+00> : vector<40x128xf32>
    %6 = tpu.matmul %4, %5, %cst {dimension_numbers = #tpu.dot_dimension_numbers<[1], [0], [0], [1], [0, 0, 1, 1], [], []>} : vector<40x512xbf16>, vector<512x128xbf16>, vector<40x128xf32> -> vector<40x128xf32>
    %7 = arith.addf %3, %6 : vector<40x128xf32>
    %c0_6 = arith.constant 0 : index
    %c0_7 = arith.constant 0 : index
    %8 = vector.load %arg7[%c0_6, %c0_7] : memref<40x128xf32, #tpu.memory_space<vmem>>, vector<40x128xf32>
    tpu.vector_store %arg7[%c0_6, %c0_7], %7 {strides = array<i32>} : memref<40x128xf32, #tpu.memory_space<vmem>>, vector<40x128xf32>,
    %c0_i32_8 = arith.constant 0 : i32
    %9 = arith.cmpi eq, %arg2, %c0_i32_8 : i32
    %10 = arith.extui %9 : i1 to i32
    %c0_i32_9 = arith.constant 0 : i32
    %11 = arith.cmpi ne, %10, %c0_i32_9 : i32
    scf.if %11 {
      %c0_10 = arith.constant 0 : index
      %c0_11 = arith.constant 0 : index
      %12 = vector.load %arg7[%c0_10, %c0_11] : memref<40x128xf32, #tpu.memory_space<vmem>>, vector<40x128xf32>
      %c0_12 = arith.constant 0 : index
      %c0_13 = arith.constant 0 : index
      %13 = vector.load %arg5[%c0_12, %c0_13] : memref<8x128xf32, #tpu.memory_space<vmem>>, vector<1x128xf32>
      %14 = vector.broadcast %13 : vector<1x128xf32> to vector<40x128xf32>
      %15 = arith.mulf %12, %14 : vector<40x128xf32>
      %c1 = arith.constant 1 : index
      %c0_14 = arith.constant 0 : index
      %16 = vector.load %arg5[%c1, %c0_14] : memref<8x128xf32, #tpu.memory_space<vmem>>, vector<1x128xf32>
      %17 = vector.broadcast %16 : vector<1x128xf32> to vector<40x128xf32>
      %18 = arith.addf %15, %17 : vector<40x128xf32>
      %cst_15 = arith.constant 0.000000e+00 : f32
      %19 = vector.broadcast %cst_15 : f32 to vector<40x128xf32>
      %20 = arith.maximumf %18, %19 : vector<40x128xf32>
      %c0_16 = arith.constant 0 : index
      %c0_17 = arith.constant 0 : index
      %21 = vector.load %arg6[%c0_16, %c0_17] : memref<40x128xf32, #tpu.memory_space<vmem>>, vector<40x128xf32>
      tpu.vector_store %arg6[%c0_16, %c0_17], %20 {strides = array<i32>} : memref<40x128xf32, #tpu.memory_space<vmem>>, vector<40x128xf32>,
    } else {
    }
    return
  }
  func.func @transform_0(%arg0: i32, %arg1: i32, %arg2: i32) -> (i32, i32) {
    %c0_i32 = arith.constant 0 : i32
    return %arg0, %arg2 : i32, i32
  }
  func.func @transform_1(%arg0: i32, %arg1: i32, %arg2: i32) -> (i32, i32) {
    %c0_i32 = arith.constant 0 : i32
    return %arg2, %arg1 : i32, i32
  }
  func.func @transform_2(%arg0: i32, %arg1: i32, %arg2: i32) -> (i32, i32) {
    %c0_i32 = arith.constant 0 : i32
    %c0_i32_0 = arith.constant 0 : i32
    return %c0_i32, %arg1 : i32, i32
  }
  func.func @transform_3(%arg0: i32, %arg1: i32, %arg2: i32) -> (i32, i32) {
    %c0_i32 = arith.constant 0 : i32
    return %arg0, %arg1 : i32, i32
  }
}

module attributes {stable_mosaic.version = 11 : i64} {
  func.func @_mm_kernel(%arg0: i32, %arg1: i32, %arg2: i32, %arg3: memref<40x512xbf16, #tpu.memory_space<vmem>>, %arg4: memref<512x128xbf16, #tpu.memory_space<vmem>>, %arg5: memref<8x128xf32, #tpu.memory_space<vmem>>, %arg6: memref<40x128xf32, #tpu.memory_space<vmem>>, %arg7: memref<40x128xf32, #tpu.memory_space<vmem>>) attributes {dimension_semantics = [#tpu.dimension_semantics<parallel>, #tpu.dimension_semantics<parallel>, #tpu.dimension_semantics<arbitrary>], iteration_bounds = array<i64: 1, 1, 1>, scalar_prefetch = 0 : i64, scratch_operands = 1 : i64, tpu.core_type = #tpu.core_type<tc>, window_params = [{transform_indices = @transform_0, window_bounds = array<i64: 40, 512>}, {transform_indices = @transform_1, window_bounds = array<i64: 512, 128>}, {transform_indices = @transform_2, window_bounds = array<i64: 8, 128>}, {transform_indices = @transform_3, window_bounds = array<i64: 40, 128>}]} {
    %c0_i32 = arith.constant 0 : i32
    %0 = arith.cmpi eq, %arg2, %c0_i32 : i32
    %1 = arith.extui %0 : i1 to i32
    %c0_i32_0 = arith.constant 0 : i32
    %2 = arith.cmpi ne, %1, %c0_i32_0 : i32
    scf.if %2 {
      %cst_10 = arith.constant 0.000000e+00 : f32
      %12 = vector.broadcast %cst_10 : f32 to vector<40x128xf32>
      %c0_11 = arith.constant 0 : index
      %c0_12 = arith.constant 0 : index
      %13 = vector.load %arg7[%c0_11, %c0_12] : memref<40x128xf32, #tpu.memory_space<vmem>>, vector<40x128xf32>
      tpu.vector_store %arg7[%c0_11, %c0_12], %12 {strides = array<i32>} : memref<40x128xf32, #tpu.memory_space<vmem>>, vector<40x128xf32>,
    } else {
    }
    %c0 = arith.constant 0 : index
    %c0_1 = arith.constant 0 : index
    %3 = vector.load %arg7[%c0, %c0_1] : memref<40x128xf32, #tpu.memory_space<vmem>>, vector<40x128xf32>
    %c0_2 = arith.constant 0 : index
    %c0_3 = arith.constant 0 : index
    %4 = vector.load %arg3[%c0_2, %c0_3] : memref<40x512xbf16, #tpu.memory_space<vmem>>, vector<40x512xbf16>
    %c0_4 = arith.constant 0 : index
    %c0_5 = arith.constant 0 : index
    %5 = vector.load %arg4[%c0_4, %c0_5] : memref<512x128xbf16, #tpu.memory_space<vmem>>, vector<512x128xbf16>
    %cst = arith.constant dense<0.000000e+00> : vector<40x128xf32>
    %6 = tpu.matmul %4, %5, %cst {dimension_numbers = #tpu.dot_dimension_numbers<[1], [0], [0], [1], [0, 0, 1, 1], [], []>} : vector<40x512xbf16>, vector<512x128xbf16>, vector<40x128xf32> -> vector<40x128xf32>
    %7 = arith.addf %3, %6 : vector<40x128xf32>
    %c0_6 = arith.constant 0 : index
    %c0_7 = arith.constant 0 : index
    %8 = vector.load %arg7[%c0_6, %c0_7] : memref<40x128xf32, #tpu.memory_space<vmem>>, vector<40x128xf32>
    tpu.vector_store %arg7[%c0_6, %c0_7], %7 {strides = array<i32>} : memref<40x128xf32, #tpu.memory_space<vmem>>, vector<40x128xf32>,
    %c0_i32_8 = arith.constant 0 : i32
    %9 = arith.cmpi eq, %arg2, %c0_i32_8 : i32
    %10 = arith.extui %9 : i1 to i32
    %c0_i32_9 = arith.constant 0 : i32
    %11 = arith.cmpi ne, %10, %c0_i32_9 : i32
    scf.if %11 {
      %c0_10 = arith.constant 0 : index
      %c0_11 = arith.constant 0 : index
      %12 = vector.load %arg7[%c0_10, %c0_11] : memref<40x128xf32, #tpu.memory_space<vmem>>, vector<40x128xf32>
      %c0_12 = arith.constant 0 : index
      %c0_13 = arith.constant 0 : index
      %13 = vector.load %arg5[%c0_12, %c0_13] : memref<8x128xf32, #tpu.memory_space<vmem>>, vector<1x128xf32>
      %14 = vector.broadcast %13 : vector<1x128xf32> to vector<40x128xf32>
      %15 = arith.mulf %12, %14 : vector<40x128xf32>
      %c1 = arith.constant 1 : index
      %c0_14 = arith.constant 0 : index
      %16 = vector.load %arg5[%c1, %c0_14] : memref<8x128xf32, #tpu.memory_space<vmem>>, vector<1x128xf32>
      %17 = vector.broadcast %16 : vector<1x128xf32> to vector<40x128xf32>
      %18 = arith.addf %15, %17 : vector<40x128xf32>
      %c0_15 = arith.constant 0 : index
      %c0_16 = arith.constant 0 : index
      %19 = vector.load %arg6[%c0_15, %c0_16] : memref<40x128xf32, #tpu.memory_space<vmem>>, vector<40x128xf32>
      tpu.vector_store %arg6[%c0_15, %c0_16], %18 {strides = array<i32>} : memref<40x128xf32, #tpu.memory_space<vmem>>, vector<40x128xf32>,
    } else {
    }
    return
  }
  func.func @transform_0(%arg0: i32, %arg1: i32, %arg2: i32) -> (i32, i32) {
    %c0_i32 = arith.constant 0 : i32
    return %arg0, %arg2 : i32, i32
  }
  func.func @transform_1(%arg0: i32, %arg1: i32, %arg2: i32) -> (i32, i32) {
    %c0_i32 = arith.constant 0 : i32
    return %arg2, %arg1 : i32, i32
  }
  func.func @transform_2(%arg0: i32, %arg1: i32, %arg2: i32) -> (i32, i32) {
    %c0_i32 = arith.constant 0 : i32
    %c0_i32_0 = arith.constant 0 : i32
    return %c0_i32, %arg1 : i32, i32
  }
  func.func @transform_3(%arg0: i32, %arg1: i32, %arg2: i32) -> (i32, i32) {
    %c0_i32 = arith.constant 0 : i32
    return %arg0, %arg1 : i32, i32
  }
}

module attributes {stable_mosaic.version = 11 : i64} {
  func.func @_mm_kernel(%arg0: i32, %arg1: i32, %arg2: i32, %arg3: memref<16x512xbf16, #tpu.memory_space<vmem>>, %arg4: memref<512x128xbf16, #tpu.memory_space<vmem>>, %arg5: memref<8x128xf32, #tpu.memory_space<vmem>>, %arg6: memref<16x128xf32, #tpu.memory_space<vmem>>, %arg7: memref<16x128xf32, #tpu.memory_space<vmem>>) attributes {dimension_semantics = [#tpu.dimension_semantics<parallel>, #tpu.dimension_semantics<parallel>, #tpu.dimension_semantics<arbitrary>], iteration_bounds = array<i64: 1, 1, 1>, scalar_prefetch = 0 : i64, scratch_operands = 1 : i64, tpu.core_type = #tpu.core_type<tc>, window_params = [{transform_indices = @transform_0, window_bounds = array<i64: 16, 512>}, {transform_indices = @transform_1, window_bounds = array<i64: 512, 128>}, {transform_indices = @transform_2, window_bounds = array<i64: 8, 128>}, {transform_indices = @transform_3, window_bounds = array<i64: 16, 128>}]} {
    %c0_i32 = arith.constant 0 : i32
    %0 = arith.cmpi eq, %arg2, %c0_i32 : i32
    %1 = arith.extui %0 : i1 to i32
    %c0_i32_0 = arith.constant 0 : i32
    %2 = arith.cmpi ne, %1, %c0_i32_0 : i32
    scf.if %2 {
      %cst_10 = arith.constant 0.000000e+00 : f32
      %12 = vector.broadcast %cst_10 : f32 to vector<16x128xf32>
      %c0_11 = arith.constant 0 : index
      %c0_12 = arith.constant 0 : index
      %13 = vector.load %arg7[%c0_11, %c0_12] : memref<16x128xf32, #tpu.memory_space<vmem>>, vector<16x128xf32>
      tpu.vector_store %arg7[%c0_11, %c0_12], %12 {strides = array<i32>} : memref<16x128xf32, #tpu.memory_space<vmem>>, vector<16x128xf32>,
    } else {
    }
    %c0 = arith.constant 0 : index
    %c0_1 = arith.constant 0 : index
    %3 = vector.load %arg7[%c0, %c0_1] : memref<16x128xf32, #tpu.memory_space<vmem>>, vector<16x128xf32>
    %c0_2 = arith.constant 0 : index
    %c0_3 = arith.constant 0 : index
    %4 = vector.load %arg3[%c0_2, %c0_3] : memref<16x512xbf16, #tpu.memory_space<vmem>>, vector<16x512xbf16>
    %c0_4 = arith.constant 0 : index
    %c0_5 = arith.constant 0 : index
    %5 = vector.load %arg4[%c0_4, %c0_5] : memref<512x128xbf16, #tpu.memory_space<vmem>>, vector<512x128xbf16>
    %cst = arith.constant dense<0.000000e+00> : vector<16x128xf32>
    %6 = tpu.matmul %4, %5, %cst {dimension_numbers = #tpu.dot_dimension_numbers<[1], [0], [0], [1], [0, 0, 1, 1], [], []>} : vector<16x512xbf16>, vector<512x128xbf16>, vector<16x128xf32> -> vector<16x128xf32>
    %7 = arith.addf %3, %6 : vector<16x128xf32>
    %c0_6 = arith.constant 0 : index
    %c0_7 = arith.constant 0 : index
    %8 = vector.load %arg7[%c0_6, %c0_7] : memref<16x128xf32, #tpu.memory_space<vmem>>, vector<16x128xf32>
    tpu.vector_store %arg7[%c0_6, %c0_7], %7 {strides = array<i32>} : memref<16x128xf32, #tpu.memory_space<vmem>>, vector<16x128xf32>,
    %c0_i32_8 = arith.constant 0 : i32
    %9 = arith.cmpi eq, %arg2, %c0_i32_8 : i32
    %10 = arith.extui %9 : i1 to i32
    %c0_i32_9 = arith.constant 0 : i32
    %11 = arith.cmpi ne, %10, %c0_i32_9 : i32
    scf.if %11 {
      %c0_10 = arith.constant 0 : index
      %c0_11 = arith.constant 0 : index
      %12 = vector.load %arg7[%c0_10, %c0_11] : memref<16x128xf32, #tpu.memory_space<vmem>>, vector<16x128xf32>
      %c0_12 = arith.constant 0 : index
      %c0_13 = arith.constant 0 : index
      %13 = vector.load %arg5[%c0_12, %c0_13] : memref<8x128xf32, #tpu.memory_space<vmem>>, vector<1x128xf32>
      %14 = vector.broadcast %13 : vector<1x128xf32> to vector<16x128xf32>
      %15 = arith.mulf %12, %14 : vector<16x128xf32>
      %c1 = arith.constant 1 : index
      %c0_14 = arith.constant 0 : index
      %16 = vector.load %arg5[%c1, %c0_14] : memref<8x128xf32, #tpu.memory_space<vmem>>, vector<1x128xf32>
      %17 = vector.broadcast %16 : vector<1x128xf32> to vector<16x128xf32>
      %18 = arith.addf %15, %17 : vector<16x128xf32>
      %c0_15 = arith.constant 0 : index
      %c0_16 = arith.constant 0 : index
      %19 = vector.load %arg6[%c0_15, %c0_16] : memref<16x128xf32, #tpu.memory_space<vmem>>, vector<16x128xf32>
      tpu.vector_store %arg6[%c0_15, %c0_16], %18 {strides = array<i32>} : memref<16x128xf32, #tpu.memory_space<vmem>>, vector<16x128xf32>,
    } else {
    }
    return
  }
  func.func @transform_0(%arg0: i32, %arg1: i32, %arg2: i32) -> (i32, i32) {
    %c0_i32 = arith.constant 0 : i32
    return %arg0, %arg2 : i32, i32
  }
  func.func @transform_1(%arg0: i32, %arg1: i32, %arg2: i32) -> (i32, i32) {
    %c0_i32 = arith.constant 0 : i32
    return %arg2, %arg1 : i32, i32
  }
  func.func @transform_2(%arg0: i32, %arg1: i32, %arg2: i32) -> (i32, i32) {
    %c0_i32 = arith.constant 0 : i32
    %c0_i32_0 = arith.constant 0 : i32
    return %c0_i32, %arg1 : i32, i32
  }
  func.func @transform_3(%arg0: i32, %arg1: i32, %arg2: i32) -> (i32, i32) {
    %c0_i32 = arith.constant 0 : i32
    return %arg0, %arg1 : i32, i32
  }
}

module attributes {stable_mosaic.version = 11 : i64} {
  func.func @_mm_kernel(%arg0: i32, %arg1: i32, %arg2: i32, %arg3: memref<8x512xbf16, #tpu.memory_space<vmem>>, %arg4: memref<512x128xbf16, #tpu.memory_space<vmem>>, %arg5: memref<8x128xf32, #tpu.memory_space<vmem>>, %arg6: memref<8x128xf32, #tpu.memory_space<vmem>>, %arg7: memref<8x128xf32, #tpu.memory_space<vmem>>) attributes {dimension_semantics = [#tpu.dimension_semantics<parallel>, #tpu.dimension_semantics<parallel>, #tpu.dimension_semantics<arbitrary>], iteration_bounds = array<i64: 1, 1, 1>, scalar_prefetch = 0 : i64, scratch_operands = 1 : i64, tpu.core_type = #tpu.core_type<tc>, window_params = [{transform_indices = @transform_0, window_bounds = array<i64: 8, 512>}, {transform_indices = @transform_1, window_bounds = array<i64: 512, 128>}, {transform_indices = @transform_2, window_bounds = array<i64: 8, 128>}, {transform_indices = @transform_3, window_bounds = array<i64: 8, 128>}]} {
    %c0_i32 = arith.constant 0 : i32
    %0 = arith.cmpi eq, %arg2, %c0_i32 : i32
    %1 = arith.extui %0 : i1 to i32
    %c0_i32_0 = arith.constant 0 : i32
    %2 = arith.cmpi ne, %1, %c0_i32_0 : i32
    scf.if %2 {
      %cst_10 = arith.constant 0.000000e+00 : f32
      %12 = vector.broadcast %cst_10 : f32 to vector<8x128xf32>
      %c0_11 = arith.constant 0 : index
      %c0_12 = arith.constant 0 : index
      %13 = vector.load %arg7[%c0_11, %c0_12] : memref<8x128xf32, #tpu.memory_space<vmem>>, vector<8x128xf32>
      tpu.vector_store %arg7[%c0_11, %c0_12], %12 {strides = array<i32>} : memref<8x128xf32, #tpu.memory_space<vmem>>, vector<8x128xf32>,
    } else {
    }
    %c0 = arith.constant 0 : index
    %c0_1 = arith.constant 0 : index
    %3 = vector.load %arg7[%c0, %c0_1] : memref<8x128xf32, #tpu.memory_space<vmem>>, vector<8x128xf32>
    %c0_2 = arith.constant 0 : index
    %c0_3 = arith.constant 0 : index
    %4 = vector.load %arg3[%c0_2, %c0_3] : memref<8x512xbf16, #tpu.memory_space<vmem>>, vector<8x512xbf16>
    %c0_4 = arith.constant 0 : index
    %c0_5 = arith.constant 0 : index
    %5 = vector.load %arg4[%c0_4, %c0_5] : memref<512x128xbf16, #tpu.memory_space<vmem>>, vector<512x128xbf16>
    %cst = arith.constant dense<0.000000e+00> : vector<8x128xf32>
    %6 = tpu.matmul %4, %5, %cst {dimension_numbers = #tpu.dot_dimension_numbers<[1], [0], [0], [1], [0, 0, 1, 1], [], []>} : vector<8x512xbf16>, vector<512x128xbf16>, vector<8x128xf32> -> vector<8x128xf32>
    %7 = arith.addf %3, %6 : vector<8x128xf32>
    %c0_6 = arith.constant 0 : index
    %c0_7 = arith.constant 0 : index
    %8 = vector.load %arg7[%c0_6, %c0_7] : memref<8x128xf32, #tpu.memory_space<vmem>>, vector<8x128xf32>
    tpu.vector_store %arg7[%c0_6, %c0_7], %7 {strides = array<i32>} : memref<8x128xf32, #tpu.memory_space<vmem>>, vector<8x128xf32>,
    %c0_i32_8 = arith.constant 0 : i32
    %9 = arith.cmpi eq, %arg2, %c0_i32_8 : i32
    %10 = arith.extui %9 : i1 to i32
    %c0_i32_9 = arith.constant 0 : i32
    %11 = arith.cmpi ne, %10, %c0_i32_9 : i32
    scf.if %11 {
      %c0_10 = arith.constant 0 : index
      %c0_11 = arith.constant 0 : index
      %12 = vector.load %arg7[%c0_10, %c0_11] : memref<8x128xf32, #tpu.memory_space<vmem>>, vector<8x128xf32>
      %c0_12 = arith.constant 0 : index
      %c0_13 = arith.constant 0 : index
      %13 = vector.load %arg5[%c0_12, %c0_13] : memref<8x128xf32, #tpu.memory_space<vmem>>, vector<1x128xf32>
      %14 = vector.broadcast %13 : vector<1x128xf32> to vector<8x128xf32>
      %15 = arith.mulf %12, %14 : vector<8x128xf32>
      %c1 = arith.constant 1 : index
      %c0_14 = arith.constant 0 : index
      %16 = vector.load %arg5[%c1, %c0_14] : memref<8x128xf32, #tpu.memory_space<vmem>>, vector<1x128xf32>
      %17 = vector.broadcast %16 : vector<1x128xf32> to vector<8x128xf32>
      %18 = arith.addf %15, %17 : vector<8x128xf32>
      %c0_15 = arith.constant 0 : index
      %c0_16 = arith.constant 0 : index
      %19 = vector.load %arg6[%c0_15, %c0_16] : memref<8x128xf32, #tpu.memory_space<vmem>>, vector<8x128xf32>
      tpu.vector_store %arg6[%c0_15, %c0_16], %18 {strides = array<i32>} : memref<8x128xf32, #tpu.memory_space<vmem>>, vector<8x128xf32>,
    } else {
    }
    return
  }
  func.func @transform_0(%arg0: i32, %arg1: i32, %arg2: i32) -> (i32, i32) {
    %c0_i32 = arith.constant 0 : i32
    return %arg0, %arg2 : i32, i32
  }
  func.func @transform_1(%arg0: i32, %arg1: i32, %arg2: i32) -> (i32, i32) {
    %c0_i32 = arith.constant 0 : i32
    return %arg2, %arg1 : i32, i32
  }
  func.func @transform_2(%arg0: i32, %arg1: i32, %arg2: i32) -> (i32, i32) {
    %c0_i32 = arith.constant 0 : i32
    %c0_i32_0 = arith.constant 0 : i32
    return %c0_i32, %arg1 : i32, i32
  }
  func.func @transform_3(%arg0: i32, %arg1: i32, %arg2: i32) -> (i32, i32) {
    %c0_i32 = arith.constant 0 : i32
    return %arg0, %arg1 : i32, i32
  }
}

module attributes {stable_mosaic.version = 11 : i64} {
  func.func @_mm_kernel(%arg0: i32, %arg1: i32, %arg2: i32, %arg3: memref<40x512xbf16, #tpu.memory_space<vmem>>, %arg4: memref<512x128xbf16, #tpu.memory_space<vmem>>, %arg5: memref<8x128xf32, #tpu.memory_space<vmem>>, %arg6: memref<40x128xf32, #tpu.memory_space<vmem>>, %arg7: memref<40x128xf32, #tpu.memory_space<vmem>>) attributes {dimension_semantics = [#tpu.dimension_semantics<parallel>, #tpu.dimension_semantics<parallel>, #tpu.dimension_semantics<arbitrary>], iteration_bounds = array<i64: 1, 1, 18>, scalar_prefetch = 0 : i64, scratch_operands = 1 : i64, tpu.core_type = #tpu.core_type<tc>, window_params = [{transform_indices = @transform_0, window_bounds = array<i64: 40, 512>}, {transform_indices = @transform_1, window_bounds = array<i64: 512, 128>}, {transform_indices = @transform_2, window_bounds = array<i64: 8, 128>}, {transform_indices = @transform_3, window_bounds = array<i64: 40, 128>}]} {
    %c0_i32 = arith.constant 0 : i32
    %0 = arith.cmpi eq, %arg2, %c0_i32 : i32
    %1 = arith.extui %0 : i1 to i32
    %c0_i32_0 = arith.constant 0 : i32
    %2 = arith.cmpi ne, %1, %c0_i32_0 : i32
    scf.if %2 {
      %cst_9 = arith.constant 0.000000e+00 : f32
      %12 = vector.broadcast %cst_9 : f32 to vector<40x128xf32>
      %c0_10 = arith.constant 0 : index
      %c0_11 = arith.constant 0 : index
      %13 = vector.load %arg7[%c0_10, %c0_11] : memref<40x128xf32, #tpu.memory_space<vmem>>, vector<40x128xf32>
      tpu.vector_store %arg7[%c0_10, %c0_11], %12 {strides = array<i32>} : memref<40x128xf32, #tpu.memory_space<vmem>>, vector<40x128xf32>,
    } else {
    }
    %c0 = arith.constant 0 : index
    %c0_1 = arith.constant 0 : index
    %3 = vector.load %arg7[%c0, %c0_1] : memref<40x128xf32, #tpu.memory_space<vmem>>, vector<40x128xf32>
    %c0_2 = arith.constant 0 : index
    %c0_3 = arith.constant 0 : index
    %4 = vector.load %arg3[%c0_2, %c0_3] : memref<40x512xbf16, #tpu.memory_space<vmem>>, vector<40x512xbf16>
    %c0_4 = arith.constant 0 : index
    %c0_5 = arith.constant 0 : index
    %5 = vector.load %arg4[%c0_4, %c0_5] : memref<512x128xbf16, #tpu.memory_space<vmem>>, vector<512x128xbf16>
    %cst = arith.constant dense<0.000000e+00> : vector<40x128xf32>
    %6 = tpu.matmul %4, %5, %cst {dimension_numbers = #tpu.dot_dimension_numbers<[1], [0], [0], [1], [0, 0, 1, 1], [], []>} : vector<40x512xbf16>, vector<512x128xbf16>, vector<40x128xf32> -> vector<40x128xf32>
    %7 = arith.addf %3, %6 : vector<40x128xf32>
    %c0_6 = arith.constant 0 : index
    %c0_7 = arith.constant 0 : index
    %8 = vector.load %arg7[%c0_6, %c0_7] : memref<40x128xf32, #tpu.memory_space<vmem>>, vector<40x128xf32>
    tpu.vector_store %arg7[%c0_6, %c0_7], %7 {strides = array<i32>} : memref<40x128xf32, #tpu.memory_space<vmem>>, vector<40x128xf32>,
    %c17_i32 = arith.constant 17 : i32
    %9 = arith.cmpi eq, %arg2, %c17_i32 : i32
    %10 = arith.extui %9 : i1 to i32
    %c0_i32_8 = arith.constant 0 : i32
    %11 = arith.cmpi ne, %10, %c0_i32_8 : i32
    scf.if %11 {
      %c0_9 = arith.constant 0 : index
      %c0_10 = arith.constant 0 : index
      %12 = vector.load %arg7[%c0_9, %c0_10] : memref<40x128xf32, #tpu.memory_space<vmem>>, vector<40x128xf32>
      %c0_11 = arith.constant 0 : index
      %c0_12 = arith.constant 0 : index
      %13 = vector.load %arg5[%c0_11, %c0_12] : memref<8x128xf32, #tpu.memory_space<vmem>>, vector<1x128xf32>
      %14 = vector.broadcast %13 : vector<1x128xf32> to vector<40x128xf32>
      %15 = arith.mulf %12, %14 : vector<40x128xf32>
      %c1 = arith.constant 1 : index
      %c0_13 = arith.constant 0 : index
      %16 = vector.load %arg5[%c1, %c0_13] : memref<8x128xf32, #tpu.memory_space<vmem>>, vector<1x128xf32>
      %17 = vector.broadcast %16 : vector<1x128xf32> to vector<40x128xf32>
      %18 = arith.addf %15, %17 : vector<40x128xf32>
      %cst_14 = arith.constant 0.000000e+00 : f32
      %19 = vector.broadcast %cst_14 : f32 to vector<40x128xf32>
      %20 = arith.maximumf %18, %19 : vector<40x128xf32>
      %c0_15 = arith.constant 0 : index
      %c0_16 = arith.constant 0 : index
      %21 = vector.load %arg6[%c0_15, %c0_16] : memref<40x128xf32, #tpu.memory_space<vmem>>, vector<40x128xf32>
      tpu.vector_store %arg6[%c0_15, %c0_16], %20 {strides = array<i32>} : memref<40x128xf32, #tpu.memory_space<vmem>>, vector<40x128xf32>,
    } else {
    }
    return
  }
  func.func @transform_0(%arg0: i32, %arg1: i32, %arg2: i32) -> (i32, i32) {
    %c0_i32 = arith.constant 0 : i32
    return %arg0, %arg2 : i32, i32
  }
  func.func @transform_1(%arg0: i32, %arg1: i32, %arg2: i32) -> (i32, i32) {
    %c0_i32 = arith.constant 0 : i32
    return %arg2, %arg1 : i32, i32
  }
  func.func @transform_2(%arg0: i32, %arg1: i32, %arg2: i32) -> (i32, i32) {
    %c0_i32 = arith.constant 0 : i32
    %c0_i32_0 = arith.constant 0 : i32
    return %c0_i32, %arg1 : i32, i32
  }
  func.func @transform_3(%arg0: i32, %arg1: i32, %arg2: i32) -> (i32, i32) {
    %c0_i32 = arith.constant 0 : i32
    return %arg0, %arg1 : i32, i32
  }
}

</mosaic_0001>

<bundles_post_ra>
// kernel: pspnet_forward.37
= control target key start
LH: loop header
LB: loop body
LE: loop exit
PB: predicated region body
PF: predicated region fallthrough
CT: control target
= control target key end

     0   :  { %s1701_s1 = inlined_call_operand.vmem [shape: bf16[128,128], index: 1, kind: input, shape index: {}]   ;;  %s1702_s0 = inlined_call_operand.vmem [shape: bf16[448,128], index: 0, kind: input, shape index: {}]   ;;  %s1703_s2 = inlined_call_operand.vmem [shape: f32[8,128], index: 2, kind: input, shape index: {}]   ;;  %s1704_s3 = inlined_call_operand.vmem [shape: f32[448,128], index: 3, kind: output, shape index: {}]  }
   0x1   :  { %v1247_v0 = vld [vmem:[%s1701_s1] sm:$0xff]   ;;  %v1248_v1 = vld [vmem:[%s1701_s1 + $0x8] sm:$0xff]   ;;  %v1249_v2 = vld [vmem:[%s1701_s1 + $0x10] sm:$0xff]  }
   0x2   :  { %1159 = vmatprep.subr.bf16.mxu0 %v1247_v0  ;;  %1231 = vmatprep.subr.bf16.mxu1 %v1247_v0  ;;  %v1250_v3 = vld [vmem:[%s1701_s1 + $0x18] sm:$0xff]   ;;  %v1255_v4 = vld [vmem:[%s1702_s0] sm:$0xff]   ;;  %v1256_v5 = vld [vmem:[%s1702_s0 + $0x70] sm:$0xff]  }
   0x3   :  { %1160 = vmatpush3.bf16.msra.mxu0 %v1247_v0  ;;  %1239 = vmatpush3.bf16.msra.mxu1 %v1247_v0  ;;  %v1251_v6 = vld [vmem:[%s1701_s1 + $0x20] sm:$0xff]   ;;  %v1252_v7 = vld [vmem:[%s1701_s1 + $0x28] sm:$0xff]   ;;  %v1253_v8 = vld [vmem:[%s1701_s1 + $0x30] sm:$0xff]  }
   0x4   :  { %1161 = vmatprep.subr.bf16.mxu0 %v1248_v1  ;;  %1232 = vmatprep.subr.bf16.mxu1 %v1248_v1  ;;  %v1254_v9 = vld [vmem:[%s1701_s1 + $0x38] sm:$0xff]   ;;  %v1257_v10 = vld [vmem:[%s1702_s0 + $0x8] sm:$0xff]   ;;  %v1259_v12 = vld [vmem:[%s1702_s0 + $0x10] sm:$0xff]  }
   0x5   :  { %1175 = vmatprep.mubr.bf16.mxu0 %v1255_v4  ;;  %1203 = vmatprep.mubr.bf16.mxu1 %v1256_v5  ;;  %v1258_v11 = vld [vmem:[%s1702_s0 + $0x78] sm:$0xff]   ;;  %v1260_v13 = vld [vmem:[%s1702_s0 + $0x80] sm:$0xff]   ;;  %v1262_v15 = vld [vmem:[%s1702_s0 + $0x88] sm:$0xff]  }
   0x6   :  { %v1261_v14 = vld [vmem:[%s1702_s0 + $0x18] sm:$0xff]   ;;  %v1263_v16 = vld [vmem:[%s1702_s0 + $0x20] sm:$0xff]   ;;  %v1264_v17 = vld [vmem:[%s1702_s0 + $0x90] sm:$0xff]  }
   0x7   :  { %1162 = vmatpush3.bf16.msra.mxu0 %v1248_v1  ;;  %1240 = vmatpush3.bf16.msra.mxu1 %v1248_v1  ;;  %v1265_v18 = vld [vmem:[%s1702_s0 + $0x28] sm:$0xff]   ;;  %v1266_v19 = vld [vmem:[%s1702_s0 + $0x98] sm:$0xff]   ;;  %v1267_v20 = vld [vmem:[%s1702_s0 + $0x30] sm:$0xff]  }
   0x8   :  { %1163 = vmatprep.subr.bf16.mxu0 %v1249_v2  ;;  %1233 = vmatprep.subr.bf16.mxu1 %v1249_v2  ;;  %v1268_v21 = vld [vmem:[%s1702_s0 + $0xa0] sm:$0xff]   ;;  %v1269_v22 = vld [vmem:[%s1702_s0 + $0x38] sm:$0xff]   ;;  %v1270_v23 = vld [vmem:[%s1702_s0 + $0xa8] sm:$0xff]  }
   0x9   :  { %v1271_v24 = vld [vmem:[%s1702_s0 + $0x40] sm:$0xff]   ;;  %v1272_v25 = vld [vmem:[%s1702_s0 + $0xb0] sm:$0xff]   ;;  %v1273_v26 = vld [vmem:[%s1702_s0 + $0x48] sm:$0xff]  }
   0xa   :  { %v1274_v27 = vld [vmem:[%s1702_s0 + $0xb8] sm:$0xff]   ;;  %v1275_v28 = vld [vmem:[%s1702_s0 + $0x50] sm:$0xff]   ;;  %v1276_v29 = vld [vmem:[%s1702_s0 + $0xc0] sm:$0xff]  }
   0xb   :  { %1164 = vmatpush3.bf16.msra.mxu0 %v1249_v2  ;;  %1241 = vmatpush3.bf16.msra.mxu1 %v1249_v2  ;;  %v1277_v30 = vld [vmem:[%s1702_s0 + $0x58] sm:$0xff]   ;;  %v1278_v31 = vld [vmem:[%s1702_s0 + $0xc8] sm:$0xff]   ;;  %v1279_v32 = vld [vmem:[%s1702_s0 + $0x60] sm:$0xff]  }
   0xc   :  { %1165 = vmatprep.subr.bf16.mxu0 %v1250_v3  ;;  %1234 = vmatprep.subr.bf16.mxu1 %v1250_v3  ;;  %v1280_v33 = vld [vmem:[%s1702_s0 + $0xd0] sm:$0xff]   ;;  %v1281_v34 = vld [vmem:[%s1702_s0 + $0x68] sm:$0xff]   ;;  %v1282_v35 = vld [vmem:[%s1702_s0 + $0xd8] sm:$0xff]  }
   0xd   :  { %v1414_v36 = vld [vmem:[%s1703_s2] ss:$0 sm:$0xff]  ;;  %v1419_v38 = vld [vmem:[%s1703_s2 + $0x1] ss:$0 sm:$0xff] }
   0xf   :  { %1166 = vmatpush3.bf16.msra.mxu0 %v1250_v3  ;;  %1242 = vmatpush3.bf16.msra.mxu1 %v1250_v3 }
  0x10   :  { %1167 = vmatprep.subr.bf16.mxu0 %v1251_v6  ;;  %1235 = vmatprep.subr.bf16.mxu1 %v1251_v6 }
  0x13   :  { %1168 = vmatpush3.bf16.msra.mxu0 %v1251_v6  ;;  %1243 = vmatpush3.bf16.msra.mxu1 %v1251_v6 }
  0x14   :  { %1169 = vmatprep.subr.bf16.mxu0 %v1252_v7  ;;  %1236 = vmatprep.subr.bf16.mxu1 %v1252_v7 }
  0x17   :  { %1170 = vmatpush3.bf16.msra.mxu0 %v1252_v7  ;;  %1244 = vmatpush3.bf16.msra.mxu1 %v1252_v7 }
  0x18   :  { %1171 = vmatprep.subr.bf16.mxu0 %v1253_v8  ;;  %1237 = vmatprep.subr.bf16.mxu1 %v1253_v8 }
  0x1b   :  { %1172 = vmatpush3.bf16.msra.mxu0 %v1253_v8  ;;  %1245 = vmatpush3.bf16.msra.mxu1 %v1253_v8 }
  0x1c   :  { %1173 = vmatprep.subr.bf16.mxu0 %v1254_v9  ;;  %1238 = vmatprep.subr.bf16.mxu1 %v1254_v9 }
  0x1f   :  { %1174 = vmatpush3.bf16.msra.mxu0 %v1254_v9  ;;  %1246 = vmatpush3.bf16.msra.mxu1 %v1254_v9 }
  0x22   :  { %1176 = vmatmul.mubr.bf16.vlgmr.msra.gmra.mrb[0].mxu0 %v1257_v10  ;;  %1204 = vmatmul.mubr.bf16.vlgmr.msra.gmra.mrb[0].mxu1 %v1258_v11 }
  0x23   :  { %1179 = vmatprep.mubr.bf16.mxu0 %v1259_v12  ;;  %1207 = vmatprep.mubr.bf16.mxu1 %v1260_v13 }
  0x2a   :  { %1180 = vmatmul.mubr.bf16.gmra.mrb[4].mxu0 %v1261_v14  ;;  %1208 = vmatmul.mubr.bf16.gmra.mrb[4].mxu1 %v1262_v15 }
  0x2b   :  { %1183 = vmatprep.mubr.bf16.mxu0 %v1263_v16  ;;  %1211 = vmatprep.mubr.bf16.mxu1 %v1264_v17 }
  0x32   :  { %1184 = vmatmul.mubr.bf16.gmra.mrb[8].mxu0 %v1265_v18  ;;  %1212 = vmatmul.mubr.bf16.gmra.mrb[8].mxu1 %v1266_v19 }
  0x33   :  { %1187 = vmatprep.mubr.bf16.mxu0 %v1267_v20  ;;  %1215 = vmatprep.mubr.bf16.mxu1 %v1268_v21 }
  0x3a   :  { %1188 = vmatmul.mubr.bf16.gmra.mrb[12].mxu0 %v1269_v22  ;;  %1216 = vmatmul.mubr.bf16.gmra.mrb[12].mxu1 %v1270_v23 }
  0x3b   :  { %1191 = vmatprep.mubr.bf16.mxu0 %v1271_v24  ;;  %1219 = vmatprep.mubr.bf16.mxu1 %v1272_v25 }
  0x42   :  { %1192 = vmatmul.mubr.bf16.gmra.mrb[16].mxu0 %v1273_v26  ;;  %1220 = vmatmul.mubr.bf16.gmra.mrb[16].mxu1 %v1274_v27 }
  0x43   :  { %1195 = vmatprep.mubr.bf16.mxu0 %v1275_v28  ;;  %1223 = vmatprep.mubr.bf16.mxu1 %v1276_v29 }
  0x4a   :  { %1196 = vmatmul.mubr.bf16.gmra.mrb[20].mxu0 %v1277_v30  ;;  %1224 = vmatmul.mubr.bf16.gmra.mrb[20].mxu1 %v1278_v31 }
  0x4b   :  { %1199 = vmatprep.mubr.bf16.mxu0 %v1279_v32  ;;  %1227 = vmatprep.mubr.bf16.mxu1 %v1280_v33 }
  0x52   :  { %1200 = vmatmul.mubr.bf16.gmra.mrb[24].mxu0 %v1281_v34  ;;  %1228 = vmatmul.mubr.bf16.gmra.mrb[24].mxu1 %v1282_v35 }
  0xf5   :  { %v1177_v37 = vpop.f32.mrb[0].mxu0  ;;  %v1205_v39 = vpop.f32.mrb[0].mxu1 }
  0xf6   :  { %v854_v40 = vmul.f32 %v1177_v37, %v1414_v36  ;;  %v882_v41 = vmul.f32 %v1205_v39, %v1414_v36  ;;  %v453_v42 = vpop.f32.mrb[1].mxu0  ;;  %v565_v43 = vpop.f32.mrb[1].mxu1 }
  0xf7   :  { %v852_v44 = vmul.f32 %v1414_v36, %v453_v42  ;;  %v880_v45 = vmul.f32 %v1414_v36, %v565_v43  ;;  %v1178_v46 = vpop.f32.mrb[2].mxu0  ;;  %v1206_v47 = vpop.f32.mrb[2].mxu1 }
  0xf8   :  { %v915_v48 = vadd.f32 %v1419_v38, %v854_v40  ;;  %v943_v49 = vadd.f32 %v1419_v38, %v882_v41  ;;  %v855_v50 = vmul.f32 %v1178_v46, %v1414_v36  ;;  %v883_v51 = vmul.f32 %v1206_v47, %v1414_v36  ;;  %v456_v52 = vpop.f32.mrb[3].mxu0  ;;  %v568_v53 = vpop.f32.mrb[3].mxu1 }
  0xf9   :  { %v913_v54 = vadd.f32 %v1419_v38, %v852_v44  ;;  %v941_v55 = vadd.f32 %v1419_v38, %v880_v45  ;;  %v853_v56 = vmul.f32 %v1414_v36, %v456_v52  ;;  %v881_v57 = vmul.f32 %v1414_v36, %v568_v53 }
  0xfa   :  { %v971_v58 = vmax.f32 %v915_v48, 0.0  ;;  %v999_v59 = vmax.f32 %v943_v49, 0.0  ;;  %v916_v60 = vadd.f32 %v1419_v38, %v855_v50  ;;  %v944_v61 = vadd.f32 %v1419_v38, %v883_v51 }
  0xfb   :  { %v969_v62 = vmax.f32 %v913_v54, 0.0  ;;  %v997_v63 = vmax.f32 %v941_v55, 0.0  ;;  %v914_v0 = vadd.f32 %v1419_v38, %v853_v56  ;;  %v942_v1 = vadd.f32 %v1419_v38, %v881_v57 }
  0xfc   :  { %1027 = vst [vmem:[%s1704_s3 + $0x10] sm:$0xff] %v971_v58  ;;  %1055 = vst [vmem:[%s1704_s3 + $0xf0] sm:$0xff] %v999_v59  ;;  %v972_v2 = vmax.f32 %v916_v60, 0.0  ;;  %v1000_v3 = vmax.f32 %v944_v61, 0.0 }
  0xfd   :  { %1025 = vst [vmem:[%s1704_s3] sm:$0xff] %v969_v62  ;;  %1053 = vst [vmem:[%s1704_s3 + $0xe0] sm:$0xff] %v997_v63  ;;  %v970_v4 = vmax.f32 %v914_v0, 0.0  ;;  %v998_v5 = vmax.f32 %v942_v1, 0.0  ;;  %v1181_v6 = vpop.f32.mrb[4].mxu0  ;;  %v1209_v7 = vpop.f32.mrb[4].mxu1 }
  0xfe   :  { %1028 = vst [vmem:[%s1704_s3 + $0x18] sm:$0xff] %v972_v2  ;;  %1056 = vst [vmem:[%s1704_s3 + $0xf8] sm:$0xff] %v1000_v3  ;;  %v858_v8 = vmul.f32 %v1181_v6, %v1414_v36  ;;  %v886_v9 = vmul.f32 %v1209_v7, %v1414_v36  ;;  %v469_v10 = vpop.f32.mrb[5].mxu0  ;;  %v581_v11 = vpop.f32.mrb[5].mxu1 }
  0xff   :  { %1026 = vst [vmem:[%s1704_s3 + $0x8] sm:$0xff] %v970_v4  ;;  %1054 = vst [vmem:[%s1704_s3 + $0xe8] sm:$0xff] %v998_v5  ;;  %v856_v12 = vmul.f32 %v1414_v36, %v469_v10  ;;  %v884_v13 = vmul.f32 %v1414_v36, %v581_v11  ;;  %v1182_v14 = vpop.f32.mrb[6].mxu0  ;;  %v1210_v15 = vpop.f32.mrb[6].mxu1 }
 0x100   :  { %v919_v16 = vadd.f32 %v1419_v38, %v858_v8  ;;  %v947_v17 = vadd.f32 %v1419_v38, %v886_v9  ;;  %v859_v18 = vmul.f32 %v1182_v14, %v1414_v36  ;;  %v887_v19 = vmul.f32 %v1210_v15, %v1414_v36  ;;  %v472_v20 = vpop.f32.mrb[7].mxu0  ;;  %v584_v21 = vpop.f32.mrb[7].mxu1 }
 0x101   :  { %v917_v22 = vadd.f32 %v1419_v38, %v856_v12  ;;  %v945_v23 = vadd.f32 %v1419_v38, %v884_v13  ;;  %v857_v24 = vmul.f32 %v1414_v36, %v472_v20  ;;  %v885_v25 = vmul.f32 %v1414_v36, %v584_v21 }
 0x102   :  { %v975_v26 = vmax.f32 %v919_v16, 0.0  ;;  %v1003_v27 = vmax.f32 %v947_v17, 0.0  ;;  %v920_v28 = vadd.f32 %v1419_v38, %v859_v18  ;;  %v948_v29 = vadd.f32 %v1419_v38, %v887_v19 }
 0x103   :  { %v973_v30 = vmax.f32 %v917_v22, 0.0  ;;  %v1001_v31 = vmax.f32 %v945_v23, 0.0  ;;  %v918_v32 = vadd.f32 %v1419_v38, %v857_v24  ;;  %v946_v33 = vadd.f32 %v1419_v38, %v885_v25 }
 0x104   :  { %1031 = vst [vmem:[%s1704_s3 + $0x30] sm:$0xff] %v975_v26  ;;  %1059 = vst [vmem:[%s1704_s3 + $0x110] sm:$0xff] %v1003_v27  ;;  %v976_v34 = vmax.f32 %v920_v28, 0.0  ;;  %v1004_v35 = vmax.f32 %v948_v29, 0.0 }
 0x105   :  { %1029 = vst [vmem:[%s1704_s3 + $0x20] sm:$0xff] %v973_v30  ;;  %1057 = vst [vmem:[%s1704_s3 + $0x100] sm:$0xff] %v1001_v31  ;;  %v974_v37 = vmax.f32 %v918_v32, 0.0  ;;  %v1002_v39 = vmax.f32 %v946_v33, 0.0  ;;  %v1185_v40 = vpop.f32.mrb[8].mxu0  ;;  %v1213_v41 = vpop.f32.mrb[8].mxu1 }
 0x106   :  { %1032 = vst [vmem:[%s1704_s3 + $0x38] sm:$0xff] %v976_v34  ;;  %1060 = vst [vmem:[%s1704_s3 + $0x118] sm:$0xff] %v1004_v35  ;;  %v862_v42 = vmul.f32 %v1185_v40, %v1414_v36  ;;  %v890_v43 = vmul.f32 %v1213_v41, %v1414_v36  ;;  %v485_v44 = vpop.f32.mrb[9].mxu0  ;;  %v597_v45 = vpop.f32.mrb[9].mxu1 }
 0x107   :  { %1030 = vst [vmem:[%s1704_s3 + $0x28] sm:$0xff] %v974_v37  ;;  %1058 = vst [vmem:[%s1704_s3 + $0x108] sm:$0xff] %v1002_v39  ;;  %v860_v46 = vmul.f32 %v1414_v36, %v485_v44  ;;  %v888_v47 = vmul.f32 %v1414_v36, %v597_v45  ;;  %v1186_v48 = vpop.f32.mrb[10].mxu0  ;;  %v1214_v49 = vpop.f32.mrb[10].mxu1 }
 0x108   :  { %v923_v50 = vadd.f32 %v1419_v38, %v862_v42  ;;  %v951_v51 = vadd.f32 %v1419_v38, %v890_v43  ;;  %v863_v52 = vmul.f32 %v1186_v48, %v1414_v36  ;;  %v891_v53 = vmul.f32 %v1214_v49, %v1414_v36  ;;  %v488_v54 = vpop.f32.mrb[11].mxu0  ;;  %v600_v55 = vpop.f32.mrb[11].mxu1 }
 0x109   :  { %v921_v56 = vadd.f32 %v1419_v38, %v860_v46  ;;  %v949_v57 = vadd.f32 %v1419_v38, %v888_v47  ;;  %v861_v58 = vmul.f32 %v1414_v36, %v488_v54  ;;  %v889_v59 = vmul.f32 %v1414_v36, %v600_v55 }
 0x10a   :  { %v979_v60 = vmax.f32 %v923_v50, 0.0  ;;  %v1007_v61 = vmax.f32 %v951_v51, 0.0  ;;  %v924_v62 = vadd.f32 %v1419_v38, %v863_v52  ;;  %v952_v63 = vadd.f32 %v1419_v38, %v891_v53 }
 0x10b   :  { %v977_v0 = vmax.f32 %v921_v56, 0.0  ;;  %v1005_v1 = vmax.f32 %v949_v57, 0.0  ;;  %v922_v2 = vadd.f32 %v1419_v38, %v861_v58  ;;  %v950_v3 = vadd.f32 %v1419_v38, %v889_v59 }
 0x10c   :  { %1035 = vst [vmem:[%s1704_s3 + $0x50] sm:$0xff] %v979_v60  ;;  %1063 = vst [vmem:[%s1704_s3 + $0x130] sm:$0xff] %v1007_v61  ;;  %v980_v4 = vmax.f32 %v924_v62, 0.0  ;;  %v1008_v5 = vmax.f32 %v952_v63, 0.0 }
 0x10d   :  { %1033 = vst [vmem:[%s1704_s3 + $0x40] sm:$0xff] %v977_v0  ;;  %1061 = vst [vmem:[%s1704_s3 + $0x120] sm:$0xff] %v1005_v1  ;;  %v978_v6 = vmax.f32 %v922_v2, 0.0  ;;  %v1006_v7 = vmax.f32 %v950_v3, 0.0  ;;  %v1189_v8 = vpop.f32.mrb[12].mxu0  ;;  %v1217_v9 = vpop.f32.mrb[12].mxu1 }
 0x10e   :  { %1036 = vst [vmem:[%s1704_s3 + $0x58] sm:$0xff] %v980_v4  ;;  %1064 = vst [vmem:[%s1704_s3 + $0x138] sm:$0xff] %v1008_v5  ;;  %v866_v10 = vmul.f32 %v1189_v8, %v1414_v36  ;;  %v894_v11 = vmul.f32 %v1217_v9, %v1414_v36  ;;  %v501_v12 = vpop.f32.mrb[13].mxu0  ;;  %v613_v13 = vpop.f32.mrb[13].mxu1 }
 0x10f   :  { %1034 = vst [vmem:[%s1704_s3 + $0x48] sm:$0xff] %v978_v6  ;;  %1062 = vst [vmem:[%s1704_s3 + $0x128] sm:$0xff] %v1006_v7  ;;  %v864_v14 = vmul.f32 %v1414_v36, %v501_v12  ;;  %v892_v15 = vmul.f32 %v1414_v36, %v613_v13  ;;  %v1190_v16 = vpop.f32.mrb[14].mxu0  ;;  %v1218_v17 = vpop.f32.mrb[14].mxu1 }
 0x110   :  { %v927_v18 = vadd.f32 %v1419_v38, %v866_v10  ;;  %v955_v19 = vadd.f32 %v1419_v38, %v894_v11  ;;  %v867_v20 = vmul.f32 %v1190_v16, %v1414_v36  ;;  %v895_v21 = vmul.f32 %v1218_v17, %v1414_v36  ;;  %v504_v22 = vpop.f32.mrb[15].mxu0  ;;  %v616_v23 = vpop.f32.mrb[15].mxu1 }
 0x111   :  { %v925_v24 = vadd.f32 %v1419_v38, %v864_v14  ;;  %v953_v25 = vadd.f32 %v1419_v38, %v892_v15  ;;  %v865_v26 = vmul.f32 %v1414_v36, %v504_v22  ;;  %v893_v27 = vmul.f32 %v1414_v36, %v616_v23 }
 0x112   :  { %v983_v28 = vmax.f32 %v927_v18, 0.0  ;;  %v1011_v29 = vmax.f32 %v955_v19, 0.0  ;;  %v928_v30 = vadd.f32 %v1419_v38, %v867_v20  ;;  %v956_v31 = vadd.f32 %v1419_v38, %v895_v21 }
 0x113   :  { %v981_v32 = vmax.f32 %v925_v24, 0.0  ;;  %v1009_v33 = vmax.f32 %v953_v25, 0.0  ;;  %v926_v34 = vadd.f32 %v1419_v38, %v865_v26  ;;  %v954_v35 = vadd.f32 %v1419_v38, %v893_v27 }
 0x114   :  { %1039 = vst [vmem:[%s1704_s3 + $0x70] sm:$0xff] %v983_v28  ;;  %1067 = vst [vmem:[%s1704_s3 + $0x150] sm:$0xff] %v1011_v29  ;;  %v984_v37 = vmax.f32 %v928_v30, 0.0  ;;  %v1012_v39 = vmax.f32 %v956_v31, 0.0 }
 0x115   :  { %1037 = vst [vmem:[%s1704_s3 + $0x60] sm:$0xff] %v981_v32  ;;  %1065 = vst [vmem:[%s1704_s3 + $0x140] sm:$0xff] %v1009_v33  ;;  %v982_v40 = vmax.f32 %v926_v34, 0.0  ;;  %v1010_v41 = vmax.f32 %v954_v35, 0.0  ;;  %v1193_v42 = vpop.f32.mrb[16].mxu0  ;;  %v1221_v43 = vpop.f32.mrb[16].mxu1 }
 0x116   :  { %1040 = vst [vmem:[%s1704_s3 + $0x78] sm:$0xff] %v984_v37  ;;  %1068 = vst [vmem:[%s1704_s3 + $0x158] sm:$0xff] %v1012_v39  ;;  %v870_v44 = vmul.f32 %v1193_v42, %v1414_v36  ;;  %v898_v45 = vmul.f32 %v1221_v43, %v1414_v36  ;;  %v517_v46 = vpop.f32.mrb[17].mxu0  ;;  %v629_v47 = vpop.f32.mrb[17].mxu1 }
 0x117   :  { %1038 = vst [vmem:[%s1704_s3 + $0x68] sm:$0xff] %v982_v40  ;;  %1066 = vst [vmem:[%s1704_s3 + $0x148] sm:$0xff] %v1010_v41  ;;  %v868_v48 = vmul.f32 %v1414_v36, %v517_v46  ;;  %v896_v49 = vmul.f32 %v1414_v36, %v629_v47  ;;  %v1194_v50 = vpop.f32.mrb[18].mxu0  ;;  %v1222_v51 = vpop.f32.mrb[18].mxu1 }
 0x118   :  { %v931_v52 = vadd.f32 %v1419_v38, %v870_v44  ;;  %v959_v53 = vadd.f32 %v1419_v38, %v898_v45  ;;  %v871_v54 = vmul.f32 %v1194_v50, %v1414_v36  ;;  %v899_v55 = vmul.f32 %v1222_v51, %v1414_v36  ;;  %v520_v56 = vpop.f32.mrb[19].mxu0  ;;  %v632_v57 = vpop.f32.mrb[19].mxu1 }
 0x119   :  { %v929_v58 = vadd.f32 %v1419_v38, %v868_v48  ;;  %v957_v59 = vadd.f32 %v1419_v38, %v896_v49  ;;  %v869_v60 = vmul.f32 %v1414_v36, %v520_v56  ;;  %v897_v61 = vmul.f32 %v1414_v36, %v632_v57 }
 0x11a   :  { %v987_v62 = vmax.f32 %v931_v52, 0.0  ;;  %v1015_v63 = vmax.f32 %v959_v53, 0.0  ;;  %v932_v0 = vadd.f32 %v1419_v38, %v871_v54  ;;  %v960_v1 = vadd.f32 %v1419_v38, %v899_v55 }
 0x11b   :  { %v985_v2 = vmax.f32 %v929_v58, 0.0  ;;  %v1013_v3 = vmax.f32 %v957_v59, 0.0  ;;  %v930_v4 = vadd.f32 %v1419_v38, %v869_v60  ;;  %v958_v5 = vadd.f32 %v1419_v38, %v897_v61 }
 0x11c   :  { %1043 = vst [vmem:[%s1704_s3 + $0x90] sm:$0xff] %v987_v62  ;;  %1071 = vst [vmem:[%s1704_s3 + $0x170] sm:$0xff] %v1015_v63  ;;  %v988_v6 = vmax.f32 %v932_v0, 0.0  ;;  %v1016_v7 = vmax.f32 %v960_v1, 0.0 }
 0x11d   :  { %1041 = vst [vmem:[%s1704_s3 + $0x80] sm:$0xff] %v985_v2  ;;  %1069 = vst [vmem:[%s1704_s3 + $0x160] sm:$0xff] %v1013_v3  ;;  %v986_v8 = vmax.f32 %v930_v4, 0.0  ;;  %v1014_v9 = vmax.f32 %v958_v5, 0.0  ;;  %v1197_v10 = vpop.f32.mrb[20].mxu0  ;;  %v1225_v11 = vpop.f32.mrb[20].mxu1 }
 0x11e   :  { %1044 = vst [vmem:[%s1704_s3 + $0x98] sm:$0xff] %v988_v6  ;;  %1072 = vst [vmem:[%s1704_s3 + $0x178] sm:$0xff] %v1016_v7  ;;  %v874_v12 = vmul.f32 %v1197_v10, %v1414_v36  ;;  %v902_v13 = vmul.f32 %v1225_v11, %v1414_v36  ;;  %v533_v14 = vpop.f32.mrb[21].mxu0  ;;  %v645_v15 = vpop.f32.mrb[21].mxu1 }
 0x11f   :  { %1042 = vst [vmem:[%s1704_s3 + $0x88] sm:$0xff] %v986_v8  ;;  %1070 = vst [vmem:[%s1704_s3 + $0x168] sm:$0xff] %v1014_v9  ;;  %v872_v16 = vmul.f32 %v1414_v36, %v533_v14  ;;  %v900_v17 = vmul.f32 %v1414_v36, %v645_v15  ;;  %v1198_v18 = vpop.f32.mrb[22].mxu0  ;;  %v1226_v19 = vpop.f32.mrb[22].mxu1 }
 0x120   :  { %v935_v20 = vadd.f32 %v1419_v38, %v874_v12  ;;  %v963_v21 = vadd.f32 %v1419_v38, %v902_v13  ;;  %v875_v22 = vmul.f32 %v1198_v18, %v1414_v36  ;;  %v903_v23 = vmul.f32 %v1226_v19, %v1414_v36  ;;  %v536_v24 = vpop.f32.mrb[23].mxu0  ;;  %v648_v25 = vpop.f32.mrb[23].mxu1 }
 0x121   :  { %v933_v26 = vadd.f32 %v1419_v38, %v872_v16  ;;  %v961_v27 = vadd.f32 %v1419_v38, %v900_v17  ;;  %v873_v28 = vmul.f32 %v1414_v36, %v536_v24  ;;  %v901_v29 = vmul.f32 %v1414_v36, %v648_v25 }
 0x122   :  { %v991_v30 = vmax.f32 %v935_v20, 0.0  ;;  %v1019_v31 = vmax.f32 %v963_v21, 0.0  ;;  %v936_v32 = vadd.f32 %v1419_v38, %v875_v22  ;;  %v964_v33 = vadd.f32 %v1419_v38, %v903_v23 }
 0x123   :  { %v989_v34 = vmax.f32 %v933_v26, 0.0  ;;  %v1017_v35 = vmax.f32 %v961_v27, 0.0  ;;  %v934_v37 = vadd.f32 %v1419_v38, %v873_v28  ;;  %v962_v39 = vadd.f32 %v1419_v38, %v901_v29 }
 0x124   :  { %1047 = vst [vmem:[%s1704_s3 + $0xb0] sm:$0xff] %v991_v30  ;;  %1075 = vst [vmem:[%s1704_s3 + $0x190] sm:$0xff] %v1019_v31  ;;  %v992_v40 = vmax.f32 %v936_v32, 0.0  ;;  %v1020_v41 = vmax.f32 %v964_v33, 0.0 }
 0x125   :  { %1045 = vst [vmem:[%s1704_s3 + $0xa0] sm:$0xff] %v989_v34  ;;  %1073 = vst [vmem:[%s1704_s3 + $0x180] sm:$0xff] %v1017_v35  ;;  %v990_v42 = vmax.f32 %v934_v37, 0.0  ;;  %v1018_v43 = vmax.f32 %v962_v39, 0.0  ;;  %v1201_v44 = vpop.f32.mrb[24].mxu0  ;;  %v1229_v45 = vpop.f32.mrb[24].mxu1 }
 0x126   :  { %1048 = vst [vmem:[%s1704_s3 + $0xb8] sm:$0xff] %v992_v40  ;;  %1076 = vst [vmem:[%s1704_s3 + $0x198] sm:$0xff] %v1020_v41  ;;  %v878_v46 = vmul.f32 %v1201_v44, %v1414_v36  ;;  %v906_v47 = vmul.f32 %v1229_v45, %v1414_v36  ;;  %v549_v48 = vpop.f32.mrb[25].mxu0  ;;  %v661_v49 = vpop.f32.mrb[25].mxu1 }
 0x127   :  { %1046 = vst [vmem:[%s1704_s3 + $0xa8] sm:$0xff] %v990_v42  ;;  %1074 = vst [vmem:[%s1704_s3 + $0x188] sm:$0xff] %v1018_v43  ;;  %v876_v50 = vmul.f32 %v1414_v36, %v549_v48  ;;  %v904_v51 = vmul.f32 %v1414_v36, %v661_v49  ;;  %v1202_v52 = vpop.f32.mrb[26].mxu0  ;;  %v1230_v53 = vpop.f32.mrb[26].mxu1 }
 0x128   :  { %v939_v54 = vadd.f32 %v1419_v38, %v878_v46  ;;  %v967_v55 = vadd.f32 %v1419_v38, %v906_v47  ;;  %v879_v56 = vmul.f32 %v1202_v52, %v1414_v36  ;;  %v907_v57 = vmul.f32 %v1230_v53, %v1414_v36  ;;  %v552_v58 = vpop.f32.mrb[27].mxu0  ;;  %v664_v59 = vpop.f32.mrb[27].mxu1 }
 0x129   :  { %v937_v60 = vadd.f32 %v1419_v38, %v876_v50  ;;  %v965_v61 = vadd.f32 %v1419_v38, %v904_v51  ;;  %v877_v62 = vmul.f32 %v1414_v36, %v552_v58  ;;  %v905_v63 = vmul.f32 %v1414_v36, %v664_v59 }
 0x12a   :  { %v995_v0 = vmax.f32 %v939_v54, 0.0  ;;  %v1023_v1 = vmax.f32 %v967_v55, 0.0  ;;  %v940_v2 = vadd.f32 %v1419_v38, %v879_v56  ;;  %v968_v3 = vadd.f32 %v1419_v38, %v907_v57 }
 0x12b   :  { %v993_v4 = vmax.f32 %v937_v60, 0.0  ;;  %v1021_v5 = vmax.f32 %v965_v61, 0.0  ;;  %v938_v6 = vadd.f32 %v1419_v38, %v877_v62  ;;  %v966_v7 = vadd.f32 %v1419_v38, %v905_v63 }
 0x12c   :  { %1051 = vst [vmem:[%s1704_s3 + $0xd0] sm:$0xff] %v995_v0  ;;  %1079 = vst [vmem:[%s1704_s3 + $0x1b0] sm:$0xff] %v1023_v1  ;;  %v996_v36 = vmax.f32 %v940_v2, 0.0  ;;  %v1024_v8 = vmax.f32 %v968_v3, 0.0 }
 0x12d   :  { %1049 = vst [vmem:[%s1704_s3 + $0xc0] sm:$0xff] %v993_v4  ;;  %1077 = vst [vmem:[%s1704_s3 + $0x1a0] sm:$0xff] %v1021_v5  ;;  %v994_v9 = vmax.f32 %v938_v6, 0.0  ;;  %v1022_v38 = vmax.f32 %v966_v7, 0.0 }
 0x12e   :  { %1052 = vst [vmem:[%s1704_s3 + $0xd8] sm:$0xff] %v996_v36  ;;  %1080 = vst [vmem:[%s1704_s3 + $0x1b8] sm:$0xff] %v1024_v8 }
 0x12f   :  { %1050 = vst [vmem:[%s1704_s3 + $0xc8] sm:$0xff] %v994_v9  ;;  %1078 = vst [vmem:[%s1704_s3 + $0x1a8] sm:$0xff] %v1022_v38 }

// kernel: pspnet_forward.38
= control target key start
LH: loop header
LB: loop body
LE: loop exit
PB: predicated region body
PF: predicated region fallthrough
CT: control target
= control target key end

     0   :  { %v1468_v0 = vmov 0   ;;  %s2027_s1 = inlined_call_operand.vmem [shape: bf16[256,128], index: 1, kind: input, shape index: {}]   ;;  %s2028_s0 = inlined_call_operand.vmem [shape: bf16[448,256], index: 0, kind: input, shape index: {}]   ;;  %s2029_s2 = inlined_call_operand.vmem [shape: f32[8,128], index: 2, kind: input, shape index: {}]   ;;  %s2030_s3 = inlined_call_operand.vmem [shape: f32[448,128], index: 3, kind: output, shape index: {}]  }
   0x1   :  { %595 = vmatprep.subr.bf16.mxu0 %v1468_v0  ;;  %1335 = vmatprep.subr.bf16.mxu1 %v1468_v0  ;;  %v1368_v1 = vld [vmem:[%s2027_s1] sm:$0xff]   ;;  %v1369_v2 = vld [vmem:[%s2027_s1 + $0x8] sm:$0xff]   ;;  %v1370_v3 = vld [vmem:[%s2027_s1 + $0x10] sm:$0xff]  }
   0x2   :  { %596 = vmatpush1.bf16.msra.mxu0 %v1368_v1  ;;  %1351 = vmatpush1.bf16.msra.mxu1 %v1368_v1  ;;  %v1371_v4 = vld [vmem:[%s2027_s1 + $0x18] sm:$0xff]   ;;  %v1372_v5 = vld [vmem:[%s2027_s1 + $0x20] sm:$0xff]   ;;  %v1373_v7 = vld [vmem:[%s2027_s1 + $0x28] sm:$0xff]  }
   0x3   :  { %597 = vmatprep.subr.bf16.mxu0 %v1468_v0  ;;  %1336 = vmatprep.subr.bf16.mxu1 %v1468_v0  ;;  %v1386_v6 = vld [vmem:[%s2028_s0 + $0x4] ss:$8 sps:$4 sm:$0xff]   ;;  %v1374_v9 = vld [vmem:[%s2027_s1 + $0x30] sm:$0xff]   ;;  %v1375_v10 = vld [vmem:[%s2027_s1 + $0x38] sm:$0xff]  }
   0x4   :  { %v1389_v8 = vld [vmem:[%s2028_s0 + $0xe4] ss:$8 sps:$4 sm:$0xff]   ;;  %627 = vmatprep.mubr.bf16.mxu0 %v1386_v6  ;;  %v1378_v13 = vld [vmem:[%s2027_s1 + $0x50] sm:$0xff]   ;;  %v1379_v14 = vld [vmem:[%s2027_s1 + $0x58] sm:$0xff]  }
   0x5   :  { %739 = vmatprep.mubr.bf16.mxu1 %v1389_v8  ;;  %v1376_v11 = vld [vmem:[%s2027_s1 + $0x40] sm:$0xff]   ;;  %v1377_v12 = vld [vmem:[%s2027_s1 + $0x48] sm:$0xff]   ;;  %v1382_v17 = vld [vmem:[%s2027_s1 + $0x70] sm:$0xff]  }
   0x6   :  { %598 = vmatpush1.bf16.msra.mxu0 %v1369_v2  ;;  %1352 = vmatpush1.bf16.msra.mxu1 %v1369_v2  ;;  %v1380_v15 = vld [vmem:[%s2027_s1 + $0x60] sm:$0xff]   ;;  %v1381_v16 = vld [vmem:[%s2027_s1 + $0x68] sm:$0xff]   ;;  %v1383_v18 = vld [vmem:[%s2027_s1 + $0x78] sm:$0xff]  }
   0x7   :  { %599 = vmatprep.subr.bf16.mxu0 %v1468_v0  ;;  %1337 = vmatprep.subr.bf16.mxu1 %v1468_v0  ;;  %v1384_v19 = vld [vmem:[%s2028_s0] ss:$8 sps:$4 sm:$0xff]   ;;  %v1390_v21 = vld [vmem:[%s2028_s0 + $0x14] ss:$8 sps:$4 sm:$0xff]   ;;  %v1394_v23 = vld [vmem:[%s2028_s0 + $0x10] ss:$8 sps:$4 sm:$0xff]  }
   0x8   :  { %v1387_v20 = vld [vmem:[%s2028_s0 + $0xe0] ss:$8 sps:$4 sm:$0xff]   ;;  %v1392_v22 = vld [vmem:[%s2028_s0 + $0xf4] ss:$8 sps:$4 sm:$0xff]   ;;  %v1395_v24 = vld [vmem:[%s2028_s0 + $0xf0] ss:$8 sps:$4 sm:$0xff]  }
   0x9   :  { %v1396_v25 = vld [vmem:[%s2028_s0 + $0x24] ss:$8 sps:$4 sm:$0xff]   ;;  %v1400_v27 = vld [vmem:[%s2028_s0 + $0x20] ss:$8 sps:$4 sm:$0xff]   ;;  %v1402_v29 = vld [vmem:[%s2028_s0 + $0x34] ss:$8 sps:$4 sm:$0xff]  }
   0xa   :  { %600 = vmatpush1.bf16.msra.mxu0 %v1370_v3  ;;  %1353 = vmatpush1.bf16.msra.mxu1 %v1370_v3  ;;  %v1398_v26 = vld [vmem:[%s2028_s0 + $0x104] ss:$8 sps:$4 sm:$0xff]   ;;  %v1401_v28 = vld [vmem:[%s2028_s0 + $0x100] ss:$8 sps:$4 sm:$0xff]   ;;  %v1404_v30 = vld [vmem:[%s2028_s0 + $0x114] ss:$8 sps:$4 sm:$0xff]  }
   0xb   :  { %601 = vmatprep.subr.bf16.mxu0 %v1468_v0  ;;  %1338 = vmatprep.subr.bf16.mxu1 %v1468_v0  ;;  %v1406_v31 = vld [vmem:[%s2028_s0 + $0x30] ss:$8 sps:$4 sm:$0xff]   ;;  %v1408_v33 = vld [vmem:[%s2028_s0 + $0x44] ss:$8 sps:$4 sm:$0xff]   ;;  %v1412_v35 = vld [vmem:[%s2028_s0 + $0x40] ss:$8 sps:$4 sm:$0xff]  }
   0xc   :  { %v1407_v32 = vld [vmem:[%s2028_s0 + $0x110] ss:$8 sps:$4 sm:$0xff]   ;;  %v1410_v34 = vld [vmem:[%s2028_s0 + $0x124] ss:$8 sps:$4 sm:$0xff]   ;;  %v1413_v36 = vld [vmem:[%s2028_s0 + $0x120] ss:$8 sps:$4 sm:$0xff]  }
   0xd   :  { %v1414_v37 = vld [vmem:[%s2028_s0 + $0x54] ss:$8 sps:$4 sm:$0xff]   ;;  %v1418_v39 = vld [vmem:[%s2028_s0 + $0x50] ss:$8 sps:$4 sm:$0xff]   ;;  %v1420_v41 = vld [vmem:[%s2028_s0 + $0x64] ss:$8 sps:$4 sm:$0xff]  }
   0xe   :  { %602 = vmatpush1.bf16.msra.mxu0 %v1371_v4  ;;  %1354 = vmatpush1.bf16.msra.mxu1 %v1371_v4  ;;  %v1416_v38 = vld [vmem:[%s2028_s0 + $0x134] ss:$8 sps:$4 sm:$0xff]   ;;  %v1419_v40 = vld [vmem:[%s2028_s0 + $0x130] ss:$8 sps:$4 sm:$0xff]   ;;  %v1422_v42 = vld [vmem:[%s2028_s0 + $0x144] ss:$8 sps:$4 sm:$0xff]  }
   0xf   :  { %603 = vmatprep.subr.bf16.mxu0 %v1468_v0  ;;  %1339 = vmatprep.subr.bf16.mxu1 %v1468_v0  ;;  %v1424_v43 = vld [vmem:[%s2028_s0 + $0x60] ss:$8 sps:$4 sm:$0xff]   ;;  %v1426_v45 = vld [vmem:[%s2028_s0 + $0x74] ss:$8 sps:$4 sm:$0xff]   ;;  %v1430_v47 = vld [vmem:[%s2028_s0 + $0x70] ss:$8 sps:$4 sm:$0xff]  }
  0x10   :  { %v1425_v44 = vld [vmem:[%s2028_s0 + $0x140] ss:$8 sps:$4 sm:$0xff]   ;;  %v1428_v46 = vld [vmem:[%s2028_s0 + $0x154] ss:$8 sps:$4 sm:$0xff]   ;;  %v1431_v48 = vld [vmem:[%s2028_s0 + $0x150] ss:$8 sps:$4 sm:$0xff]  }
  0x11   :  { %v1432_v49 = vld [vmem:[%s2028_s0 + $0x84] ss:$8 sps:$4 sm:$0xff]   ;;  %v1436_v51 = vld [vmem:[%s2028_s0 + $0x80] ss:$8 sps:$4 sm:$0xff]   ;;  %v1438_v53 = vld [vmem:[%s2028_s0 + $0x94] ss:$8 sps:$4 sm:$0xff]  }
  0x12   :  { %604 = vmatpush1.bf16.msra.mxu0 %v1372_v5  ;;  %1355 = vmatpush1.bf16.msra.mxu1 %v1372_v5  ;;  %v1434_v50 = vld [vmem:[%s2028_s0 + $0x164] ss:$8 sps:$4 sm:$0xff]   ;;  %v1437_v52 = vld [vmem:[%s2028_s0 + $0x160] ss:$8 sps:$4 sm:$0xff]   ;;  %v1440_v54 = vld [vmem:[%s2028_s0 + $0x174] ss:$8 sps:$4 sm:$0xff]  }
  0x13   :  { %605 = vmatprep.subr.bf16.mxu0 %v1468_v0  ;;  %1340 = vmatprep.subr.bf16.mxu1 %v1468_v0  ;;  %v1442_v55 = vld [vmem:[%s2028_s0 + $0x90] ss:$8 sps:$4 sm:$0xff]   ;;  %v1444_v57 = vld [vmem:[%s2028_s0 + $0xa4] ss:$8 sps:$4 sm:$0xff]   ;;  %v1448_v59 = vld [vmem:[%s2028_s0 + $0xa0] ss:$8 sps:$4 sm:$0xff]  }
  0x14   :  { %v1443_v56 = vld [vmem:[%s2028_s0 + $0x170] ss:$8 sps:$4 sm:$0xff]   ;;  %v1446_v58 = vld [vmem:[%s2028_s0 + $0x184] ss:$8 sps:$4 sm:$0xff]   ;;  %v1449_v60 = vld [vmem:[%s2028_s0 + $0x180] ss:$8 sps:$4 sm:$0xff]  }
  0x15   :  { %v1450_v61 = vld [vmem:[%s2028_s0 + $0xb4] ss:$8 sps:$4 sm:$0xff]   ;;  %v1454_v63 = vld [vmem:[%s2028_s0 + $0xb0] ss:$8 sps:$4 sm:$0xff]   ;;  %v1456_v1 = vld [vmem:[%s2028_s0 + $0xc4] ss:$8 sps:$4 sm:$0xff]  }
  0x16   :  { %606 = vmatpush1.bf16.msra.mxu0 %v1373_v7  ;;  %1356 = vmatpush1.bf16.msra.mxu1 %v1373_v7  ;;  %v1452_v62 = vld [vmem:[%s2028_s0 + $0x194] ss:$8 sps:$4 sm:$0xff]   ;;  %v1458_v2 = vld [vmem:[%s2028_s0 + $0x1a4] ss:$8 sps:$4 sm:$0xff]   ;;  %v1460_v3 = vld [vmem:[%s2028_s0 + $0xc0] ss:$8 sps:$4 sm:$0xff]  }
  0x17   :  { %607 = vmatprep.subr.bf16.mxu0 %v1468_v0  ;;  %1341 = vmatprep.subr.bf16.mxu1 %v1468_v0  ;;  %v1461_v4 = vld [vmem:[%s2028_s0 + $0x1a0] ss:$8 sps:$4 sm:$0xff]   ;;  %v1462_v5 = vld [vmem:[%s2028_s0 + $0xd4] ss:$8 sps:$4 sm:$0xff]   ;;  %v1466_v7 = vld [vmem:[%s2028_s0 + $0xd0] ss:$8 sps:$4 sm:$0xff]  }
  0x18   :  { %v1464_v6 = vld [vmem:[%s2028_s0 + $0x1b4] ss:$8 sps:$4 sm:$0xff]   ;;  %v1467_v8 = vld [vmem:[%s2028_s0 + $0x1b0] ss:$8 sps:$4 sm:$0xff]  }
  0x1a   :  { %608 = vmatpush1.bf16.msra.mxu0 %v1374_v9  ;;  %1357 = vmatpush1.bf16.msra.mxu1 %v1374_v9  ;;  %v1740_v9 = vld [vmem:[%s2029_s2] ss:$0 sm:$0xff] }
  0x1b   :  { %609 = vmatprep.subr.bf16.mxu0 %v1468_v0  ;;  %1342 = vmatprep.subr.bf16.mxu1 %v1468_v0 }
  0x1e   :  { %610 = vmatpush1.bf16.msra.mxu0 %v1375_v10  ;;  %1358 = vmatpush1.bf16.msra.mxu1 %v1375_v10 }
  0x1f   :  { %611 = vmatprep.subr.bf16.mxu0 %v1468_v0  ;;  %1343 = vmatprep.subr.bf16.mxu1 %v1468_v0 }
  0x22   :  { %612 = vmatpush1.bf16.msra.mxu0 %v1376_v11  ;;  %1359 = vmatpush1.bf16.msra.mxu1 %v1376_v11  ;;  %v1745_v11 = vld [vmem:[%s2029_s2 + $0x1] ss:$0 sm:$0xff] }
  0x23   :  { %613 = vmatprep.subr.bf16.mxu0 %v1468_v0  ;;  %1344 = vmatprep.subr.bf16.mxu1 %v1468_v0 }
  0x26   :  { %614 = vmatpush1.bf16.msra.mxu0 %v1377_v12  ;;  %1360 = vmatpush1.bf16.msra.mxu1 %v1377_v12 }
  0x27   :  { %615 = vmatprep.subr.bf16.mxu0 %v1468_v0  ;;  %1345 = vmatprep.subr.bf16.mxu1 %v1468_v0 }
  0x2a   :  { %616 = vmatpush1.bf16.msra.mxu0 %v1378_v13  ;;  %1361 = vmatpush1.bf16.msra.mxu1 %v1378_v13 }
  0x2b   :  { %617 = vmatprep.subr.bf16.mxu0 %v1468_v0  ;;  %1346 = vmatprep.subr.bf16.mxu1 %v1468_v0 }
  0x2e   :  { %618 = vmatpush1.bf16.msra.mxu0 %v1379_v14  ;;  %1362 = vmatpush1.bf16.msra.mxu1 %v1379_v14 }
  0x2f   :  { %619 = vmatprep.subr.bf16.mxu0 %v1468_v0  ;;  %1347 = vmatprep.subr.bf16.mxu1 %v1468_v0 }
  0x32   :  { %620 = vmatpush1.bf16.msra.mxu0 %v1380_v15  ;;  %1363 = vmatpush1.bf16.msra.mxu1 %v1380_v15 }
  0x33   :  { %621 = vmatprep.subr.bf16.mxu0 %v1468_v0  ;;  %1348 = vmatprep.subr.bf16.mxu1 %v1468_v0 }
  0x36   :  { %622 = vmatpush1.bf16.msra.mxu0 %v1381_v16  ;;  %1364 = vmatpush1.bf16.msra.mxu1 %v1381_v16 }
  0x37   :  { %623 = vmatprep.subr.bf16.mxu0 %v1468_v0  ;;  %1349 = vmatprep.subr.bf16.mxu1 %v1468_v0 }
  0x3a   :  { %624 = vmatpush1.bf16.msra.mxu0 %v1382_v17  ;;  %1365 = vmatpush1.bf16.msra.mxu1 %v1382_v17 }
  0x3b   :  { %625 = vmatprep.subr.bf16.mxu0 %v1468_v0  ;;  %1350 = vmatprep.subr.bf16.mxu1 %v1468_v0  ;;  %v1455_v0 = vld [vmem:[%s2028_s0 + $0x190] ss:$8 sps:$4 sm:$0xff]  }
  0x3e   :  { %626 = vmatpush1.bf16.msra.mxu0 %v1383_v18  ;;  %1366 = vmatpush1.bf16.msra.mxu1 %v1383_v18 }
  0x41   :  { %628 = vmatmul.mubr.bf16.vlgmr.msra.gmra.mrb[0].mxu0 %v1384_v19  ;;  %740 = vmatmul.mubr.bf16.vlgmr.msra.gmra.mrb[0].mxu1 %v1387_v20 }
  0x42   :  { %635 = vmatprep.mubr.bf16.mxu0 %v1390_v21  ;;  %747 = vmatprep.mubr.bf16.mxu1 %v1392_v22 }
  0x49   :  { %636 = vmatmul.mubr.bf16.gmra.mrb[4].mxu0 %v1394_v23  ;;  %748 = vmatmul.mubr.bf16.gmra.mrb[4].mxu1 %v1395_v24 }
  0x4a   :  { %643 = vmatprep.mubr.bf16.mxu0 %v1396_v25  ;;  %755 = vmatprep.mubr.bf16.mxu1 %v1398_v26 }
  0x51   :  { %644 = vmatmul.mubr.bf16.gmra.mrb[8].mxu0 %v1400_v27  ;;  %756 = vmatmul.mubr.bf16.gmra.mrb[8].mxu1 %v1401_v28 }
  0x52   :  { %651 = vmatprep.mubr.bf16.mxu0 %v1402_v29  ;;  %763 = vmatprep.mubr.bf16.mxu1 %v1404_v30 }
  0x59   :  { %652 = vmatmul.mubr.bf16.gmra.mrb[12].mxu0 %v1406_v31  ;;  %764 = vmatmul.mubr.bf16.gmra.mrb[12].mxu1 %v1407_v32 }
  0x5a   :  { %659 = vmatprep.mubr.bf16.mxu0 %v1408_v33  ;;  %771 = vmatprep.mubr.bf16.mxu1 %v1410_v34 }
  0x61   :  { %660 = vmatmul.mubr.bf16.gmra.mrb[16].mxu0 %v1412_v35  ;;  %772 = vmatmul.mubr.bf16.gmra.mrb[16].mxu1 %v1413_v36 }
  0x62   :  { %667 = vmatprep.mubr.bf16.mxu0 %v1414_v37  ;;  %779 = vmatprep.mubr.bf16.mxu1 %v1416_v38 }
  0x69   :  { %668 = vmatmul.mubr.bf16.gmra.mrb[20].mxu0 %v1418_v39  ;;  %780 = vmatmul.mubr.bf16.gmra.mrb[20].mxu1 %v1419_v40 }
  0x6a   :  { %675 = vmatprep.mubr.bf16.mxu0 %v1420_v41  ;;  %787 = vmatprep.mubr.bf16.mxu1 %v1422_v42 }
  0x71   :  { %676 = vmatmul.mubr.bf16.gmra.mrb[24].mxu0 %v1424_v43  ;;  %788 = vmatmul.mubr.bf16.gmra.mrb[24].mxu1 %v1425_v44 }
  0x72   :  { %683 = vmatprep.mubr.bf16.mxu0 %v1426_v45  ;;  %795 = vmatprep.mubr.bf16.mxu1 %v1428_v46 }
  0x79   :  { %684 = vmatmul.mubr.bf16.gmra.mrb[28].mxu0 %v1430_v47  ;;  %796 = vmatmul.mubr.bf16.gmra.mrb[28].mxu1 %v1431_v48 }
  0x7a   :  { %691 = vmatprep.mubr.bf16.mxu0 %v1432_v49  ;;  %803 = vmatprep.mubr.bf16.mxu1 %v1434_v50 }
  0x81   :  { %692 = vmatmul.mubr.bf16.gmra.mrb[32].mxu0 %v1436_v51  ;;  %804 = vmatmul.mubr.bf16.gmra.mrb[32].mxu1 %v1437_v52 }
  0x82   :  { %699 = vmatprep.mubr.bf16.mxu0 %v1438_v53  ;;  %811 = vmatprep.mubr.bf16.mxu1 %v1440_v54 }
  0x89   :  { %700 = vmatmul.mubr.bf16.gmra.mrb[36].mxu0 %v1442_v55  ;;  %812 = vmatmul.mubr.bf16.gmra.mrb[36].mxu1 %v1443_v56 }
  0x8a   :  { %707 = vmatprep.mubr.bf16.mxu0 %v1444_v57  ;;  %819 = vmatprep.mubr.bf16.mxu1 %v1446_v58 }
  0x91   :  { %708 = vmatmul.mubr.bf16.gmra.mrb[40].mxu0 %v1448_v59  ;;  %820 = vmatmul.mubr.bf16.gmra.mrb[40].mxu1 %v1449_v60 }
  0x92   :  { %715 = vmatprep.mubr.bf16.mxu0 %v1450_v61  ;;  %827 = vmatprep.mubr.bf16.mxu1 %v1452_v62 }
  0x99   :  { %716 = vmatmul.mubr.bf16.gmra.mrb[44].mxu0 %v1454_v63  ;;  %828 = vmatmul.mubr.bf16.gmra.mrb[44].mxu1 %v1455_v0 }
  0x9a   :  { %723 = vmatprep.mubr.bf16.mxu0 %v1456_v1  ;;  %835 = vmatprep.mubr.bf16.mxu1 %v1458_v2 }
  0xa1   :  { %724 = vmatmul.mubr.bf16.gmra.mrb[48].mxu0 %v1460_v3  ;;  %836 = vmatmul.mubr.bf16.gmra.mrb[48].mxu1 %v1461_v4 }
  0xa2   :  { %731 = vmatprep.mubr.bf16.mxu0 %v1462_v5  ;;  %843 = vmatprep.mubr.bf16.mxu1 %v1464_v6 }
  0xa9   :  { %732 = vmatmul.mubr.bf16.gmra.mrb[52].mxu0 %v1466_v7  ;;  %844 = vmatmul.mubr.bf16.gmra.mrb[52].mxu1 %v1467_v8 }
 0x114   :  { %v629_v10 = vpop.f32.mrb[0].mxu0  ;;  %v741_v12 = vpop.f32.mrb[0].mxu1 }
 0x115   :  { %v1028_v13 = vmul.f32 %v1740_v9, %v629_v10  ;;  %v1056_v14 = vmul.f32 %v1740_v9, %v741_v12  ;;  %v631_v15 = vpop.f32.mrb[1].mxu0  ;;  %v743_v16 = vpop.f32.mrb[1].mxu1 }
 0x116   :  { %v632_v17 = vpop.f32.mrb[2].mxu0  ;;  %v744_v18 = vpop.f32.mrb[2].mxu1 }
 0x117   :  { %v1089_v19 = vadd.f32 %v1745_v11, %v1028_v13  ;;  %v1117_v20 = vadd.f32 %v1745_v11, %v1056_v14  ;;  %v1029_v21 = vmul.f32 %v1740_v9, %v632_v17  ;;  %v1057_v22 = vmul.f32 %v1740_v9, %v744_v18  ;;  %v634_v23 = vpop.f32.mrb[3].mxu0  ;;  %v746_v24 = vpop.f32.mrb[3].mxu1 }
 0x119   :  { %v1145_v25 = vmax.f32 %v1089_v19, 0.0  ;;  %v1173_v26 = vmax.f32 %v1117_v20, 0.0  ;;  %v1090_v27 = vadd.f32 %v1745_v11, %v1029_v21  ;;  %v1118_v28 = vadd.f32 %v1745_v11, %v1057_v22 }
 0x11b   :  { %1201 = vst [vmem:[%s2030_s3] sm:$0xff] %v1145_v25  ;;  %1229 = vst [vmem:[%s2030_s3 + $0xe0] sm:$0xff] %v1173_v26  ;;  %v1146_v29 = vmax.f32 %v1090_v27, 0.0  ;;  %v1174_v30 = vmax.f32 %v1118_v28, 0.0 }
 0x11c   :  { %v637_v31 = vpop.f32.mrb[4].mxu0  ;;  %v749_v32 = vpop.f32.mrb[4].mxu1 }
 0x11d   :  { %1202 = vst [vmem:[%s2030_s3 + $0x8] sm:$0xff] %v1146_v29  ;;  %1230 = vst [vmem:[%s2030_s3 + $0xe8] sm:$0xff] %v1174_v30  ;;  %v1030_v33 = vmul.f32 %v1740_v9, %v637_v31  ;;  %v1058_v34 = vmul.f32 %v1740_v9, %v749_v32  ;;  %v639_v35 = vpop.f32.mrb[5].mxu0  ;;  %v751_v36 = vpop.f32.mrb[5].mxu1 }
 0x11e   :  { %v640_v37 = vpop.f32.mrb[6].mxu0  ;;  %v752_v38 = vpop.f32.mrb[6].mxu1 }
 0x11f   :  { %v1091_v39 = vadd.f32 %v1745_v11, %v1030_v33  ;;  %v1119_v40 = vadd.f32 %v1745_v11, %v1058_v34  ;;  %v1031_v41 = vmul.f32 %v1740_v9, %v640_v37  ;;  %v1059_v42 = vmul.f32 %v1740_v9, %v752_v38  ;;  %v642_v43 = vpop.f32.mrb[7].mxu0  ;;  %v754_v44 = vpop.f32.mrb[7].mxu1 }
 0x121   :  { %v1147_v45 = vmax.f32 %v1091_v39, 0.0  ;;  %v1175_v46 = vmax.f32 %v1119_v40, 0.0  ;;  %v1092_v47 = vadd.f32 %v1745_v11, %v1031_v41  ;;  %v1120_v48 = vadd.f32 %v1745_v11, %v1059_v42 }
 0x123   :  { %1203 = vst [vmem:[%s2030_s3 + $0x10] sm:$0xff] %v1147_v45  ;;  %1231 = vst [vmem:[%s2030_s3 + $0xf0] sm:$0xff] %v1175_v46  ;;  %v1148_v49 = vmax.f32 %v1092_v47, 0.0  ;;  %v1176_v50 = vmax.f32 %v1120_v48, 0.0 }
 0x124   :  { %v645_v51 = vpop.f32.mrb[8].mxu0  ;;  %v757_v52 = vpop.f32.mrb[8].mxu1 }
 0x125   :  { %1204 = vst [vmem:[%s2030_s3 + $0x18] sm:$0xff] %v1148_v49  ;;  %1232 = vst [vmem:[%s2030_s3 + $0xf8] sm:$0xff] %v1176_v50  ;;  %v1032_v53 = vmul.f32 %v1740_v9, %v645_v51  ;;  %v1060_v54 = vmul.f32 %v1740_v9, %v757_v52  ;;  %v647_v55 = vpop.f32.mrb[9].mxu0  ;;  %v759_v56 = vpop.f32.mrb[9].mxu1 }
 0x126   :  { %v648_v57 = vpop.f32.mrb[10].mxu0  ;;  %v760_v58 = vpop.f32.mrb[10].mxu1 }
 0x127   :  { %v1093_v59 = vadd.f32 %v1745_v11, %v1032_v53  ;;  %v1121_v60 = vadd.f32 %v1745_v11, %v1060_v54  ;;  %v1033_v61 = vmul.f32 %v1740_v9, %v648_v57  ;;  %v1061_v62 = vmul.f32 %v1740_v9, %v760_v58  ;;  %v650_v63 = vpop.f32.mrb[11].mxu0  ;;  %v762_v0 = vpop.f32.mrb[11].mxu1 }
 0x129   :  { %v1149_v1 = vmax.f32 %v1093_v59, 0.0  ;;  %v1177_v2 = vmax.f32 %v1121_v60, 0.0  ;;  %v1094_v3 = vadd.f32 %v1745_v11, %v1033_v61  ;;  %v1122_v4 = vadd.f32 %v1745_v11, %v1061_v62 }
 0x12b   :  { %1205 = vst [vmem:[%s2030_s3 + $0x20] sm:$0xff] %v1149_v1  ;;  %1233 = vst [vmem:[%s2030_s3 + $0x100] sm:$0xff] %v1177_v2  ;;  %v1150_v5 = vmax.f32 %v1094_v3, 0.0  ;;  %v1178_v6 = vmax.f32 %v1122_v4, 0.0 }
 0x12c   :  { %v653_v7 = vpop.f32.mrb[12].mxu0  ;;  %v765_v8 = vpop.f32.mrb[12].mxu1 }
 0x12d   :  { %1206 = vst [vmem:[%s2030_s3 + $0x28] sm:$0xff] %v1150_v5  ;;  %1234 = vst [vmem:[%s2030_s3 + $0x108] sm:$0xff] %v1178_v6  ;;  %v1034_v10 = vmul.f32 %v1740_v9, %v653_v7  ;;  %v1062_v12 = vmul.f32 %v1740_v9, %v765_v8  ;;  %v655_v13 = vpop.f32.mrb[13].mxu0  ;;  %v767_v14 = vpop.f32.mrb[13].mxu1 }
 0x12e   :  { %v656_v15 = vpop.f32.mrb[14].mxu0  ;;  %v768_v16 = vpop.f32.mrb[14].mxu1 }
 0x12f   :  { %v1095_v17 = vadd.f32 %v1745_v11, %v1034_v10  ;;  %v1123_v18 = vadd.f32 %v1745_v11, %v1062_v12  ;;  %v1035_v19 = vmul.f32 %v1740_v9, %v656_v15  ;;  %v1063_v20 = vmul.f32 %v1740_v9, %v768_v16  ;;  %v658_v21 = vpop.f32.mrb[15].mxu0  ;;  %v770_v22 = vpop.f32.mrb[15].mxu1 }
 0x131   :  { %v1151_v23 = vmax.f32 %v1095_v17, 0.0  ;;  %v1179_v24 = vmax.f32 %v1123_v18, 0.0  ;;  %v1096_v25 = vadd.f32 %v1745_v11, %v1035_v19  ;;  %v1124_v26 = vadd.f32 %v1745_v11, %v1063_v20 }
 0x133   :  { %1207 = vst [vmem:[%s2030_s3 + $0x30] sm:$0xff] %v1151_v23  ;;  %1235 = vst [vmem:[%s2030_s3 + $0x110] sm:$0xff] %v1179_v24  ;;  %v1152_v27 = vmax.f32 %v1096_v25, 0.0  ;;  %v1180_v28 = vmax.f32 %v1124_v26, 0.0 }
 0x134   :  { %v661_v29 = vpop.f32.mrb[16].mxu0  ;;  %v773_v30 = vpop.f32.mrb[16].mxu1 }
 0x135   :  { %1208 = vst [vmem:[%s2030_s3 + $0x38] sm:$0xff] %v1152_v27  ;;  %1236 = vst [vmem:[%s2030_s3 + $0x118] sm:$0xff] %v1180_v28  ;;  %v1036_v31 = vmul.f32 %v1740_v9, %v661_v29  ;;  %v1064_v32 = vmul.f32 %v1740_v9, %v773_v30  ;;  %v663_v33 = vpop.f32.mrb[17].mxu0  ;;  %v775_v34 = vpop.f32.mrb[17].mxu1 }
 0x136   :  { %v664_v35 = vpop.f32.mrb[18].mxu0  ;;  %v776_v36 = vpop.f32.mrb[18].mxu1 }
 0x137   :  { %v1097_v37 = vadd.f32 %v1745_v11, %v1036_v31  ;;  %v1125_v38 = vadd.f32 %v1745_v11, %v1064_v32  ;;  %v1037_v39 = vmul.f32 %v1740_v9, %v664_v35  ;;  %v1065_v40 = vmul.f32 %v1740_v9, %v776_v36  ;;  %v666_v41 = vpop.f32.mrb[19].mxu0  ;;  %v778_v42 = vpop.f32.mrb[19].mxu1 }
 0x139   :  { %v1153_v43 = vmax.f32 %v1097_v37, 0.0  ;;  %v1181_v44 = vmax.f32 %v1125_v38, 0.0  ;;  %v1098_v45 = vadd.f32 %v1745_v11, %v1037_v39  ;;  %v1126_v46 = vadd.f32 %v1745_v11, %v1065_v40 }
 0x13b   :  { %1209 = vst [vmem:[%s2030_s3 + $0x40] sm:$0xff] %v1153_v43  ;;  %1237 = vst [vmem:[%s2030_s3 + $0x120] sm:$0xff] %v1181_v44  ;;  %v1154_v47 = vmax.f32 %v1098_v45, 0.0  ;;  %v1182_v48 = vmax.f32 %v1126_v46, 0.0 }
 0x13c   :  { %v669_v49 = vpop.f32.mrb[20].mxu0  ;;  %v781_v50 = vpop.f32.mrb[20].mxu1 }
 0x13d   :  { %1210 = vst [vmem:[%s2030_s3 + $0x48] sm:$0xff] %v1154_v47  ;;  %1238 = vst [vmem:[%s2030_s3 + $0x128] sm:$0xff] %v1182_v48  ;;  %v1038_v51 = vmul.f32 %v1740_v9, %v669_v49  ;;  %v1066_v52 = vmul.f32 %v1740_v9, %v781_v50  ;;  %v671_v53 = vpop.f32.mrb[21].mxu0  ;;  %v783_v54 = vpop.f32.mrb[21].mxu1 }
 0x13e   :  { %v672_v55 = vpop.f32.mrb[22].mxu0  ;;  %v784_v56 = vpop.f32.mrb[22].mxu1 }
 0x13f   :  { %v1099_v57 = vadd.f32 %v1745_v11, %v1038_v51  ;;  %v1127_v58 = vadd.f32 %v1745_v11, %v1066_v52  ;;  %v1039_v59 = vmul.f32 %v1740_v9, %v672_v55  ;;  %v1067_v60 = vmul.f32 %v1740_v9, %v784_v56  ;;  %v674_v61 = vpop.f32.mrb[23].mxu0  ;;  %v786_v62 = vpop.f32.mrb[23].mxu1 }
 0x141   :  { %v1155_v63 = vmax.f32 %v1099_v57, 0.0  ;;  %v1183_v0 = vmax.f32 %v1127_v58, 0.0  ;;  %v1100_v1 = vadd.f32 %v1745_v11, %v1039_v59  ;;  %v1128_v2 = vadd.f32 %v1745_v11, %v1067_v60 }
 0x143   :  { %1211 = vst [vmem:[%s2030_s3 + $0x50] sm:$0xff] %v1155_v63  ;;  %1239 = vst [vmem:[%s2030_s3 + $0x130] sm:$0xff] %v1183_v0  ;;  %v1156_v3 = vmax.f32 %v1100_v1, 0.0  ;;  %v1184_v4 = vmax.f32 %v1128_v2, 0.0 }
 0x144   :  { %v677_v5 = vpop.f32.mrb[24].mxu0  ;;  %v789_v6 = vpop.f32.mrb[24].mxu1 }
 0x145   :  { %1212 = vst [vmem:[%s2030_s3 + $0x58] sm:$0xff] %v1156_v3  ;;  %1240 = vst [vmem:[%s2030_s3 + $0x138] sm:$0xff] %v1184_v4  ;;  %v1040_v7 = vmul.f32 %v1740_v9, %v677_v5  ;;  %v1068_v8 = vmul.f32 %v1740_v9, %v789_v6  ;;  %v679_v10 = vpop.f32.mrb[25].mxu0  ;;  %v791_v12 = vpop.f32.mrb[25].mxu1 }
 0x146   :  { %v680_v13 = vpop.f32.mrb[26].mxu0  ;;  %v792_v14 = vpop.f32.mrb[26].mxu1 }
 0x147   :  { %v1101_v15 = vadd.f32 %v1745_v11, %v1040_v7  ;;  %v1129_v16 = vadd.f32 %v1745_v11, %v1068_v8  ;;  %v1041_v17 = vmul.f32 %v1740_v9, %v680_v13  ;;  %v1069_v18 = vmul.f32 %v1740_v9, %v792_v14  ;;  %v682_v19 = vpop.f32.mrb[27].mxu0  ;;  %v794_v20 = vpop.f32.mrb[27].mxu1 }
 0x149   :  { %v1157_v21 = vmax.f32 %v1101_v15, 0.0  ;;  %v1185_v22 = vmax.f32 %v1129_v16, 0.0  ;;  %v1102_v23 = vadd.f32 %v1745_v11, %v1041_v17  ;;  %v1130_v24 = vadd.f32 %v1745_v11, %v1069_v18 }
 0x14b   :  { %1213 = vst [vmem:[%s2030_s3 + $0x60] sm:$0xff] %v1157_v21  ;;  %1241 = vst [vmem:[%s2030_s3 + $0x140] sm:$0xff] %v1185_v22  ;;  %v1158_v25 = vmax.f32 %v1102_v23, 0.0  ;;  %v1186_v26 = vmax.f32 %v1130_v24, 0.0 }
 0x14c   :  { %v685_v27 = vpop.f32.mrb[28].mxu0  ;;  %v797_v28 = vpop.f32.mrb[28].mxu1 }
 0x14d   :  { %1214 = vst [vmem:[%s2030_s3 + $0x68] sm:$0xff] %v1158_v25  ;;  %1242 = vst [vmem:[%s2030_s3 + $0x148] sm:$0xff] %v1186_v26  ;;  %v1042_v29 = vmul.f32 %v1740_v9, %v685_v27  ;;  %v1070_v30 = vmul.f32 %v1740_v9, %v797_v28  ;;  %v687_v31 = vpop.f32.mrb[29].mxu0  ;;  %v799_v32 = vpop.f32.mrb[29].mxu1 }
 0x14e   :  { %v688_v33 = vpop.f32.mrb[30].mxu0  ;;  %v800_v34 = vpop.f32.mrb[30].mxu1 }
 0x14f   :  { %v1103_v35 = vadd.f32 %v1745_v11, %v1042_v29  ;;  %v1131_v36 = vadd.f32 %v1745_v11, %v1070_v30  ;;  %v1043_v37 = vmul.f32 %v1740_v9, %v688_v33  ;;  %v1071_v38 = vmul.f32 %v1740_v9, %v800_v34  ;;  %v690_v39 = vpop.f32.mrb[31].mxu0  ;;  %v802_v40 = vpop.f32.mrb[31].mxu1 }
 0x151   :  { %v1159_v41 = vmax.f32 %v1103_v35, 0.0  ;;  %v1187_v42 = vmax.f32 %v1131_v36, 0.0  ;;  %v1104_v43 = vadd.f32 %v1745_v11, %v1043_v37  ;;  %v1132_v44 = vadd.f32 %v1745_v11, %v1071_v38 }
 0x153   :  { %1215 = vst [vmem:[%s2030_s3 + $0x70] sm:$0xff] %v1159_v41  ;;  %1243 = vst [vmem:[%s2030_s3 + $0x150] sm:$0xff] %v1187_v42  ;;  %v1160_v45 = vmax.f32 %v1104_v43, 0.0  ;;  %v1188_v46 = vmax.f32 %v1132_v44, 0.0 }
 0x154   :  { %v693_v47 = vpop.f32.mrb[32].mxu0  ;;  %v805_v48 = vpop.f32.mrb[32].mxu1 }
 0x155   :  { %1216 = vst [vmem:[%s2030_s3 + $0x78] sm:$0xff] %v1160_v45  ;;  %1244 = vst [vmem:[%s2030_s3 + $0x158] sm:$0xff] %v1188_v46  ;;  %v1044_v49 = vmul.f32 %v1740_v9, %v693_v47  ;;  %v1072_v50 = vmul.f32 %v1740_v9, %v805_v48  ;;  %v695_v51 = vpop.f32.mrb[33].mxu0  ;;  %v807_v52 = vpop.f32.mrb[33].mxu1 }
 0x156   :  { %v696_v53 = vpop.f32.mrb[34].mxu0  ;;  %v808_v54 = vpop.f32.mrb[34].mxu1 }
 0x157   :  { %v1105_v55 = vadd.f32 %v1745_v11, %v1044_v49  ;;  %v1133_v56 = vadd.f32 %v1745_v11, %v1072_v50  ;;  %v1045_v57 = vmul.f32 %v1740_v9, %v696_v53  ;;  %v1073_v58 = vmul.f32 %v1740_v9, %v808_v54  ;;  %v698_v59 = vpop.f32.mrb[35].mxu0  ;;  %v810_v60 = vpop.f32.mrb[35].mxu1 }
 0x159   :  { %v1161_v61 = vmax.f32 %v1105_v55, 0.0  ;;  %v1189_v62 = vmax.f32 %v1133_v56, 0.0  ;;  %v1106_v63 = vadd.f32 %v1745_v11, %v1045_v57  ;;  %v1134_v0 = vadd.f32 %v1745_v11, %v1073_v58 }
 0x15b   :  { %1217 = vst [vmem:[%s2030_s3 + $0x80] sm:$0xff] %v1161_v61  ;;  %1245 = vst [vmem:[%s2030_s3 + $0x160] sm:$0xff] %v1189_v62  ;;  %v1162_v1 = vmax.f32 %v1106_v63, 0.0  ;;  %v1190_v2 = vmax.f32 %v1134_v0, 0.0 }
 0x15c   :  { %v701_v3 = vpop.f32.mrb[36].mxu0  ;;  %v813_v4 = vpop.f32.mrb[36].mxu1 }
 0x15d   :  { %1218 = vst [vmem:[%s2030_s3 + $0x88] sm:$0xff] %v1162_v1  ;;  %1246 = vst [vmem:[%s2030_s3 + $0x168] sm:$0xff] %v1190_v2  ;;  %v1046_v5 = vmul.f32 %v1740_v9, %v701_v3  ;;  %v1074_v6 = vmul.f32 %v1740_v9, %v813_v4  ;;  %v703_v7 = vpop.f32.mrb[37].mxu0  ;;  %v815_v8 = vpop.f32.mrb[37].mxu1 }
 0x15e   :  { %v704_v10 = vpop.f32.mrb[38].mxu0  ;;  %v816_v12 = vpop.f32.mrb[38].mxu1 }
 0x15f   :  { %v1107_v13 = vadd.f32 %v1745_v11, %v1046_v5  ;;  %v1135_v14 = vadd.f32 %v1745_v11, %v1074_v6  ;;  %v1047_v15 = vmul.f32 %v1740_v9, %v704_v10  ;;  %v1075_v16 = vmul.f32 %v1740_v9, %v816_v12  ;;  %v706_v17 = vpop.f32.mrb[39].mxu0  ;;  %v818_v18 = vpop.f32.mrb[39].mxu1 }
 0x161   :  { %v1163_v19 = vmax.f32 %v1107_v13, 0.0  ;;  %v1191_v20 = vmax.f32 %v1135_v14, 0.0  ;;  %v1108_v21 = vadd.f32 %v1745_v11, %v1047_v15  ;;  %v1136_v22 = vadd.f32 %v1745_v11, %v1075_v16 }
 0x163   :  { %1219 = vst [vmem:[%s2030_s3 + $0x90] sm:$0xff] %v1163_v19  ;;  %1247 = vst [vmem:[%s2030_s3 + $0x170] sm:$0xff] %v1191_v20  ;;  %v1164_v23 = vmax.f32 %v1108_v21, 0.0  ;;  %v1192_v24 = vmax.f32 %v1136_v22, 0.0 }
 0x164   :  { %v709_v25 = vpop.f32.mrb[40].mxu0  ;;  %v821_v26 = vpop.f32.mrb[40].mxu1 }
 0x165   :  { %1220 = vst [vmem:[%s2030_s3 + $0x98] sm:$0xff] %v1164_v23  ;;  %1248 = vst [vmem:[%s2030_s3 + $0x178] sm:$0xff] %v1192_v24  ;;  %v1048_v27 = vmul.f32 %v1740_v9, %v709_v25  ;;  %v1076_v28 = vmul.f32 %v1740_v9, %v821_v26  ;;  %v711_v29 = vpop.f32.mrb[41].mxu0  ;;  %v823_v30 = vpop.f32.mrb[41].mxu1 }
 0x166   :  { %v712_v31 = vpop.f32.mrb[42].mxu0  ;;  %v824_v32 = vpop.f32.mrb[42].mxu1 }
 0x167   :  { %v1109_v33 = vadd.f32 %v1745_v11, %v1048_v27  ;;  %v1137_v34 = vadd.f32 %v1745_v11, %v1076_v28  ;;  %v1049_v35 = vmul.f32 %v1740_v9, %v712_v31  ;;  %v1077_v36 = vmul.f32 %v1740_v9, %v824_v32  ;;  %v714_v37 = vpop.f32.mrb[43].mxu0  ;;  %v826_v38 = vpop.f32.mrb[43].mxu1 }
 0x169   :  { %v1165_v39 = vmax.f32 %v1109_v33, 0.0  ;;  %v1193_v40 = vmax.f32 %v1137_v34, 0.0  ;;  %v1110_v41 = vadd.f32 %v1745_v11, %v1049_v35  ;;  %v1138_v42 = vadd.f32 %v1745_v11, %v1077_v36 }
 0x16b   :  { %1221 = vst [vmem:[%s2030_s3 + $0xa0] sm:$0xff] %v1165_v39  ;;  %1249 = vst [vmem:[%s2030_s3 + $0x180] sm:$0xff] %v1193_v40  ;;  %v1166_v43 = vmax.f32 %v1110_v41, 0.0  ;;  %v1194_v44 = vmax.f32 %v1138_v42, 0.0 }
 0x16c   :  { %v717_v45 = vpop.f32.mrb[44].mxu0  ;;  %v829_v46 = vpop.f32.mrb[44].mxu1 }
 0x16d   :  { %1222 = vst [vmem:[%s2030_s3 + $0xa8] sm:$0xff] %v1166_v43  ;;  %1250 = vst [vmem:[%s2030_s3 + $0x188] sm:$0xff] %v1194_v44  ;;  %v1050_v47 = vmul.f32 %v1740_v9, %v717_v45  ;;  %v1078_v48 = vmul.f32 %v1740_v9, %v829_v46  ;;  %v719_v49 = vpop.f32.mrb[45].mxu0  ;;  %v831_v50 = vpop.f32.mrb[45].mxu1 }
 0x16e   :  { %v720_v51 = vpop.f32.mrb[46].mxu0  ;;  %v832_v52 = vpop.f32.mrb[46].mxu1 }
 0x16f   :  { %v1111_v53 = vadd.f32 %v1745_v11, %v1050_v47  ;;  %v1139_v54 = vadd.f32 %v1745_v11, %v1078_v48  ;;  %v1051_v55 = vmul.f32 %v1740_v9, %v720_v51  ;;  %v1079_v56 = vmul.f32 %v1740_v9, %v832_v52  ;;  %v722_v57 = vpop.f32.mrb[47].mxu0  ;;  %v834_v58 = vpop.f32.mrb[47].mxu1 }
 0x171   :  { %v1167_v59 = vmax.f32 %v1111_v53, 0.0  ;;  %v1195_v60 = vmax.f32 %v1139_v54, 0.0  ;;  %v1112_v61 = vadd.f32 %v1745_v11, %v1051_v55  ;;  %v1140_v62 = vadd.f32 %v1745_v11, %v1079_v56 }
 0x173   :  { %1223 = vst [vmem:[%s2030_s3 + $0xb0] sm:$0xff] %v1167_v59  ;;  %1251 = vst [vmem:[%s2030_s3 + $0x190] sm:$0xff] %v1195_v60  ;;  %v1168_v63 = vmax.f32 %v1112_v61, 0.0  ;;  %v1196_v0 = vmax.f32 %v1140_v62, 0.0 }
 0x174   :  { %v725_v1 = vpop.f32.mrb[48].mxu0  ;;  %v837_v2 = vpop.f32.mrb[48].mxu1 }
 0x175   :  { %1224 = vst [vmem:[%s2030_s3 + $0xb8] sm:$0xff] %v1168_v63  ;;  %1252 = vst [vmem:[%s2030_s3 + $0x198] sm:$0xff] %v1196_v0  ;;  %v1052_v3 = vmul.f32 %v1740_v9, %v725_v1  ;;  %v1080_v4 = vmul.f32 %v1740_v9, %v837_v2  ;;  %v727_v5 = vpop.f32.mrb[49].mxu0  ;;  %v839_v6 = vpop.f32.mrb[49].mxu1 }
 0x176   :  { %v728_v7 = vpop.f32.mrb[50].mxu0  ;;  %v840_v8 = vpop.f32.mrb[50].mxu1 }
 0x177   :  { %v1113_v10 = vadd.f32 %v1745_v11, %v1052_v3  ;;  %v1141_v12 = vadd.f32 %v1745_v11, %v1080_v4  ;;  %v1053_v13 = vmul.f32 %v1740_v9, %v728_v7  ;;  %v1081_v14 = vmul.f32 %v1740_v9, %v840_v8  ;;  %v730_v15 = vpop.f32.mrb[51].mxu0  ;;  %v842_v16 = vpop.f32.mrb[51].mxu1 }
 0x179   :  { %v1169_v17 = vmax.f32 %v1113_v10, 0.0  ;;  %v1197_v18 = vmax.f32 %v1141_v12, 0.0  ;;  %v1114_v19 = vadd.f32 %v1745_v11, %v1053_v13  ;;  %v1142_v20 = vadd.f32 %v1745_v11, %v1081_v14 }
 0x17b   :  { %1225 = vst [vmem:[%s2030_s3 + $0xc0] sm:$0xff] %v1169_v17  ;;  %1253 = vst [vmem:[%s2030_s3 + $0x1a0] sm:$0xff] %v1197_v18  ;;  %v1170_v21 = vmax.f32 %v1114_v19, 0.0  ;;  %v1198_v22 = vmax.f32 %v1142_v20, 0.0 }
 0x17c   :  { %v733_v23 = vpop.f32.mrb[52].mxu0  ;;  %v845_v24 = vpop.f32.mrb[52].mxu1 }
 0x17d   :  { %1226 = vst [vmem:[%s2030_s3 + $0xc8] sm:$0xff] %v1170_v21  ;;  %1254 = vst [vmem:[%s2030_s3 + $0x1a8] sm:$0xff] %v1198_v22  ;;  %v1054_v25 = vmul.f32 %v1740_v9, %v733_v23  ;;  %v1082_v26 = vmul.f32 %v1740_v9, %v845_v24  ;;  %v735_v27 = vpop.f32.mrb[53].mxu0  ;;  %v847_v28 = vpop.f32.mrb[53].mxu1 }
 0x17e   :  { %v736_v29 = vpop.f32.mrb[54].mxu0  ;;  %v848_v30 = vpop.f32.mrb[54].mxu1 }
 0x17f   :  { %v1115_v31 = vadd.f32 %v1745_v11, %v1054_v25  ;;  %v1143_v32 = vadd.f32 %v1745_v11, %v1082_v26  ;;  %v1055_v33 = vmul.f32 %v1740_v9, %v736_v29  ;;  %v1083_v34 = vmul.f32 %v1740_v9, %v848_v30  ;;  %v738_v35 = vpop.f32.mrb[55].mxu0  ;;  %v850_v36 = vpop.f32.mrb[55].mxu1 }
 0x181   :  { %v1171_v37 = vmax.f32 %v1115_v31, 0.0  ;;  %v1199_v38 = vmax.f32 %v1143_v32, 0.0  ;;  %v1116_v39 = vadd.f32 %v1745_v11, %v1055_v33  ;;  %v1144_v40 = vadd.f32 %v1745_v11, %v1083_v34 }
 0x183   :  { %1227 = vst [vmem:[%s2030_s3 + $0xd0] sm:$0xff] %v1171_v37  ;;  %1255 = vst [vmem:[%s2030_s3 + $0x1b0] sm:$0xff] %v1199_v38  ;;  %v1172_v41 = vmax.f32 %v1116_v39, 0.0  ;;  %v1200_v42 = vmax.f32 %v1144_v40, 0.0 }
 0x185   :  { %1228 = vst [vmem:[%s2030_s3 + $0xd8] sm:$0xff] %v1172_v41  ;;  %1256 = vst [vmem:[%s2030_s3 + $0x1b8] sm:$0xff] %v1200_v42 }

// kernel: pspnet_forward.41
= control target key start
LH: loop header
LB: loop body
LE: loop exit
PB: predicated region body
PF: predicated region fallthrough
CT: control target
= control target key end

     0   :  { %s643_s1 = inlined_call_operand.vmem [shape: bf16[128,128], index: 1, kind: input, shape index: {}]   ;;  %s644_s0 = inlined_call_operand.vmem [shape: bf16[128,128], index: 0, kind: input, shape index: {}]   ;;  %s645_s2 = inlined_call_operand.vmem [shape: f32[8,128], index: 2, kind: input, shape index: {}]   ;;  %s646_s3 = inlined_call_operand.vmem [shape: f32[128,128], index: 3, kind: output, shape index: {}]  }
   0x1   :  { %v487_v0 = vld [vmem:[%s643_s1] sm:$0xff]   ;;  %v488_v1 = vld [vmem:[%s643_s1 + $0x8] sm:$0xff]   ;;  %v489_v2 = vld [vmem:[%s643_s1 + $0x10] sm:$0xff]  }
   0x2   :  { %439 = vmatprep.subr.bf16.mxu0 %v487_v0  ;;  %471 = vmatprep.subr.bf16.mxu1 %v487_v0  ;;  %v490_v3 = vld [vmem:[%s643_s1 + $0x18] sm:$0xff]   ;;  %v495_v4 = vld [vmem:[%s644_s0] sm:$0xff]   ;;  %v492_v7 = vld [vmem:[%s643_s1 + $0x28] sm:$0xff]  }
   0x3   :  { %440 = vmatpush3.bf16.msra.mxu0 %v487_v0  ;;  %479 = vmatpush3.bf16.msra.mxu1 %v487_v0  ;;  %v496_v5 = vld [vmem:[%s644_s0 + $0x20] sm:$0xff]   ;;  %v493_v8 = vld [vmem:[%s643_s1 + $0x30] sm:$0xff]   ;;  %v494_v9 = vld [vmem:[%s643_s1 + $0x38] sm:$0xff]  }
   0x4   :  { %441 = vmatprep.subr.bf16.mxu0 %v488_v1  ;;  %472 = vmatprep.subr.bf16.mxu1 %v488_v1  ;;  %v491_v6 = vld [vmem:[%s643_s1 + $0x20] sm:$0xff]   ;;  %v497_v10 = vld [vmem:[%s644_s0 + $0x8] sm:$0xff]   ;;  %v499_v12 = vld [vmem:[%s644_s0 + $0x10] sm:$0xff]  }
   0x5   :  { %455 = vmatprep.mubr.bf16.mxu0 %v495_v4  ;;  %463 = vmatprep.mubr.bf16.mxu1 %v496_v5  ;;  %v498_v11 = vld [vmem:[%s644_s0 + $0x28] sm:$0xff]   ;;  %v500_v13 = vld [vmem:[%s644_s0 + $0x30] sm:$0xff]   ;;  %v501_v14 = vld [vmem:[%s644_s0 + $0x18] sm:$0xff]  }
   0x6   :  { %v502_v15 = vld [vmem:[%s644_s0 + $0x38] sm:$0xff]   ;;  %v421_v16 = vld [vmem:[%s645_s2] ss:$0 sm:$0xff]  ;;  %v577_v18 = vld [vmem:[%s645_s2 + $0x1] ss:$0 sm:$0xff] }
   0x7   :  { %442 = vmatpush3.bf16.msra.mxu0 %v488_v1  ;;  %480 = vmatpush3.bf16.msra.mxu1 %v488_v1 }
   0x8   :  { %443 = vmatprep.subr.bf16.mxu0 %v489_v2  ;;  %473 = vmatprep.subr.bf16.mxu1 %v489_v2 }
   0xb   :  { %444 = vmatpush3.bf16.msra.mxu0 %v489_v2  ;;  %481 = vmatpush3.bf16.msra.mxu1 %v489_v2 }
   0xc   :  { %445 = vmatprep.subr.bf16.mxu0 %v490_v3  ;;  %474 = vmatprep.subr.bf16.mxu1 %v490_v3 }
   0xf   :  { %446 = vmatpush3.bf16.msra.mxu0 %v490_v3  ;;  %482 = vmatpush3.bf16.msra.mxu1 %v490_v3 }
  0x10   :  { %447 = vmatprep.subr.bf16.mxu0 %v491_v6  ;;  %475 = vmatprep.subr.bf16.mxu1 %v491_v6 }
  0x13   :  { %448 = vmatpush3.bf16.msra.mxu0 %v491_v6  ;;  %483 = vmatpush3.bf16.msra.mxu1 %v491_v6 }
  0x14   :  { %449 = vmatprep.subr.bf16.mxu0 %v492_v7  ;;  %476 = vmatprep.subr.bf16.mxu1 %v492_v7 }
  0x17   :  { %450 = vmatpush3.bf16.msra.mxu0 %v492_v7  ;;  %484 = vmatpush3.bf16.msra.mxu1 %v492_v7 }
  0x18   :  { %451 = vmatprep.subr.bf16.mxu0 %v493_v8  ;;  %477 = vmatprep.subr.bf16.mxu1 %v493_v8 }
  0x1b   :  { %452 = vmatpush3.bf16.msra.mxu0 %v493_v8  ;;  %485 = vmatpush3.bf16.msra.mxu1 %v493_v8 }
  0x1c   :  { %453 = vmatprep.subr.bf16.mxu0 %v494_v9  ;;  %478 = vmatprep.subr.bf16.mxu1 %v494_v9 }
  0x1f   :  { %454 = vmatpush3.bf16.msra.mxu0 %v494_v9  ;;  %486 = vmatpush3.bf16.msra.mxu1 %v494_v9 }
  0x22   :  { %456 = vmatmul.mubr.bf16.vlgmr.msra.gmra.mrb[0].mxu0 %v497_v10  ;;  %464 = vmatmul.mubr.bf16.vlgmr.msra.gmra.mrb[0].mxu1 %v498_v11 }
  0x23   :  { %459 = vmatprep.mubr.bf16.mxu0 %v499_v12  ;;  %467 = vmatprep.mubr.bf16.mxu1 %v500_v13 }
  0x2a   :  { %460 = vmatmul.mubr.bf16.gmra.mrb[4].mxu0 %v501_v14  ;;  %468 = vmatmul.mubr.bf16.gmra.mrb[4].mxu1 %v502_v15 }
  0xf5   :  { %v457_v17 = vpop.f32.mrb[0].mxu0  ;;  %v465_v19 = vpop.f32.mrb[0].mxu1 }
  0xf6   :  { %v334_v20 = vmul.f32 %v457_v17, %v421_v16  ;;  %v342_v21 = vmul.f32 %v465_v19, %v421_v16  ;;  %v213_v22 = vpop.f32.mrb[1].mxu0  ;;  %v245_v23 = vpop.f32.mrb[1].mxu1 }
  0xf7   :  { %v332_v24 = vmul.f32 %v421_v16, %v213_v22  ;;  %v340_v25 = vmul.f32 %v421_v16, %v245_v23  ;;  %v458_v26 = vpop.f32.mrb[2].mxu0  ;;  %v466_v27 = vpop.f32.mrb[2].mxu1 }
  0xf8   :  { %v355_v28 = vadd.f32 %v577_v18, %v334_v20  ;;  %v363_v29 = vadd.f32 %v577_v18, %v342_v21  ;;  %v335_v30 = vmul.f32 %v458_v26, %v421_v16  ;;  %v343_v31 = vmul.f32 %v466_v27, %v421_v16  ;;  %v216_v32 = vpop.f32.mrb[3].mxu0  ;;  %v248_v33 = vpop.f32.mrb[3].mxu1 }
  0xf9   :  { %v353_v34 = vadd.f32 %v577_v18, %v332_v24  ;;  %v361_v35 = vadd.f32 %v577_v18, %v340_v25  ;;  %v333_v36 = vmul.f32 %v421_v16, %v216_v32  ;;  %v341_v37 = vmul.f32 %v421_v16, %v248_v33 }
  0xfa   :  { %v371_v38 = vmax.f32 %v355_v28, 0.0  ;;  %v379_v39 = vmax.f32 %v363_v29, 0.0  ;;  %v356_v40 = vadd.f32 %v577_v18, %v335_v30  ;;  %v364_v41 = vadd.f32 %v577_v18, %v343_v31 }
  0xfb   :  { %v369_v42 = vmax.f32 %v353_v34, 0.0  ;;  %v377_v43 = vmax.f32 %v361_v35, 0.0  ;;  %v354_v44 = vadd.f32 %v577_v18, %v333_v36  ;;  %v362_v45 = vadd.f32 %v577_v18, %v341_v37 }
  0xfc   :  { %387 = vst [vmem:[%s646_s3 + $0x10] sm:$0xff] %v371_v38  ;;  %395 = vst [vmem:[%s646_s3 + $0x50] sm:$0xff] %v379_v39  ;;  %v372_v46 = vmax.f32 %v356_v40, 0.0  ;;  %v380_v47 = vmax.f32 %v364_v41, 0.0 }
  0xfd   :  { %385 = vst [vmem:[%s646_s3] sm:$0xff] %v369_v42  ;;  %393 = vst [vmem:[%s646_s3 + $0x40] sm:$0xff] %v377_v43  ;;  %v370_v48 = vmax.f32 %v354_v44, 0.0  ;;  %v378_v49 = vmax.f32 %v362_v45, 0.0  ;;  %v461_v50 = vpop.f32.mrb[4].mxu0  ;;  %v469_v51 = vpop.f32.mrb[4].mxu1 }
  0xfe   :  { %388 = vst [vmem:[%s646_s3 + $0x18] sm:$0xff] %v372_v46  ;;  %396 = vst [vmem:[%s646_s3 + $0x58] sm:$0xff] %v380_v47  ;;  %v338_v52 = vmul.f32 %v461_v50, %v421_v16  ;;  %v346_v53 = vmul.f32 %v469_v51, %v421_v16  ;;  %v229_v54 = vpop.f32.mrb[5].mxu0  ;;  %v261_v55 = vpop.f32.mrb[5].mxu1 }
  0xff   :  { %386 = vst [vmem:[%s646_s3 + $0x8] sm:$0xff] %v370_v48  ;;  %394 = vst [vmem:[%s646_s3 + $0x48] sm:$0xff] %v378_v49  ;;  %v336_v56 = vmul.f32 %v421_v16, %v229_v54  ;;  %v344_v57 = vmul.f32 %v421_v16, %v261_v55  ;;  %v462_v58 = vpop.f32.mrb[6].mxu0  ;;  %v470_v59 = vpop.f32.mrb[6].mxu1 }
 0x100   :  { %v359_v60 = vadd.f32 %v577_v18, %v338_v52  ;;  %v367_v61 = vadd.f32 %v577_v18, %v346_v53  ;;  %v339_v62 = vmul.f32 %v462_v58, %v421_v16  ;;  %v347_v63 = vmul.f32 %v470_v59, %v421_v16  ;;  %v232_v0 = vpop.f32.mrb[7].mxu0  ;;  %v264_v1 = vpop.f32.mrb[7].mxu1 }
 0x101   :  { %v357_v2 = vadd.f32 %v577_v18, %v336_v56  ;;  %v365_v3 = vadd.f32 %v577_v18, %v344_v57  ;;  %v337_v4 = vmul.f32 %v421_v16, %v232_v0  ;;  %v345_v5 = vmul.f32 %v421_v16, %v264_v1 }
 0x102   :  { %v375_v6 = vmax.f32 %v359_v60, 0.0  ;;  %v383_v7 = vmax.f32 %v367_v61, 0.0  ;;  %v360_v8 = vadd.f32 %v577_v18, %v339_v62  ;;  %v368_v9 = vadd.f32 %v577_v18, %v347_v63 }
 0x103   :  { %v373_v10 = vmax.f32 %v357_v2, 0.0  ;;  %v381_v11 = vmax.f32 %v365_v3, 0.0  ;;  %v358_v12 = vadd.f32 %v577_v18, %v337_v4  ;;  %v366_v13 = vadd.f32 %v577_v18, %v345_v5 }
 0x104   :  { %391 = vst [vmem:[%s646_s3 + $0x30] sm:$0xff] %v375_v6  ;;  %399 = vst [vmem:[%s646_s3 + $0x70] sm:$0xff] %v383_v7  ;;  %v376_v14 = vmax.f32 %v360_v8, 0.0  ;;  %v384_v15 = vmax.f32 %v368_v9, 0.0 }
 0x105   :  { %389 = vst [vmem:[%s646_s3 + $0x20] sm:$0xff] %v373_v10  ;;  %397 = vst [vmem:[%s646_s3 + $0x60] sm:$0xff] %v381_v11  ;;  %v374_v16 = vmax.f32 %v358_v12, 0.0  ;;  %v382_v17 = vmax.f32 %v366_v13, 0.0 }
 0x106   :  { %392 = vst [vmem:[%s646_s3 + $0x38] sm:$0xff] %v376_v14  ;;  %400 = vst [vmem:[%s646_s3 + $0x78] sm:$0xff] %v384_v15 }
 0x107   :  { %390 = vst [vmem:[%s646_s3 + $0x28] sm:$0xff] %v374_v16  ;;  %398 = vst [vmem:[%s646_s3 + $0x68] sm:$0xff] %v382_v17 }

// kernel: pspnet_forward.42
= control target key start
LH: loop header
LB: loop body
LE: loop exit
PB: predicated region body
PF: predicated region fallthrough
CT: control target
= control target key end

     0   :  { %s861_s1 = inlined_call_operand.vmem [shape: bf16[256,128], index: 1, kind: input, shape index: {}]   ;;  %s862_s0 = inlined_call_operand.vmem [shape: bf16[128,256], index: 0, kind: input, shape index: {}]   ;;  %s863_s2 = inlined_call_operand.vmem [shape: f32[8,128], index: 2, kind: input, shape index: {}]   ;;  %s864_s3 = inlined_call_operand.vmem [shape: f32[128,128], index: 3, kind: output, shape index: {}]  }
   0x1   :  { %v615_v0 = vld [vmem:[%s861_s1 + $0x40] sm:$0xff]   ;;  %v617_v2 = vld [vmem:[%s861_s1 + $0x48] sm:$0xff]   ;;  %v619_v4 = vld [vmem:[%s861_s1 + $0x50] sm:$0xff]  }
   0x2   :  { %v616_v1 = vld [vmem:[%s861_s1] sm:$0xff]   ;;  %535 = vmatprep.subr.bf16.mxu0 %v615_v0  ;;  %599 = vmatprep.subr.bf16.mxu1 %v615_v0  ;;  %v618_v3 = vld [vmem:[%s861_s1 + $0x8] sm:$0xff]   ;;  %v620_v5 = vld [vmem:[%s861_s1 + $0x10] sm:$0xff]  }
   0x3   :  { %536 = vmatpush3.bf16.msra.mxu0 %v616_v1  ;;  %607 = vmatpush3.bf16.msra.mxu1 %v616_v1  ;;  %v621_v6 = vld [vmem:[%s861_s1 + $0x58] sm:$0xff]   ;;  %v623_v8 = vld [vmem:[%s861_s1 + $0x60] sm:$0xff]   ;;  %v625_v10 = vld [vmem:[%s861_s1 + $0x68] sm:$0xff]  }
   0x4   :  { %537 = vmatprep.subr.bf16.mxu0 %v617_v2  ;;  %600 = vmatprep.subr.bf16.mxu1 %v617_v2  ;;  %v622_v7 = vld [vmem:[%s861_s1 + $0x18] sm:$0xff]   ;;  %v624_v9 = vld [vmem:[%s861_s1 + $0x20] sm:$0xff]   ;;  %v626_v13 = vld [vmem:[%s861_s1 + $0x28] sm:$0xff]  }
   0x5   :  { %v633_v11 = vld [vmem:[%s862_s0 + $0x4] ss:$8 sps:$4 sm:$0xff]   ;;  %v627_v14 = vld [vmem:[%s861_s1 + $0x70] sm:$0xff]   ;;  %v629_v16 = vld [vmem:[%s861_s1 + $0x78] sm:$0xff]  }
   0x6   :  { %v636_v12 = vld [vmem:[%s862_s0 + $0x44] ss:$8 sps:$4 sm:$0xff]   ;;  %307 = vmatprep.mubr.bf16.mxu0 %v633_v11  ;;  %v628_v15 = vld [vmem:[%s861_s1 + $0x30] sm:$0xff]   ;;  %v630_v17 = vld [vmem:[%s861_s1 + $0x38] sm:$0xff]  }
   0x7   :  { %538 = vmatpush3.bf16.msra.mxu0 %v618_v3  ;;  %608 = vmatpush3.bf16.msra.mxu1 %v618_v3  ;;  %v631_v18 = vld [vmem:[%s862_s0] ss:$8 sps:$4 sm:$0xff]   ;;  %v637_v20 = vld [vmem:[%s862_s0 + $0x14] ss:$8 sps:$4 sm:$0xff]   ;;  %v641_v22 = vld [vmem:[%s862_s0 + $0x10] ss:$8 sps:$4 sm:$0xff]  }
   0x8   :  { %539 = vmatprep.subr.bf16.mxu0 %v619_v4  ;;  %601 = vmatprep.subr.bf16.mxu1 %v619_v4  ;;  %v634_v19 = vld [vmem:[%s862_s0 + $0x40] ss:$8 sps:$4 sm:$0xff]   ;;  %v639_v21 = vld [vmem:[%s862_s0 + $0x54] ss:$8 sps:$4 sm:$0xff]   ;;  %v642_v23 = vld [vmem:[%s862_s0 + $0x50] ss:$8 sps:$4 sm:$0xff]  }
   0x9   :  { %339 = vmatprep.mubr.bf16.mxu1 %v636_v12  ;;  %v643_v24 = vld [vmem:[%s862_s0 + $0x24] ss:$8 sps:$4 sm:$0xff]   ;;  %v647_v26 = vld [vmem:[%s862_s0 + $0x20] ss:$8 sps:$4 sm:$0xff]   ;;  %v649_v28 = vld [vmem:[%s862_s0 + $0x34] ss:$8 sps:$4 sm:$0xff]  }
   0xa   :  { %v645_v25 = vld [vmem:[%s862_s0 + $0x64] ss:$8 sps:$4 sm:$0xff]   ;;  %v648_v27 = vld [vmem:[%s862_s0 + $0x60] ss:$8 sps:$4 sm:$0xff]   ;;  %v651_v29 = vld [vmem:[%s862_s0 + $0x74] ss:$8 sps:$4 sm:$0xff]  }
   0xb   :  { %540 = vmatpush3.bf16.msra.mxu0 %v620_v5  ;;  %609 = vmatpush3.bf16.msra.mxu1 %v620_v5  ;;  %v653_v30 = vld [vmem:[%s862_s0 + $0x30] ss:$8 sps:$4 sm:$0xff]   ;;  %v774_v35 = vld [vmem:[%s863_s2] ss:$0 sm:$0xff]  ;;  %v779_v41 = vld [vmem:[%s863_s2 + $0x1] ss:$0 sm:$0xff] }
   0xc   :  { %541 = vmatprep.subr.bf16.mxu0 %v621_v6  ;;  %602 = vmatprep.subr.bf16.mxu1 %v621_v6  ;;  %v654_v31 = vld [vmem:[%s862_s0 + $0x70] ss:$8 sps:$4 sm:$0xff]  }
   0xf   :  { %542 = vmatpush3.bf16.msra.mxu0 %v622_v7  ;;  %610 = vmatpush3.bf16.msra.mxu1 %v622_v7 }
  0x10   :  { %543 = vmatprep.subr.bf16.mxu0 %v623_v8  ;;  %603 = vmatprep.subr.bf16.mxu1 %v623_v8 }
  0x13   :  { %544 = vmatpush3.bf16.msra.mxu0 %v624_v9  ;;  %611 = vmatpush3.bf16.msra.mxu1 %v624_v9 }
  0x14   :  { %545 = vmatprep.subr.bf16.mxu0 %v625_v10  ;;  %604 = vmatprep.subr.bf16.mxu1 %v625_v10 }
  0x17   :  { %546 = vmatpush3.bf16.msra.mxu0 %v626_v13  ;;  %612 = vmatpush3.bf16.msra.mxu1 %v626_v13 }
  0x18   :  { %547 = vmatprep.subr.bf16.mxu0 %v627_v14  ;;  %605 = vmatprep.subr.bf16.mxu1 %v627_v14 }
  0x1b   :  { %548 = vmatpush3.bf16.msra.mxu0 %v628_v15  ;;  %613 = vmatpush3.bf16.msra.mxu1 %v628_v15 }
  0x1c   :  { %549 = vmatprep.subr.bf16.mxu0 %v629_v16  ;;  %606 = vmatprep.subr.bf16.mxu1 %v629_v16 }
  0x1f   :  { %550 = vmatpush3.bf16.msra.mxu0 %v630_v17  ;;  %614 = vmatpush3.bf16.msra.mxu1 %v630_v17 }
  0x22   :  { %308 = vmatmul.mubr.bf16.vlgmr.msra.gmra.mrb[0].mxu0 %v631_v18  ;;  %340 = vmatmul.mubr.bf16.vlgmr.msra.gmra.mrb[0].mxu1 %v634_v19 }
  0x23   :  { %315 = vmatprep.mubr.bf16.mxu0 %v637_v20  ;;  %347 = vmatprep.mubr.bf16.mxu1 %v639_v21 }
  0x2a   :  { %316 = vmatmul.mubr.bf16.gmra.mrb[4].mxu0 %v641_v22  ;;  %348 = vmatmul.mubr.bf16.gmra.mrb[4].mxu1 %v642_v23 }
  0x2b   :  { %323 = vmatprep.mubr.bf16.mxu0 %v643_v24  ;;  %355 = vmatprep.mubr.bf16.mxu1 %v645_v25 }
  0x32   :  { %324 = vmatmul.mubr.bf16.gmra.mrb[8].mxu0 %v647_v26  ;;  %356 = vmatmul.mubr.bf16.gmra.mrb[8].mxu1 %v648_v27 }
  0x33   :  { %331 = vmatprep.mubr.bf16.mxu0 %v649_v28  ;;  %363 = vmatprep.mubr.bf16.mxu1 %v651_v29 }
  0x3a   :  { %332 = vmatmul.mubr.bf16.gmra.mrb[12].mxu0 %v653_v30  ;;  %364 = vmatmul.mubr.bf16.gmra.mrb[12].mxu1 %v654_v31 }
  0xf5   :  { %v551_v32 = vpop.f32.mrb[0].mxu0  ;;  %v575_v33 = vpop.f32.mrb[0].mxu1 }
  0xf6   :  { %v552_v34 = vpop.f32.mrb[1].mxu0  ;;  %v576_v36 = vpop.f32.mrb[1].mxu1 }
  0xf7   :  { %v553_v37 = vadd.f32 %v552_v34, %v551_v32  ;;  %v577_v38 = vadd.f32 %v576_v36, %v575_v33  ;;  %v554_v39 = vpop.f32.mrb[2].mxu0  ;;  %v578_v40 = vpop.f32.mrb[2].mxu1 }
  0xf8   :  { %v555_v42 = vpop.f32.mrb[3].mxu0  ;;  %v579_v43 = vpop.f32.mrb[3].mxu1 }
  0xf9   :  { %v428_v44 = vmul.f32 %v553_v37, %v774_v35  ;;  %v436_v45 = vmul.f32 %v577_v38, %v774_v35  ;;  %v556_v46 = vadd.f32 %v555_v42, %v554_v39  ;;  %v580_v47 = vadd.f32 %v579_v43, %v578_v40 }
  0xfb   :  { %v449_v48 = vadd.f32 %v779_v41, %v428_v44  ;;  %v457_v49 = vadd.f32 %v779_v41, %v436_v45  ;;  %v429_v50 = vmul.f32 %v556_v46, %v774_v35  ;;  %v437_v51 = vmul.f32 %v580_v47, %v774_v35 }
  0xfd   :  { %v465_v52 = vmax.f32 %v449_v48, 0.0  ;;  %v473_v53 = vmax.f32 %v457_v49, 0.0  ;;  %v450_v54 = vadd.f32 %v779_v41, %v429_v50  ;;  %v458_v55 = vadd.f32 %v779_v41, %v437_v51  ;;  %v557_v56 = vpop.f32.mrb[4].mxu0  ;;  %v581_v57 = vpop.f32.mrb[4].mxu1 }
  0xfe   :  { %v558_v58 = vpop.f32.mrb[5].mxu0  ;;  %v582_v59 = vpop.f32.mrb[5].mxu1 }
  0xff   :  { %481 = vst [vmem:[%s864_s3] sm:$0xff] %v465_v52  ;;  %489 = vst [vmem:[%s864_s3 + $0x40] sm:$0xff] %v473_v53  ;;  %v466_v60 = vmax.f32 %v450_v54, 0.0  ;;  %v474_v61 = vmax.f32 %v458_v55, 0.0  ;;  %v559_v62 = vadd.f32 %v558_v58, %v557_v56  ;;  %v583_v63 = vadd.f32 %v582_v59, %v581_v57  ;;  %v560_v0 = vpop.f32.mrb[6].mxu0  ;;  %v584_v1 = vpop.f32.mrb[6].mxu1 }
 0x100   :  { %v561_v2 = vpop.f32.mrb[7].mxu0  ;;  %v585_v3 = vpop.f32.mrb[7].mxu1 }
 0x101   :  { %482 = vst [vmem:[%s864_s3 + $0x8] sm:$0xff] %v466_v60  ;;  %490 = vst [vmem:[%s864_s3 + $0x48] sm:$0xff] %v474_v61  ;;  %v430_v4 = vmul.f32 %v559_v62, %v774_v35  ;;  %v438_v5 = vmul.f32 %v583_v63, %v774_v35  ;;  %v562_v6 = vadd.f32 %v561_v2, %v560_v0 }
 0x102   :  { %v586_v7 = vadd.f32 %v585_v3, %v584_v1 }
 0x103   :  { %v451_v8 = vadd.f32 %v779_v41, %v430_v4  ;;  %v459_v9 = vadd.f32 %v779_v41, %v438_v5  ;;  %v431_v10 = vmul.f32 %v562_v6, %v774_v35 }
 0x104   :  { %v439_v11 = vmul.f32 %v586_v7, %v774_v35 }
 0x105   :  { %v467_v12 = vmax.f32 %v451_v8, 0.0  ;;  %v475_v13 = vmax.f32 %v459_v9, 0.0  ;;  %v452_v14 = vadd.f32 %v779_v41, %v431_v10  ;;  %v563_v16 = vpop.f32.mrb[8].mxu0  ;;  %v587_v17 = vpop.f32.mrb[8].mxu1 }
 0x106   :  { %v460_v15 = vadd.f32 %v779_v41, %v439_v11  ;;  %v564_v18 = vpop.f32.mrb[9].mxu0  ;;  %v588_v19 = vpop.f32.mrb[9].mxu1 }
 0x107   :  { %483 = vst [vmem:[%s864_s3 + $0x10] sm:$0xff] %v467_v12  ;;  %491 = vst [vmem:[%s864_s3 + $0x50] sm:$0xff] %v475_v13  ;;  %v468_v20 = vmax.f32 %v452_v14, 0.0  ;;  %v565_v22 = vadd.f32 %v564_v18, %v563_v16  ;;  %v589_v23 = vadd.f32 %v588_v19, %v587_v17  ;;  %v566_v24 = vpop.f32.mrb[10].mxu0  ;;  %v590_v25 = vpop.f32.mrb[10].mxu1 }
 0x108   :  { %v476_v21 = vmax.f32 %v460_v15, 0.0  ;;  %v567_v26 = vpop.f32.mrb[11].mxu0  ;;  %v591_v27 = vpop.f32.mrb[11].mxu1 }
 0x109   :  { %484 = vst [vmem:[%s864_s3 + $0x18] sm:$0xff] %v468_v20  ;;  %v432_v28 = vmul.f32 %v565_v22, %v774_v35  ;;  %v440_v29 = vmul.f32 %v589_v23, %v774_v35  ;;  %v568_v30 = vadd.f32 %v567_v26, %v566_v24  ;;  %v592_v31 = vadd.f32 %v591_v27, %v590_v25 }
 0x10a   :  { %492 = vst [vmem:[%s864_s3 + $0x58] sm:$0xff] %v476_v21 }
 0x10b   :  { %v453_v32 = vadd.f32 %v779_v41, %v432_v28  ;;  %v461_v33 = vadd.f32 %v779_v41, %v440_v29  ;;  %v433_v34 = vmul.f32 %v568_v30, %v774_v35  ;;  %v441_v36 = vmul.f32 %v592_v31, %v774_v35 }
 0x10d   :  { %v469_v37 = vmax.f32 %v453_v32, 0.0  ;;  %v477_v38 = vmax.f32 %v461_v33, 0.0  ;;  %v454_v39 = vadd.f32 %v779_v41, %v433_v34  ;;  %v462_v40 = vadd.f32 %v779_v41, %v441_v36  ;;  %v569_v42 = vpop.f32.mrb[12].mxu0  ;;  %v593_v43 = vpop.f32.mrb[12].mxu1 }
 0x10e   :  { %v570_v44 = vpop.f32.mrb[13].mxu0  ;;  %v594_v45 = vpop.f32.mrb[13].mxu1 }
 0x10f   :  { %485 = vst [vmem:[%s864_s3 + $0x20] sm:$0xff] %v469_v37  ;;  %493 = vst [vmem:[%s864_s3 + $0x60] sm:$0xff] %v477_v38  ;;  %v470_v46 = vmax.f32 %v454_v39, 0.0  ;;  %v478_v47 = vmax.f32 %v462_v40, 0.0  ;;  %v571_v48 = vadd.f32 %v570_v44, %v569_v42  ;;  %v595_v49 = vadd.f32 %v594_v45, %v593_v43  ;;  %v572_v50 = vpop.f32.mrb[14].mxu0  ;;  %v596_v51 = vpop.f32.mrb[14].mxu1 }
 0x110   :  { %v573_v52 = vpop.f32.mrb[15].mxu0  ;;  %v597_v53 = vpop.f32.mrb[15].mxu1 }
 0x111   :  { %486 = vst [vmem:[%s864_s3 + $0x28] sm:$0xff] %v470_v46  ;;  %494 = vst [vmem:[%s864_s3 + $0x68] sm:$0xff] %v478_v47  ;;  %v434_v54 = vmul.f32 %v571_v48, %v774_v35  ;;  %v442_v55 = vmul.f32 %v595_v49, %v774_v35  ;;  %v574_v56 = vadd.f32 %v573_v52, %v572_v50 }
 0x112   :  { %v598_v57 = vadd.f32 %v597_v53, %v596_v51 }
 0x113   :  { %v455_v58 = vadd.f32 %v779_v41, %v434_v54  ;;  %v463_v59 = vadd.f32 %v779_v41, %v442_v55  ;;  %v435_v60 = vmul.f32 %v574_v56, %v774_v35 }
 0x114   :  { %v443_v61 = vmul.f32 %v598_v57, %v774_v35 }
 0x115   :  { %v471_v62 = vmax.f32 %v455_v58, 0.0  ;;  %v479_v63 = vmax.f32 %v463_v59, 0.0  ;;  %v456_v0 = vadd.f32 %v779_v41, %v435_v60 }
 0x116   :  { %v464_v1 = vadd.f32 %v779_v41, %v443_v61 }
 0x117   :  { %487 = vst [vmem:[%s864_s3 + $0x30] sm:$0xff] %v471_v62  ;;  %495 = vst [vmem:[%s864_s3 + $0x70] sm:$0xff] %v479_v63  ;;  %v472_v2 = vmax.f32 %v456_v0, 0.0 }
 0x118   :  { %v480_v3 = vmax.f32 %v464_v1, 0.0 }
 0x119   :  { %488 = vst [vmem:[%s864_s3 + $0x38] sm:$0xff] %v472_v2 }
 0x11a   :  { %496 = vst [vmem:[%s864_s3 + $0x78] sm:$0xff] %v480_v3 }

// kernel: pspnet_forward.40
= control target key start
LH: loop header
LB: loop body
LE: loop exit
PB: predicated region body
PF: predicated region fallthrough
CT: control target
= control target key end

     0   :  { %s609_s1 = inlined_call_operand.vmem [shape: bf16[128,128], index: 1, kind: input, shape index: {}]   ;;  %s610_s0 = inlined_call_operand.vmem [shape: bf16[128,128], index: 0, kind: input, shape index: {}]   ;;  %s611_s2 = inlined_call_operand.vmem [shape: f32[8,128], index: 2, kind: input, shape index: {}]   ;;  %s612_s3 = inlined_call_operand.vmem [shape: f32[128,128], index: 3, kind: output, shape index: {}]  }
   0x1   :  { %v471_v0 = vld [vmem:[%s609_s1] sm:$0xff]   ;;  %v472_v1 = vld [vmem:[%s609_s1 + $0x8] sm:$0xff]   ;;  %v473_v2 = vld [vmem:[%s609_s1 + $0x10] sm:$0xff]  }
   0x2   :  { %423 = vmatprep.subr.bf16.mxu0 %v471_v0  ;;  %455 = vmatprep.subr.bf16.mxu1 %v471_v0  ;;  %v474_v3 = vld [vmem:[%s609_s1 + $0x18] sm:$0xff]   ;;  %v479_v4 = vld [vmem:[%s610_s0] sm:$0xff]   ;;  %v476_v7 = vld [vmem:[%s609_s1 + $0x28] sm:$0xff]  }
   0x3   :  { %424 = vmatpush3.bf16.msra.mxu0 %v471_v0  ;;  %463 = vmatpush3.bf16.msra.mxu1 %v471_v0  ;;  %v480_v5 = vld [vmem:[%s610_s0 + $0x20] sm:$0xff]   ;;  %v477_v8 = vld [vmem:[%s609_s1 + $0x30] sm:$0xff]   ;;  %v478_v9 = vld [vmem:[%s609_s1 + $0x38] sm:$0xff]  }
   0x4   :  { %425 = vmatprep.subr.bf16.mxu0 %v472_v1  ;;  %456 = vmatprep.subr.bf16.mxu1 %v472_v1  ;;  %v475_v6 = vld [vmem:[%s609_s1 + $0x20] sm:$0xff]   ;;  %v481_v10 = vld [vmem:[%s610_s0 + $0x8] sm:$0xff]   ;;  %v483_v12 = vld [vmem:[%s610_s0 + $0x10] sm:$0xff]  }
   0x5   :  { %439 = vmatprep.mubr.bf16.mxu0 %v479_v4  ;;  %447 = vmatprep.mubr.bf16.mxu1 %v480_v5  ;;  %v482_v11 = vld [vmem:[%s610_s0 + $0x28] sm:$0xff]   ;;  %v484_v13 = vld [vmem:[%s610_s0 + $0x30] sm:$0xff]   ;;  %v485_v14 = vld [vmem:[%s610_s0 + $0x18] sm:$0xff]  }
   0x6   :  { %v486_v15 = vld [vmem:[%s610_s0 + $0x38] sm:$0xff]   ;;  %v405_v16 = vld [vmem:[%s611_s2] ss:$0 sm:$0xff]  ;;  %v406_v18 = vld [vmem:[%s611_s2 + $0x1] ss:$0 sm:$0xff] }
   0x7   :  { %426 = vmatpush3.bf16.msra.mxu0 %v472_v1  ;;  %464 = vmatpush3.bf16.msra.mxu1 %v472_v1 }
   0x8   :  { %427 = vmatprep.subr.bf16.mxu0 %v473_v2  ;;  %457 = vmatprep.subr.bf16.mxu1 %v473_v2 }
   0xb   :  { %428 = vmatpush3.bf16.msra.mxu0 %v473_v2  ;;  %465 = vmatpush3.bf16.msra.mxu1 %v473_v2 }
   0xc   :  { %429 = vmatprep.subr.bf16.mxu0 %v474_v3  ;;  %458 = vmatprep.subr.bf16.mxu1 %v474_v3 }
   0xf   :  { %430 = vmatpush3.bf16.msra.mxu0 %v474_v3  ;;  %466 = vmatpush3.bf16.msra.mxu1 %v474_v3 }
  0x10   :  { %431 = vmatprep.subr.bf16.mxu0 %v475_v6  ;;  %459 = vmatprep.subr.bf16.mxu1 %v475_v6 }
  0x13   :  { %432 = vmatpush3.bf16.msra.mxu0 %v475_v6  ;;  %467 = vmatpush3.bf16.msra.mxu1 %v475_v6 }
  0x14   :  { %433 = vmatprep.subr.bf16.mxu0 %v476_v7  ;;  %460 = vmatprep.subr.bf16.mxu1 %v476_v7 }
  0x17   :  { %434 = vmatpush3.bf16.msra.mxu0 %v476_v7  ;;  %468 = vmatpush3.bf16.msra.mxu1 %v476_v7 }
  0x18   :  { %435 = vmatprep.subr.bf16.mxu0 %v477_v8  ;;  %461 = vmatprep.subr.bf16.mxu1 %v477_v8 }
  0x1b   :  { %436 = vmatpush3.bf16.msra.mxu0 %v477_v8  ;;  %469 = vmatpush3.bf16.msra.mxu1 %v477_v8 }
  0x1c   :  { %437 = vmatprep.subr.bf16.mxu0 %v478_v9  ;;  %462 = vmatprep.subr.bf16.mxu1 %v478_v9 }
  0x1f   :  { %438 = vmatpush3.bf16.msra.mxu0 %v478_v9  ;;  %470 = vmatpush3.bf16.msra.mxu1 %v478_v9 }
  0x22   :  { %440 = vmatmul.mubr.bf16.vlgmr.msra.gmra.mrb[0].mxu0 %v481_v10  ;;  %448 = vmatmul.mubr.bf16.vlgmr.msra.gmra.mrb[0].mxu1 %v482_v11 }
  0x23   :  { %443 = vmatprep.mubr.bf16.mxu0 %v483_v12  ;;  %451 = vmatprep.mubr.bf16.mxu1 %v484_v13 }
  0x2a   :  { %444 = vmatmul.mubr.bf16.gmra.mrb[4].mxu0 %v485_v14  ;;  %452 = vmatmul.mubr.bf16.gmra.mrb[4].mxu1 %v486_v15 }
  0xf5   :  { %v441_v17 = vpop.f32.mrb[0].mxu0  ;;  %v449_v19 = vpop.f32.mrb[0].mxu1 }
  0xf6   :  { %v334_v20 = vmul.f32 %v441_v17, %v405_v16  ;;  %v342_v21 = vmul.f32 %v449_v19, %v405_v16  ;;  %v213_v22 = vpop.f32.mrb[1].mxu0  ;;  %v245_v23 = vpop.f32.mrb[1].mxu1 }
  0xf7   :  { %v332_v24 = vmul.f32 %v405_v16, %v213_v22  ;;  %v340_v25 = vmul.f32 %v405_v16, %v245_v23  ;;  %v442_v26 = vpop.f32.mrb[2].mxu0  ;;  %v450_v27 = vpop.f32.mrb[2].mxu1 }
  0xf8   :  { %v355_v28 = vadd.f32 %v406_v18, %v334_v20  ;;  %v363_v29 = vadd.f32 %v406_v18, %v342_v21  ;;  %v335_v30 = vmul.f32 %v442_v26, %v405_v16  ;;  %v343_v31 = vmul.f32 %v450_v27, %v405_v16  ;;  %v216_v32 = vpop.f32.mrb[3].mxu0  ;;  %v248_v33 = vpop.f32.mrb[3].mxu1 }
  0xf9   :  { %v353_v34 = vadd.f32 %v406_v18, %v332_v24  ;;  %v361_v35 = vadd.f32 %v406_v18, %v340_v25  ;;  %v333_v36 = vmul.f32 %v405_v16, %v216_v32  ;;  %v341_v37 = vmul.f32 %v405_v16, %v248_v33 }
  0xfa   :  { %371 = vst [vmem:[%s612_s3 + $0x10] sm:$0xff] %v355_v28  ;;  %379 = vst [vmem:[%s612_s3 + $0x50] sm:$0xff] %v363_v29  ;;  %v356_v38 = vadd.f32 %v406_v18, %v335_v30  ;;  %v364_v39 = vadd.f32 %v406_v18, %v343_v31 }
  0xfb   :  { %369 = vst [vmem:[%s612_s3] sm:$0xff] %v353_v34  ;;  %377 = vst [vmem:[%s612_s3 + $0x40] sm:$0xff] %v361_v35  ;;  %v354_v40 = vadd.f32 %v406_v18, %v333_v36  ;;  %v362_v41 = vadd.f32 %v406_v18, %v341_v37 }
  0xfc   :  { %372 = vst [vmem:[%s612_s3 + $0x18] sm:$0xff] %v356_v38  ;;  %380 = vst [vmem:[%s612_s3 + $0x58] sm:$0xff] %v364_v39 }
  0xfd   :  { %370 = vst [vmem:[%s612_s3 + $0x8] sm:$0xff] %v354_v40  ;;  %378 = vst [vmem:[%s612_s3 + $0x48] sm:$0xff] %v362_v41  ;;  %v445_v42 = vpop.f32.mrb[4].mxu0  ;;  %v453_v43 = vpop.f32.mrb[4].mxu1 }
  0xfe   :  { %v338_v44 = vmul.f32 %v445_v42, %v405_v16  ;;  %v346_v45 = vmul.f32 %v453_v43, %v405_v16  ;;  %v229_v46 = vpop.f32.mrb[5].mxu0  ;;  %v261_v47 = vpop.f32.mrb[5].mxu1 }
  0xff   :  { %v336_v48 = vmul.f32 %v405_v16, %v229_v46  ;;  %v344_v49 = vmul.f32 %v405_v16, %v261_v47  ;;  %v446_v50 = vpop.f32.mrb[6].mxu0  ;;  %v454_v51 = vpop.f32.mrb[6].mxu1 }
 0x100   :  { %v359_v52 = vadd.f32 %v406_v18, %v338_v44  ;;  %v367_v53 = vadd.f32 %v406_v18, %v346_v45  ;;  %v339_v54 = vmul.f32 %v446_v50, %v405_v16  ;;  %v347_v55 = vmul.f32 %v454_v51, %v405_v16  ;;  %v232_v56 = vpop.f32.mrb[7].mxu0  ;;  %v264_v57 = vpop.f32.mrb[7].mxu1 }
 0x101   :  { %v357_v58 = vadd.f32 %v406_v18, %v336_v48  ;;  %v365_v59 = vadd.f32 %v406_v18, %v344_v49  ;;  %v337_v60 = vmul.f32 %v405_v16, %v232_v56  ;;  %v345_v61 = vmul.f32 %v405_v16, %v264_v57 }
 0x102   :  { %375 = vst [vmem:[%s612_s3 + $0x30] sm:$0xff] %v359_v52  ;;  %383 = vst [vmem:[%s612_s3 + $0x70] sm:$0xff] %v367_v53  ;;  %v360_v62 = vadd.f32 %v406_v18, %v339_v54  ;;  %v368_v63 = vadd.f32 %v406_v18, %v347_v55 }
 0x103   :  { %373 = vst [vmem:[%s612_s3 + $0x20] sm:$0xff] %v357_v58  ;;  %381 = vst [vmem:[%s612_s3 + $0x60] sm:$0xff] %v365_v59  ;;  %v358_v0 = vadd.f32 %v406_v18, %v337_v60  ;;  %v366_v1 = vadd.f32 %v406_v18, %v345_v61 }
 0x104   :  { %376 = vst [vmem:[%s612_s3 + $0x38] sm:$0xff] %v360_v62  ;;  %384 = vst [vmem:[%s612_s3 + $0x78] sm:$0xff] %v368_v63 }
 0x105   :  { %374 = vst [vmem:[%s612_s3 + $0x28] sm:$0xff] %v358_v0  ;;  %382 = vst [vmem:[%s612_s3 + $0x68] sm:$0xff] %v366_v1 }

// kernel: pspnet_forward.43
= control target key start
LH: loop header
LB: loop body
LE: loop exit
PB: predicated region body
PF: predicated region fallthrough
CT: control target
= control target key end

     0   :  { %s749_s1 = inlined_call_operand.vmem [shape: bf16[128,128], index: 1, kind: input, shape index: {}]   ;;  %s750_s0 = inlined_call_operand.vmem [shape: bf16[128,128], index: 0, kind: input, shape index: {}]   ;;  %s751_s2 = inlined_call_operand.vmem [shape: f32[8,128], index: 2, kind: input, shape index: {}]   ;;  %s752_s3 = inlined_call_operand.vmem [shape: f32[128,128], index: 3, kind: input, shape index: {}]   ;;  %s753_s4 = inlined_call_operand.vmem [shape: f32[128,128], index: 4, kind: output, shape index: {}]  }
   0x1   :  { %v522_v0 = vld [vmem:[%s749_s1] sm:$0xff]   ;;  %v523_v1 = vld [vmem:[%s749_s1 + $0x8] sm:$0xff]   ;;  %v524_v2 = vld [vmem:[%s749_s1 + $0x10] sm:$0xff]  }
   0x2   :  { %474 = vmatprep.subr.bf16.mxu0 %v522_v0  ;;  %506 = vmatprep.subr.bf16.mxu1 %v522_v0  ;;  %v525_v3 = vld [vmem:[%s749_s1 + $0x18] sm:$0xff]   ;;  %v530_v4 = vld [vmem:[%s750_s0] sm:$0xff]   ;;  %v527_v7 = vld [vmem:[%s749_s1 + $0x28] sm:$0xff]  }
   0x3   :  { %475 = vmatpush3.bf16.msra.mxu0 %v522_v0  ;;  %514 = vmatpush3.bf16.msra.mxu1 %v522_v0  ;;  %v531_v5 = vld [vmem:[%s750_s0 + $0x20] sm:$0xff]   ;;  %v528_v8 = vld [vmem:[%s749_s1 + $0x30] sm:$0xff]   ;;  %v529_v9 = vld [vmem:[%s749_s1 + $0x38] sm:$0xff]  }
   0x4   :  { %476 = vmatprep.subr.bf16.mxu0 %v523_v1  ;;  %507 = vmatprep.subr.bf16.mxu1 %v523_v1  ;;  %v526_v6 = vld [vmem:[%s749_s1 + $0x20] sm:$0xff]   ;;  %v532_v10 = vld [vmem:[%s750_s0 + $0x8] sm:$0xff]   ;;  %v534_v12 = vld [vmem:[%s750_s0 + $0x10] sm:$0xff]  }
   0x5   :  { %490 = vmatprep.mubr.bf16.mxu0 %v530_v4  ;;  %498 = vmatprep.mubr.bf16.mxu1 %v531_v5  ;;  %v533_v11 = vld [vmem:[%s750_s0 + $0x28] sm:$0xff]   ;;  %v535_v13 = vld [vmem:[%s750_s0 + $0x30] sm:$0xff]   ;;  %v536_v14 = vld [vmem:[%s750_s0 + $0x18] sm:$0xff]  }
   0x6   :  { %v537_v15 = vld [vmem:[%s750_s0 + $0x38] sm:$0xff]   ;;  %v614_v16 = vld [vmem:[%s751_s2] ss:$0 sm:$0xff]  ;;  %v619_v18 = vld [vmem:[%s751_s2 + $0x1] ss:$0 sm:$0xff] }
   0x7   :  { %477 = vmatpush3.bf16.msra.mxu0 %v523_v1  ;;  %515 = vmatpush3.bf16.msra.mxu1 %v523_v1  ;;  %v374_v24 = vld [vmem:[%s752_s3 + $0x10] sm:$0xff]  ;;  %v372_v32 = vld [vmem:[%s752_s3] sm:$0xff]  ;;  %v375_v40 = vld [vmem:[%s752_s3 + $0x18] sm:$0xff] }
   0x8   :  { %478 = vmatprep.subr.bf16.mxu0 %v524_v2  ;;  %508 = vmatprep.subr.bf16.mxu1 %v524_v2  ;;  %v382_v25 = vld [vmem:[%s752_s3 + $0x50] sm:$0xff]  ;;  %v380_v33 = vld [vmem:[%s752_s3 + $0x40] sm:$0xff]  ;;  %v383_v41 = vld [vmem:[%s752_s3 + $0x58] sm:$0xff] }
   0x9   :  { %v373_v48 = vld [vmem:[%s752_s3 + $0x8] sm:$0xff] }
   0xa   :  { %v381_v49 = vld [vmem:[%s752_s3 + $0x48] sm:$0xff] }
   0xb   :  { %479 = vmatpush3.bf16.msra.mxu0 %v524_v2  ;;  %516 = vmatpush3.bf16.msra.mxu1 %v524_v2 }
   0xc   :  { %480 = vmatprep.subr.bf16.mxu0 %v525_v3  ;;  %509 = vmatprep.subr.bf16.mxu1 %v525_v3 }
   0xf   :  { %481 = vmatpush3.bf16.msra.mxu0 %v525_v3  ;;  %517 = vmatpush3.bf16.msra.mxu1 %v525_v3 }
  0x10   :  { %482 = vmatprep.subr.bf16.mxu0 %v526_v6  ;;  %510 = vmatprep.subr.bf16.mxu1 %v526_v6 }
  0x13   :  { %483 = vmatpush3.bf16.msra.mxu0 %v526_v6  ;;  %518 = vmatpush3.bf16.msra.mxu1 %v526_v6 }
  0x14   :  { %484 = vmatprep.subr.bf16.mxu0 %v527_v7  ;;  %511 = vmatprep.subr.bf16.mxu1 %v527_v7 }
  0x17   :  { %485 = vmatpush3.bf16.msra.mxu0 %v527_v7  ;;  %519 = vmatpush3.bf16.msra.mxu1 %v527_v7 }
  0x18   :  { %486 = vmatprep.subr.bf16.mxu0 %v528_v8  ;;  %512 = vmatprep.subr.bf16.mxu1 %v528_v8 }
  0x1b   :  { %487 = vmatpush3.bf16.msra.mxu0 %v528_v8  ;;  %520 = vmatpush3.bf16.msra.mxu1 %v528_v8  ;;  %v378_v8 = vld [vmem:[%s752_s3 + $0x30] sm:$0xff] }
  0x1c   :  { %488 = vmatprep.subr.bf16.mxu0 %v529_v9  ;;  %513 = vmatprep.subr.bf16.mxu1 %v529_v9 }
  0x1f   :  { %489 = vmatpush3.bf16.msra.mxu0 %v529_v9  ;;  %521 = vmatpush3.bf16.msra.mxu1 %v529_v9  ;;  %v386_v9 = vld [vmem:[%s752_s3 + $0x70] sm:$0xff] }
  0x22   :  { %491 = vmatmul.mubr.bf16.vlgmr.msra.gmra.mrb[0].mxu0 %v532_v10  ;;  %499 = vmatmul.mubr.bf16.vlgmr.msra.gmra.mrb[0].mxu1 %v533_v11 }
  0x23   :  { %494 = vmatprep.mubr.bf16.mxu0 %v534_v12  ;;  %502 = vmatprep.mubr.bf16.mxu1 %v535_v13 }
  0x2a   :  { %495 = vmatmul.mubr.bf16.gmra.mrb[4].mxu0 %v536_v14  ;;  %503 = vmatmul.mubr.bf16.gmra.mrb[4].mxu1 %v537_v15 }
  0xf5   :  { %v492_v17 = vpop.f32.mrb[0].mxu0  ;;  %v500_v19 = vpop.f32.mrb[0].mxu1 }
  0xf6   :  { %v337_v20 = vmul.f32 %v492_v17, %v614_v16  ;;  %v345_v21 = vmul.f32 %v500_v19, %v614_v16  ;;  %v216_v22 = vpop.f32.mrb[1].mxu0  ;;  %v248_v23 = vpop.f32.mrb[1].mxu1  ;;  %v376_v17 = vld [vmem:[%s752_s3 + $0x20] sm:$0xff] }
  0xf7   :  { %v335_v26 = vmul.f32 %v614_v16, %v216_v22  ;;  %v343_v27 = vmul.f32 %v614_v16, %v248_v23  ;;  %v493_v28 = vpop.f32.mrb[2].mxu0  ;;  %v501_v29 = vpop.f32.mrb[2].mxu1  ;;  %v384_v19 = vld [vmem:[%s752_s3 + $0x60] sm:$0xff] }
  0xf8   :  { %v358_v30 = vadd.f32 %v619_v18, %v337_v20  ;;  %v366_v31 = vadd.f32 %v619_v18, %v345_v21  ;;  %v338_v34 = vmul.f32 %v493_v28, %v614_v16  ;;  %v346_v35 = vmul.f32 %v501_v29, %v614_v16  ;;  %v219_v36 = vpop.f32.mrb[3].mxu0  ;;  %v251_v37 = vpop.f32.mrb[3].mxu1 }
  0xf9   :  { %v356_v38 = vadd.f32 %v619_v18, %v335_v26  ;;  %v364_v39 = vadd.f32 %v619_v18, %v343_v27  ;;  %v336_v42 = vmul.f32 %v614_v16, %v219_v36  ;;  %v344_v43 = vmul.f32 %v614_v16, %v251_v37  ;;  %v379_v26 = vld [vmem:[%s752_s3 + $0x38] sm:$0xff] }
  0xfa   :  { %v390_v44 = vadd.f32 %v374_v24, %v358_v30  ;;  %v398_v45 = vadd.f32 %v382_v25, %v366_v31  ;;  %v359_v46 = vadd.f32 %v619_v18, %v338_v34  ;;  %v367_v47 = vadd.f32 %v619_v18, %v346_v35  ;;  %v387_v27 = vld [vmem:[%s752_s3 + $0x78] sm:$0xff]  ;;  %v377_v34 = vld [vmem:[%s752_s3 + $0x28] sm:$0xff] }
  0xfb   :  { %v388_v50 = vadd.f32 %v372_v32, %v356_v38  ;;  %v396_v51 = vadd.f32 %v380_v33, %v364_v39  ;;  %v357_v52 = vadd.f32 %v619_v18, %v336_v42  ;;  %v365_v53 = vadd.f32 %v619_v18, %v344_v43  ;;  %v385_v35 = vld [vmem:[%s752_s3 + $0x68] sm:$0xff] }
  0xfc   :  { %v406_v54 = vmax.f32 %v390_v44, 0.0  ;;  %v414_v55 = vmax.f32 %v398_v45, 0.0  ;;  %v391_v56 = vadd.f32 %v375_v40, %v359_v46  ;;  %v399_v57 = vadd.f32 %v383_v41, %v367_v47 }
  0xfd   :  { %v404_v58 = vmax.f32 %v388_v50, 0.0  ;;  %v412_v59 = vmax.f32 %v396_v51, 0.0  ;;  %v389_v60 = vadd.f32 %v373_v48, %v357_v52  ;;  %v397_v61 = vadd.f32 %v381_v49, %v365_v53  ;;  %v496_v62 = vpop.f32.mrb[4].mxu0  ;;  %v504_v63 = vpop.f32.mrb[4].mxu1 }
  0xfe   :  { %422 = vst [vmem:[%s753_s4 + $0x10] sm:$0xff] %v406_v54  ;;  %430 = vst [vmem:[%s753_s4 + $0x50] sm:$0xff] %v414_v55  ;;  %v407_v0 = vmax.f32 %v391_v56, 0.0  ;;  %v415_v1 = vmax.f32 %v399_v57, 0.0  ;;  %v341_v2 = vmul.f32 %v496_v62, %v614_v16  ;;  %v349_v3 = vmul.f32 %v504_v63, %v614_v16  ;;  %v232_v4 = vpop.f32.mrb[5].mxu0  ;;  %v264_v5 = vpop.f32.mrb[5].mxu1 }
  0xff   :  { %420 = vst [vmem:[%s753_s4] sm:$0xff] %v404_v58  ;;  %428 = vst [vmem:[%s753_s4 + $0x40] sm:$0xff] %v412_v59  ;;  %v405_v6 = vmax.f32 %v389_v60, 0.0  ;;  %v413_v7 = vmax.f32 %v397_v61, 0.0  ;;  %v339_v10 = vmul.f32 %v614_v16, %v232_v4  ;;  %v347_v11 = vmul.f32 %v614_v16, %v264_v5  ;;  %v497_v12 = vpop.f32.mrb[6].mxu0  ;;  %v505_v13 = vpop.f32.mrb[6].mxu1 }
 0x100   :  { %423 = vst [vmem:[%s753_s4 + $0x18] sm:$0xff] %v407_v0  ;;  %431 = vst [vmem:[%s753_s4 + $0x58] sm:$0xff] %v415_v1  ;;  %v362_v14 = vadd.f32 %v619_v18, %v341_v2  ;;  %v370_v15 = vadd.f32 %v619_v18, %v349_v3  ;;  %v342_v20 = vmul.f32 %v497_v12, %v614_v16  ;;  %v235_v22 = vpop.f32.mrb[7].mxu0  ;;  %v267_v23 = vpop.f32.mrb[7].mxu1 }
 0x101   :  { %v350_v21 = vmul.f32 %v505_v13, %v614_v16  ;;  %421 = vst [vmem:[%s753_s4 + $0x8] sm:$0xff] %v405_v6  ;;  %429 = vst [vmem:[%s753_s4 + $0x48] sm:$0xff] %v413_v7  ;;  %v360_v24 = vadd.f32 %v619_v18, %v339_v10  ;;  %v368_v25 = vadd.f32 %v619_v18, %v347_v11 }
 0x102   :  { %v340_v28 = vmul.f32 %v614_v16, %v235_v22  ;;  %v348_v29 = vmul.f32 %v614_v16, %v267_v23  ;;  %v394_v30 = vadd.f32 %v378_v8, %v362_v14  ;;  %v402_v31 = vadd.f32 %v386_v9, %v370_v15 }
 0x103   :  { %v363_v32 = vadd.f32 %v619_v18, %v342_v20  ;;  %v371_v33 = vadd.f32 %v619_v18, %v350_v21  ;;  %v392_v36 = vadd.f32 %v376_v17, %v360_v24  ;;  %v400_v37 = vadd.f32 %v384_v19, %v368_v25 }
 0x104   :  { %v361_v38 = vadd.f32 %v619_v18, %v340_v28  ;;  %v369_v16 = vadd.f32 %v619_v18, %v348_v29  ;;  %v410_v39 = vmax.f32 %v394_v30, 0.0  ;;  %v418_v40 = vmax.f32 %v402_v31, 0.0 }
 0x105   :  { %v395_v41 = vadd.f32 %v379_v26, %v363_v32  ;;  %v403_v42 = vadd.f32 %v387_v27, %v371_v33  ;;  %v408_v43 = vmax.f32 %v392_v36, 0.0  ;;  %v416_v44 = vmax.f32 %v400_v37, 0.0 }
 0x106   :  { %v393_v45 = vadd.f32 %v377_v34, %v361_v38  ;;  %v401_v46 = vadd.f32 %v385_v35, %v369_v16  ;;  %426 = vst [vmem:[%s753_s4 + $0x30] sm:$0xff] %v410_v39  ;;  %434 = vst [vmem:[%s753_s4 + $0x70] sm:$0xff] %v418_v40 }
 0x107   :  { %v411_v47 = vmax.f32 %v395_v41, 0.0  ;;  %v419_v48 = vmax.f32 %v403_v42, 0.0  ;;  %424 = vst [vmem:[%s753_s4 + $0x20] sm:$0xff] %v408_v43  ;;  %432 = vst [vmem:[%s753_s4 + $0x60] sm:$0xff] %v416_v44 }
 0x108   :  { %v409_v18 = vmax.f32 %v393_v45, 0.0  ;;  %v417_v49 = vmax.f32 %v401_v46, 0.0 }
 0x109   :  { %427 = vst [vmem:[%s753_s4 + $0x38] sm:$0xff] %v411_v47  ;;  %435 = vst [vmem:[%s753_s4 + $0x78] sm:$0xff] %v419_v48 }
 0x10a   :  { %425 = vst [vmem:[%s753_s4 + $0x28] sm:$0xff] %v409_v18  ;;  %433 = vst [vmem:[%s753_s4 + $0x68] sm:$0xff] %v417_v49 }

// kernel: pspnet_forward.47
= control target key start
LH: loop header
LB: loop body
LE: loop exit
PB: predicated region body
PF: predicated region fallthrough
CT: control target
= control target key end

     0   :  { %v298_v0 = vmov 0.0   ;;  %vm299_vm0 = vmmov 0   ;;  %s377_s1 = inlined_call_operand.vmem [shape: bf16[128,128], index: 1, kind: input, shape index: {}]   ;;  %s378_s0 = inlined_call_operand.vmem [shape: bf16[40,128], index: 0, kind: input, shape index: {}]   ;;  %s379_s2 = inlined_call_operand.vmem [shape: f32[8,128], index: 2, kind: input, shape index: {}]   ;;  %s380_s3 = inlined_call_operand.vmem [shape: f32[40,128], index: 3, kind: output, shape index: {}]  }
   0x1   :  { %269 = vmatprep.subr.bf16.mxu1 %v298_v0  ;;  %v287_v1 = vld [vmem:[%s377_s1] sm:$0xff]   ;;  %241 = vmatprep.subr.bf16.mxu0 %v298_v0  ;;  %v288_v2 = vld [vmem:[%s377_s1 + $0x8] sm:$0xff]   ;;  %v289_v3 = vld [vmem:[%s377_s1 + $0x10] sm:$0xff]  }
   0x2   :  { %261 = vmatprep.mubr.msk.bf16.mxu1 %vm299_vm0, %v298_v0  ;;  %257 = vmatprep.mubr.msk.bf16.mxu0 %vm299_vm0, %v298_v0  ;;  %v290_v4 = vld [vmem:[%s377_s1 + $0x18] sm:$0xff]   ;;  %v291_v5 = vld [vmem:[%s377_s1 + $0x20] sm:$0xff]   ;;  %v292_v6 = vld [vmem:[%s377_s1 + $0x28] sm:$0xff]  }
   0x3   :  { %277 = vmatpush3.bf16.msra.mxu1 %v287_v1  ;;  %242 = vmatpush3.bf16.msra.mxu0 %v287_v1  ;;  %v293_v7 = vld [vmem:[%s377_s1 + $0x30] sm:$0xff]   ;;  %v294_v8 = vld [vmem:[%s377_s1 + $0x38] sm:$0xff]   ;;  %v295_v9 = vld [vmem:[%s378_s0 + $0x8] sm:$0xff]  }
   0x4   :  { %270 = vmatprep.subr.bf16.mxu1 %v298_v0  ;;  %243 = vmatprep.subr.bf16.mxu0 %v298_v0  ;;  %v296_v10 = vld [vmem:[%s378_s0] sm:$0xff]   ;;  %v297_v11 = vld [vmem:[%s378_s0 + $0x10] ss:$0 sps:$4 sm:$0xff]  }
   0x5   :  { %v228_v12 = vld [vmem:[%s379_s2] ss:$0 sm:$0xff]  ;;  %v229_v14 = vld [vmem:[%s379_s2 + $0x1] ss:$0 sm:$0xff] }
   0x7   :  { %278 = vmatpush3.bf16.msra.mxu1 %v288_v2  ;;  %244 = vmatpush3.bf16.msra.mxu0 %v288_v2 }
   0x8   :  { %271 = vmatprep.subr.bf16.mxu1 %v298_v0  ;;  %245 = vmatprep.subr.bf16.mxu0 %v298_v0 }
   0xb   :  { %279 = vmatpush3.bf16.msra.mxu1 %v289_v3  ;;  %246 = vmatpush3.bf16.msra.mxu0 %v289_v3 }
   0xc   :  { %272 = vmatprep.subr.bf16.mxu1 %v298_v0  ;;  %247 = vmatprep.subr.bf16.mxu0 %v298_v0 }
   0xf   :  { %280 = vmatpush3.bf16.msra.mxu1 %v290_v4  ;;  %248 = vmatpush3.bf16.msra.mxu0 %v290_v4 }
  0x10   :  { %273 = vmatprep.subr.bf16.mxu1 %v298_v0  ;;  %249 = vmatprep.subr.bf16.mxu0 %v298_v0 }
  0x13   :  { %281 = vmatpush3.bf16.msra.mxu1 %v291_v5  ;;  %250 = vmatpush3.bf16.msra.mxu0 %v291_v5 }
  0x14   :  { %274 = vmatprep.subr.bf16.mxu1 %v298_v0  ;;  %251 = vmatprep.subr.bf16.mxu0 %v298_v0 }
  0x17   :  { %282 = vmatpush3.bf16.msra.mxu1 %v292_v6  ;;  %252 = vmatpush3.bf16.msra.mxu0 %v292_v6 }
  0x18   :  { %275 = vmatprep.subr.bf16.mxu1 %v298_v0  ;;  %253 = vmatprep.subr.bf16.mxu0 %v298_v0 }
  0x1b   :  { %283 = vmatpush3.bf16.msra.mxu1 %v293_v7  ;;  %254 = vmatpush3.bf16.msra.mxu0 %v293_v7 }
  0x1c   :  { %276 = vmatprep.subr.bf16.mxu1 %v298_v0  ;;  %255 = vmatprep.subr.bf16.mxu0 %v298_v0 }
  0x1f   :  { %284 = vmatpush3.bf16.msra.mxu1 %v294_v8  ;;  %256 = vmatpush3.bf16.msra.mxu0 %v294_v8 }
  0x22   :  { %262 = vmatmul.mubr.bf16.vlgmr.msra.gmra.mrb[0].mxu1 %v295_v9  ;;  %258 = vmatmul.mubr.bf16.vlgmr.msra.gmra.mrb[0].mxu0 %v296_v10 }
  0x23   :  { %265 = vmatprep.mubr.msk.bf16.mxu1 %vm299_vm0, %v298_v0 }
  0x2a   :  { %266 = vmatmul.mubr.bf16.gmra.mrb[4].mxu1 %v297_v11 }
  0xf5   :  { %v156_v13 = vpop.f32.mrb[0].mxu1  ;;  %v148_v15 = vpop.f32.mrb[0].mxu0 }
  0xf6   :  { %v195_v16 = vmul.f32 %v228_v12, %v156_v13  ;;  %v263_v17 = vpop.f32.mrb[1].mxu1  ;;  %v193_v18 = vmul.f32 %v228_v12, %v148_v15  ;;  %v259_v19 = vpop.f32.mrb[1].mxu0 }
  0xf7   :  { %v159_v20 = vpop.f32.mrb[2].mxu1  ;;  %v151_v21 = vpop.f32.mrb[2].mxu0 }
  0xf8   :  { %v205_v22 = vadd.f32 %v229_v14, %v195_v16  ;;  %v196_v23 = vmul.f32 %v228_v12, %v159_v20  ;;  %v203_v24 = vadd.f32 %v229_v14, %v193_v18  ;;  %v264_v25 = vpop.f32.mrb[3].mxu1  ;;  %v194_v26 = vmul.f32 %v228_v12, %v151_v21  ;;  %v260_v27 = vpop.f32.mrb[3].mxu0 }
  0xfa   :  { %210 = vst [vmem:[%s380_s3 + $0x10] sm:$0xff] %v205_v22  ;;  %v206_v28 = vadd.f32 %v229_v14, %v196_v23  ;;  %208 = vst [vmem:[%s380_s3] sm:$0xff] %v203_v24  ;;  %v204_v29 = vadd.f32 %v229_v14, %v194_v26 }
  0xfc   :  { %211 = vst [vmem:[%s380_s3 + $0x18] sm:$0xff] %v206_v28  ;;  %209 = vst [vmem:[%s380_s3 + $0x8] sm:$0xff] %v204_v29 }
  0xfd   :  { %v164_v30 = vpop.f32.mrb[4].mxu1 }
  0xfe   :  { %v197_v31 = vmul.f32 %v228_v12, %v164_v30  ;;  %v267_v32 = vpop.f32.mrb[5].mxu1 }
  0xff   :  { %v167_v33 = vpop.f32.mrb[6].mxu1 }
 0x100   :  { %v207_v34 = vadd.f32 %v229_v14, %v197_v31  ;;  %v268_v35 = vpop.f32.mrb[7].mxu1 }
 0x102   :  { %212 = vst [vmem:[%s380_s3 + $0x20] sm:$0xff] %v207_v34 }

// kernel: pspnet_forward.50
= control target key start
LH: loop header
LB: loop body
LE: loop exit
PB: predicated region body
PF: predicated region fallthrough
CT: control target
= control target key end

     0   :  { %v316_v0 = vmov 0.0   ;;  %vm317_vm0 = vmmov 0   ;;  %s415_s1 = inlined_call_operand.vmem [shape: bf16[128,128], index: 1, kind: input, shape index: {}]   ;;  %s416_s0 = inlined_call_operand.vmem [shape: bf16[40,128], index: 0, kind: input, shape index: {}]   ;;  %s417_s2 = inlined_call_operand.vmem [shape: f32[8,128], index: 2, kind: input, shape index: {}]   ;;  %s418_s3 = inlined_call_operand.vmem [shape: f32[40,128], index: 3, kind: input, shape index: {}]   ;;  %s419_s4 = inlined_call_operand.vmem [shape: f32[40,128], index: 4, kind: output, shape index: {}]  }
   0x1   :  { %287 = vmatprep.subr.bf16.mxu1 %v316_v0  ;;  %v305_v1 = vld [vmem:[%s415_s1] sm:$0xff]   ;;  %259 = vmatprep.subr.bf16.mxu0 %v316_v0  ;;  %v306_v2 = vld [vmem:[%s415_s1 + $0x8] sm:$0xff]   ;;  %v307_v3 = vld [vmem:[%s415_s1 + $0x10] sm:$0xff]  }
   0x2   :  { %279 = vmatprep.mubr.msk.bf16.mxu1 %vm317_vm0, %v316_v0  ;;  %275 = vmatprep.mubr.msk.bf16.mxu0 %vm317_vm0, %v316_v0  ;;  %v308_v4 = vld [vmem:[%s415_s1 + $0x18] sm:$0xff]   ;;  %v309_v5 = vld [vmem:[%s415_s1 + $0x20] sm:$0xff]   ;;  %v310_v6 = vld [vmem:[%s415_s1 + $0x28] sm:$0xff]  }
   0x3   :  { %295 = vmatpush3.bf16.msra.mxu1 %v305_v1  ;;  %260 = vmatpush3.bf16.msra.mxu0 %v305_v1  ;;  %v311_v7 = vld [vmem:[%s415_s1 + $0x30] sm:$0xff]   ;;  %v312_v8 = vld [vmem:[%s415_s1 + $0x38] sm:$0xff]   ;;  %v313_v9 = vld [vmem:[%s416_s0 + $0x8] sm:$0xff]  }
   0x4   :  { %288 = vmatprep.subr.bf16.mxu1 %v316_v0  ;;  %261 = vmatprep.subr.bf16.mxu0 %v316_v0  ;;  %v314_v10 = vld [vmem:[%s416_s0] sm:$0xff]   ;;  %v315_v11 = vld [vmem:[%s416_s0 + $0x10] ss:$0 sps:$4 sm:$0xff]   ;;  %v214_v30 = vld [vmem:[%s418_s3 + $0x18] sm:$0xff] }
   0x5   :  { %v246_v12 = vld [vmem:[%s417_s2] ss:$0 sm:$0xff]  ;;  %v247_v14 = vld [vmem:[%s417_s2 + $0x1] ss:$0 sm:$0xff]  ;;  %v213_v20 = vld [vmem:[%s418_s3 + $0x10] sm:$0xff] }
   0x6   :  { %v211_v22 = vld [vmem:[%s418_s3] sm:$0xff]  ;;  %v212_v31 = vld [vmem:[%s418_s3 + $0x8] sm:$0xff] }
   0x7   :  { %296 = vmatpush3.bf16.msra.mxu1 %v306_v2  ;;  %262 = vmatpush3.bf16.msra.mxu0 %v306_v2  ;;  %v215_v45 = vld [vmem:[%s418_s3 + $0x20] sm:$0xff] }
   0x8   :  { %289 = vmatprep.subr.bf16.mxu1 %v316_v0  ;;  %263 = vmatprep.subr.bf16.mxu0 %v316_v0 }
   0xb   :  { %297 = vmatpush3.bf16.msra.mxu1 %v307_v3  ;;  %264 = vmatpush3.bf16.msra.mxu0 %v307_v3 }
   0xc   :  { %290 = vmatprep.subr.bf16.mxu1 %v316_v0  ;;  %265 = vmatprep.subr.bf16.mxu0 %v316_v0 }
   0xf   :  { %298 = vmatpush3.bf16.msra.mxu1 %v308_v4  ;;  %266 = vmatpush3.bf16.msra.mxu0 %v308_v4 }
  0x10   :  { %291 = vmatprep.subr.bf16.mxu1 %v316_v0  ;;  %267 = vmatprep.subr.bf16.mxu0 %v316_v0 }
  0x13   :  { %299 = vmatpush3.bf16.msra.mxu1 %v309_v5  ;;  %268 = vmatpush3.bf16.msra.mxu0 %v309_v5 }
  0x14   :  { %292 = vmatprep.subr.bf16.mxu1 %v316_v0  ;;  %269 = vmatprep.subr.bf16.mxu0 %v316_v0 }
  0x17   :  { %300 = vmatpush3.bf16.msra.mxu1 %v310_v6  ;;  %270 = vmatpush3.bf16.msra.mxu0 %v310_v6 }
  0x18   :  { %293 = vmatprep.subr.bf16.mxu1 %v316_v0  ;;  %271 = vmatprep.subr.bf16.mxu0 %v316_v0 }
  0x1b   :  { %301 = vmatpush3.bf16.msra.mxu1 %v311_v7  ;;  %272 = vmatpush3.bf16.msra.mxu0 %v311_v7 }
  0x1c   :  { %294 = vmatprep.subr.bf16.mxu1 %v316_v0  ;;  %273 = vmatprep.subr.bf16.mxu0 %v316_v0 }
  0x1f   :  { %302 = vmatpush3.bf16.msra.mxu1 %v312_v8  ;;  %274 = vmatpush3.bf16.msra.mxu0 %v312_v8 }
  0x22   :  { %280 = vmatmul.mubr.bf16.vlgmr.msra.gmra.mrb[0].mxu1 %v313_v9  ;;  %276 = vmatmul.mubr.bf16.vlgmr.msra.gmra.mrb[0].mxu0 %v314_v10 }
  0x23   :  { %283 = vmatprep.mubr.msk.bf16.mxu1 %vm317_vm0, %v316_v0 }
  0x2a   :  { %284 = vmatmul.mubr.bf16.gmra.mrb[4].mxu1 %v315_v11 }
  0xf5   :  { %v159_v13 = vpop.f32.mrb[0].mxu1  ;;  %v151_v15 = vpop.f32.mrb[0].mxu0 }
  0xf6   :  { %v198_v16 = vmul.f32 %v246_v12, %v159_v13  ;;  %v281_v17 = vpop.f32.mrb[1].mxu1  ;;  %v196_v18 = vmul.f32 %v246_v12, %v151_v15  ;;  %v277_v19 = vpop.f32.mrb[1].mxu0 }
  0xf7   :  { %v162_v21 = vpop.f32.mrb[2].mxu1  ;;  %v154_v23 = vpop.f32.mrb[2].mxu0 }
  0xf8   :  { %v208_v24 = vadd.f32 %v247_v14, %v198_v16  ;;  %v199_v25 = vmul.f32 %v246_v12, %v162_v21  ;;  %v206_v26 = vadd.f32 %v247_v14, %v196_v18  ;;  %v282_v27 = vpop.f32.mrb[3].mxu1  ;;  %v197_v28 = vmul.f32 %v246_v12, %v154_v23  ;;  %v278_v29 = vpop.f32.mrb[3].mxu0 }
  0xfa   :  { %v218_v32 = vadd.f32 %v213_v20, %v208_v24  ;;  %v209_v33 = vadd.f32 %v247_v14, %v199_v25  ;;  %v216_v34 = vadd.f32 %v211_v22, %v206_v26  ;;  %v207_v35 = vadd.f32 %v247_v14, %v197_v28 }
  0xfc   :  { %v223_v36 = vmax.f32 %v218_v32, 0.0  ;;  %v219_v37 = vadd.f32 %v214_v30, %v209_v33  ;;  %v221_v38 = vmax.f32 %v216_v34, 0.0  ;;  %v217_v39 = vadd.f32 %v212_v31, %v207_v35 }
  0xfd   :  { %v167_v40 = vpop.f32.mrb[4].mxu1 }
  0xfe   :  { %228 = vst [vmem:[%s419_s4 + $0x10] sm:$0xff] %v223_v36  ;;  %v224_v41 = vmax.f32 %v219_v37, 0.0  ;;  %226 = vst [vmem:[%s419_s4] sm:$0xff] %v221_v38  ;;  %v222_v42 = vmax.f32 %v217_v39, 0.0  ;;  %v200_v43 = vmul.f32 %v246_v12, %v167_v40  ;;  %v285_v44 = vpop.f32.mrb[5].mxu1 }
  0xff   :  { %v170_v46 = vpop.f32.mrb[6].mxu1 }
 0x100   :  { %229 = vst [vmem:[%s419_s4 + $0x18] sm:$0xff] %v224_v41  ;;  %227 = vst [vmem:[%s419_s4 + $0x8] sm:$0xff] %v222_v42  ;;  %v210_v47 = vadd.f32 %v247_v14, %v200_v43  ;;  %v286_v48 = vpop.f32.mrb[7].mxu1 }
 0x102   :  { %v220_v49 = vadd.f32 %v215_v45, %v210_v47 }
 0x104   :  { %v225_v50 = vmax.f32 %v220_v49, 0.0 }
 0x106   :  { %230 = vst [vmem:[%s419_s4 + $0x20] sm:$0xff] %v225_v50 }

// kernel: pspnet_forward.49
= control target key start
LH: loop header
LB: loop body
LE: loop exit
PB: predicated region body
PF: predicated region fallthrough
CT: control target
= control target key end

     0   :  { %v583_v1 = vmov 0.0   ;;  %vm584_vm0 = vmmov 0   ;;  %s736_s1 = inlined_call_operand.vmem [shape: bf16[384,128], index: 1, kind: input, shape index: {}]   ;;  %s737_s0 = inlined_call_operand.vmem [shape: bf16[40,384], index: 0, kind: input, shape index: {}]   ;;  %s738_s2 = inlined_call_operand.vmem [shape: f32[8,128], index: 2, kind: input, shape index: {}]   ;;  %s739_s3 = inlined_call_operand.vmem [shape: f32[40,128], index: 3, kind: output, shape index: {}]  }
   0x1   :  { %v548_v0 = vld [vmem:[%s736_s1 + $0x40] sm:$0xff]   ;;  %518 = vmatprep.subr.bf16.mxu1 %v583_v1  ;;  %534 = vmatprep.mubr.msk.bf16.mxu1 %vm584_vm0, %v583_v1  ;;  %v551_v4 = vld [vmem:[%s736_s1 + $0x48] sm:$0xff]   ;;  %v554_v7 = vld [vmem:[%s736_s1 + $0x50] sm:$0xff]  }
   0x2   :  { %v549_v2 = vld [vmem:[%s736_s1] sm:$0xff]   ;;  %473 = vmatprep.subr.bf16.mxu0 %v548_v0  ;;  %v552_v5 = vld [vmem:[%s736_s1 + $0x8] sm:$0xff]   ;;  %v555_v8 = vld [vmem:[%s736_s1 + $0x10] sm:$0xff]  }
   0x3   :  { %v550_v3 = vld [vmem:[%s736_s1 + $0x80] sm:$0xff]   ;;  %474 = vmatpush3.bf16.msra.mxu0 %v549_v2  ;;  %v553_v6 = vld [vmem:[%s736_s1 + $0x88] sm:$0xff]   ;;  %v556_v9 = vld [vmem:[%s736_s1 + $0x90] sm:$0xff]  }
   0x4   :  { %519 = vmatpush3.bf16.msra.mxu1 %v550_v3  ;;  %475 = vmatprep.subr.bf16.mxu0 %v551_v4  ;;  %v557_v10 = vld [vmem:[%s736_s1 + $0x58] sm:$0xff]   ;;  %v560_v13 = vld [vmem:[%s736_s1 + $0x60] sm:$0xff]   ;;  %v563_v16 = vld [vmem:[%s736_s1 + $0x68] sm:$0xff]  }
   0x5   :  { %520 = vmatprep.subr.bf16.mxu1 %v583_v1  ;;  %v558_v11 = vld [vmem:[%s736_s1 + $0x18] sm:$0xff]   ;;  %v561_v14 = vld [vmem:[%s736_s1 + $0x20] sm:$0xff]   ;;  %v564_v17 = vld [vmem:[%s736_s1 + $0x28] sm:$0xff]  }
   0x6   :  { %v559_v12 = vld [vmem:[%s736_s1 + $0x98] sm:$0xff]   ;;  %v562_v15 = vld [vmem:[%s736_s1 + $0xa0] sm:$0xff]   ;;  %v565_v18 = vld [vmem:[%s736_s1 + $0xa8] sm:$0xff]  }
   0x7   :  { %476 = vmatpush3.bf16.msra.mxu0 %v552_v5  ;;  %v566_v19 = vld [vmem:[%s736_s1 + $0x70] sm:$0xff]   ;;  %v569_v22 = vld [vmem:[%s736_s1 + $0x78] sm:$0xff]   ;;  %v572_v26 = vld [vmem:[%s737_s0] ss:$12 sps:$4 sm:$0xff]  }
   0x8   :  { %521 = vmatpush3.bf16.msra.mxu1 %v553_v6  ;;  %477 = vmatprep.subr.bf16.mxu0 %v554_v7  ;;  %v567_v20 = vld [vmem:[%s736_s1 + $0x30] sm:$0xff]   ;;  %v570_v24 = vld [vmem:[%s736_s1 + $0x38] sm:$0xff]   ;;  %v579_v31 = vld [vmem:[%s737_s0 + $0x20] ss:$12 sps:$4 sm:$0xff]  }
   0x9   :  { %522 = vmatprep.subr.bf16.mxu1 %v583_v1  ;;  %v568_v21 = vld [vmem:[%s736_s1 + $0xb0] sm:$0xff]   ;;  %v571_v25 = vld [vmem:[%s736_s1 + $0xb8] sm:$0xff]   ;;  %v471_v41 = vld [vmem:[%s738_s2] ss:$0 sm:$0xff] }
   0xa   :  { %v574_v23 = vld [vmem:[%s737_s0 + $0x4] ss:$12 sps:$4 sm:$0xff]   ;;  %v575_v27 = vld [vmem:[%s737_s0 + $0x8] ss:$12 sps:$4 sm:$0xff]   ;;  %v582_v34 = vld [vmem:[%s737_s0 + $0x38] ss:$0 sps:$4 sm:$0xff]  }
   0xb   :  { %478 = vmatpush3.bf16.msra.mxu0 %v555_v8  ;;  %306 = vmatprep.mubr.bf16.mxu0 %v574_v23  ;;  %v576_v28 = vld [vmem:[%s737_s0 + $0x1c] ss:$12 sps:$4 sm:$0xff]   ;;  %v37_v29 = vld [vmem:[%s737_s0 + $0x30] sm:$0xff]  ;;  %v578_v30 = vld [vmem:[%s737_s0 + $0x18] ss:$12 sps:$4 sm:$0xff]  }
   0xc   :  { %523 = vmatpush3.bf16.msra.mxu1 %v556_v9  ;;  %479 = vmatprep.subr.bf16.mxu0 %v557_v10  ;;  %v445_v32 = vcombine.high %v37_v29, %v37_v29  ;;  %v444_v33 = vcombine.low %v37_v29, %v37_v29  ;;  %v472_v47 = vld [vmem:[%s738_s2 + $0x1] ss:$0 sm:$0xff] }
   0xd   :  { %524 = vmatprep.subr.bf16.mxu1 %v583_v1 }
   0xf   :  { %480 = vmatpush3.bf16.msra.mxu0 %v558_v11 }
  0x10   :  { %525 = vmatpush3.bf16.msra.mxu1 %v559_v12  ;;  %481 = vmatprep.subr.bf16.mxu0 %v560_v13 }
  0x11   :  { %526 = vmatprep.subr.bf16.mxu1 %v583_v1 }
  0x13   :  { %482 = vmatpush3.bf16.msra.mxu0 %v561_v14 }
  0x14   :  { %527 = vmatpush3.bf16.msra.mxu1 %v562_v15  ;;  %483 = vmatprep.subr.bf16.mxu0 %v563_v16 }
  0x15   :  { %528 = vmatprep.subr.bf16.mxu1 %v583_v1 }
  0x17   :  { %484 = vmatpush3.bf16.msra.mxu0 %v564_v17 }
  0x18   :  { %529 = vmatpush3.bf16.msra.mxu1 %v565_v18  ;;  %485 = vmatprep.subr.bf16.mxu0 %v566_v19 }
  0x19   :  { %530 = vmatprep.subr.bf16.mxu1 %v583_v1 }
  0x1b   :  { %486 = vmatpush3.bf16.msra.mxu0 %v567_v20 }
  0x1c   :  { %531 = vmatpush3.bf16.msra.mxu1 %v568_v21  ;;  %487 = vmatprep.subr.bf16.mxu0 %v569_v22 }
  0x1d   :  { %532 = vmatprep.subr.bf16.mxu1 %v583_v1 }
  0x1f   :  { %488 = vmatpush3.bf16.msra.mxu0 %v570_v24 }
  0x20   :  { %533 = vmatpush3.bf16.msra.mxu1 %v571_v25 }
  0x22   :  { %307 = vmatmul.mubr.bf16.vlgmr.msra.gmra.mrb[0].mxu0 %v572_v26 }
  0x23   :  { %535 = vmatmul.mubr.bf16.vlgmr.msra.gmra.mrb[0].mxu1 %v575_v27  ;;  %314 = vmatprep.mubr.bf16.mxu0 %v576_v28 }
  0x24   :  { %538 = vmatprep.mubr.msk.bf16.mxu1 %vm584_vm0, %v583_v1 }
  0x2a   :  { %315 = vmatmul.mubr.bf16.gmra.mrb[4].mxu0 %v578_v30 }
  0x2b   :  { %539 = vmatmul.mubr.bf16.gmra.mrb[4].mxu1 %v579_v31  ;;  %322 = vmatprep.mubr.bf16.mxu0 %v445_v32 }
  0x2c   :  { %542 = vmatprep.mubr.msk.bf16.mxu1 %vm584_vm0, %v583_v1 }
  0x32   :  { %323 = vmatmul.mubr.bf16.gmra.mrb[8].mxu0 %v444_v33 }
  0x33   :  { %543 = vmatmul.mubr.bf16.gmra.mrb[8].mxu1 %v582_v34 }
  0xf5   :  { %v489_v35 = vpop.f32.mrb[0].mxu0 }
  0xf6   :  { %v364_v36 = vpop.f32.mrb[0].mxu1  ;;  %v490_v37 = vpop.f32.mrb[1].mxu0 }
  0xf7   :  { %v491_v38 = vadd.f32 %v490_v37, %v489_v35  ;;  %v536_v39 = vpop.f32.mrb[1].mxu1  ;;  %v492_v40 = vpop.f32.mrb[2].mxu0 }
  0xf8   :  { %v367_v42 = vpop.f32.mrb[2].mxu1  ;;  %v493_v43 = vpop.f32.mrb[3].mxu0 }
  0xf9   :  { %v365_v44 = vadd.f32 %v491_v38, %v364_v36  ;;  %v494_v45 = vadd.f32 %v493_v43, %v492_v40  ;;  %v537_v46 = vpop.f32.mrb[3].mxu1 }
  0xfb   :  { %v409_v48 = vmul.f32 %v471_v41, %v365_v44  ;;  %v368_v49 = vadd.f32 %v494_v45, %v367_v42 }
  0xfd   :  { %v419_v50 = vadd.f32 %v472_v47, %v409_v48  ;;  %v410_v51 = vmul.f32 %v471_v41, %v368_v49  ;;  %v495_v52 = vpop.f32.mrb[4].mxu0 }
  0xfe   :  { %v372_v53 = vpop.f32.mrb[4].mxu1  ;;  %v496_v54 = vpop.f32.mrb[5].mxu0 }
  0xff   :  { %v424_v55 = vmax.f32 %v419_v50, 0.0  ;;  %v420_v56 = vadd.f32 %v472_v47, %v410_v51  ;;  %v497_v57 = vadd.f32 %v496_v54, %v495_v52  ;;  %v540_v58 = vpop.f32.mrb[5].mxu1  ;;  %v498_v59 = vpop.f32.mrb[6].mxu0 }
 0x100   :  { %v375_v60 = vpop.f32.mrb[6].mxu1  ;;  %v499_v61 = vpop.f32.mrb[7].mxu0 }
 0x101   :  { %429 = vst [vmem:[%s739_s3] sm:$0xff] %v424_v55  ;;  %v425_v62 = vmax.f32 %v420_v56, 0.0  ;;  %v373_v63 = vadd.f32 %v497_v57, %v372_v53  ;;  %v500_v0 = vadd.f32 %v499_v61, %v498_v59  ;;  %v541_v1 = vpop.f32.mrb[7].mxu1 }
 0x103   :  { %430 = vst [vmem:[%s739_s3 + $0x8] sm:$0xff] %v425_v62  ;;  %v411_v2 = vmul.f32 %v471_v41, %v373_v63  ;;  %v376_v3 = vadd.f32 %v500_v0, %v375_v60 }
 0x105   :  { %v421_v4 = vadd.f32 %v472_v47, %v411_v2  ;;  %v412_v5 = vmul.f32 %v471_v41, %v376_v3  ;;  %v501_v6 = vpop.f32.mrb[8].mxu0 }
 0x106   :  { %v380_v7 = vpop.f32.mrb[8].mxu1  ;;  %v502_v8 = vpop.f32.mrb[9].mxu0 }
 0x107   :  { %v426_v9 = vmax.f32 %v421_v4, 0.0  ;;  %v422_v10 = vadd.f32 %v472_v47, %v412_v5  ;;  %v503_v11 = vadd.f32 %v502_v8, %v501_v6  ;;  %v544_v12 = vpop.f32.mrb[9].mxu1  ;;  %v504_v13 = vpop.f32.mrb[10].mxu0 }
 0x108   :  { %v383_v14 = vpop.f32.mrb[10].mxu1  ;;  %v505_v15 = vpop.f32.mrb[11].mxu0 }
 0x109   :  { %431 = vst [vmem:[%s739_s3 + $0x10] sm:$0xff] %v426_v9  ;;  %v427_v16 = vmax.f32 %v422_v10, 0.0  ;;  %v381_v17 = vadd.f32 %v503_v11, %v380_v7  ;;  %v545_v18 = vpop.f32.mrb[11].mxu1 }
 0x10b   :  { %432 = vst [vmem:[%s739_s3 + $0x18] sm:$0xff] %v427_v16  ;;  %v413_v19 = vmul.f32 %v471_v41, %v381_v17 }
 0x10d   :  { %v423_v20 = vadd.f32 %v472_v47, %v413_v19 }
 0x10f   :  { %v428_v21 = vmax.f32 %v423_v20, 0.0 }
 0x111   :  { %433 = vst [vmem:[%s739_s3 + $0x20] sm:$0xff] %v428_v21 }

// kernel: pspnet_forward.51
= control target key start
LH: loop header
LB: loop body
LE: loop exit
PB: predicated region body
PF: predicated region fallthrough
CT: control target
= control target key end

     0   :  { %v303_v0 = vmov 0.0   ;;  %vm304_vm0 = vmmov 0   ;;  %s382_s1 = inlined_call_operand.vmem [shape: bf16[128,128], index: 1, kind: input, shape index: {}]   ;;  %s383_s0 = inlined_call_operand.vmem [shape: bf16[40,128], index: 0, kind: input, shape index: {}]   ;;  %s384_s2 = inlined_call_operand.vmem [shape: f32[8,128], index: 2, kind: input, shape index: {}]   ;;  %s385_s3 = inlined_call_operand.vmem [shape: f32[40,128], index: 3, kind: output, shape index: {}]  }
   0x1   :  { %274 = vmatprep.subr.bf16.mxu1 %v303_v0  ;;  %v292_v1 = vld [vmem:[%s382_s1] sm:$0xff]   ;;  %246 = vmatprep.subr.bf16.mxu0 %v303_v0  ;;  %v293_v2 = vld [vmem:[%s382_s1 + $0x8] sm:$0xff]   ;;  %v294_v3 = vld [vmem:[%s382_s1 + $0x10] sm:$0xff]  }
   0x2   :  { %266 = vmatprep.mubr.msk.bf16.mxu1 %vm304_vm0, %v303_v0  ;;  %262 = vmatprep.mubr.msk.bf16.mxu0 %vm304_vm0, %v303_v0  ;;  %v295_v4 = vld [vmem:[%s382_s1 + $0x18] sm:$0xff]   ;;  %v296_v5 = vld [vmem:[%s382_s1 + $0x20] sm:$0xff]   ;;  %v297_v6 = vld [vmem:[%s382_s1 + $0x28] sm:$0xff]  }
   0x3   :  { %282 = vmatpush3.bf16.msra.mxu1 %v292_v1  ;;  %247 = vmatpush3.bf16.msra.mxu0 %v292_v1  ;;  %v298_v7 = vld [vmem:[%s382_s1 + $0x30] sm:$0xff]   ;;  %v299_v8 = vld [vmem:[%s382_s1 + $0x38] sm:$0xff]   ;;  %v300_v9 = vld [vmem:[%s383_s0 + $0x8] sm:$0xff]  }
   0x4   :  { %275 = vmatprep.subr.bf16.mxu1 %v303_v0  ;;  %248 = vmatprep.subr.bf16.mxu0 %v303_v0  ;;  %v301_v10 = vld [vmem:[%s383_s0] sm:$0xff]   ;;  %v302_v11 = vld [vmem:[%s383_s0 + $0x10] ss:$0 sps:$4 sm:$0xff]  }
   0x5   :  { %v233_v12 = vld [vmem:[%s384_s2] ss:$0 sm:$0xff]  ;;  %v234_v14 = vld [vmem:[%s384_s2 + $0x1] ss:$0 sm:$0xff] }
   0x7   :  { %283 = vmatpush3.bf16.msra.mxu1 %v293_v2  ;;  %249 = vmatpush3.bf16.msra.mxu0 %v293_v2 }
   0x8   :  { %276 = vmatprep.subr.bf16.mxu1 %v303_v0  ;;  %250 = vmatprep.subr.bf16.mxu0 %v303_v0 }
   0xb   :  { %284 = vmatpush3.bf16.msra.mxu1 %v294_v3  ;;  %251 = vmatpush3.bf16.msra.mxu0 %v294_v3 }
   0xc   :  { %277 = vmatprep.subr.bf16.mxu1 %v303_v0  ;;  %252 = vmatprep.subr.bf16.mxu0 %v303_v0 }
   0xf   :  { %285 = vmatpush3.bf16.msra.mxu1 %v295_v4  ;;  %253 = vmatpush3.bf16.msra.mxu0 %v295_v4 }
  0x10   :  { %278 = vmatprep.subr.bf16.mxu1 %v303_v0  ;;  %254 = vmatprep.subr.bf16.mxu0 %v303_v0 }
  0x13   :  { %286 = vmatpush3.bf16.msra.mxu1 %v296_v5  ;;  %255 = vmatpush3.bf16.msra.mxu0 %v296_v5 }
  0x14   :  { %279 = vmatprep.subr.bf16.mxu1 %v303_v0  ;;  %256 = vmatprep.subr.bf16.mxu0 %v303_v0 }
  0x17   :  { %287 = vmatpush3.bf16.msra.mxu1 %v297_v6  ;;  %257 = vmatpush3.bf16.msra.mxu0 %v297_v6 }
  0x18   :  { %280 = vmatprep.subr.bf16.mxu1 %v303_v0  ;;  %258 = vmatprep.subr.bf16.mxu0 %v303_v0 }
  0x1b   :  { %288 = vmatpush3.bf16.msra.mxu1 %v298_v7  ;;  %259 = vmatpush3.bf16.msra.mxu0 %v298_v7 }
  0x1c   :  { %281 = vmatprep.subr.bf16.mxu1 %v303_v0  ;;  %260 = vmatprep.subr.bf16.mxu0 %v303_v0 }
  0x1f   :  { %289 = vmatpush3.bf16.msra.mxu1 %v299_v8  ;;  %261 = vmatpush3.bf16.msra.mxu0 %v299_v8 }
  0x22   :  { %267 = vmatmul.mubr.bf16.vlgmr.msra.gmra.mrb[0].mxu1 %v300_v9  ;;  %263 = vmatmul.mubr.bf16.vlgmr.msra.gmra.mrb[0].mxu0 %v301_v10 }
  0x23   :  { %270 = vmatprep.mubr.msk.bf16.mxu1 %vm304_vm0, %v303_v0 }
  0x2a   :  { %271 = vmatmul.mubr.bf16.gmra.mrb[4].mxu1 %v302_v11 }
  0xf5   :  { %v156_v13 = vpop.f32.mrb[0].mxu1  ;;  %v148_v15 = vpop.f32.mrb[0].mxu0 }
  0xf6   :  { %v195_v16 = vmul.f32 %v233_v12, %v156_v13  ;;  %v268_v17 = vpop.f32.mrb[1].mxu1  ;;  %v193_v18 = vmul.f32 %v233_v12, %v148_v15  ;;  %v264_v19 = vpop.f32.mrb[1].mxu0 }
  0xf7   :  { %v159_v20 = vpop.f32.mrb[2].mxu1  ;;  %v151_v21 = vpop.f32.mrb[2].mxu0 }
  0xf8   :  { %v205_v22 = vadd.f32 %v234_v14, %v195_v16  ;;  %v196_v23 = vmul.f32 %v233_v12, %v159_v20  ;;  %v203_v24 = vadd.f32 %v234_v14, %v193_v18  ;;  %v269_v25 = vpop.f32.mrb[3].mxu1  ;;  %v194_v26 = vmul.f32 %v233_v12, %v151_v21  ;;  %v265_v27 = vpop.f32.mrb[3].mxu0 }
  0xfa   :  { %v210_v28 = vmax.f32 %v205_v22, 0.0  ;;  %v206_v29 = vadd.f32 %v234_v14, %v196_v23  ;;  %v208_v30 = vmax.f32 %v203_v24, 0.0  ;;  %v204_v31 = vadd.f32 %v234_v14, %v194_v26 }
  0xfc   :  { %215 = vst [vmem:[%s385_s3 + $0x10] sm:$0xff] %v210_v28  ;;  %v211_v32 = vmax.f32 %v206_v29, 0.0  ;;  %213 = vst [vmem:[%s385_s3] sm:$0xff] %v208_v30  ;;  %v209_v33 = vmax.f32 %v204_v31, 0.0 }
  0xfd   :  { %v164_v34 = vpop.f32.mrb[4].mxu1 }
  0xfe   :  { %216 = vst [vmem:[%s385_s3 + $0x18] sm:$0xff] %v211_v32  ;;  %214 = vst [vmem:[%s385_s3 + $0x8] sm:$0xff] %v209_v33  ;;  %v197_v35 = vmul.f32 %v233_v12, %v164_v34  ;;  %v272_v36 = vpop.f32.mrb[5].mxu1 }
  0xff   :  { %v167_v37 = vpop.f32.mrb[6].mxu1 }
 0x100   :  { %v207_v38 = vadd.f32 %v234_v14, %v197_v35  ;;  %v273_v39 = vpop.f32.mrb[7].mxu1 }
 0x102   :  { %v212_v40 = vmax.f32 %v207_v38, 0.0 }
 0x104   :  { %217 = vst [vmem:[%s385_s3 + $0x20] sm:$0xff] %v212_v40 }

// kernel: pspnet_forward.56
= control target key start
LH: loop header
LB: loop body
LE: loop exit
PB: predicated region body
PF: predicated region fallthrough
CT: control target
= control target key end

     0   :  { %s831_s12 = smov 0   ;;  %s833_s13 = smov 0   ;;  %s937_s0 = inlined_call_operand.vmem [shape: bf16[40,640], index: 0, kind: input, shape index: {}]   ;;  %s938_s1 = inlined_call_operand.vmem [shape: bf16[640,128], index: 1, kind: input, shape index: {}]   ;;  %s939_s2 = inlined_call_operand.vmem [shape: f32[8,128], index: 2, kind: input, shape index: {}]   ;;  %s940_s3 = inlined_call_operand.vmem [shape: f32[40,128], index: 3, kind: output, shape index: {}]  }
   0x1   :  { %s835_s14 = smov 0   ;;  %s837_s15 = smov 0  }
   0x2   :  { %s839_s16 = smov 0  }
   0x3 LB: > { %s25_s17 = sadd.s32 1, %s802_s15  ;;  %p48_p1 = scmp.ne.s32.totalorder %s794_s13, %s790_s12  ;;  %s806_s16 = sphi %s839_s16, %s13_s16   ;;  %s802_s15 = sphi %s837_s15, %s944_s15   ;;  %s798_s14 = sphi %s835_s14, %s943_s14   ;;  %s794_s13 = sphi %s833_s13, %s942_s13   ;;  %s790_s12 = sphi %s831_s12, %s941_s12  }
   0x4   : > { %p26_p0 = scmp.ge.s32.totalorder %s25_s17, 5  ;;  %p49_p2 = scmp.eq.s32.totalorder %s806_s16, 0 }
   0x5   : > { %s41_s19 = sadd.s32 1, %s794_s13  ;;  %p633_p5 = scmp.ge.s32.totalorder %s806_s16, 5 }
   0x6   : > { %s946_s17 = smov (%p26_p0, %s25_s17), 0  ;;  %p50_p3 = por %p49_p2, %p48_p1 }
   0x7   : > { %s37_s18 = ssub.s32 %s802_s15, %s946_s17  ;;  %163 = sbr.rel (%p633_p5) target bundleno = 22 (0x16), region = 20 }
   0x8   : > { %p39_p4 = scmp.eq.s32.totalorder %s37_s18, 0 }
   0xa   : > { %s866_s20 = scalar_select %p39_p4, %s794_s13, %s41_s19  }
   0xe   : > { %166 = sbr.rel (!%p50_p3) target bundleno = 22 (0x16), region = 24  ;;  %s168_s21 = sand.u32 (%p50_p3), 1, %s794_s13  }
   0xf   : > { %s634_s22 = sshll.u32 (%p50_p3), %s802_s15, 2  ;;  %s712_s23 = smul.u32 (%p50_p3), 20, %s168_s21 }
  0x10   : > { %s175_s26 = scalar_lea.vmem (%p50_p3), %s937_s0, %s634_s22 }
  0x11   : > { %v191_v0 = vld [vmem:[%s175_s26] sm:$0xf] (%p50_p3)  ;;  %v193_v1 = vld [vmem:[%s175_s26 + $0x14] sm:$0xf] (%p50_p3)  ;;  %v195_v2 = vld [vmem:[%s175_s26 + $0x28] sm:$0xf] (%p50_p3) }
  0x12   : > { %v197_v3 = vld [vmem:[%s175_s26 + $0x3c] sm:$0xf] (%p50_p3)  ;;  %v199_v4 = vld [vmem:[%s175_s26 + $0x50] sm:$0xf] (%p50_p3)  ;;  %s170_s27 = scalar_lea.vmem (%p50_p3), [#allocation3], %s712_s23 }
  0x13   : > { %192 = vst [vmem:[%s170_s27] sm:$0xf] (%p50_p3), %v191_v0  ;;  %194 = vst [vmem:[%s170_s27 + $0x4] sm:$0xf] (%p50_p3), %v193_v1 }
  0x14   : > { %196 = vst [vmem:[%s170_s27 + $0x8] sm:$0xf] (%p50_p3), %v195_v2  ;;  %198 = vst [vmem:[%s170_s27 + $0xc] sm:$0xf] (%p50_p3), %v197_v3 }
  0x15   : > { %200 = vst [vmem:[%s170_s27 + $0x10] sm:$0xf] %v199_v4 }
  0x16 PF: > { %p635_p6 = scmp.ge.s32.totalorder %s806_s16, 1  ;;  %p244_p7 = scmp.lt.s32.totalorder %s806_s16, 6 }
  0x18   : > { %p245_p8 = pnand %p635_p6, %p244_p7 }
  0x19   : > { %s251_s28 = sand.u32 (!%p245_p8), 1, %s790_s12   ;;  %s636_s29 = sshll.u32 (!%p245_p8), %s798_s14, 4 }
  0x1a   : > { %248 = sbr.rel (%p245_p8) target bundleno = 310 (0x136), region = 69  ;;  %p291_p9 = scmp.lt.s32.totalorder (!%p245_p8), %s636_s29, 79 }
  0x1b   : > { %s713_s30 = smul.u32 (!%p245_p8), 20, %s251_s28  ;;  %p638_p10 = scmp.ne.s32.totalorder (!%p245_p8), %s798_s14, 0 }
  0x1d   : > { %s883_s8 = scalar_lea.vmem (!%p245_p8), [#allocation3], %s713_s30 }
  0x21   : > { %s948_s29 = smov (!%p291_p9, %s636_s29), 79  ;;  %316 = sbr.rel (%p638_p10) target bundleno = 40 (0x28), region = 77 }
  0x22   : > { %s637_s4 = sshll.u32 %s948_s29, 2  ;;  %v808_v5 = vmov (!%p638_p10), 0.0  }
  0x23   : > { %s881_s7 = scalar_lea.vmem %s938_s1, %s637_s4  ;;  %317 = vst [vmem:[#allocation2] sm:$0xff] (!%p638_p10), %v808_v5  ;;  %318 = vst [vmem:[#allocation2 + $0x8] sm:$0xff] (!%p638_p10), %v808_v5 }
  0x24   : > { %319 = vst [vmem:[#allocation2 + $0x10] sm:$0xff] (!%p638_p10), %v808_v5  ;;  %320 = vst [vmem:[#allocation2 + $0x18] sm:$0xff] (!%p638_p10), %v808_v5 }
  0x25   : > { %321 = vst [vmem:[#allocation2 + $0x20] sm:$0xff] (!%p638_p10), %v808_v5 }
  0x28 PF: > { %v757_v6 = vld [vmem:[%s881_s7] sm:$0xff]   ;;  %v809_v7 = vmov 0.0   ;;  %v758_v8 = vld [vmem:[%s881_s7 + $0x8] sm:$0xff]   ;;  %vm810_vm0 = vmmov 0   ;;  %v759_v9 = vld [vmem:[%s881_s7 + $0x10] sm:$0xff]   ;;  %p650_p11 = scmp.ne.s32.totalorder %s798_s14, 4 }
  0x29   : > { %696 = vmatprep.subr.bf16.mxu1 %v809_v7  ;;  %668 = vmatprep.subr.bf16.mxu0 %v809_v7  ;;  %v760_v10 = vld [vmem:[%s881_s7 + $0x18] sm:$0xff]   ;;  %v761_v11 = vld [vmem:[%s881_s7 + $0x20] sm:$0xff]   ;;  %v762_v12 = vld [vmem:[%s881_s7 + $0x28] sm:$0xff]  }
  0x2a   : > { %704 = vmatpush3.bf16.msra.mxu1 %v757_v6  ;;  %669 = vmatpush3.bf16.msra.mxu0 %v757_v6  ;;  %v763_v13 = vld [vmem:[%s881_s7 + $0x30] sm:$0xff]   ;;  %v764_v14 = vld [vmem:[%s881_s7 + $0x38] sm:$0xff]   ;;  %v322_v19 = vld [vmem:[#allocation2] sm:$0xff] }
  0x2b   : > { %697 = vmatprep.subr.bf16.mxu1 %v809_v7  ;;  %670 = vmatprep.subr.bf16.mxu0 %v809_v7  ;;  %v765_v15 = vld [vmem:[%s883_s8 + $0x8] sm:$0xff]   ;;  %v766_v16 = vld [vmem:[%s883_s8] sm:$0xff]   ;;  %v767_v17 = vld [vmem:[%s883_s8 + $0x10] ss:$0 sps:$4 sm:$0xff]  }
  0x2c   : > { %688 = vmatprep.mubr.msk.bf16.mxu1 %vm810_vm0, %v809_v7  ;;  %684 = vmatprep.mubr.msk.bf16.mxu0 %vm810_vm0, %v809_v7  ;;  %v324_v18 = vld [vmem:[#allocation2 + $0x10] sm:$0xff]  ;;  %v325_v21 = vld [vmem:[#allocation2 + $0x18] sm:$0xff]  ;;  %v323_v23 = vld [vmem:[#allocation2 + $0x8] sm:$0xff] }
  0x2d   : > { %v326_v34 = vld [vmem:[#allocation2 + $0x20] sm:$0xff] }
  0x2e   : > { %705 = vmatpush3.bf16.msra.mxu1 %v758_v8  ;;  %671 = vmatpush3.bf16.msra.mxu0 %v758_v8  ;;  %v651_v41 = vld [vmem:[%s939_s2] ss:$0 sm:$0xff] (!%p650_p11)  ;;  %v652_v42 = vld [vmem:[%s939_s2 + $0x1] ss:$0 sm:$0xff] (!%p650_p11) }
  0x2f   : > { %698 = vmatprep.subr.bf16.mxu1 %v809_v7  ;;  %672 = vmatprep.subr.bf16.mxu0 %v809_v7 }
  0x32   : > { %706 = vmatpush3.bf16.msra.mxu1 %v759_v9  ;;  %673 = vmatpush3.bf16.msra.mxu0 %v759_v9 }
  0x33   : > { %699 = vmatprep.subr.bf16.mxu1 %v809_v7  ;;  %674 = vmatprep.subr.bf16.mxu0 %v809_v7 }
  0x36   : > { %707 = vmatpush3.bf16.msra.mxu1 %v760_v10  ;;  %675 = vmatpush3.bf16.msra.mxu0 %v760_v10 }
  0x37   : > { %700 = vmatprep.subr.bf16.mxu1 %v809_v7  ;;  %676 = vmatprep.subr.bf16.mxu0 %v809_v7 }
  0x3a   : > { %708 = vmatpush3.bf16.msra.mxu1 %v761_v11  ;;  %677 = vmatpush3.bf16.msra.mxu0 %v761_v11 }
  0x3b   : > { %701 = vmatprep.subr.bf16.mxu1 %v809_v7  ;;  %678 = vmatprep.subr.bf16.mxu0 %v809_v7 }
  0x3e   : > { %709 = vmatpush3.bf16.msra.mxu1 %v762_v12  ;;  %679 = vmatpush3.bf16.msra.mxu0 %v762_v12 }
  0x3f   : > { %702 = vmatprep.subr.bf16.mxu1 %v809_v7  ;;  %680 = vmatprep.subr.bf16.mxu0 %v809_v7 }
  0x42   : > { %710 = vmatpush3.bf16.msra.mxu1 %v763_v13  ;;  %681 = vmatpush3.bf16.msra.mxu0 %v763_v13 }
  0x43   : > { %703 = vmatprep.subr.bf16.mxu1 %v809_v7  ;;  %682 = vmatprep.subr.bf16.mxu0 %v809_v7 }
  0x46   : > { %711 = vmatpush3.bf16.msra.mxu1 %v764_v14  ;;  %683 = vmatpush3.bf16.msra.mxu0 %v764_v14 }
  0x49   : > { %689 = vmatmul.mubr.bf16.vlgmr.msra.gmra.mrb[0].mxu1 %v765_v15  ;;  %685 = vmatmul.mubr.bf16.vlgmr.msra.gmra.mrb[0].mxu0 %v766_v16 }
  0x4a   : > { %692 = vmatprep.mubr.msk.bf16.mxu1 %vm810_vm0, %v809_v7 }
  0x51   : > { %693 = vmatmul.mubr.bf16.gmra.mrb[4].mxu1 %v767_v17 }
 0x11c   : > { %v454_v20 = vpop.f32.mrb[0].mxu1  ;;  %v446_v22 = vpop.f32.mrb[0].mxu0 }
 0x11d   : > { %v470_v24 = vadd.f32 %v454_v20, %v324_v18  ;;  %v690_v25 = vpop.f32.mrb[1].mxu1  ;;  %v468_v26 = vadd.f32 %v446_v22, %v322_v19  ;;  %v686_v27 = vpop.f32.mrb[1].mxu0 }
 0x11e   : > { %v457_v28 = vpop.f32.mrb[2].mxu1  ;;  %v449_v29 = vpop.f32.mrb[2].mxu0 }
 0x11f   : > { %475 = vst [vmem:[#allocation2 + $0x10] sm:$0xff] %v470_v24  ;;  %v471_v30 = vadd.f32 %v457_v28, %v325_v21  ;;  %473 = vst [vmem:[#allocation2] sm:$0xff] %v468_v26  ;;  %v691_v31 = vpop.f32.mrb[3].mxu1  ;;  %v469_v32 = vadd.f32 %v449_v29, %v323_v23  ;;  %v687_v33 = vpop.f32.mrb[3].mxu0 }
 0x121   : > { %476 = vst [vmem:[#allocation2 + $0x18] sm:$0xff] %v471_v30  ;;  %474 = vst [vmem:[#allocation2 + $0x8] sm:$0xff] %v469_v32  ;;  %481 = sbr.rel (%p650_p11) target bundleno = 310 (0x136), region = 81 }
 0x124   : > { %v462_v35 = vpop.f32.mrb[4].mxu1 }
 0x125   : > { %v472_v36 = vadd.f32 %v462_v35, %v326_v34  ;;  %v694_v37 = vpop.f32.mrb[5].mxu1 }
 0x126   : > { %v465_v38 = vpop.f32.mrb[6].mxu1  ;;  %v482_v40 = vld [vmem:[#allocation2] sm:$0xff] (!%p650_p11)  ;;  %v484_v45 = vld [vmem:[#allocation2 + $0x10] sm:$0xff] (!%p650_p11) }
 0x127   : > { %477 = vst [vmem:[#allocation2 + $0x20] sm:$0xff] %v472_v36  ;;  %v695_v39 = vpop.f32.mrb[7].mxu1  ;;  %v492_v43 = vmul.f32 (!%p650_p11), %v651_v41, %v482_v40  ;;  %v494_v48 = vmul.f32 (!%p650_p11), %v651_v41, %v484_v45 }
 0x128   : > { %v483_v44 = vld [vmem:[#allocation2 + $0x8] sm:$0xff]  ;;  %v485_v46 = vld [vmem:[#allocation2 + $0x18] sm:$0xff] }
 0x129   : > { %v493_v47 = vmul.f32 %v651_v41, %v483_v44  ;;  %v495_v49 = vmul.f32 %v651_v41, %v485_v46  ;;  %v502_v51 = vadd.f32 %v652_v42, %v492_v43  ;;  %v504_v54 = vadd.f32 %v652_v42, %v494_v48 }
 0x12b   : > { %v503_v53 = vadd.f32 %v652_v42, %v493_v47  ;;  %v505_v55 = vadd.f32 %v652_v42, %v495_v49  ;;  %v507_v56 = vmax.f32 %v502_v51, 0.0  ;;  %v509_v59 = vmax.f32 %v504_v54, 0.0 }
 0x12d   : > { %v508_v58 = vmax.f32 %v503_v53, 0.0  ;;  %v510_v60 = vmax.f32 %v505_v55, 0.0  ;;  %512 = vst [vmem:[%s940_s3] sm:$0xff] %v507_v56  ;;  %514 = vst [vmem:[%s940_s3 + $0x10] sm:$0xff] %v509_v59 }
 0x12e   : > { %v486_v50 = vld [vmem:[#allocation2 + $0x20] sm:$0xff] }
 0x12f   : > { %v496_v52 = vmul.f32 %v651_v41, %v486_v50  ;;  %513 = vst [vmem:[%s940_s3 + $0x8] sm:$0xff] %v508_v58  ;;  %515 = vst [vmem:[%s940_s3 + $0x18] sm:$0xff] %v510_v60 }
 0x131   : > { %v506_v57 = vadd.f32 %v652_v42, %v496_v52 }
 0x133   : > { %v511_v61 = vmax.f32 %v506_v57, 0.0 }
 0x135   : > { %516 = vst [vmem:[%s940_s3 + $0x20] sm:$0xff] %v511_v61 }
 0x136 PF: > { %s13_s16 = sadd.s32 1, %s806_s16   ;;  %s941_s12 = smov %s794_s13 }
 0x137   : > { %p10_p12 = scmp.ge.s32.totalorder %s13_s16, 7   ;;  %s942_s13 = smov %s866_s20 }
 0x138   : > { %s943_s14 = smov %s802_s15  ;;  %s944_s15 = smov %s946_s17 }
 0x139   :  { %12 = sbr.rel (!%p10_p12) target bundleno = 3 (0x3), region = 122 }

// kernel: pspnet_forward.54
= control target key start
LH: loop header
LB: loop body
LE: loop exit
PB: predicated region body
PF: predicated region fallthrough
CT: control target
= control target key end

     0   :  { %v373_v1 = vmov 0   ;;  %v252_v20 = vlaneseq  ;;  %s487_s1 = inlined_call_operand.vmem [shape: bf16[128,256], index: 1, kind: input, shape index: {}]   ;;  %s488_s0 = inlined_call_operand.vmem [shape: bf16[40,128], index: 0, kind: input, shape index: {}]   ;;  %s489_s2 = inlined_call_operand.vmem [shape: f32[8,256], index: 2, kind: input, shape index: {}]   ;;  %s490_s3 = inlined_call_operand.vmem [shape: f32[40,256], index: 3, kind: output, shape index: {}]  }
   0x1   :  { %v346_v0 = vld [vmem:[%s487_s1 + $0x4] ss:$8 sps:$4 sm:$0xff]   ;;  %198 = vmatprep.mubr.bf16.mxu1 %v373_v1  ;;  %188 = vmatprep.mubr.bf16.mxu0 %v373_v1  ;;  %v348_v2 = vld [vmem:[%s487_s1] ss:$8 sps:$4 sm:$0xff]   ;;  %v349_v3 = vld [vmem:[%s487_s1 + $0x14] ss:$8 sps:$4 sm:$0xff]  }
   0x2   :  { %329 = vmatprep.subr.bf16.mxu1 %v346_v0  ;;  %156 = vmatprep.subr.bf16.mxu0 %v346_v0  ;;  %v351_v4 = vld [vmem:[%s487_s1 + $0x10] ss:$8 sps:$4 sm:$0xff]   ;;  %v352_v5 = vld [vmem:[%s487_s1 + $0x24] ss:$8 sps:$4 sm:$0xff]   ;;  %v354_v6 = vld [vmem:[%s487_s1 + $0x20] ss:$8 sps:$4 sm:$0xff]  }
   0x3   :  { %337 = vmatpush1.bf16.msra.mxu1 %v348_v2  ;;  %157 = vmatpush1.bf16.msra.mxu0 %v348_v2  ;;  %v355_v7 = vld [vmem:[%s487_s1 + $0x34] ss:$8 sps:$4 sm:$0xff]   ;;  %v357_v8 = vld [vmem:[%s487_s1 + $0x30] ss:$8 sps:$4 sm:$0xff]   ;;  %v358_v9 = vld [vmem:[%s487_s1 + $0x44] ss:$8 sps:$4 sm:$0xff]  }
   0x4   :  { %330 = vmatprep.subr.bf16.mxu1 %v349_v3  ;;  %158 = vmatprep.subr.bf16.mxu0 %v349_v3  ;;  %v360_v10 = vld [vmem:[%s487_s1 + $0x40] ss:$8 sps:$4 sm:$0xff]   ;;  %v361_v11 = vld [vmem:[%s487_s1 + $0x54] ss:$8 sps:$4 sm:$0xff]   ;;  %v363_v12 = vld [vmem:[%s487_s1 + $0x50] ss:$8 sps:$4 sm:$0xff]  }
   0x5   :  { %v364_v13 = vld [vmem:[%s487_s1 + $0x64] ss:$8 sps:$4 sm:$0xff]   ;;  %v366_v14 = vld [vmem:[%s487_s1 + $0x60] ss:$8 sps:$4 sm:$0xff]   ;;  %v367_v15 = vld [vmem:[%s487_s1 + $0x74] ss:$8 sps:$4 sm:$0xff]  }
   0x6   :  { %v369_v16 = vld [vmem:[%s487_s1 + $0x70] ss:$8 sps:$4 sm:$0xff]   ;;  %v370_v17 = vld [vmem:[%s488_s0 + $0x8] sm:$0xff]   ;;  %v371_v18 = vld [vmem:[%s488_s0] sm:$0xff]   ;;  %v253_v21 = vshrl.u32 %v252_v20, 7 }
   0x7   :  { %338 = vmatpush1.bf16.msra.mxu1 %v351_v4  ;;  %159 = vmatpush1.bf16.msra.mxu0 %v351_v4  ;;  %v372_v19 = vld [vmem:[%s488_s0 + $0x10] ss:$0 sps:$4 sm:$0xff]   ;;  %v250_v23 = vld [vmem:[%s489_s2] ss:$8 sm:$0x3] }
   0x8   :  { %331 = vmatprep.subr.bf16.mxu1 %v352_v5  ;;  %160 = vmatprep.subr.bf16.mxu0 %v352_v5  ;;  %v254_v22 = vsub.s32 0, %v253_v21  ;;  %v258_v24 = vsub.s32 1, %v253_v21  ;;  %v328_v25 = vld [vmem:[%s489_s2 + $0x1] ss:$8 sm:$0x3] }
   0xa   :  { %v255_v26 = vrot.slane %v250_v23, %v254_v22  ;;  %v259_v27 = vrot.slane %v250_v23, %v258_v24  ;;  %v278_v28 = vrot.slane %v328_v25, %v254_v22  ;;  %v282_v30 = vrot.slane %v328_v25, %v258_v24 }
   0xb   :  { %339 = vmatpush1.bf16.msra.mxu1 %v354_v6  ;;  %161 = vmatpush1.bf16.msra.mxu0 %v354_v6 }
   0xc   :  { %332 = vmatprep.subr.bf16.mxu1 %v355_v7  ;;  %162 = vmatprep.subr.bf16.mxu0 %v355_v7 }
   0xf   :  { %340 = vmatpush1.bf16.msra.mxu1 %v357_v8  ;;  %163 = vmatpush1.bf16.msra.mxu0 %v357_v8 }
  0x10   :  { %333 = vmatprep.subr.bf16.mxu1 %v358_v9  ;;  %164 = vmatprep.subr.bf16.mxu0 %v358_v9 }
  0x13   :  { %341 = vmatpush1.bf16.msra.mxu1 %v360_v10  ;;  %165 = vmatpush1.bf16.msra.mxu0 %v360_v10 }
  0x14   :  { %334 = vmatprep.subr.bf16.mxu1 %v361_v11  ;;  %166 = vmatprep.subr.bf16.mxu0 %v361_v11 }
  0x17   :  { %342 = vmatpush1.bf16.msra.mxu1 %v363_v12  ;;  %167 = vmatpush1.bf16.msra.mxu0 %v363_v12 }
  0x18   :  { %335 = vmatprep.subr.bf16.mxu1 %v364_v13  ;;  %168 = vmatprep.subr.bf16.mxu0 %v364_v13 }
  0x1b   :  { %343 = vmatpush1.bf16.msra.mxu1 %v366_v14  ;;  %169 = vmatpush1.bf16.msra.mxu0 %v366_v14 }
  0x1c   :  { %336 = vmatprep.subr.bf16.mxu1 %v367_v15  ;;  %170 = vmatprep.subr.bf16.mxu0 %v367_v15 }
  0x1f   :  { %344 = vmatpush1.bf16.msra.mxu1 %v369_v16  ;;  %171 = vmatpush1.bf16.msra.mxu0 %v369_v16 }
  0x22   :  { %199 = vmatmul.mubr.bf16.vlgmr.msra.gmra.mrb[0].mxu1 %v370_v17  ;;  %189 = vmatmul.mubr.bf16.vlgmr.msra.gmra.mrb[0].mxu0 %v371_v18 }
  0x23   :  { %208 = vmatprep.mubr.bf16.mxu1 %v373_v1 }
  0x2a   :  { %209 = vmatmul.mubr.bf16.gmra.mrb[4].mxu1 %v372_v19 }
  0xf5   :  { %v200_v29 = vpop.f32.mrb[0].mxu1  ;;  %v190_v31 = vpop.f32.mrb[0].mxu0 }
  0xf6   :  { %v266_v32 = vmul.f32 %v255_v26, %v200_v29  ;;  %v202_v33 = vpop.f32.mrb[1].mxu1  ;;  %v262_v34 = vmul.f32 %v255_v26, %v190_v31  ;;  %v192_v35 = vpop.f32.mrb[1].mxu0 }
  0xf7   :  { %v267_v36 = vmul.f32 %v259_v27, %v202_v33  ;;  %v204_v37 = vpop.f32.mrb[2].mxu1  ;;  %v263_v38 = vmul.f32 %v259_v27, %v192_v35  ;;  %v194_v39 = vpop.f32.mrb[2].mxu0 }
  0xf8   :  { %v289_v40 = vadd.f32 %v278_v28, %v266_v32  ;;  %v268_v41 = vmul.f32 %v255_v26, %v204_v37  ;;  %v285_v42 = vadd.f32 %v278_v28, %v262_v34  ;;  %v206_v43 = vpop.f32.mrb[3].mxu1  ;;  %v264_v44 = vmul.f32 %v255_v26, %v194_v39  ;;  %v196_v45 = vpop.f32.mrb[3].mxu0 }
  0xf9   :  { %v290_v46 = vadd.f32 %v282_v30, %v267_v36  ;;  %v269_v47 = vmul.f32 %v259_v27, %v206_v43  ;;  %v286_v48 = vadd.f32 %v282_v30, %v263_v38  ;;  %v265_v49 = vmul.f32 %v259_v27, %v196_v45 }
  0xfa   :  { %299 = vst [vmem:[%s490_s3 + $0x20] sm:$0xff] %v289_v40  ;;  %v291_v50 = vadd.f32 %v278_v28, %v268_v41  ;;  %295 = vst [vmem:[%s490_s3] sm:$0xff] %v285_v42  ;;  %v287_v51 = vadd.f32 %v278_v28, %v264_v44 }
  0xfb   :  { %300 = vst [vmem:[%s490_s3 + $0x28] sm:$0xff] %v290_v46  ;;  %v292_v52 = vadd.f32 %v282_v30, %v269_v47  ;;  %296 = vst [vmem:[%s490_s3 + $0x8] sm:$0xff] %v286_v48  ;;  %v288_v53 = vadd.f32 %v282_v30, %v265_v49 }
  0xfc   :  { %301 = vst [vmem:[%s490_s3 + $0x30] sm:$0xff] %v291_v50  ;;  %297 = vst [vmem:[%s490_s3 + $0x10] sm:$0xff] %v287_v51 }
  0xfd   :  { %302 = vst [vmem:[%s490_s3 + $0x38] sm:$0xff] %v292_v52  ;;  %298 = vst [vmem:[%s490_s3 + $0x18] sm:$0xff] %v288_v53  ;;  %v210_v54 = vpop.f32.mrb[4].mxu1 }
  0xfe   :  { %v270_v55 = vmul.f32 %v255_v26, %v210_v54  ;;  %v212_v56 = vpop.f32.mrb[5].mxu1 }
  0xff   :  { %v271_v57 = vmul.f32 %v259_v27, %v212_v56  ;;  %v214_v58 = vpop.f32.mrb[6].mxu1 }
 0x100   :  { %v293_v59 = vadd.f32 %v278_v28, %v270_v55  ;;  %v215_v60 = vpop.f32.mrb[7].mxu1 }
 0x101   :  { %v294_v61 = vadd.f32 %v282_v30, %v271_v57 }
 0x102   :  { %303 = vst [vmem:[%s490_s3 + $0x40] sm:$0xff] %v293_v59 }
 0x103   :  { %304 = vst [vmem:[%s490_s3 + $0x48] sm:$0xff] %v294_v61 }

// kernel: pspnet_forward.57
= control target key start
LH: loop header
LB: loop body
LE: loop exit
PB: predicated region body
PF: predicated region fallthrough
CT: control target
= control target key end

     0   :  { %v406_v1 = vmov 0   ;;  %v255_v20 = vlaneseq  ;;  %s569_s1 = inlined_call_operand.vmem [shape: bf16[128,256], index: 1, kind: input, shape index: {}]   ;;  %s570_s0 = inlined_call_operand.vmem [shape: bf16[40,128], index: 0, kind: input, shape index: {}]   ;;  %s571_s2 = inlined_call_operand.vmem [shape: f32[8,256], index: 2, kind: input, shape index: {}]   ;;  %s572_s3 = inlined_call_operand.vmem [shape: f32[40,256], index: 3, kind: input, shape index: {}]   ;;  %s573_s4 = inlined_call_operand.vmem [shape: f32[40,256], index: 4, kind: output, shape index: {}]  }
   0x1   :  { %v379_v0 = vld [vmem:[%s569_s1 + $0x4] ss:$8 sps:$4 sm:$0xff]   ;;  %201 = vmatprep.mubr.bf16.mxu1 %v406_v1  ;;  %191 = vmatprep.mubr.bf16.mxu0 %v406_v1  ;;  %v381_v2 = vld [vmem:[%s569_s1] ss:$8 sps:$4 sm:$0xff]   ;;  %v382_v3 = vld [vmem:[%s569_s1 + $0x14] ss:$8 sps:$4 sm:$0xff]  }
   0x2   :  { %362 = vmatprep.subr.bf16.mxu1 %v379_v0  ;;  %159 = vmatprep.subr.bf16.mxu0 %v379_v0  ;;  %v384_v4 = vld [vmem:[%s569_s1 + $0x10] ss:$8 sps:$4 sm:$0xff]   ;;  %v385_v5 = vld [vmem:[%s569_s1 + $0x24] ss:$8 sps:$4 sm:$0xff]   ;;  %v387_v6 = vld [vmem:[%s569_s1 + $0x20] ss:$8 sps:$4 sm:$0xff]  }
   0x3   :  { %370 = vmatpush1.bf16.msra.mxu1 %v381_v2  ;;  %160 = vmatpush1.bf16.msra.mxu0 %v381_v2  ;;  %v388_v7 = vld [vmem:[%s569_s1 + $0x34] ss:$8 sps:$4 sm:$0xff]   ;;  %v390_v8 = vld [vmem:[%s569_s1 + $0x30] ss:$8 sps:$4 sm:$0xff]   ;;  %v391_v9 = vld [vmem:[%s569_s1 + $0x44] ss:$8 sps:$4 sm:$0xff]  }
   0x4   :  { %363 = vmatprep.subr.bf16.mxu1 %v382_v3  ;;  %161 = vmatprep.subr.bf16.mxu0 %v382_v3  ;;  %v393_v10 = vld [vmem:[%s569_s1 + $0x40] ss:$8 sps:$4 sm:$0xff]   ;;  %v394_v11 = vld [vmem:[%s569_s1 + $0x54] ss:$8 sps:$4 sm:$0xff]   ;;  %v396_v12 = vld [vmem:[%s569_s1 + $0x50] ss:$8 sps:$4 sm:$0xff]  }
   0x5   :  { %v397_v13 = vld [vmem:[%s569_s1 + $0x64] ss:$8 sps:$4 sm:$0xff]   ;;  %v399_v14 = vld [vmem:[%s569_s1 + $0x60] ss:$8 sps:$4 sm:$0xff]   ;;  %v400_v15 = vld [vmem:[%s569_s1 + $0x74] ss:$8 sps:$4 sm:$0xff]  }
   0x6   :  { %v402_v16 = vld [vmem:[%s569_s1 + $0x70] ss:$8 sps:$4 sm:$0xff]   ;;  %v403_v17 = vld [vmem:[%s570_s0 + $0x8] sm:$0xff]   ;;  %v404_v18 = vld [vmem:[%s570_s0] sm:$0xff]   ;;  %v256_v21 = vshrl.u32 %v255_v20, 7 }
   0x7   :  { %371 = vmatpush1.bf16.msra.mxu1 %v384_v4  ;;  %162 = vmatpush1.bf16.msra.mxu0 %v384_v4  ;;  %v405_v19 = vld [vmem:[%s570_s0 + $0x10] ss:$0 sps:$4 sm:$0xff]   ;;  %v253_v23 = vld [vmem:[%s571_s2] ss:$8 sm:$0x3]  ;;  %v305_v59 = vld [vmem:[%s572_s3 + $0x38] sm:$0xff] }
   0x8   :  { %364 = vmatprep.subr.bf16.mxu1 %v385_v5  ;;  %163 = vmatprep.subr.bf16.mxu0 %v385_v5  ;;  %v257_v22 = vsub.s32 0, %v256_v21  ;;  %v261_v24 = vsub.s32 1, %v256_v21  ;;  %v361_v25 = vld [vmem:[%s571_s2 + $0x1] ss:$8 sm:$0x3]  ;;  %v304_v51 = vld [vmem:[%s572_s3 + $0x30] sm:$0xff] }
   0x9   :  { %v302_v36 = vld [vmem:[%s572_s3 + $0x20] sm:$0xff]  ;;  %v303_v43 = vld [vmem:[%s572_s3 + $0x28] sm:$0xff]  ;;  %v300_v54 = vld [vmem:[%s572_s3 + $0x10] sm:$0xff] }
   0xa   :  { %v258_v26 = vrot.slane %v253_v23, %v257_v22  ;;  %v262_v27 = vrot.slane %v253_v23, %v261_v24  ;;  %v495_v28 = vrot.slane %v361_v25, %v257_v22  ;;  %v497_v30 = vrot.slane %v361_v25, %v261_v24  ;;  %v298_v39 = vld [vmem:[%s572_s3] sm:$0xff]  ;;  %v299_v47 = vld [vmem:[%s572_s3 + $0x8] sm:$0xff]  ;;  %v301_v61 = vld [vmem:[%s572_s3 + $0x18] sm:$0xff] }
   0xb   :  { %372 = vmatpush1.bf16.msra.mxu1 %v387_v6  ;;  %164 = vmatpush1.bf16.msra.mxu0 %v387_v6  ;;  %v307_v21 = vld [vmem:[%s572_s3 + $0x48] sm:$0xff] }
   0xc   :  { %365 = vmatprep.subr.bf16.mxu1 %v388_v7  ;;  %165 = vmatprep.subr.bf16.mxu0 %v388_v7 }
   0xf   :  { %373 = vmatpush1.bf16.msra.mxu1 %v390_v8  ;;  %166 = vmatpush1.bf16.msra.mxu0 %v390_v8 }
  0x10   :  { %366 = vmatprep.subr.bf16.mxu1 %v391_v9  ;;  %167 = vmatprep.subr.bf16.mxu0 %v391_v9 }
  0x13   :  { %374 = vmatpush1.bf16.msra.mxu1 %v393_v10  ;;  %168 = vmatpush1.bf16.msra.mxu0 %v393_v10 }
  0x14   :  { %367 = vmatprep.subr.bf16.mxu1 %v394_v11  ;;  %169 = vmatprep.subr.bf16.mxu0 %v394_v11 }
  0x17   :  { %375 = vmatpush1.bf16.msra.mxu1 %v396_v12  ;;  %170 = vmatpush1.bf16.msra.mxu0 %v396_v12 }
  0x18   :  { %368 = vmatprep.subr.bf16.mxu1 %v397_v13  ;;  %171 = vmatprep.subr.bf16.mxu0 %v397_v13 }
  0x1b   :  { %376 = vmatpush1.bf16.msra.mxu1 %v399_v14  ;;  %172 = vmatpush1.bf16.msra.mxu0 %v399_v14 }
  0x1c   :  { %369 = vmatprep.subr.bf16.mxu1 %v400_v15  ;;  %173 = vmatprep.subr.bf16.mxu0 %v400_v15 }
  0x1f   :  { %377 = vmatpush1.bf16.msra.mxu1 %v402_v16  ;;  %174 = vmatpush1.bf16.msra.mxu0 %v402_v16 }
  0x22   :  { %202 = vmatmul.mubr.bf16.vlgmr.msra.gmra.mrb[0].mxu1 %v403_v17  ;;  %192 = vmatmul.mubr.bf16.vlgmr.msra.gmra.mrb[0].mxu0 %v404_v18  ;;  %v306_v17 = vld [vmem:[%s572_s3 + $0x40] sm:$0xff] }
  0x23   :  { %211 = vmatprep.mubr.bf16.mxu1 %v406_v1 }
  0x2a   :  { %212 = vmatmul.mubr.bf16.gmra.mrb[4].mxu1 %v405_v19 }
  0xf5   :  { %v203_v29 = vpop.f32.mrb[0].mxu1  ;;  %v193_v31 = vpop.f32.mrb[0].mxu0 }
  0xf6   :  { %v269_v32 = vmul.f32 %v258_v26, %v203_v29  ;;  %v205_v33 = vpop.f32.mrb[1].mxu1  ;;  %v265_v34 = vmul.f32 %v258_v26, %v193_v31  ;;  %v195_v35 = vpop.f32.mrb[1].mxu0 }
  0xf7   :  { %v270_v37 = vmul.f32 %v262_v27, %v205_v33  ;;  %v207_v38 = vpop.f32.mrb[2].mxu1  ;;  %v266_v40 = vmul.f32 %v262_v27, %v195_v35  ;;  %v197_v41 = vpop.f32.mrb[2].mxu0 }
  0xf8   :  { %v292_v42 = vadd.f32 %v495_v28, %v269_v32  ;;  %v271_v44 = vmul.f32 %v258_v26, %v207_v38  ;;  %v288_v45 = vadd.f32 %v495_v28, %v265_v34  ;;  %v209_v46 = vpop.f32.mrb[3].mxu1  ;;  %v267_v48 = vmul.f32 %v258_v26, %v197_v41  ;;  %v199_v49 = vpop.f32.mrb[3].mxu0 }
  0xf9   :  { %v293_v50 = vadd.f32 %v497_v30, %v270_v37  ;;  %v272_v52 = vmul.f32 %v262_v27, %v209_v46  ;;  %v289_v53 = vadd.f32 %v497_v30, %v266_v40  ;;  %v268_v55 = vmul.f32 %v262_v27, %v199_v49 }
  0xfa   :  { %v312_v56 = vadd.f32 %v302_v36, %v292_v42  ;;  %v294_v57 = vadd.f32 %v495_v28, %v271_v44  ;;  %v308_v58 = vadd.f32 %v298_v39, %v288_v45  ;;  %v290_v60 = vadd.f32 %v495_v28, %v267_v48 }
  0xfb   :  { %v313_v62 = vadd.f32 %v303_v43, %v293_v50  ;;  %v295_v63 = vadd.f32 %v497_v30, %v272_v52  ;;  %v309_v0 = vadd.f32 %v299_v47, %v289_v53  ;;  %v291_v1 = vadd.f32 %v497_v30, %v268_v55 }
  0xfc   :  { %v322_v2 = vmax.f32 %v312_v56, 0.0  ;;  %v314_v3 = vadd.f32 %v304_v51, %v294_v57  ;;  %v318_v4 = vmax.f32 %v308_v58, 0.0  ;;  %v310_v5 = vadd.f32 %v300_v54, %v290_v60 }
  0xfd   :  { %v323_v6 = vmax.f32 %v313_v62, 0.0  ;;  %v315_v7 = vadd.f32 %v305_v59, %v295_v63  ;;  %v319_v8 = vmax.f32 %v309_v0, 0.0  ;;  %v311_v9 = vadd.f32 %v301_v61, %v291_v1  ;;  %v213_v10 = vpop.f32.mrb[4].mxu1 }
  0xfe   :  { %332 = vst [vmem:[%s573_s4 + $0x20] sm:$0xff] %v322_v2  ;;  %v324_v11 = vmax.f32 %v314_v3, 0.0  ;;  %328 = vst [vmem:[%s573_s4] sm:$0xff] %v318_v4  ;;  %v320_v12 = vmax.f32 %v310_v5, 0.0  ;;  %v273_v13 = vmul.f32 %v258_v26, %v213_v10  ;;  %v215_v14 = vpop.f32.mrb[5].mxu1 }
  0xff   :  { %333 = vst [vmem:[%s573_s4 + $0x28] sm:$0xff] %v323_v6  ;;  %v325_v15 = vmax.f32 %v315_v7, 0.0  ;;  %329 = vst [vmem:[%s573_s4 + $0x8] sm:$0xff] %v319_v8  ;;  %v321_v16 = vmax.f32 %v311_v9, 0.0  ;;  %v274_v18 = vmul.f32 %v262_v27, %v215_v14  ;;  %v217_v19 = vpop.f32.mrb[6].mxu1 }
 0x100   :  { %334 = vst [vmem:[%s573_s4 + $0x30] sm:$0xff] %v324_v11  ;;  %330 = vst [vmem:[%s573_s4 + $0x10] sm:$0xff] %v320_v12  ;;  %v296_v20 = vadd.f32 %v495_v28, %v273_v13  ;;  %v218_v22 = vpop.f32.mrb[7].mxu1 }
 0x101   :  { %335 = vst [vmem:[%s573_s4 + $0x38] sm:$0xff] %v325_v15  ;;  %331 = vst [vmem:[%s573_s4 + $0x18] sm:$0xff] %v321_v16  ;;  %v297_v23 = vadd.f32 %v497_v30, %v274_v18 }
 0x102   :  { %v316_v24 = vadd.f32 %v306_v17, %v296_v20 }
 0x103   :  { %v317_v25 = vadd.f32 %v307_v21, %v297_v23 }
 0x104   :  { %v326_v26 = vmax.f32 %v316_v24, 0.0 }
 0x105   :  { %v327_v27 = vmax.f32 %v317_v25, 0.0 }
 0x106   :  { %336 = vst [vmem:[%s573_s4 + $0x40] sm:$0xff] %v326_v26 }
 0x107   :  { %337 = vst [vmem:[%s573_s4 + $0x48] sm:$0xff] %v327_v27 }

// kernel: pspnet_forward.58
= control target key start
LH: loop header
LB: loop body
LE: loop exit
PB: predicated region body
PF: predicated region fallthrough
CT: control target
= control target key end

     0   :  { %s499_s1 = inlined_call_operand.vmem [shape: bf16[256,128], index: 1, kind: input, shape index: {}]   ;;  %s500_s0 = inlined_call_operand.vmem [shape: bf16[40,256], index: 0, kind: input, shape index: {}]   ;;  %s501_s2 = inlined_call_operand.vmem [shape: f32[8,128], index: 2, kind: input, shape index: {}]   ;;  %s502_s3 = inlined_call_operand.vmem [shape: f32[40,128], index: 3, kind: output, shape index: {}]  }
   0x1   :  { %v371_v0 = vld [vmem:[%s499_s1 + $0x40] sm:$0xff]   ;;  %v373_v2 = vld [vmem:[%s499_s1 + $0x48] sm:$0xff]   ;;  %v375_v4 = vld [vmem:[%s499_s1 + $0x50] sm:$0xff]  }
   0x2   :  { %v372_v1 = vld [vmem:[%s499_s1] sm:$0xff]   ;;  %355 = vmatprep.subr.bf16.mxu1 %v371_v0  ;;  %321 = vmatprep.subr.bf16.mxu0 %v371_v0  ;;  %v374_v3 = vld [vmem:[%s499_s1 + $0x8] sm:$0xff]   ;;  %v376_v5 = vld [vmem:[%s499_s1 + $0x10] sm:$0xff]  }
   0x3   :  { %363 = vmatpush3.bf16.msra.mxu1 %v372_v1  ;;  %322 = vmatpush3.bf16.msra.mxu0 %v372_v1  ;;  %v377_v6 = vld [vmem:[%s499_s1 + $0x58] sm:$0xff]   ;;  %v379_v8 = vld [vmem:[%s499_s1 + $0x60] sm:$0xff]   ;;  %v381_v10 = vld [vmem:[%s499_s1 + $0x68] sm:$0xff]  }
   0x4   :  { %356 = vmatprep.subr.bf16.mxu1 %v373_v2  ;;  %323 = vmatprep.subr.bf16.mxu0 %v373_v2  ;;  %v378_v7 = vld [vmem:[%s499_s1 + $0x18] sm:$0xff]   ;;  %v380_v9 = vld [vmem:[%s499_s1 + $0x20] sm:$0xff]   ;;  %v382_v13 = vld [vmem:[%s499_s1 + $0x28] sm:$0xff]  }
   0x5   :  { %v389_v11 = vld [vmem:[%s500_s0 + $0x14] ss:$8 sps:$4 sm:$0xff]   ;;  %v392_v12 = vld [vmem:[%s500_s0 + $0x4] ss:$8 sps:$4 sm:$0xff]   ;;  %v387_v19 = vld [vmem:[%s500_s0 + $0x10] ss:$8 sps:$4 sm:$0xff]  }
   0x6   :  { %v383_v14 = vld [vmem:[%s499_s1 + $0x70] sm:$0xff]   ;;  %229 = vmatprep.mubr.bf16.mxu1 %v389_v11  ;;  %221 = vmatprep.mubr.bf16.mxu0 %v392_v12  ;;  %v385_v16 = vld [vmem:[%s499_s1 + $0x78] sm:$0xff]   ;;  %v33_v18 = vld [vmem:[%s500_s0 + $0x20] sm:$0xff] }
   0x7   :  { %364 = vmatpush3.bf16.msra.mxu1 %v374_v3  ;;  %324 = vmatpush3.bf16.msra.mxu0 %v374_v3  ;;  %v384_v15 = vld [vmem:[%s499_s1 + $0x30] sm:$0xff]   ;;  %v386_v17 = vld [vmem:[%s499_s1 + $0x38] sm:$0xff]   ;;  %v390_v20 = vld [vmem:[%s500_s0] ss:$8 sps:$4 sm:$0xff]   ;;  %v302_v21 = vcombine.high %v33_v18, %v33_v18  ;;  %v301_v22 = vcombine.low %v33_v18, %v33_v18 }
   0x8   :  { %357 = vmatprep.subr.bf16.mxu1 %v375_v4  ;;  %325 = vmatprep.subr.bf16.mxu0 %v375_v4  ;;  %v319_v26 = vld [vmem:[%s501_s2] ss:$0 sm:$0xff]  ;;  %v320_v32 = vld [vmem:[%s501_s2 + $0x1] ss:$0 sm:$0xff] }
   0xb   :  { %365 = vmatpush3.bf16.msra.mxu1 %v376_v5  ;;  %326 = vmatpush3.bf16.msra.mxu0 %v376_v5 }
   0xc   :  { %358 = vmatprep.subr.bf16.mxu1 %v377_v6  ;;  %327 = vmatprep.subr.bf16.mxu0 %v377_v6 }
   0xf   :  { %366 = vmatpush3.bf16.msra.mxu1 %v378_v7  ;;  %328 = vmatpush3.bf16.msra.mxu0 %v378_v7 }
  0x10   :  { %359 = vmatprep.subr.bf16.mxu1 %v379_v8  ;;  %329 = vmatprep.subr.bf16.mxu0 %v379_v8 }
  0x13   :  { %367 = vmatpush3.bf16.msra.mxu1 %v380_v9  ;;  %330 = vmatpush3.bf16.msra.mxu0 %v380_v9 }
  0x14   :  { %360 = vmatprep.subr.bf16.mxu1 %v381_v10  ;;  %331 = vmatprep.subr.bf16.mxu0 %v381_v10 }
  0x17   :  { %368 = vmatpush3.bf16.msra.mxu1 %v382_v13  ;;  %332 = vmatpush3.bf16.msra.mxu0 %v382_v13 }
  0x18   :  { %361 = vmatprep.subr.bf16.mxu1 %v383_v14  ;;  %333 = vmatprep.subr.bf16.mxu0 %v383_v14 }
  0x1b   :  { %369 = vmatpush3.bf16.msra.mxu1 %v384_v15  ;;  %334 = vmatpush3.bf16.msra.mxu0 %v384_v15 }
  0x1c   :  { %362 = vmatprep.subr.bf16.mxu1 %v385_v16  ;;  %335 = vmatprep.subr.bf16.mxu0 %v385_v16 }
  0x1f   :  { %370 = vmatpush3.bf16.msra.mxu1 %v386_v17  ;;  %336 = vmatpush3.bf16.msra.mxu0 %v386_v17 }
  0x22   :  { %230 = vmatmul.mubr.bf16.vlgmr.msra.gmra.mrb[0].mxu1 %v387_v19  ;;  %222 = vmatmul.mubr.bf16.vlgmr.msra.gmra.mrb[0].mxu0 %v390_v20 }
  0x23   :  { %237 = vmatprep.mubr.bf16.mxu1 %v302_v21 }
  0x2a   :  { %238 = vmatmul.mubr.bf16.gmra.mrb[4].mxu1 %v301_v22 }
  0xf5   :  { %v343_v23 = vpop.f32.mrb[0].mxu1  ;;  %v337_v24 = vpop.f32.mrb[0].mxu0 }
  0xf6   :  { %v344_v25 = vpop.f32.mrb[1].mxu1  ;;  %v338_v27 = vpop.f32.mrb[1].mxu0 }
  0xf7   :  { %v345_v28 = vadd.f32 %v344_v25, %v343_v23  ;;  %v346_v29 = vpop.f32.mrb[2].mxu1  ;;  %v339_v30 = vadd.f32 %v338_v27, %v337_v24  ;;  %v340_v31 = vpop.f32.mrb[2].mxu0 }
  0xf8   :  { %v347_v33 = vpop.f32.mrb[3].mxu1  ;;  %v341_v34 = vpop.f32.mrb[3].mxu0 }
  0xf9   :  { %v270_v35 = vmul.f32 %v345_v28, %v319_v26  ;;  %v348_v36 = vadd.f32 %v347_v33, %v346_v29  ;;  %v268_v37 = vmul.f32 %v339_v30, %v319_v26  ;;  %v342_v38 = vadd.f32 %v341_v34, %v340_v31 }
  0xfb   :  { %v280_v39 = vadd.f32 %v320_v32, %v270_v35  ;;  %v271_v40 = vmul.f32 %v348_v36, %v319_v26  ;;  %v278_v41 = vadd.f32 %v320_v32, %v268_v37  ;;  %v269_v42 = vmul.f32 %v342_v38, %v319_v26 }
  0xfd   :  { %v285_v43 = vmax.f32 %v280_v39, 0.0  ;;  %v281_v44 = vadd.f32 %v320_v32, %v271_v40  ;;  %v283_v45 = vmax.f32 %v278_v41, 0.0  ;;  %v279_v46 = vadd.f32 %v320_v32, %v269_v42  ;;  %v349_v47 = vpop.f32.mrb[4].mxu1 }
  0xfe   :  { %v350_v48 = vpop.f32.mrb[5].mxu1 }
  0xff   :  { %290 = vst [vmem:[%s502_s3 + $0x10] sm:$0xff] %v285_v43  ;;  %v286_v49 = vmax.f32 %v281_v44, 0.0  ;;  %288 = vst [vmem:[%s502_s3] sm:$0xff] %v283_v45  ;;  %v284_v50 = vmax.f32 %v279_v46, 0.0  ;;  %v351_v51 = vadd.f32 %v350_v48, %v349_v47  ;;  %v352_v52 = vpop.f32.mrb[6].mxu1 }
 0x100   :  { %v353_v53 = vpop.f32.mrb[7].mxu1 }
 0x101   :  { %291 = vst [vmem:[%s502_s3 + $0x18] sm:$0xff] %v286_v49  ;;  %289 = vst [vmem:[%s502_s3 + $0x8] sm:$0xff] %v284_v50  ;;  %v272_v54 = vmul.f32 %v351_v51, %v319_v26 }
 0x103   :  { %v282_v55 = vadd.f32 %v320_v32, %v272_v54 }
 0x105   :  { %v287_v56 = vmax.f32 %v282_v55, 0.0 }
 0x107   :  { %292 = vst [vmem:[%s502_s3 + $0x20] sm:$0xff] %v287_v56 }

// kernel: pspnet_forward.63
= control target key start
LH: loop header
LB: loop body
LE: loop exit
PB: predicated region body
PF: predicated region fallthrough
CT: control target
= control target key end

     0   :  { %s1117_s12 = smov 0   ;;  %s1119_s13 = smov 0   ;;  %s1255_s0 = inlined_call_operand.vmem [shape: bf16[40,1152], index: 0, kind: input, shape index: {}]   ;;  %s1256_s1 = inlined_call_operand.vmem [shape: bf16[1152,128], index: 1, kind: input, shape index: {}]   ;;  %s1257_s2 = inlined_call_operand.vmem [shape: f32[8,128], index: 2, kind: input, shape index: {}]   ;;  %s1258_s3 = inlined_call_operand.vmem [shape: f32[40,128], index: 3, kind: output, shape index: {}]  }
   0x1   :  { %s1121_s14 = smov 0   ;;  %s1123_s15 = smov 0  }
   0x2   :  { %s1125_s16 = smov 0  }
   0x3 LB: > { %s25_s17 = sadd.s32 1, %s1088_s15  ;;  %p48_p1 = scmp.ne.s32.totalorder %s1080_s13, %s1076_s12  ;;  %s1092_s16 = sphi %s1125_s16, %s13_s16   ;;  %s1088_s15 = sphi %s1123_s15, %s1262_s15   ;;  %s1084_s14 = sphi %s1121_s14, %s1261_s14   ;;  %s1080_s13 = sphi %s1119_s13, %s1260_s13   ;;  %s1076_s12 = sphi %s1117_s12, %s1259_s12  }
   0x4   : > { %p26_p0 = scmp.ge.s32.totalorder %s25_s17, 3  ;;  %p49_p2 = scmp.eq.s32.totalorder %s1092_s16, 0 }
   0x5   : > { %s41_s19 = sadd.s32 1, %s1080_s13  ;;  %p845_p5 = scmp.ge.s32.totalorder %s1092_s16, 3 }
   0x6   : > { %s1264_s17 = smov (%p26_p0, %s25_s17), 0  ;;  %p50_p3 = por %p49_p2, %p48_p1 }
   0x7   : > { %s37_s18 = ssub.s32 %s1088_s15, %s1264_s17  ;;  %163 = sbr.rel (%p845_p5) target bundleno = 25 (0x19), region = 20 }
   0x8   : > { %p39_p4 = scmp.eq.s32.totalorder %s37_s18, 0 }
   0xa   : > { %s1152_s20 = scalar_select %p39_p4, %s1080_s13, %s41_s19  }
   0xe   : > { %166 = sbr.rel (!%p50_p3) target bundleno = 25 (0x19), region = 24  ;;  %s168_s21 = sand.u32 (%p50_p3), 1, %s1080_s13  }
   0xf   : > { %s900_s22 = smul.u32 (%p50_p3), 12, %s1088_s15 }
  0x10   : > { %s974_s23 = smul.u32 (%p50_p3), 60, %s168_s21 }
  0x11   : > { %s176_s26 = scalar_lea.vmem (%p50_p3), %s1255_s0, %s900_s22 }
  0x12   : > { %v191_v0 = vld [vmem:[%s176_s26] sm:$0xff] (%p50_p3)  ;;  %v195_v2 = vld [vmem:[%s176_s26 + $0x48] sm:$0xff] (%p50_p3)  ;;  %s170_s27 = scalar_lea.vmem (%p50_p3), [#allocation3], %s974_s23  ;;  %v199_v4 = vld [vmem:[%s176_s26 + $0x90] sm:$0xff] (%p50_p3) }
  0x13   : > { %v193_v1 = vld [vmem:[%s176_s26 + $0x24] sm:$0xff] (%p50_p3)  ;;  %192 = vst [vmem:[%s170_s27] sm:$0xff] (%p50_p3), %v191_v0  ;;  %196 = vst [vmem:[%s170_s27 + $0x18] sm:$0xff] (%p50_p3), %v195_v2  ;;  %v197_v3 = vld [vmem:[%s176_s26 + $0x6c] sm:$0xff] (%p50_p3) }
  0x14   : > { %194 = vst [vmem:[%s170_s27 + $0xc] sm:$0xff] (%p50_p3), %v193_v1  ;;  %v847_v5 = vld [vmem:[%s176_s26 + $0x8] sm:$0xf] (%p50_p3)  ;;  %198 = vst [vmem:[%s170_s27 + $0x24] sm:$0xff] (%p50_p3), %v197_v3  ;;  %v849_v6 = vld [vmem:[%s176_s26 + $0x2c] sm:$0xf] (%p50_p3) }
  0x15   : > { %200 = vst [vmem:[%s170_s27 + $0x30] sm:$0xff] %v199_v4  ;;  %848 = vst [vmem:[%s170_s27 + $0x8] sm:$0xf] %v847_v5  ;;  %v851_v7 = vld [vmem:[%s176_s26 + $0x50] sm:$0xf] }
  0x16   : > { %v853_v8 = vld [vmem:[%s176_s26 + $0x74] sm:$0xf]  ;;  %850 = vst [vmem:[%s170_s27 + $0x14] sm:$0xf] %v849_v6  ;;  %852 = vst [vmem:[%s170_s27 + $0x20] sm:$0xf] %v851_v7 }
  0x17   : > { %854 = vst [vmem:[%s170_s27 + $0x2c] sm:$0xf] %v853_v8  ;;  %v855_v9 = vld [vmem:[%s176_s26 + $0x98] sm:$0xf] }
  0x18   : > { %856 = vst [vmem:[%s170_s27 + $0x38] sm:$0xf] %v855_v9 }
  0x19 PF: > { %p857_p6 = scmp.ge.s32.totalorder %s1092_s16, 1  ;;  %p234_p7 = scmp.lt.s32.totalorder %s1092_s16, 4 }
  0x1b   : > { %p235_p8 = pnand %p857_p6, %p234_p7 }
  0x1c   : > { %s241_s28 = sand.u32 (!%p235_p8), 1, %s1076_s12   ;;  %s281_s29 = smul.u32 (!%p235_p8), 48, %s1084_s14 }
  0x1d   : > { %238 = sbr.rel (%p235_p8) target bundleno = 326 (0x146), region = 54  ;;  %p859_p10 = scmp.ne.s32.totalorder (!%p235_p8), %s1084_s14, 0 }
  0x1e   : > { %s975_s30 = smul.u32 (!%p235_p8), 60, %s241_s28  ;;  %p282_p9 = scmp.lt.s32.totalorder (!%p235_p8), %s281_s29, 143 }
  0x20   : > { %s1169_s8 = scalar_lea.vmem (!%p235_p8), [#allocation3], %s975_s30 }
  0x24   : > { %s1266_s29 = smov (!%p282_p9, %s281_s29), 143  ;;  %307 = sbr.rel (%p859_p10) target bundleno = 43 (0x2b), region = 62 }
  0x25   : > { %s858_s4 = sshll.u32 %s1266_s29, 2  ;;  %v1094_v10 = vmov (!%p859_p10), 0.0  }
  0x26   : > { %s1167_s7 = scalar_lea.vmem %s1256_s1, %s858_s4  ;;  %308 = vst [vmem:[#allocation2] sm:$0xff] (!%p859_p10), %v1094_v10  ;;  %309 = vst [vmem:[#allocation2 + $0x8] sm:$0xff] (!%p859_p10), %v1094_v10 }
  0x27   : > { %310 = vst [vmem:[#allocation2 + $0x10] sm:$0xff] (!%p859_p10), %v1094_v10  ;;  %311 = vst [vmem:[#allocation2 + $0x18] sm:$0xff] (!%p859_p10), %v1094_v10 }
  0x28   : > { %312 = vst [vmem:[#allocation2 + $0x20] sm:$0xff] (!%p859_p10), %v1094_v10 }
  0x2b PF: > { %v1019_v11 = vld [vmem:[%s1167_s7 + $0x40] sm:$0xff]   ;;  %v1095_v12 = vmov 0.0   ;;  %vm1096_vm0 = vmmov 0   ;;  %v1022_v15 = vld [vmem:[%s1167_s7 + $0x48] sm:$0xff]   ;;  %v1025_v18 = vld [vmem:[%s1167_s7 + $0x50] sm:$0xff]   ;;  %p893_p11 = scmp.ne.s32.totalorder %s1084_s14, 2 }
  0x2c   : > { %946 = vmatprep.subr.bf16.mxu1 %v1095_v12  ;;  %v1020_v13 = vld [vmem:[%s1167_s7] sm:$0xff]   ;;  %901 = vmatprep.subr.bf16.mxu0 %v1019_v11  ;;  %v1023_v16 = vld [vmem:[%s1167_s7 + $0x8] sm:$0xff]   ;;  %v1026_v19 = vld [vmem:[%s1167_s7 + $0x10] sm:$0xff]  }
  0x2d   : > { %v1021_v14 = vld [vmem:[%s1167_s7 + $0x80] sm:$0xff]   ;;  %962 = vmatprep.mubr.msk.bf16.mxu1 %vm1096_vm0, %v1095_v12  ;;  %902 = vmatpush3.bf16.msra.mxu0 %v1020_v13  ;;  %v1024_v17 = vld [vmem:[%s1167_s7 + $0x88] sm:$0xff]   ;;  %v1027_v20 = vld [vmem:[%s1167_s7 + $0x90] sm:$0xff]  }
  0x2e   : > { %947 = vmatpush3.bf16.msra.mxu1 %v1021_v14  ;;  %903 = vmatprep.subr.bf16.mxu0 %v1022_v15  ;;  %v1028_v21 = vld [vmem:[%s1167_s7 + $0x58] sm:$0xff]   ;;  %v1031_v24 = vld [vmem:[%s1167_s7 + $0x60] sm:$0xff]   ;;  %v1034_v27 = vld [vmem:[%s1167_s7 + $0x68] sm:$0xff]  }
  0x2f   : > { %948 = vmatprep.subr.bf16.mxu1 %v1095_v12  ;;  %v1029_v22 = vld [vmem:[%s1167_s7 + $0x18] sm:$0xff]   ;;  %v1032_v25 = vld [vmem:[%s1167_s7 + $0x20] sm:$0xff]   ;;  %v1035_v28 = vld [vmem:[%s1167_s7 + $0x28] sm:$0xff]  }
  0x30   : > { %v1030_v23 = vld [vmem:[%s1167_s7 + $0x98] sm:$0xff]   ;;  %v1033_v26 = vld [vmem:[%s1167_s7 + $0xa0] sm:$0xff]   ;;  %v1036_v29 = vld [vmem:[%s1167_s7 + $0xa8] sm:$0xff]  }
  0x31   : > { %904 = vmatpush3.bf16.msra.mxu0 %v1023_v16  ;;  %v1037_v30 = vld [vmem:[%s1167_s7 + $0x70] sm:$0xff]   ;;  %v1040_v33 = vld [vmem:[%s1167_s7 + $0x78] sm:$0xff]   ;;  %v313_v52 = vld [vmem:[#allocation2] sm:$0xff] }
  0x32   : > { %949 = vmatpush3.bf16.msra.mxu1 %v1024_v17  ;;  %905 = vmatprep.subr.bf16.mxu0 %v1025_v18  ;;  %v1038_v31 = vld [vmem:[%s1167_s7 + $0x30] sm:$0xff]   ;;  %v1041_v35 = vld [vmem:[%s1167_s7 + $0x38] sm:$0xff]   ;;  %v314_v58 = vld [vmem:[#allocation2 + $0x8] sm:$0xff] }
  0x33   : > { %950 = vmatprep.subr.bf16.mxu1 %v1095_v12  ;;  %v1039_v32 = vld [vmem:[%s1167_s7 + $0xb0] sm:$0xff]   ;;  %v1042_v36 = vld [vmem:[%s1167_s7 + $0xb8] sm:$0xff]  }
  0x34   : > { %v1045_v34 = vld [vmem:[%s1169_s8 + $0x4] ss:$12 sps:$4 sm:$0xff]   ;;  %v1043_v37 = vld [vmem:[%s1169_s8] ss:$12 sps:$4 sm:$0xff]   ;;  %v1046_v38 = vld [vmem:[%s1169_s8 + $0x8] ss:$12 sps:$4 sm:$0xff]  }
  0x35   : > { %906 = vmatpush3.bf16.msra.mxu0 %v1026_v19  ;;  %595 = vmatprep.mubr.bf16.mxu0 %v1045_v34  ;;  %v1047_v39 = vld [vmem:[%s1169_s8 + $0x1c] ss:$12 sps:$4 sm:$0xff]   ;;  %v326_v40 = vld [vmem:[%s1169_s8 + $0x30] sm:$0xff]  ;;  %v1049_v41 = vld [vmem:[%s1169_s8 + $0x18] ss:$12 sps:$4 sm:$0xff]  }
  0x36   : > { %951 = vmatpush3.bf16.msra.mxu1 %v1027_v20  ;;  %907 = vmatprep.subr.bf16.mxu0 %v1028_v21  ;;  %v1050_v42 = vld [vmem:[%s1169_s8 + $0x20] ss:$12 sps:$4 sm:$0xff]   ;;  %v867_v43 = vcombine.high %v326_v40, %v326_v40  ;;  %v866_v44 = vcombine.low %v326_v40, %v326_v40  ;;  %v1053_v45 = vld [vmem:[%s1169_s8 + $0x38] ss:$0 sps:$4 sm:$0xff]  }
  0x37   : > { %952 = vmatprep.subr.bf16.mxu1 %v1095_v12  ;;  %v315_v4 = vld [vmem:[#allocation2 + $0x10] sm:$0xff]  ;;  %v316_v10 = vld [vmem:[#allocation2 + $0x18] sm:$0xff]  ;;  %v317_v20 = vld [vmem:[#allocation2 + $0x20] sm:$0xff] }
  0x39   : > { %908 = vmatpush3.bf16.msra.mxu0 %v1029_v22 }
  0x3a   : > { %953 = vmatpush3.bf16.msra.mxu1 %v1030_v23  ;;  %909 = vmatprep.subr.bf16.mxu0 %v1031_v24 }
  0x3b   : > { %954 = vmatprep.subr.bf16.mxu1 %v1095_v12 }
  0x3d   : > { %910 = vmatpush3.bf16.msra.mxu0 %v1032_v25 }
  0x3e   : > { %955 = vmatpush3.bf16.msra.mxu1 %v1033_v26  ;;  %911 = vmatprep.subr.bf16.mxu0 %v1034_v27  ;;  %v894_v27 = vld [vmem:[%s1257_s2] ss:$0 sm:$0xff] (!%p893_p11) }
  0x3f   : > { %956 = vmatprep.subr.bf16.mxu1 %v1095_v12 }
  0x41   : > { %912 = vmatpush3.bf16.msra.mxu0 %v1035_v28  ;;  %v895_v28 = vld [vmem:[%s1257_s2 + $0x1] ss:$0 sm:$0xff] (!%p893_p11) }
  0x42   : > { %957 = vmatpush3.bf16.msra.mxu1 %v1036_v29  ;;  %913 = vmatprep.subr.bf16.mxu0 %v1037_v30 }
  0x43   : > { %958 = vmatprep.subr.bf16.mxu1 %v1095_v12 }
  0x45   : > { %914 = vmatpush3.bf16.msra.mxu0 %v1038_v31 }
  0x46   : > { %959 = vmatpush3.bf16.msra.mxu1 %v1039_v32  ;;  %915 = vmatprep.subr.bf16.mxu0 %v1040_v33 }
  0x47   : > { %960 = vmatprep.subr.bf16.mxu1 %v1095_v12 }
  0x49   : > { %916 = vmatpush3.bf16.msra.mxu0 %v1041_v35 }
  0x4a   : > { %961 = vmatpush3.bf16.msra.mxu1 %v1042_v36 }
  0x4c   : > { %596 = vmatmul.mubr.bf16.vlgmr.msra.gmra.mrb[0].mxu0 %v1043_v37 }
  0x4d   : > { %963 = vmatmul.mubr.bf16.vlgmr.msra.gmra.mrb[0].mxu1 %v1046_v38  ;;  %603 = vmatprep.mubr.bf16.mxu0 %v1047_v39 }
  0x4e   : > { %966 = vmatprep.mubr.msk.bf16.mxu1 %vm1096_vm0, %v1095_v12 }
  0x54   : > { %604 = vmatmul.mubr.bf16.gmra.mrb[4].mxu0 %v1049_v41 }
  0x55   : > { %967 = vmatmul.mubr.bf16.gmra.mrb[4].mxu1 %v1050_v42  ;;  %611 = vmatprep.mubr.bf16.mxu0 %v867_v43 }
  0x56   : > { %970 = vmatprep.mubr.msk.bf16.mxu1 %vm1096_vm0, %v1095_v12 }
  0x5c   : > { %612 = vmatmul.mubr.bf16.gmra.mrb[8].mxu0 %v866_v44 }
  0x5d   : > { %971 = vmatmul.mubr.bf16.gmra.mrb[8].mxu1 %v1053_v45 }
 0x11f   : > { %v917_v46 = vpop.f32.mrb[0].mxu0 }
 0x120   : > { %v653_v47 = vpop.f32.mrb[0].mxu1  ;;  %v918_v48 = vpop.f32.mrb[1].mxu0 }
 0x121   : > { %v919_v49 = vadd.f32 %v918_v48, %v917_v46  ;;  %v964_v50 = vpop.f32.mrb[1].mxu1  ;;  %v920_v51 = vpop.f32.mrb[2].mxu0 }
 0x122   : > { %v656_v53 = vpop.f32.mrb[2].mxu1  ;;  %v921_v54 = vpop.f32.mrb[3].mxu0 }
 0x123   : > { %v654_v55 = vadd.f32 %v919_v49, %v653_v47  ;;  %v922_v56 = vadd.f32 %v921_v54, %v920_v51  ;;  %v965_v57 = vpop.f32.mrb[3].mxu1 }
 0x125   : > { %v675_v59 = vadd.f32 %v654_v55, %v313_v52  ;;  %v657_v60 = vadd.f32 %v922_v56, %v656_v53 }
 0x127   : > { %680 = vst [vmem:[#allocation2] sm:$0xff] %v675_v59  ;;  %v676_v61 = vadd.f32 %v657_v60, %v314_v58  ;;  %v923_v62 = vpop.f32.mrb[4].mxu0 }
 0x128   : > { %v661_v63 = vpop.f32.mrb[4].mxu1  ;;  %v924_v0 = vpop.f32.mrb[5].mxu0 }
 0x129   : > { %681 = vst [vmem:[#allocation2 + $0x8] sm:$0xff] %v676_v61  ;;  %v925_v1 = vadd.f32 %v924_v0, %v923_v62  ;;  %v968_v2 = vpop.f32.mrb[5].mxu1  ;;  %v926_v3 = vpop.f32.mrb[6].mxu0 }
 0x12a   : > { %v664_v5 = vpop.f32.mrb[6].mxu1  ;;  %v927_v6 = vpop.f32.mrb[7].mxu0 }
 0x12b   : > { %v662_v7 = vadd.f32 %v925_v1, %v661_v63  ;;  %v928_v8 = vadd.f32 %v927_v6, %v926_v3  ;;  %v969_v9 = vpop.f32.mrb[7].mxu1 }
 0x12d   : > { %v677_v11 = vadd.f32 %v662_v7, %v315_v4  ;;  %v665_v12 = vadd.f32 %v928_v8, %v664_v5 }
 0x12e   : > { %v689_v26 = vld [vmem:[#allocation2] sm:$0xff] (!%p893_p11) }
 0x12f   : > { %682 = vst [vmem:[#allocation2 + $0x10] sm:$0xff] %v677_v11  ;;  %v678_v13 = vadd.f32 %v665_v12, %v316_v10  ;;  %v929_v14 = vpop.f32.mrb[8].mxu0  ;;  %v699_v29 = vmul.f32 (!%p893_p11), %v894_v27, %v689_v26 }
 0x130   : > { %v669_v15 = vpop.f32.mrb[8].mxu1  ;;  %v930_v16 = vpop.f32.mrb[9].mxu0  ;;  %v690_v30 = vld [vmem:[#allocation2 + $0x8] sm:$0xff] (!%p893_p11) }
 0x131   : > { %683 = vst [vmem:[#allocation2 + $0x18] sm:$0xff] %v678_v13  ;;  %v931_v17 = vadd.f32 %v930_v16, %v929_v14  ;;  %v972_v18 = vpop.f32.mrb[9].mxu1  ;;  %v932_v19 = vpop.f32.mrb[10].mxu0  ;;  %688 = sbr.rel (%p893_p11) target bundleno = 326 (0x146), region = 66  ;;  %v700_v33 = vmul.f32 (!%p893_p11), %v894_v27, %v690_v30  ;;  %v709_v37 = vadd.f32 (!%p893_p11), %v895_v28, %v699_v29 }
 0x132   : > { %v672_v21 = vpop.f32.mrb[10].mxu1  ;;  %v933_v22 = vpop.f32.mrb[11].mxu0 }
 0x133   : > { %v670_v23 = vadd.f32 %v931_v17, %v669_v15  ;;  %v973_v24 = vpop.f32.mrb[11].mxu1  ;;  %v710_v39 = vadd.f32 (!%p893_p11), %v895_v28, %v700_v33  ;;  %v714_v42 = vmax.f32 (!%p893_p11), %v709_v37, 0.0 }
 0x135   : > { %v679_v25 = vadd.f32 %v670_v23, %v317_v20  ;;  %v715_v44 = vmax.f32 (!%p893_p11), %v710_v39, 0.0  ;;  %719 = vst [vmem:[%s1258_s3] sm:$0xff] (!%p893_p11), %v714_v42 }
 0x136   : > { %v691_v31 = vld [vmem:[#allocation2 + $0x10] sm:$0xff] (!%p893_p11) }
 0x137   : > { %684 = vst [vmem:[#allocation2 + $0x20] sm:$0xff] %v679_v25  ;;  %v701_v34 = vmul.f32 (!%p893_p11), %v894_v27, %v691_v31  ;;  %720 = vst [vmem:[%s1258_s3 + $0x8] sm:$0xff] (!%p893_p11), %v715_v44 }
 0x138   : > { %v692_v32 = vld [vmem:[#allocation2 + $0x18] sm:$0xff] }
 0x139   : > { %v702_v35 = vmul.f32 %v894_v27, %v692_v32  ;;  %v711_v40 = vadd.f32 %v895_v28, %v701_v34 }
 0x13b   : > { %v712_v41 = vadd.f32 %v895_v28, %v702_v35  ;;  %v716_v45 = vmax.f32 %v711_v40, 0.0 }
 0x13d   : > { %v717_v46 = vmax.f32 %v712_v41, 0.0  ;;  %721 = vst [vmem:[%s1258_s3 + $0x10] sm:$0xff] %v716_v45 }
 0x13e   : > { %v693_v36 = vld [vmem:[#allocation2 + $0x20] sm:$0xff] }
 0x13f   : > { %v703_v38 = vmul.f32 %v894_v27, %v693_v36  ;;  %722 = vst [vmem:[%s1258_s3 + $0x18] sm:$0xff] %v717_v46 }
 0x141   : > { %v713_v43 = vadd.f32 %v895_v28, %v703_v38 }
 0x143   : > { %v718_v47 = vmax.f32 %v713_v43, 0.0 }
 0x145   : > { %723 = vst [vmem:[%s1258_s3 + $0x20] sm:$0xff] %v718_v47 }
 0x146 PF: > { %s13_s16 = sadd.s32 1, %s1092_s16   ;;  %s1259_s12 = smov %s1080_s13 }
 0x147   : > { %p10_p12 = scmp.ge.s32.totalorder %s13_s16, 5   ;;  %s1260_s13 = smov %s1152_s20 }
 0x148   : > { %s1261_s14 = smov %s1088_s15  ;;  %s1262_s15 = smov %s1264_s17 }
 0x149   :  { %12 = sbr.rel (!%p10_p12) target bundleno = 3 (0x3), region = 113 }

// kernel: pspnet_forward.64
= control target key start
LH: loop header
LB: loop body
LE: loop exit
PB: predicated region body
PF: predicated region fallthrough
CT: control target
= control target key end

     0   :  { %v717_v1 = vmov 0   ;;  %v462_v36 = vlaneseq  ;;  %s1036_s1 = inlined_call_operand.vmem [shape: bf16[128,512], index: 1, kind: input, shape index: {}]   ;;  %s1037_s0 = inlined_call_operand.vmem [shape: bf16[40,128], index: 0, kind: input, shape index: {}]   ;;  %s1038_s2 = inlined_call_operand.vmem [shape: f32[8,512], index: 2, kind: input, shape index: {}]   ;;  %s1039_s3 = inlined_call_operand.vmem [shape: f32[40,512], index: 3, kind: input, shape index: {}]   ;;  %s1040_s4 = inlined_call_operand.vmem [shape: f32[40,512], index: 4, kind: output, shape index: {}]  }
   0x1   :  { %v666_v0 = vld [vmem:[%s1036_s1 + $0x4] ss:$16 sps:$4 sm:$0xff]   ;;  %307 = vmatprep.mubr.bf16.mxu0 %v717_v1  ;;  %368 = vmatprep.mubr.bf16.mxu1 %v717_v1  ;;  %v668_v2 = vld [vmem:[%s1036_s1 + $0xc] ss:$16 sps:$4 sm:$0xff]   ;;  %v670_v3 = vld [vmem:[%s1036_s1] ss:$16 sps:$4 sm:$0xff]  }
   0x2   :  { %275 = vmatprep.subr.bf16.mxu0 %v666_v0  ;;  %v671_v4 = vld [vmem:[%s1036_s1 + $0x8] ss:$16 sps:$4 sm:$0xff]   ;;  %336 = vmatprep.subr.bf16.mxu1 %v668_v2  ;;  %v672_v5 = vld [vmem:[%s1036_s1 + $0x24] ss:$16 sps:$4 sm:$0xff]   ;;  %v674_v6 = vld [vmem:[%s1036_s1 + $0x2c] ss:$16 sps:$4 sm:$0xff]  }
   0x3   :  { %276 = vmatpush1.bf16.msra.mxu0 %v670_v3  ;;  %337 = vmatpush1.bf16.msra.mxu1 %v671_v4  ;;  %v676_v7 = vld [vmem:[%s1036_s1 + $0x20] ss:$16 sps:$4 sm:$0xff]   ;;  %v677_v8 = vld [vmem:[%s1036_s1 + $0x28] ss:$16 sps:$4 sm:$0xff]   ;;  %v678_v9 = vld [vmem:[%s1036_s1 + $0x44] ss:$16 sps:$4 sm:$0xff]  }
   0x4   :  { %277 = vmatprep.subr.bf16.mxu0 %v672_v5  ;;  %338 = vmatprep.subr.bf16.mxu1 %v674_v6  ;;  %v680_v10 = vld [vmem:[%s1036_s1 + $0x4c] ss:$16 sps:$4 sm:$0xff]   ;;  %v682_v11 = vld [vmem:[%s1036_s1 + $0x40] ss:$16 sps:$4 sm:$0xff]   ;;  %v683_v12 = vld [vmem:[%s1036_s1 + $0x48] ss:$16 sps:$4 sm:$0xff]  }
   0x5   :  { %v684_v13 = vld [vmem:[%s1036_s1 + $0x64] ss:$16 sps:$4 sm:$0xff]   ;;  %v686_v14 = vld [vmem:[%s1036_s1 + $0x6c] ss:$16 sps:$4 sm:$0xff]   ;;  %v688_v15 = vld [vmem:[%s1036_s1 + $0x60] ss:$16 sps:$4 sm:$0xff]  }
   0x6   :  { %v689_v16 = vld [vmem:[%s1036_s1 + $0x68] ss:$16 sps:$4 sm:$0xff]   ;;  %v690_v17 = vld [vmem:[%s1036_s1 + $0x84] ss:$16 sps:$4 sm:$0xff]   ;;  %v692_v18 = vld [vmem:[%s1036_s1 + $0x8c] ss:$16 sps:$4 sm:$0xff]  }
   0x7   :  { %278 = vmatpush1.bf16.msra.mxu0 %v676_v7  ;;  %339 = vmatpush1.bf16.msra.mxu1 %v677_v8  ;;  %v694_v19 = vld [vmem:[%s1036_s1 + $0x80] ss:$16 sps:$4 sm:$0xff]   ;;  %v695_v20 = vld [vmem:[%s1036_s1 + $0x88] ss:$16 sps:$4 sm:$0xff]   ;;  %v696_v21 = vld [vmem:[%s1036_s1 + $0xa4] ss:$16 sps:$4 sm:$0xff]  }
   0x8   :  { %279 = vmatprep.subr.bf16.mxu0 %v678_v9  ;;  %340 = vmatprep.subr.bf16.mxu1 %v680_v10  ;;  %v698_v22 = vld [vmem:[%s1036_s1 + $0xac] ss:$16 sps:$4 sm:$0xff]   ;;  %v700_v23 = vld [vmem:[%s1036_s1 + $0xa0] ss:$16 sps:$4 sm:$0xff]   ;;  %v701_v24 = vld [vmem:[%s1036_s1 + $0xa8] ss:$16 sps:$4 sm:$0xff]  }
   0x9   :  { %v702_v25 = vld [vmem:[%s1036_s1 + $0xc4] ss:$16 sps:$4 sm:$0xff]   ;;  %v704_v26 = vld [vmem:[%s1036_s1 + $0xcc] ss:$16 sps:$4 sm:$0xff]   ;;  %v706_v27 = vld [vmem:[%s1036_s1 + $0xc0] ss:$16 sps:$4 sm:$0xff]  }
   0xa   :  { %v707_v28 = vld [vmem:[%s1036_s1 + $0xc8] ss:$16 sps:$4 sm:$0xff]   ;;  %v708_v29 = vld [vmem:[%s1036_s1 + $0xe4] ss:$16 sps:$4 sm:$0xff]   ;;  %v710_v30 = vld [vmem:[%s1036_s1 + $0xec] ss:$16 sps:$4 sm:$0xff]  }
   0xb   :  { %280 = vmatpush1.bf16.msra.mxu0 %v682_v11  ;;  %341 = vmatpush1.bf16.msra.mxu1 %v683_v12  ;;  %v712_v31 = vld [vmem:[%s1036_s1 + $0xe0] ss:$16 sps:$4 sm:$0xff]   ;;  %v713_v32 = vld [vmem:[%s1036_s1 + $0xe8] ss:$16 sps:$4 sm:$0xff]   ;;  %v463_v37 = vshrl.u32 %v462_v36, 7 }
   0xc   :  { %281 = vmatprep.subr.bf16.mxu0 %v684_v13  ;;  %342 = vmatprep.subr.bf16.mxu1 %v686_v14  ;;  %v714_v33 = vld [vmem:[%s1037_s0] sm:$0xff]   ;;  %v715_v34 = vld [vmem:[%s1037_s0 + $0x8] sm:$0xff]   ;;  %v716_v35 = vld [vmem:[%s1037_s0 + $0x10] ss:$0 sps:$4 sm:$0xff]  }
   0xd   :  { %v464_v38 = vsub.s32 0, %v463_v37  ;;  %v472_v39 = vsub.s32 2, %v463_v37  ;;  %v460_v40 = vld [vmem:[%s1038_s2] ss:$8 sm:$0xf]  ;;  %v468_v41 = vsub.s32 1, %v463_v37 }
   0xe   :  { %v476_v42 = vsub.s32 3, %v463_v37  ;;  %v664_v43 = vld [vmem:[%s1038_s2 + $0x1] ss:$8 sm:$0xf] }
   0xf   :  { %282 = vmatpush1.bf16.msra.mxu0 %v688_v15  ;;  %343 = vmatpush1.bf16.msra.mxu1 %v689_v16  ;;  %v860_v44 = vrot.slane %v460_v40, %v464_v38  ;;  %v862_v45 = vrot.slane %v460_v40, %v472_v39  ;;  %v864_v46 = vrot.slane %v460_v40, %v468_v41  ;;  %v545_v58 = vld [vmem:[%s1039_s3] sm:$0xff]  ;;  %v547_v59 = vld [vmem:[%s1039_s3 + $0x10] sm:$0xff]  ;;  %v546_v2 = vld [vmem:[%s1039_s3 + $0x8] sm:$0xff] }
  0x10   :  { %283 = vmatprep.subr.bf16.mxu0 %v690_v17  ;;  %344 = vmatprep.subr.bf16.mxu1 %v692_v18  ;;  %v866_v47 = vrot.slane %v460_v40, %v476_v42  ;;  %v868_v48 = vrot.slane %v664_v43, %v464_v38  ;;  %v870_v49 = vrot.slane %v664_v43, %v472_v39  ;;  %v548_v3 = vld [vmem:[%s1039_s3 + $0x18] sm:$0xff]  ;;  %v549_v10 = vld [vmem:[%s1039_s3 + $0x20] sm:$0xff]  ;;  %v551_v11 = vld [vmem:[%s1039_s3 + $0x30] sm:$0xff] }
  0x11   :  { %v872_v52 = vrot.slane %v664_v43, %v468_v41  ;;  %v874_v53 = vrot.slane %v664_v43, %v476_v42  ;;  %v550_v18 = vld [vmem:[%s1039_s3 + $0x28] sm:$0xff]  ;;  %v553_v42 = vld [vmem:[%s1039_s3 + $0x40] sm:$0xff]  ;;  %v555_v43 = vld [vmem:[%s1039_s3 + $0x50] sm:$0xff] }
  0x13   :  { %284 = vmatpush1.bf16.msra.mxu0 %v694_v19  ;;  %345 = vmatpush1.bf16.msra.mxu1 %v695_v20  ;;  %v552_v19 = vld [vmem:[%s1039_s3 + $0x38] sm:$0xff] }
  0x14   :  { %285 = vmatprep.subr.bf16.mxu0 %v696_v21  ;;  %346 = vmatprep.subr.bf16.mxu1 %v698_v22 }
  0x17   :  { %286 = vmatpush1.bf16.msra.mxu0 %v700_v23  ;;  %347 = vmatpush1.bf16.msra.mxu1 %v701_v24 }
  0x18   :  { %287 = vmatprep.subr.bf16.mxu0 %v702_v25  ;;  %348 = vmatprep.subr.bf16.mxu1 %v704_v26 }
  0x1b   :  { %288 = vmatpush1.bf16.msra.mxu0 %v706_v27  ;;  %349 = vmatpush1.bf16.msra.mxu1 %v707_v28 }
  0x1c   :  { %289 = vmatprep.subr.bf16.mxu0 %v708_v29  ;;  %350 = vmatprep.subr.bf16.mxu1 %v710_v30 }
  0x1f   :  { %290 = vmatpush1.bf16.msra.mxu0 %v712_v31  ;;  %351 = vmatpush1.bf16.msra.mxu1 %v713_v32 }
  0x22   :  { %308 = vmatmul.mubr.bf16.vlgmr.msra.gmra.mrb[0].mxu0 %v714_v33  ;;  %369 = vmatmul.mubr.bf16.vlgmr.msra.gmra.mrb[0].mxu1 %v714_v33 }
  0x23   :  { %317 = vmatprep.mubr.bf16.mxu0 %v717_v1  ;;  %378 = vmatprep.mubr.bf16.mxu1 %v717_v1 }
  0x2a   :  { %318 = vmatmul.mubr.bf16.gmra.mrb[4].mxu0 %v715_v34  ;;  %379 = vmatmul.mubr.bf16.gmra.mrb[4].mxu1 %v715_v34 }
  0x2b   :  { %327 = vmatprep.mubr.bf16.mxu0 %v717_v1  ;;  %388 = vmatprep.mubr.bf16.mxu1 %v717_v1 }
  0x32   :  { %328 = vmatmul.mubr.bf16.gmra.mrb[8].mxu0 %v716_v35  ;;  %389 = vmatmul.mubr.bf16.gmra.mrb[8].mxu1 %v716_v35 }
  0xf5   :  { %v309_v50 = vpop.f32.mrb[0].mxu0  ;;  %v370_v51 = vpop.f32.mrb[0].mxu1 }
  0xf6   :  { %v482_v54 = vmul.f32 %v860_v44, %v309_v50  ;;  %v484_v55 = vmul.f32 %v862_v45, %v370_v51  ;;  %v311_v56 = vpop.f32.mrb[1].mxu0  ;;  %v372_v57 = vpop.f32.mrb[1].mxu1 }
  0xf7   :  { %v483_v60 = vmul.f32 %v864_v46, %v311_v56  ;;  %v485_v61 = vmul.f32 %v866_v47, %v372_v57  ;;  %v313_v62 = vpop.f32.mrb[2].mxu0  ;;  %v374_v63 = vpop.f32.mrb[2].mxu1 }
  0xf8   :  { %v525_v0 = vadd.f32 %v868_v48, %v482_v54  ;;  %v527_v1 = vadd.f32 %v870_v49, %v484_v55  ;;  %v486_v4 = vmul.f32 %v860_v44, %v313_v62  ;;  %v488_v5 = vmul.f32 %v862_v45, %v374_v63  ;;  %v315_v6 = vpop.f32.mrb[3].mxu0  ;;  %v376_v7 = vpop.f32.mrb[3].mxu1 }
  0xf9   :  { %v526_v8 = vadd.f32 %v872_v52, %v483_v60  ;;  %v528_v9 = vadd.f32 %v874_v53, %v485_v61  ;;  %v487_v12 = vmul.f32 %v864_v46, %v315_v6  ;;  %v489_v13 = vmul.f32 %v866_v47, %v376_v7 }
  0xfa   :  { %v565_v14 = vadd.f32 %v545_v58, %v525_v0  ;;  %v567_v15 = vadd.f32 %v547_v59, %v527_v1  ;;  %v529_v16 = vadd.f32 %v868_v48, %v486_v4  ;;  %v531_v17 = vadd.f32 %v870_v49, %v488_v5  ;;  %v554_v58 = vld [vmem:[%s1039_s3 + $0x48] sm:$0xff]  ;;  %v556_v59 = vld [vmem:[%s1039_s3 + $0x58] sm:$0xff] }
  0xfb   :  { %v566_v20 = vadd.f32 %v546_v2, %v526_v8  ;;  %v568_v21 = vadd.f32 %v548_v3, %v528_v9  ;;  %v530_v22 = vadd.f32 %v872_v52, %v487_v12  ;;  %v532_v23 = vadd.f32 %v874_v53, %v489_v13  ;;  %v557_v2 = vld [vmem:[%s1039_s3 + $0x60] sm:$0xff]  ;;  %v559_v3 = vld [vmem:[%s1039_s3 + $0x70] sm:$0xff] }
  0xfc   :  { %v585_v24 = vmax.f32 %v565_v14, 0.0  ;;  %v587_v25 = vmax.f32 %v567_v15, 0.0  ;;  %v569_v26 = vadd.f32 %v549_v10, %v529_v16  ;;  %v571_v27 = vadd.f32 %v551_v11, %v531_v17  ;;  %v558_v10 = vld [vmem:[%s1039_s3 + $0x68] sm:$0xff]  ;;  %v560_v11 = vld [vmem:[%s1039_s3 + $0x78] sm:$0xff] }
  0xfd   :  { %v586_v28 = vmax.f32 %v566_v20, 0.0  ;;  %v588_v29 = vmax.f32 %v568_v21, 0.0  ;;  %v570_v30 = vadd.f32 %v550_v18, %v530_v22  ;;  %v572_v31 = vadd.f32 %v552_v19, %v532_v23  ;;  %v319_v32 = vpop.f32.mrb[4].mxu0  ;;  %v380_v33 = vpop.f32.mrb[4].mxu1 }
  0xfe   :  { %605 = vst [vmem:[%s1040_s4] sm:$0xff] %v585_v24  ;;  %607 = vst [vmem:[%s1040_s4 + $0x10] sm:$0xff] %v587_v25  ;;  %v589_v34 = vmax.f32 %v569_v26, 0.0  ;;  %v591_v35 = vmax.f32 %v571_v27, 0.0  ;;  %v490_v36 = vmul.f32 %v860_v44, %v319_v32  ;;  %v492_v37 = vmul.f32 %v862_v45, %v380_v33  ;;  %v321_v38 = vpop.f32.mrb[5].mxu0  ;;  %v382_v39 = vpop.f32.mrb[5].mxu1 }
  0xff   :  { %606 = vst [vmem:[%s1040_s4 + $0x8] sm:$0xff] %v586_v28  ;;  %608 = vst [vmem:[%s1040_s4 + $0x18] sm:$0xff] %v588_v29  ;;  %v590_v40 = vmax.f32 %v570_v30, 0.0  ;;  %v592_v41 = vmax.f32 %v572_v31, 0.0  ;;  %v491_v50 = vmul.f32 %v864_v46, %v321_v38  ;;  %v493_v51 = vmul.f32 %v866_v47, %v382_v39  ;;  %v323_v54 = vpop.f32.mrb[6].mxu0  ;;  %v384_v55 = vpop.f32.mrb[6].mxu1 }
 0x100   :  { %609 = vst [vmem:[%s1040_s4 + $0x20] sm:$0xff] %v589_v34  ;;  %611 = vst [vmem:[%s1040_s4 + $0x30] sm:$0xff] %v591_v35  ;;  %v533_v56 = vadd.f32 %v868_v48, %v490_v36  ;;  %v535_v57 = vadd.f32 %v870_v49, %v492_v37  ;;  %v494_v60 = vmul.f32 %v860_v44, %v323_v54  ;;  %v325_v62 = vpop.f32.mrb[7].mxu0  ;;  %v386_v63 = vpop.f32.mrb[7].mxu1  ;;  %v561_v34 = vld [vmem:[%s1039_s3 + $0x80] sm:$0xff] }
 0x101   :  { %v496_v61 = vmul.f32 %v862_v45, %v384_v55  ;;  %610 = vst [vmem:[%s1040_s4 + $0x28] sm:$0xff] %v590_v40  ;;  %612 = vst [vmem:[%s1040_s4 + $0x38] sm:$0xff] %v592_v41  ;;  %v534_v0 = vadd.f32 %v872_v52, %v491_v50  ;;  %v536_v1 = vadd.f32 %v874_v53, %v493_v51 }
 0x102   :  { %v495_v4 = vmul.f32 %v864_v46, %v325_v62  ;;  %v497_v5 = vmul.f32 %v866_v47, %v386_v63  ;;  %v573_v6 = vadd.f32 %v553_v42, %v533_v56  ;;  %v575_v7 = vadd.f32 %v555_v43, %v535_v57 }
 0x103   :  { %v537_v8 = vadd.f32 %v868_v48, %v494_v60  ;;  %v539_v9 = vadd.f32 %v870_v49, %v496_v61  ;;  %v574_v12 = vadd.f32 %v554_v58, %v534_v0  ;;  %v576_v13 = vadd.f32 %v556_v59, %v536_v1 }
 0x104   :  { %v538_v14 = vadd.f32 %v872_v52, %v495_v4  ;;  %v540_v15 = vadd.f32 %v874_v53, %v497_v5  ;;  %v593_v16 = vmax.f32 %v573_v6, 0.0  ;;  %v595_v17 = vmax.f32 %v575_v7, 0.0 }
 0x105   :  { %v577_v18 = vadd.f32 %v557_v2, %v537_v8  ;;  %v579_v19 = vadd.f32 %v559_v3, %v539_v9  ;;  %v594_v20 = vmax.f32 %v574_v12, 0.0  ;;  %v596_v21 = vmax.f32 %v576_v13, 0.0  ;;  %v329_v24 = vpop.f32.mrb[8].mxu0  ;;  %v390_v25 = vpop.f32.mrb[8].mxu1 }
 0x106   :  { %v578_v22 = vadd.f32 %v558_v10, %v538_v14  ;;  %v580_v23 = vadd.f32 %v560_v11, %v540_v15  ;;  %613 = vst [vmem:[%s1040_s4 + $0x40] sm:$0xff] %v593_v16  ;;  %615 = vst [vmem:[%s1040_s4 + $0x50] sm:$0xff] %v595_v17  ;;  %v498_v28 = vmul.f32 %v860_v44, %v329_v24  ;;  %v331_v30 = vpop.f32.mrb[9].mxu0  ;;  %v392_v31 = vpop.f32.mrb[9].mxu1  ;;  %v563_v44 = vld [vmem:[%s1039_s3 + $0x90] sm:$0xff] }
 0x107   :  { %v597_v26 = vmax.f32 %v577_v18, 0.0  ;;  %v599_v27 = vmax.f32 %v579_v19, 0.0  ;;  %v500_v29 = vmul.f32 %v862_v45, %v390_v25  ;;  %614 = vst [vmem:[%s1040_s4 + $0x48] sm:$0xff] %v594_v20  ;;  %616 = vst [vmem:[%s1040_s4 + $0x58] sm:$0xff] %v596_v21  ;;  %v499_v45 = vmul.f32 %v864_v46, %v331_v30  ;;  %v333_v36 = vpop.f32.mrb[10].mxu0  ;;  %v394_v37 = vpop.f32.mrb[10].mxu1 }
 0x108   :  { %v598_v32 = vmax.f32 %v578_v22, 0.0  ;;  %v600_v33 = vmax.f32 %v580_v23, 0.0  ;;  %v501_v35 = vmul.f32 %v866_v47, %v392_v31  ;;  %v541_v38 = vadd.f32 %v868_v48, %v498_v28  ;;  %v562_v46 = vld [vmem:[%s1039_s3 + $0x88] sm:$0xff]  ;;  %v564_v47 = vld [vmem:[%s1039_s3 + $0x98] sm:$0xff]  ;;  %v334_v40 = vpop.f32.mrb[11].mxu0  ;;  %v395_v41 = vpop.f32.mrb[11].mxu1 }
 0x109   :  { %617 = vst [vmem:[%s1040_s4 + $0x60] sm:$0xff] %v597_v26  ;;  %619 = vst [vmem:[%s1040_s4 + $0x70] sm:$0xff] %v599_v27  ;;  %v543_v39 = vadd.f32 %v870_v49, %v500_v29  ;;  %v542_v48 = vadd.f32 %v872_v52, %v499_v45 }
 0x10a   :  { %618 = vst [vmem:[%s1040_s4 + $0x68] sm:$0xff] %v598_v32  ;;  %620 = vst [vmem:[%s1040_s4 + $0x78] sm:$0xff] %v600_v33  ;;  %v544_v49 = vadd.f32 %v874_v53, %v501_v35  ;;  %v581_v42 = vadd.f32 %v561_v34, %v541_v38 }
 0x10b   :  { %v583_v43 = vadd.f32 %v563_v44, %v543_v39  ;;  %v582_v50 = vadd.f32 %v562_v46, %v542_v48 }
 0x10c   :  { %v584_v51 = vadd.f32 %v564_v47, %v544_v49  ;;  %v601_v54 = vmax.f32 %v581_v42, 0.0 }
 0x10d   :  { %v603_v55 = vmax.f32 %v583_v43, 0.0  ;;  %v602_v56 = vmax.f32 %v582_v50, 0.0 }
 0x10e   :  { %v604_v57 = vmax.f32 %v584_v51, 0.0  ;;  %621 = vst [vmem:[%s1040_s4 + $0x80] sm:$0xff] %v601_v54 }
 0x10f   :  { %623 = vst [vmem:[%s1040_s4 + $0x90] sm:$0xff] %v603_v55  ;;  %622 = vst [vmem:[%s1040_s4 + $0x88] sm:$0xff] %v602_v56 }
 0x110   :  { %624 = vst [vmem:[%s1040_s4 + $0x98] sm:$0xff] %v604_v57 }

// kernel: pspnet_forward.61
= control target key start
LH: loop header
LB: loop body
LE: loop exit
PB: predicated region body
PF: predicated region fallthrough
CT: control target
= control target key end

     0   :  { %s1292_s1 = inlined_call_operand.vmem [shape: bf16[256,512], index: 1, kind: input, shape index: {}]   ;;  %s1293_s0 = inlined_call_operand.vmem [shape: bf16[40,256], index: 0, kind: input, shape index: {}]   ;;  %s1294_s2 = inlined_call_operand.vmem [shape: f32[8,512], index: 2, kind: input, shape index: {}]   ;;  %s1295_s3 = inlined_call_operand.vmem [shape: f32[40,512], index: 3, kind: output, shape index: {}]  }
   0x1   :  { %v839_v0 = vld [vmem:[%s1292_s1 + $0x4] ss:$16 sps:$4 sm:$0xff]   ;;  %v841_v1 = vld [vmem:[%s1292_s1 + $0xc] ss:$16 sps:$4 sm:$0xff]   ;;  %v843_v2 = vld [vmem:[%s1292_s1] ss:$16 sps:$4 sm:$0xff]  }
   0x2   :  { %474 = vmatprep.subr.bf16.mxu0 %v839_v0  ;;  %v844_v3 = vld [vmem:[%s1292_s1 + $0x8] ss:$16 sps:$4 sm:$0xff]   ;;  %535 = vmatprep.subr.bf16.mxu1 %v841_v1  ;;  %v845_v4 = vld [vmem:[%s1292_s1 + $0x24] ss:$16 sps:$4 sm:$0xff]   ;;  %v847_v5 = vld [vmem:[%s1292_s1 + $0x2c] ss:$16 sps:$4 sm:$0xff]  }
   0x3   :  { %475 = vmatpush1.bf16.msra.mxu0 %v843_v2  ;;  %536 = vmatpush1.bf16.msra.mxu1 %v844_v3  ;;  %v849_v6 = vld [vmem:[%s1292_s1 + $0x20] ss:$16 sps:$4 sm:$0xff]   ;;  %v850_v7 = vld [vmem:[%s1292_s1 + $0x28] ss:$16 sps:$4 sm:$0xff]   ;;  %v851_v8 = vld [vmem:[%s1292_s1 + $0x44] ss:$16 sps:$4 sm:$0xff]  }
   0x4   :  { %476 = vmatprep.subr.bf16.mxu0 %v845_v4  ;;  %537 = vmatprep.subr.bf16.mxu1 %v847_v5  ;;  %v853_v9 = vld [vmem:[%s1292_s1 + $0x4c] ss:$16 sps:$4 sm:$0xff]   ;;  %v855_v10 = vld [vmem:[%s1292_s1 + $0x40] ss:$16 sps:$4 sm:$0xff]   ;;  %v856_v11 = vld [vmem:[%s1292_s1 + $0x48] ss:$16 sps:$4 sm:$0xff]  }
   0x5   :  { %v857_v12 = vld [vmem:[%s1292_s1 + $0x64] ss:$16 sps:$4 sm:$0xff]   ;;  %v859_v13 = vld [vmem:[%s1292_s1 + $0x6c] ss:$16 sps:$4 sm:$0xff]   ;;  %v861_v14 = vld [vmem:[%s1292_s1 + $0x60] ss:$16 sps:$4 sm:$0xff]  }
   0x6   :  { %v862_v15 = vld [vmem:[%s1292_s1 + $0x68] ss:$16 sps:$4 sm:$0xff]   ;;  %v863_v16 = vld [vmem:[%s1292_s1 + $0x84] ss:$16 sps:$4 sm:$0xff]   ;;  %v865_v17 = vld [vmem:[%s1292_s1 + $0x8c] ss:$16 sps:$4 sm:$0xff]  }
   0x7   :  { %477 = vmatpush1.bf16.msra.mxu0 %v849_v6  ;;  %538 = vmatpush1.bf16.msra.mxu1 %v850_v7  ;;  %v867_v18 = vld [vmem:[%s1292_s1 + $0x80] ss:$16 sps:$4 sm:$0xff]   ;;  %v868_v19 = vld [vmem:[%s1292_s1 + $0x88] ss:$16 sps:$4 sm:$0xff]   ;;  %v869_v20 = vld [vmem:[%s1292_s1 + $0xa4] ss:$16 sps:$4 sm:$0xff]   ;;  %v661_v7 = vlaneseq }
   0x8   :  { %478 = vmatprep.subr.bf16.mxu0 %v851_v8  ;;  %539 = vmatprep.subr.bf16.mxu1 %v853_v9  ;;  %v871_v21 = vld [vmem:[%s1292_s1 + $0xac] ss:$16 sps:$4 sm:$0xff]   ;;  %v873_v22 = vld [vmem:[%s1292_s1 + $0xa0] ss:$16 sps:$4 sm:$0xff]   ;;  %v874_v23 = vld [vmem:[%s1292_s1 + $0xa8] ss:$16 sps:$4 sm:$0xff]  }
   0x9   :  { %v875_v24 = vld [vmem:[%s1292_s1 + $0xc4] ss:$16 sps:$4 sm:$0xff]   ;;  %v877_v25 = vld [vmem:[%s1292_s1 + $0xcc] ss:$16 sps:$4 sm:$0xff]   ;;  %v879_v26 = vld [vmem:[%s1292_s1 + $0xc0] ss:$16 sps:$4 sm:$0xff]  }
   0xa   :  { %v880_v27 = vld [vmem:[%s1292_s1 + $0xc8] ss:$16 sps:$4 sm:$0xff]   ;;  %v881_v28 = vld [vmem:[%s1292_s1 + $0xe4] ss:$16 sps:$4 sm:$0xff]   ;;  %v883_v29 = vld [vmem:[%s1292_s1 + $0xec] ss:$16 sps:$4 sm:$0xff]  }
   0xb   :  { %479 = vmatpush1.bf16.msra.mxu0 %v855_v10  ;;  %540 = vmatpush1.bf16.msra.mxu1 %v856_v11  ;;  %v885_v30 = vld [vmem:[%s1292_s1 + $0xe0] ss:$16 sps:$4 sm:$0xff]   ;;  %v886_v31 = vld [vmem:[%s1292_s1 + $0xe8] ss:$16 sps:$4 sm:$0xff]   ;;  %v887_v32 = vld [vmem:[%s1292_s1 + $0x104] ss:$16 sps:$4 sm:$0xff]  }
   0xc   :  { %480 = vmatprep.subr.bf16.mxu0 %v857_v12  ;;  %541 = vmatprep.subr.bf16.mxu1 %v859_v13  ;;  %v889_v33 = vld [vmem:[%s1292_s1 + $0x10c] ss:$16 sps:$4 sm:$0xff]   ;;  %v891_v34 = vld [vmem:[%s1292_s1 + $0x100] ss:$16 sps:$4 sm:$0xff]   ;;  %v892_v35 = vld [vmem:[%s1292_s1 + $0x108] ss:$16 sps:$4 sm:$0xff]  }
   0xd   :  { %v893_v36 = vld [vmem:[%s1292_s1 + $0x124] ss:$16 sps:$4 sm:$0xff]   ;;  %v895_v37 = vld [vmem:[%s1292_s1 + $0x12c] ss:$16 sps:$4 sm:$0xff]   ;;  %v897_v38 = vld [vmem:[%s1292_s1 + $0x120] ss:$16 sps:$4 sm:$0xff]  }
   0xe   :  { %v898_v39 = vld [vmem:[%s1292_s1 + $0x128] ss:$16 sps:$4 sm:$0xff]   ;;  %v899_v40 = vld [vmem:[%s1292_s1 + $0x144] ss:$16 sps:$4 sm:$0xff]   ;;  %v901_v41 = vld [vmem:[%s1292_s1 + $0x14c] ss:$16 sps:$4 sm:$0xff]  }
   0xf   :  { %481 = vmatpush1.bf16.msra.mxu0 %v861_v14  ;;  %542 = vmatpush1.bf16.msra.mxu1 %v862_v15  ;;  %v903_v42 = vld [vmem:[%s1292_s1 + $0x140] ss:$16 sps:$4 sm:$0xff]   ;;  %v904_v43 = vld [vmem:[%s1292_s1 + $0x148] ss:$16 sps:$4 sm:$0xff]   ;;  %v905_v44 = vld [vmem:[%s1292_s1 + $0x164] ss:$16 sps:$4 sm:$0xff]  }
  0x10   :  { %482 = vmatprep.subr.bf16.mxu0 %v863_v16  ;;  %543 = vmatprep.subr.bf16.mxu1 %v865_v17  ;;  %v907_v45 = vld [vmem:[%s1292_s1 + $0x16c] ss:$16 sps:$4 sm:$0xff]   ;;  %v909_v46 = vld [vmem:[%s1292_s1 + $0x160] ss:$16 sps:$4 sm:$0xff]   ;;  %v910_v48 = vld [vmem:[%s1292_s1 + $0x168] ss:$16 sps:$4 sm:$0xff]  }
  0x11   :  { %v937_v47 = vld [vmem:[%s1293_s0 + $0x4] ss:$8 sps:$4 sm:$0xff]   ;;  %v915_v51 = vld [vmem:[%s1292_s1 + $0x180] ss:$16 sps:$4 sm:$0xff]   ;;  %v916_v52 = vld [vmem:[%s1292_s1 + $0x188] ss:$16 sps:$4 sm:$0xff]  }
  0x12   :  { %v911_v49 = vld [vmem:[%s1292_s1 + $0x184] ss:$16 sps:$4 sm:$0xff]   ;;  %v913_v50 = vld [vmem:[%s1292_s1 + $0x18c] ss:$16 sps:$4 sm:$0xff]   ;;  %506 = vmatprep.mubr.bf16.mxu0 %v937_v47  ;;  %567 = vmatprep.mubr.bf16.mxu1 %v937_v47  ;;  %v921_v55 = vld [vmem:[%s1292_s1 + $0x1a0] ss:$16 sps:$4 sm:$0xff]  }
  0x13   :  { %483 = vmatpush1.bf16.msra.mxu0 %v867_v18  ;;  %544 = vmatpush1.bf16.msra.mxu1 %v868_v19  ;;  %v917_v53 = vld [vmem:[%s1292_s1 + $0x1a4] ss:$16 sps:$4 sm:$0xff]   ;;  %v919_v54 = vld [vmem:[%s1292_s1 + $0x1ac] ss:$16 sps:$4 sm:$0xff]   ;;  %v922_v56 = vld [vmem:[%s1292_s1 + $0x1a8] ss:$16 sps:$4 sm:$0xff]  }
  0x14   :  { %484 = vmatprep.subr.bf16.mxu0 %v869_v20  ;;  %545 = vmatprep.subr.bf16.mxu1 %v871_v21  ;;  %v923_v57 = vld [vmem:[%s1292_s1 + $0x1c4] ss:$16 sps:$4 sm:$0xff]   ;;  %v925_v58 = vld [vmem:[%s1292_s1 + $0x1cc] ss:$16 sps:$4 sm:$0xff]   ;;  %v927_v59 = vld [vmem:[%s1292_s1 + $0x1c0] ss:$16 sps:$4 sm:$0xff]  }
  0x15   :  { %v928_v60 = vld [vmem:[%s1292_s1 + $0x1c8] ss:$16 sps:$4 sm:$0xff]   ;;  %v929_v61 = vld [vmem:[%s1292_s1 + $0x1e4] ss:$16 sps:$4 sm:$0xff]   ;;  %v931_v62 = vld [vmem:[%s1292_s1 + $0x1ec] ss:$16 sps:$4 sm:$0xff]  }
  0x16   :  { %v933_v63 = vld [vmem:[%s1292_s1 + $0x1e0] ss:$16 sps:$4 sm:$0xff]   ;;  %v934_v0 = vld [vmem:[%s1292_s1 + $0x1e8] ss:$16 sps:$4 sm:$0xff]   ;;  %v938_v2 = vld [vmem:[%s1293_s0 + $0x14] ss:$8 sps:$4 sm:$0xff]  }
  0x17   :  { %485 = vmatpush1.bf16.msra.mxu0 %v873_v22  ;;  %546 = vmatpush1.bf16.msra.mxu1 %v874_v23  ;;  %v935_v1 = vld [vmem:[%s1293_s0] ss:$8 sps:$4 sm:$0xff]   ;;  %v940_v4 = vld [vmem:[%s1293_s0 + $0x10] ss:$8 sps:$4 sm:$0xff]   ;;  %v662_v8 = vshrl.u32 %v661_v7, 7 }
  0x18   :  { %486 = vmatprep.subr.bf16.mxu0 %v875_v24  ;;  %547 = vmatprep.subr.bf16.mxu1 %v877_v25  ;;  %v62_v3 = vld [vmem:[%s1293_s0 + $0x20] sm:$0xff] }
  0x19   :  { %v773_v5 = vcombine.high %v62_v3, %v62_v3  ;;  %v772_v6 = vcombine.low %v62_v3, %v62_v3  ;;  %v663_v9 = vsub.s32 0, %v662_v8  ;;  %v671_v10 = vsub.s32 2, %v662_v8  ;;  %v659_v11 = vld [vmem:[%s1294_s2] ss:$8 sm:$0xf] }
  0x1a   :  { %v667_v12 = vsub.s32 1, %v662_v8  ;;  %v675_v13 = vsub.s32 3, %v662_v8  ;;  %v838_v14 = vld [vmem:[%s1294_s2 + $0x1] ss:$8 sm:$0xf] }
  0x1b   :  { %487 = vmatpush1.bf16.msra.mxu0 %v879_v26  ;;  %548 = vmatpush1.bf16.msra.mxu1 %v880_v27  ;;  %v1176_v15 = vrot.slane %v659_v11, %v663_v9  ;;  %v1178_v16 = vrot.slane %v659_v11, %v671_v10  ;;  %v1184_v19 = vrot.slane %v838_v14, %v663_v9 }
  0x1c   :  { %488 = vmatprep.subr.bf16.mxu0 %v881_v28  ;;  %549 = vmatprep.subr.bf16.mxu1 %v883_v29  ;;  %v1180_v17 = vrot.slane %v659_v11, %v667_v12  ;;  %v1182_v18 = vrot.slane %v659_v11, %v675_v13  ;;  %v1186_v20 = vrot.slane %v838_v14, %v671_v10 }
  0x1d   :  { %v1188_v23 = vrot.slane %v838_v14, %v667_v12  ;;  %v1190_v24 = vrot.slane %v838_v14, %v675_v13 }
  0x1f   :  { %489 = vmatpush1.bf16.msra.mxu0 %v885_v30  ;;  %550 = vmatpush1.bf16.msra.mxu1 %v886_v31 }
  0x20   :  { %490 = vmatprep.subr.bf16.mxu0 %v887_v32  ;;  %551 = vmatprep.subr.bf16.mxu1 %v889_v33 }
  0x23   :  { %491 = vmatpush1.bf16.msra.mxu0 %v891_v34  ;;  %552 = vmatpush1.bf16.msra.mxu1 %v892_v35 }
  0x24   :  { %492 = vmatprep.subr.bf16.mxu0 %v893_v36  ;;  %553 = vmatprep.subr.bf16.mxu1 %v895_v37 }
  0x27   :  { %493 = vmatpush1.bf16.msra.mxu0 %v897_v38  ;;  %554 = vmatpush1.bf16.msra.mxu1 %v898_v39 }
  0x28   :  { %494 = vmatprep.subr.bf16.mxu0 %v899_v40  ;;  %555 = vmatprep.subr.bf16.mxu1 %v901_v41 }
  0x2b   :  { %495 = vmatpush1.bf16.msra.mxu0 %v903_v42  ;;  %556 = vmatpush1.bf16.msra.mxu1 %v904_v43 }
  0x2c   :  { %496 = vmatprep.subr.bf16.mxu0 %v905_v44  ;;  %557 = vmatprep.subr.bf16.mxu1 %v907_v45 }
  0x2f   :  { %497 = vmatpush1.bf16.msra.mxu0 %v909_v46  ;;  %558 = vmatpush1.bf16.msra.mxu1 %v910_v48 }
  0x30   :  { %498 = vmatprep.subr.bf16.mxu0 %v911_v49  ;;  %559 = vmatprep.subr.bf16.mxu1 %v913_v50 }
  0x33   :  { %499 = vmatpush1.bf16.msra.mxu0 %v915_v51  ;;  %560 = vmatpush1.bf16.msra.mxu1 %v916_v52 }
  0x34   :  { %500 = vmatprep.subr.bf16.mxu0 %v917_v53  ;;  %561 = vmatprep.subr.bf16.mxu1 %v919_v54 }
  0x37   :  { %501 = vmatpush1.bf16.msra.mxu0 %v921_v55  ;;  %562 = vmatpush1.bf16.msra.mxu1 %v922_v56 }
  0x38   :  { %502 = vmatprep.subr.bf16.mxu0 %v923_v57  ;;  %563 = vmatprep.subr.bf16.mxu1 %v925_v58 }
  0x3b   :  { %503 = vmatpush1.bf16.msra.mxu0 %v927_v59  ;;  %564 = vmatpush1.bf16.msra.mxu1 %v928_v60 }
  0x3c   :  { %504 = vmatprep.subr.bf16.mxu0 %v929_v61  ;;  %565 = vmatprep.subr.bf16.mxu1 %v931_v62 }
  0x3f   :  { %505 = vmatpush1.bf16.msra.mxu0 %v933_v63  ;;  %566 = vmatpush1.bf16.msra.mxu1 %v934_v0 }
  0x42   :  { %507 = vmatmul.mubr.bf16.vlgmr.msra.gmra.mrb[0].mxu0 %v935_v1  ;;  %568 = vmatmul.mubr.bf16.vlgmr.msra.gmra.mrb[0].mxu1 %v935_v1 }
  0x43   :  { %516 = vmatprep.mubr.bf16.mxu0 %v938_v2  ;;  %577 = vmatprep.mubr.bf16.mxu1 %v938_v2 }
  0x4a   :  { %517 = vmatmul.mubr.bf16.gmra.mrb[4].mxu0 %v940_v4  ;;  %578 = vmatmul.mubr.bf16.gmra.mrb[4].mxu1 %v940_v4 }
  0x4b   :  { %526 = vmatprep.mubr.bf16.mxu0 %v773_v5  ;;  %587 = vmatprep.mubr.bf16.mxu1 %v773_v5 }
  0x52   :  { %527 = vmatmul.mubr.bf16.gmra.mrb[8].mxu0 %v772_v6  ;;  %588 = vmatmul.mubr.bf16.gmra.mrb[8].mxu1 %v772_v6 }
 0x115   :  { %v508_v21 = vpop.f32.mrb[0].mxu0  ;;  %v569_v22 = vpop.f32.mrb[0].mxu1 }
 0x116   :  { %v681_v25 = vmul.f32 %v1176_v15, %v508_v21  ;;  %v683_v26 = vmul.f32 %v1178_v16, %v569_v22  ;;  %v510_v27 = vpop.f32.mrb[1].mxu0  ;;  %v571_v28 = vpop.f32.mrb[1].mxu1 }
 0x117   :  { %v682_v29 = vmul.f32 %v1180_v17, %v510_v27  ;;  %v684_v30 = vmul.f32 %v1182_v18, %v571_v28  ;;  %v512_v31 = vpop.f32.mrb[2].mxu0  ;;  %v573_v32 = vpop.f32.mrb[2].mxu1 }
 0x118   :  { %v724_v33 = vadd.f32 %v1184_v19, %v681_v25  ;;  %v726_v34 = vadd.f32 %v1186_v20, %v683_v26  ;;  %v685_v35 = vmul.f32 %v1176_v15, %v512_v31  ;;  %v687_v36 = vmul.f32 %v1178_v16, %v573_v32  ;;  %v514_v37 = vpop.f32.mrb[3].mxu0  ;;  %v575_v38 = vpop.f32.mrb[3].mxu1 }
 0x119   :  { %v725_v39 = vadd.f32 %v1188_v23, %v682_v29  ;;  %v727_v40 = vadd.f32 %v1190_v24, %v684_v30  ;;  %v686_v41 = vmul.f32 %v1180_v17, %v514_v37  ;;  %v688_v42 = vmul.f32 %v1182_v18, %v575_v38 }
 0x11a   :  { %744 = vst [vmem:[%s1295_s3] sm:$0xff] %v724_v33  ;;  %746 = vst [vmem:[%s1295_s3 + $0x10] sm:$0xff] %v726_v34  ;;  %v728_v43 = vadd.f32 %v1184_v19, %v685_v35  ;;  %v730_v44 = vadd.f32 %v1186_v20, %v687_v36 }
 0x11b   :  { %745 = vst [vmem:[%s1295_s3 + $0x8] sm:$0xff] %v725_v39  ;;  %747 = vst [vmem:[%s1295_s3 + $0x18] sm:$0xff] %v727_v40  ;;  %v729_v45 = vadd.f32 %v1188_v23, %v686_v41  ;;  %v731_v46 = vadd.f32 %v1190_v24, %v688_v42 }
 0x11c   :  { %748 = vst [vmem:[%s1295_s3 + $0x20] sm:$0xff] %v728_v43  ;;  %750 = vst [vmem:[%s1295_s3 + $0x30] sm:$0xff] %v730_v44 }
 0x11d   :  { %749 = vst [vmem:[%s1295_s3 + $0x28] sm:$0xff] %v729_v45  ;;  %751 = vst [vmem:[%s1295_s3 + $0x38] sm:$0xff] %v731_v46  ;;  %v518_v47 = vpop.f32.mrb[4].mxu0  ;;  %v579_v48 = vpop.f32.mrb[4].mxu1 }
 0x11e   :  { %v689_v49 = vmul.f32 %v1176_v15, %v518_v47  ;;  %v691_v50 = vmul.f32 %v1178_v16, %v579_v48  ;;  %v520_v51 = vpop.f32.mrb[5].mxu0  ;;  %v581_v52 = vpop.f32.mrb[5].mxu1 }
 0x11f   :  { %v690_v53 = vmul.f32 %v1180_v17, %v520_v51  ;;  %v692_v54 = vmul.f32 %v1182_v18, %v581_v52  ;;  %v522_v55 = vpop.f32.mrb[6].mxu0  ;;  %v583_v56 = vpop.f32.mrb[6].mxu1 }
 0x120   :  { %v732_v57 = vadd.f32 %v1184_v19, %v689_v49  ;;  %v734_v58 = vadd.f32 %v1186_v20, %v691_v50  ;;  %v693_v59 = vmul.f32 %v1176_v15, %v522_v55  ;;  %v695_v60 = vmul.f32 %v1178_v16, %v583_v56  ;;  %v524_v61 = vpop.f32.mrb[7].mxu0  ;;  %v585_v62 = vpop.f32.mrb[7].mxu1 }
 0x121   :  { %v733_v63 = vadd.f32 %v1188_v23, %v690_v53  ;;  %v735_v0 = vadd.f32 %v1190_v24, %v692_v54  ;;  %v694_v1 = vmul.f32 %v1180_v17, %v524_v61  ;;  %v696_v2 = vmul.f32 %v1182_v18, %v585_v62 }
 0x122   :  { %752 = vst [vmem:[%s1295_s3 + $0x40] sm:$0xff] %v732_v57  ;;  %754 = vst [vmem:[%s1295_s3 + $0x50] sm:$0xff] %v734_v58  ;;  %v736_v3 = vadd.f32 %v1184_v19, %v693_v59  ;;  %v738_v4 = vadd.f32 %v1186_v20, %v695_v60 }
 0x123   :  { %753 = vst [vmem:[%s1295_s3 + $0x48] sm:$0xff] %v733_v63  ;;  %755 = vst [vmem:[%s1295_s3 + $0x58] sm:$0xff] %v735_v0  ;;  %v737_v5 = vadd.f32 %v1188_v23, %v694_v1  ;;  %v739_v6 = vadd.f32 %v1190_v24, %v696_v2 }
 0x124   :  { %756 = vst [vmem:[%s1295_s3 + $0x60] sm:$0xff] %v736_v3  ;;  %758 = vst [vmem:[%s1295_s3 + $0x70] sm:$0xff] %v738_v4 }
 0x125   :  { %757 = vst [vmem:[%s1295_s3 + $0x68] sm:$0xff] %v737_v5  ;;  %759 = vst [vmem:[%s1295_s3 + $0x78] sm:$0xff] %v739_v6  ;;  %v528_v7 = vpop.f32.mrb[8].mxu0  ;;  %v589_v8 = vpop.f32.mrb[8].mxu1 }
 0x126   :  { %v697_v9 = vmul.f32 %v1176_v15, %v528_v7  ;;  %v699_v10 = vmul.f32 %v1178_v16, %v589_v8  ;;  %v530_v11 = vpop.f32.mrb[9].mxu0  ;;  %v591_v12 = vpop.f32.mrb[9].mxu1 }
 0x127   :  { %v698_v13 = vmul.f32 %v1180_v17, %v530_v11  ;;  %v700_v14 = vmul.f32 %v1182_v18, %v591_v12  ;;  %v532_v21 = vpop.f32.mrb[10].mxu0  ;;  %v593_v22 = vpop.f32.mrb[10].mxu1 }
 0x128   :  { %v740_v25 = vadd.f32 %v1184_v19, %v697_v9  ;;  %v742_v26 = vadd.f32 %v1186_v20, %v699_v10  ;;  %v533_v27 = vpop.f32.mrb[11].mxu0  ;;  %v594_v28 = vpop.f32.mrb[11].mxu1 }
 0x129   :  { %v741_v29 = vadd.f32 %v1188_v23, %v698_v13  ;;  %v743_v15 = vadd.f32 %v1190_v24, %v700_v14 }
 0x12a   :  { %760 = vst [vmem:[%s1295_s3 + $0x80] sm:$0xff] %v740_v25  ;;  %762 = vst [vmem:[%s1295_s3 + $0x90] sm:$0xff] %v742_v26 }
 0x12b   :  { %761 = vst [vmem:[%s1295_s3 + $0x88] sm:$0xff] %v741_v29  ;;  %763 = vst [vmem:[%s1295_s3 + $0x98] sm:$0xff] %v743_v15 }

// kernel: pspnet_forward.65
= control target key start
LH: loop header
LB: loop body
LE: loop exit
PB: predicated region body
PF: predicated region fallthrough
CT: control target
= control target key end

     0   :  { %s842_s1 = inlined_call_operand.vmem [shape: bf16[512,128], index: 1, kind: input, shape index: {}]   ;;  %s843_s0 = inlined_call_operand.vmem [shape: bf16[40,512], index: 0, kind: input, shape index: {}]   ;;  %s844_s2 = inlined_call_operand.vmem [shape: f32[8,128], index: 2, kind: input, shape index: {}]   ;;  %s845_s3 = inlined_call_operand.vmem [shape: f32[40,128], index: 3, kind: output, shape index: {}]  }
   0x1   :  { %v627_v0 = vld [vmem:[%s842_s1 + $0x40] sm:$0xff]   ;;  %v631_v4 = vld [vmem:[%s842_s1 + $0x48] sm:$0xff]   ;;  %v635_v8 = vld [vmem:[%s842_s1 + $0x50] sm:$0xff]  }
   0x2   :  { %v628_v1 = vld [vmem:[%s842_s1 + $0xc0] sm:$0xff]   ;;  %559 = vmatprep.subr.bf16.mxu0 %v627_v0  ;;  %v632_v5 = vld [vmem:[%s842_s1 + $0xc8] sm:$0xff]   ;;  %v636_v9 = vld [vmem:[%s842_s1 + $0xd0] sm:$0xff]  }
   0x3   :  { %v629_v2 = vld [vmem:[%s842_s1] sm:$0xff]   ;;  %593 = vmatprep.subr.bf16.mxu1 %v628_v1  ;;  %v633_v6 = vld [vmem:[%s842_s1 + $0x8] sm:$0xff]   ;;  %v637_v10 = vld [vmem:[%s842_s1 + $0x10] sm:$0xff]  }
   0x4   :  { %v630_v3 = vld [vmem:[%s842_s1 + $0x80] sm:$0xff]   ;;  %560 = vmatpush3.bf16.msra.mxu0 %v629_v2  ;;  %v634_v7 = vld [vmem:[%s842_s1 + $0x88] sm:$0xff]   ;;  %v638_v11 = vld [vmem:[%s842_s1 + $0x90] sm:$0xff]  }
   0x5   :  { %594 = vmatpush3.bf16.msra.mxu1 %v630_v3  ;;  %561 = vmatprep.subr.bf16.mxu0 %v631_v4  ;;  %v639_v12 = vld [vmem:[%s842_s1 + $0x58] sm:$0xff]   ;;  %v643_v16 = vld [vmem:[%s842_s1 + $0x60] sm:$0xff]   ;;  %v647_v20 = vld [vmem:[%s842_s1 + $0x68] sm:$0xff]  }
   0x6   :  { %595 = vmatprep.subr.bf16.mxu1 %v632_v5  ;;  %v640_v13 = vld [vmem:[%s842_s1 + $0xd8] sm:$0xff]   ;;  %v644_v17 = vld [vmem:[%s842_s1 + $0xe0] sm:$0xff]   ;;  %v648_v21 = vld [vmem:[%s842_s1 + $0xe8] sm:$0xff]  }
   0x7   :  { %v641_v14 = vld [vmem:[%s842_s1 + $0x18] sm:$0xff]   ;;  %v645_v18 = vld [vmem:[%s842_s1 + $0x20] sm:$0xff]   ;;  %v649_v22 = vld [vmem:[%s842_s1 + $0x28] sm:$0xff]  }
   0x8   :  { %562 = vmatpush3.bf16.msra.mxu0 %v633_v6  ;;  %v642_v15 = vld [vmem:[%s842_s1 + $0x98] sm:$0xff]   ;;  %v646_v19 = vld [vmem:[%s842_s1 + $0xa0] sm:$0xff]   ;;  %v650_v23 = vld [vmem:[%s842_s1 + $0xa8] sm:$0xff]  }
   0x9   :  { %596 = vmatpush3.bf16.msra.mxu1 %v634_v7  ;;  %563 = vmatprep.subr.bf16.mxu0 %v635_v8  ;;  %v651_v24 = vld [vmem:[%s842_s1 + $0x70] sm:$0xff]   ;;  %v655_v28 = vld [vmem:[%s842_s1 + $0x78] sm:$0xff]   ;;  %v37_v38 = vld [vmem:[%s843_s0 + $0x40] sm:$0xff] }
   0xa   :  { %597 = vmatprep.subr.bf16.mxu1 %v636_v9  ;;  %v652_v25 = vld [vmem:[%s842_s1 + $0xf0] sm:$0xff]   ;;  %v656_v29 = vld [vmem:[%s842_s1 + $0xf8] sm:$0xff]   ;;  %v38_v39 = vld [vmem:[%s843_s0 + $0x48] sm:$0xff]  ;;  %v522_v42 = vcombine.high %v37_v38, %v37_v38  ;;  %v521_v44 = vcombine.low %v37_v38, %v37_v38 }
   0xb   :  { %v653_v26 = vld [vmem:[%s842_s1 + $0x30] sm:$0xff]   ;;  %v657_v30 = vld [vmem:[%s842_s1 + $0x38] sm:$0xff]   ;;  %v524_v43 = vcombine.high %v38_v39, %v38_v39  ;;  %v523_v45 = vcombine.low %v38_v39, %v38_v39  ;;  %v557_v55 = vld [vmem:[%s844_s2] ss:$0 sm:$0xff] }
   0xc   :  { %564 = vmatpush3.bf16.msra.mxu0 %v637_v10  ;;  %v654_v27 = vld [vmem:[%s842_s1 + $0xb0] sm:$0xff]   ;;  %v658_v31 = vld [vmem:[%s842_s1 + $0xb8] sm:$0xff]   ;;  %v558_v60 = vld [vmem:[%s844_s2 + $0x1] ss:$0 sm:$0xff] }
   0xd   :  { %598 = vmatpush3.bf16.msra.mxu1 %v638_v11  ;;  %565 = vmatprep.subr.bf16.mxu0 %v639_v12  ;;  %v659_v32 = vld [vmem:[%s843_s0] ss:$16 sps:$4 sm:$0xff]   ;;  %v661_v33 = vld [vmem:[%s843_s0 + $0x4] ss:$16 sps:$4 sm:$0xff]   ;;  %v662_v34 = vld [vmem:[%s843_s0 + $0x8] ss:$16 sps:$4 sm:$0xff]  }
   0xe   :  { %599 = vmatprep.subr.bf16.mxu1 %v640_v13  ;;  %v664_v35 = vld [vmem:[%s843_s0 + $0xc] ss:$16 sps:$4 sm:$0xff]   ;;  %381 = vmatprep.mubr.bf16.mxu0 %v661_v33  ;;  %v665_v36 = vld [vmem:[%s843_s0 + $0x24] ss:$16 sps:$4 sm:$0xff]   ;;  %v669_v40 = vld [vmem:[%s843_s0 + $0x20] ss:$16 sps:$4 sm:$0xff]  }
   0xf   :  { %437 = vmatprep.mubr.bf16.mxu1 %v664_v35  ;;  %v667_v37 = vld [vmem:[%s843_s0 + $0x2c] ss:$16 sps:$4 sm:$0xff]   ;;  %v670_v41 = vld [vmem:[%s843_s0 + $0x28] ss:$16 sps:$4 sm:$0xff]  }
  0x10   :  { %566 = vmatpush3.bf16.msra.mxu0 %v641_v14 }
  0x11   :  { %600 = vmatpush3.bf16.msra.mxu1 %v642_v15  ;;  %567 = vmatprep.subr.bf16.mxu0 %v643_v16 }
  0x12   :  { %601 = vmatprep.subr.bf16.mxu1 %v644_v17 }
  0x14   :  { %568 = vmatpush3.bf16.msra.mxu0 %v645_v18 }
  0x15   :  { %602 = vmatpush3.bf16.msra.mxu1 %v646_v19  ;;  %569 = vmatprep.subr.bf16.mxu0 %v647_v20 }
  0x16   :  { %603 = vmatprep.subr.bf16.mxu1 %v648_v21 }
  0x18   :  { %570 = vmatpush3.bf16.msra.mxu0 %v649_v22 }
  0x19   :  { %604 = vmatpush3.bf16.msra.mxu1 %v650_v23  ;;  %571 = vmatprep.subr.bf16.mxu0 %v651_v24 }
  0x1a   :  { %605 = vmatprep.subr.bf16.mxu1 %v652_v25 }
  0x1c   :  { %572 = vmatpush3.bf16.msra.mxu0 %v653_v26 }
  0x1d   :  { %606 = vmatpush3.bf16.msra.mxu1 %v654_v27  ;;  %573 = vmatprep.subr.bf16.mxu0 %v655_v28 }
  0x1e   :  { %607 = vmatprep.subr.bf16.mxu1 %v656_v29 }
  0x20   :  { %574 = vmatpush3.bf16.msra.mxu0 %v657_v30 }
  0x21   :  { %608 = vmatpush3.bf16.msra.mxu1 %v658_v31 }
  0x23   :  { %382 = vmatmul.mubr.bf16.vlgmr.msra.gmra.mrb[0].mxu0 %v659_v32 }
  0x24   :  { %438 = vmatmul.mubr.bf16.vlgmr.msra.gmra.mrb[0].mxu1 %v662_v34  ;;  %389 = vmatprep.mubr.bf16.mxu0 %v665_v36 }
  0x25   :  { %445 = vmatprep.mubr.bf16.mxu1 %v667_v37 }
  0x2b   :  { %390 = vmatmul.mubr.bf16.gmra.mrb[4].mxu0 %v669_v40 }
  0x2c   :  { %446 = vmatmul.mubr.bf16.gmra.mrb[4].mxu1 %v670_v41  ;;  %397 = vmatprep.mubr.bf16.mxu0 %v522_v42 }
  0x2d   :  { %453 = vmatprep.mubr.bf16.mxu1 %v524_v43 }
  0x33   :  { %398 = vmatmul.mubr.bf16.gmra.mrb[8].mxu0 %v521_v44 }
  0x34   :  { %454 = vmatmul.mubr.bf16.gmra.mrb[8].mxu1 %v523_v45 }
  0xf6   :  { %v575_v46 = vpop.f32.mrb[0].mxu0 }
  0xf7   :  { %v609_v47 = vpop.f32.mrb[0].mxu1  ;;  %v576_v48 = vpop.f32.mrb[1].mxu0 }
  0xf8   :  { %v577_v49 = vadd.f32 %v576_v48, %v575_v46  ;;  %v610_v50 = vpop.f32.mrb[1].mxu1  ;;  %v578_v51 = vpop.f32.mrb[2].mxu0 }
  0xf9   :  { %v611_v52 = vadd.f32 %v610_v50, %v609_v47  ;;  %v612_v53 = vpop.f32.mrb[2].mxu1  ;;  %v579_v54 = vpop.f32.mrb[3].mxu0 }
  0xfa   :  { %v580_v56 = vadd.f32 %v579_v54, %v578_v51  ;;  %v613_v57 = vpop.f32.mrb[3].mxu1 }
  0xfb   :  { %v440_v58 = vadd.f32 %v611_v52, %v577_v49  ;;  %v614_v59 = vadd.f32 %v613_v57, %v612_v53 }
  0xfd   :  { %v484_v61 = vmul.f32 %v557_v55, %v440_v58  ;;  %v443_v62 = vadd.f32 %v614_v59, %v580_v56 }
  0xfe   :  { %v581_v63 = vpop.f32.mrb[4].mxu0 }
  0xff   :  { %v494_v0 = vadd.f32 %v558_v60, %v484_v61  ;;  %v485_v1 = vmul.f32 %v557_v55, %v443_v62  ;;  %v615_v2 = vpop.f32.mrb[4].mxu1  ;;  %v582_v3 = vpop.f32.mrb[5].mxu0 }
 0x100   :  { %v583_v4 = vadd.f32 %v582_v3, %v581_v63  ;;  %v616_v5 = vpop.f32.mrb[5].mxu1  ;;  %v584_v6 = vpop.f32.mrb[6].mxu0 }
 0x101   :  { %v499_v7 = vmax.f32 %v494_v0, 0.0  ;;  %v495_v8 = vadd.f32 %v558_v60, %v485_v1  ;;  %v617_v9 = vadd.f32 %v616_v5, %v615_v2  ;;  %v618_v10 = vpop.f32.mrb[6].mxu1  ;;  %v585_v11 = vpop.f32.mrb[7].mxu0 }
 0x102   :  { %v586_v12 = vadd.f32 %v585_v11, %v584_v6  ;;  %v619_v13 = vpop.f32.mrb[7].mxu1 }
 0x103   :  { %504 = vst [vmem:[%s845_s3] sm:$0xff] %v499_v7  ;;  %v500_v14 = vmax.f32 %v495_v8, 0.0  ;;  %v448_v15 = vadd.f32 %v617_v9, %v583_v4  ;;  %v620_v16 = vadd.f32 %v619_v13, %v618_v10 }
 0x105   :  { %505 = vst [vmem:[%s845_s3 + $0x8] sm:$0xff] %v500_v14  ;;  %v486_v17 = vmul.f32 %v557_v55, %v448_v15  ;;  %v451_v18 = vadd.f32 %v620_v16, %v586_v12 }
 0x106   :  { %v587_v19 = vpop.f32.mrb[8].mxu0 }
 0x107   :  { %v496_v20 = vadd.f32 %v558_v60, %v486_v17  ;;  %v487_v21 = vmul.f32 %v557_v55, %v451_v18  ;;  %v621_v22 = vpop.f32.mrb[8].mxu1  ;;  %v588_v23 = vpop.f32.mrb[9].mxu0 }
 0x108   :  { %v589_v24 = vadd.f32 %v588_v23, %v587_v19  ;;  %v622_v25 = vpop.f32.mrb[9].mxu1  ;;  %v590_v26 = vpop.f32.mrb[10].mxu0 }
 0x109   :  { %v501_v27 = vmax.f32 %v496_v20, 0.0  ;;  %v497_v28 = vadd.f32 %v558_v60, %v487_v21  ;;  %v623_v29 = vadd.f32 %v622_v25, %v621_v22  ;;  %v624_v30 = vpop.f32.mrb[10].mxu1  ;;  %v591_v31 = vpop.f32.mrb[11].mxu0 }
 0x10a   :  { %v625_v32 = vpop.f32.mrb[11].mxu1 }
 0x10b   :  { %506 = vst [vmem:[%s845_s3 + $0x10] sm:$0xff] %v501_v27  ;;  %v502_v33 = vmax.f32 %v497_v28, 0.0  ;;  %v456_v34 = vadd.f32 %v623_v29, %v589_v24 }
 0x10d   :  { %507 = vst [vmem:[%s845_s3 + $0x18] sm:$0xff] %v502_v33  ;;  %v488_v35 = vmul.f32 %v557_v55, %v456_v34 }
 0x10f   :  { %v498_v36 = vadd.f32 %v558_v60, %v488_v35 }
 0x111   :  { %v503_v37 = vmax.f32 %v498_v36, 0.0 }
 0x113   :  { %508 = vst [vmem:[%s845_s3 + $0x20] sm:$0xff] %v503_v37 }

// kernel: pspnet_forward.71
= control target key start
LH: loop header
LB: loop body
LE: loop exit
PB: predicated region body
PF: predicated region fallthrough
CT: control target
= control target key end

     0   :  { %s837_s1 = inlined_call_operand.vmem [shape: bf16[512,128], index: 1, kind: input, shape index: {}]   ;;  %s838_s0 = inlined_call_operand.vmem [shape: bf16[40,512], index: 0, kind: input, shape index: {}]   ;;  %s839_s2 = inlined_call_operand.vmem [shape: f32[8,128], index: 2, kind: input, shape index: {}]   ;;  %s840_s3 = inlined_call_operand.vmem [shape: f32[40,128], index: 3, kind: output, shape index: {}]  }
   0x1   :  { %v622_v0 = vld [vmem:[%s837_s1 + $0x40] sm:$0xff]   ;;  %v626_v4 = vld [vmem:[%s837_s1 + $0x48] sm:$0xff]   ;;  %v630_v8 = vld [vmem:[%s837_s1 + $0x50] sm:$0xff]  }
   0x2   :  { %v623_v1 = vld [vmem:[%s837_s1 + $0xc0] sm:$0xff]   ;;  %554 = vmatprep.subr.bf16.mxu0 %v622_v0  ;;  %v627_v5 = vld [vmem:[%s837_s1 + $0xc8] sm:$0xff]   ;;  %v631_v9 = vld [vmem:[%s837_s1 + $0xd0] sm:$0xff]  }
   0x3   :  { %v624_v2 = vld [vmem:[%s837_s1] sm:$0xff]   ;;  %588 = vmatprep.subr.bf16.mxu1 %v623_v1  ;;  %v628_v6 = vld [vmem:[%s837_s1 + $0x8] sm:$0xff]   ;;  %v632_v10 = vld [vmem:[%s837_s1 + $0x10] sm:$0xff]  }
   0x4   :  { %v625_v3 = vld [vmem:[%s837_s1 + $0x80] sm:$0xff]   ;;  %555 = vmatpush3.bf16.msra.mxu0 %v624_v2  ;;  %v629_v7 = vld [vmem:[%s837_s1 + $0x88] sm:$0xff]   ;;  %v633_v11 = vld [vmem:[%s837_s1 + $0x90] sm:$0xff]  }
   0x5   :  { %589 = vmatpush3.bf16.msra.mxu1 %v625_v3  ;;  %556 = vmatprep.subr.bf16.mxu0 %v626_v4  ;;  %v634_v12 = vld [vmem:[%s837_s1 + $0x58] sm:$0xff]   ;;  %v638_v16 = vld [vmem:[%s837_s1 + $0x60] sm:$0xff]   ;;  %v642_v20 = vld [vmem:[%s837_s1 + $0x68] sm:$0xff]  }
   0x6   :  { %590 = vmatprep.subr.bf16.mxu1 %v627_v5  ;;  %v635_v13 = vld [vmem:[%s837_s1 + $0xd8] sm:$0xff]   ;;  %v639_v17 = vld [vmem:[%s837_s1 + $0xe0] sm:$0xff]   ;;  %v643_v21 = vld [vmem:[%s837_s1 + $0xe8] sm:$0xff]  }
   0x7   :  { %v636_v14 = vld [vmem:[%s837_s1 + $0x18] sm:$0xff]   ;;  %v640_v18 = vld [vmem:[%s837_s1 + $0x20] sm:$0xff]   ;;  %v644_v22 = vld [vmem:[%s837_s1 + $0x28] sm:$0xff]  }
   0x8   :  { %557 = vmatpush3.bf16.msra.mxu0 %v628_v6  ;;  %v637_v15 = vld [vmem:[%s837_s1 + $0x98] sm:$0xff]   ;;  %v641_v19 = vld [vmem:[%s837_s1 + $0xa0] sm:$0xff]   ;;  %v645_v23 = vld [vmem:[%s837_s1 + $0xa8] sm:$0xff]  }
   0x9   :  { %591 = vmatpush3.bf16.msra.mxu1 %v629_v7  ;;  %558 = vmatprep.subr.bf16.mxu0 %v630_v8  ;;  %v646_v24 = vld [vmem:[%s837_s1 + $0x70] sm:$0xff]   ;;  %v650_v28 = vld [vmem:[%s837_s1 + $0x78] sm:$0xff]   ;;  %v37_v38 = vld [vmem:[%s838_s0 + $0x40] sm:$0xff] }
   0xa   :  { %592 = vmatprep.subr.bf16.mxu1 %v631_v9  ;;  %v647_v25 = vld [vmem:[%s837_s1 + $0xf0] sm:$0xff]   ;;  %v651_v29 = vld [vmem:[%s837_s1 + $0xf8] sm:$0xff]   ;;  %v38_v39 = vld [vmem:[%s838_s0 + $0x48] sm:$0xff]  ;;  %v517_v42 = vcombine.high %v37_v38, %v37_v38  ;;  %v516_v44 = vcombine.low %v37_v38, %v37_v38 }
   0xb   :  { %v648_v26 = vld [vmem:[%s837_s1 + $0x30] sm:$0xff]   ;;  %v652_v30 = vld [vmem:[%s837_s1 + $0x38] sm:$0xff]   ;;  %v519_v43 = vcombine.high %v38_v39, %v38_v39  ;;  %v518_v45 = vcombine.low %v38_v39, %v38_v39  ;;  %v552_v55 = vld [vmem:[%s839_s2] ss:$0 sm:$0xff] }
   0xc   :  { %559 = vmatpush3.bf16.msra.mxu0 %v632_v10  ;;  %v649_v27 = vld [vmem:[%s837_s1 + $0xb0] sm:$0xff]   ;;  %v653_v31 = vld [vmem:[%s837_s1 + $0xb8] sm:$0xff]   ;;  %v553_v60 = vld [vmem:[%s839_s2 + $0x1] ss:$0 sm:$0xff] }
   0xd   :  { %593 = vmatpush3.bf16.msra.mxu1 %v633_v11  ;;  %560 = vmatprep.subr.bf16.mxu0 %v634_v12  ;;  %v654_v32 = vld [vmem:[%s838_s0] ss:$16 sps:$4 sm:$0xff]   ;;  %v656_v33 = vld [vmem:[%s838_s0 + $0x4] ss:$16 sps:$4 sm:$0xff]   ;;  %v657_v34 = vld [vmem:[%s838_s0 + $0x8] ss:$16 sps:$4 sm:$0xff]  }
   0xe   :  { %594 = vmatprep.subr.bf16.mxu1 %v635_v13  ;;  %v659_v35 = vld [vmem:[%s838_s0 + $0xc] ss:$16 sps:$4 sm:$0xff]   ;;  %381 = vmatprep.mubr.bf16.mxu0 %v656_v33  ;;  %v660_v36 = vld [vmem:[%s838_s0 + $0x24] ss:$16 sps:$4 sm:$0xff]   ;;  %v664_v40 = vld [vmem:[%s838_s0 + $0x20] ss:$16 sps:$4 sm:$0xff]  }
   0xf   :  { %437 = vmatprep.mubr.bf16.mxu1 %v659_v35  ;;  %v662_v37 = vld [vmem:[%s838_s0 + $0x2c] ss:$16 sps:$4 sm:$0xff]   ;;  %v665_v41 = vld [vmem:[%s838_s0 + $0x28] ss:$16 sps:$4 sm:$0xff]  }
  0x10   :  { %561 = vmatpush3.bf16.msra.mxu0 %v636_v14 }
  0x11   :  { %595 = vmatpush3.bf16.msra.mxu1 %v637_v15  ;;  %562 = vmatprep.subr.bf16.mxu0 %v638_v16 }
  0x12   :  { %596 = vmatprep.subr.bf16.mxu1 %v639_v17 }
  0x14   :  { %563 = vmatpush3.bf16.msra.mxu0 %v640_v18 }
  0x15   :  { %597 = vmatpush3.bf16.msra.mxu1 %v641_v19  ;;  %564 = vmatprep.subr.bf16.mxu0 %v642_v20 }
  0x16   :  { %598 = vmatprep.subr.bf16.mxu1 %v643_v21 }
  0x18   :  { %565 = vmatpush3.bf16.msra.mxu0 %v644_v22 }
  0x19   :  { %599 = vmatpush3.bf16.msra.mxu1 %v645_v23  ;;  %566 = vmatprep.subr.bf16.mxu0 %v646_v24 }
  0x1a   :  { %600 = vmatprep.subr.bf16.mxu1 %v647_v25 }
  0x1c   :  { %567 = vmatpush3.bf16.msra.mxu0 %v648_v26 }
  0x1d   :  { %601 = vmatpush3.bf16.msra.mxu1 %v649_v27  ;;  %568 = vmatprep.subr.bf16.mxu0 %v650_v28 }
  0x1e   :  { %602 = vmatprep.subr.bf16.mxu1 %v651_v29 }
  0x20   :  { %569 = vmatpush3.bf16.msra.mxu0 %v652_v30 }
  0x21   :  { %603 = vmatpush3.bf16.msra.mxu1 %v653_v31 }
  0x23   :  { %382 = vmatmul.mubr.bf16.vlgmr.msra.gmra.mrb[0].mxu0 %v654_v32 }
  0x24   :  { %438 = vmatmul.mubr.bf16.vlgmr.msra.gmra.mrb[0].mxu1 %v657_v34  ;;  %389 = vmatprep.mubr.bf16.mxu0 %v660_v36 }
  0x25   :  { %445 = vmatprep.mubr.bf16.mxu1 %v662_v37 }
  0x2b   :  { %390 = vmatmul.mubr.bf16.gmra.mrb[4].mxu0 %v664_v40 }
  0x2c   :  { %446 = vmatmul.mubr.bf16.gmra.mrb[4].mxu1 %v665_v41  ;;  %397 = vmatprep.mubr.bf16.mxu0 %v517_v42 }
  0x2d   :  { %453 = vmatprep.mubr.bf16.mxu1 %v519_v43 }
  0x33   :  { %398 = vmatmul.mubr.bf16.gmra.mrb[8].mxu0 %v516_v44 }
  0x34   :  { %454 = vmatmul.mubr.bf16.gmra.mrb[8].mxu1 %v518_v45 }
  0xf6   :  { %v570_v46 = vpop.f32.mrb[0].mxu0 }
  0xf7   :  { %v604_v47 = vpop.f32.mrb[0].mxu1  ;;  %v571_v48 = vpop.f32.mrb[1].mxu0 }
  0xf8   :  { %v572_v49 = vadd.f32 %v571_v48, %v570_v46  ;;  %v605_v50 = vpop.f32.mrb[1].mxu1  ;;  %v573_v51 = vpop.f32.mrb[2].mxu0 }
  0xf9   :  { %v606_v52 = vadd.f32 %v605_v50, %v604_v47  ;;  %v607_v53 = vpop.f32.mrb[2].mxu1  ;;  %v574_v54 = vpop.f32.mrb[3].mxu0 }
  0xfa   :  { %v575_v56 = vadd.f32 %v574_v54, %v573_v51  ;;  %v608_v57 = vpop.f32.mrb[3].mxu1 }
  0xfb   :  { %v440_v58 = vadd.f32 %v606_v52, %v572_v49  ;;  %v609_v59 = vadd.f32 %v608_v57, %v607_v53 }
  0xfd   :  { %v484_v61 = vmul.f32 %v552_v55, %v440_v58  ;;  %v443_v62 = vadd.f32 %v609_v59, %v575_v56 }
  0xfe   :  { %v576_v63 = vpop.f32.mrb[4].mxu0 }
  0xff   :  { %v494_v0 = vadd.f32 %v553_v60, %v484_v61  ;;  %v485_v1 = vmul.f32 %v552_v55, %v443_v62  ;;  %v610_v2 = vpop.f32.mrb[4].mxu1  ;;  %v577_v3 = vpop.f32.mrb[5].mxu0 }
 0x100   :  { %v578_v4 = vadd.f32 %v577_v3, %v576_v63  ;;  %v611_v5 = vpop.f32.mrb[5].mxu1  ;;  %v579_v6 = vpop.f32.mrb[6].mxu0 }
 0x101   :  { %499 = vst [vmem:[%s840_s3] sm:$0xff] %v494_v0  ;;  %v495_v7 = vadd.f32 %v553_v60, %v485_v1  ;;  %v612_v8 = vadd.f32 %v611_v5, %v610_v2  ;;  %v613_v9 = vpop.f32.mrb[6].mxu1  ;;  %v580_v10 = vpop.f32.mrb[7].mxu0 }
 0x102   :  { %v581_v11 = vadd.f32 %v580_v10, %v579_v6  ;;  %v614_v12 = vpop.f32.mrb[7].mxu1 }
 0x103   :  { %500 = vst [vmem:[%s840_s3 + $0x8] sm:$0xff] %v495_v7  ;;  %v448_v13 = vadd.f32 %v612_v8, %v578_v4  ;;  %v615_v14 = vadd.f32 %v614_v12, %v613_v9 }
 0x105   :  { %v486_v15 = vmul.f32 %v552_v55, %v448_v13  ;;  %v451_v16 = vadd.f32 %v615_v14, %v581_v11 }
 0x106   :  { %v582_v17 = vpop.f32.mrb[8].mxu0 }
 0x107   :  { %v496_v18 = vadd.f32 %v553_v60, %v486_v15  ;;  %v487_v19 = vmul.f32 %v552_v55, %v451_v16  ;;  %v616_v20 = vpop.f32.mrb[8].mxu1  ;;  %v583_v21 = vpop.f32.mrb[9].mxu0 }
 0x108   :  { %v584_v22 = vadd.f32 %v583_v21, %v582_v17  ;;  %v617_v23 = vpop.f32.mrb[9].mxu1  ;;  %v585_v24 = vpop.f32.mrb[10].mxu0 }
 0x109   :  { %501 = vst [vmem:[%s840_s3 + $0x10] sm:$0xff] %v496_v18  ;;  %v497_v25 = vadd.f32 %v553_v60, %v487_v19  ;;  %v618_v26 = vadd.f32 %v617_v23, %v616_v20  ;;  %v619_v27 = vpop.f32.mrb[10].mxu1  ;;  %v586_v28 = vpop.f32.mrb[11].mxu0 }
 0x10a   :  { %v620_v29 = vpop.f32.mrb[11].mxu1 }
 0x10b   :  { %502 = vst [vmem:[%s840_s3 + $0x18] sm:$0xff] %v497_v25  ;;  %v456_v30 = vadd.f32 %v618_v26, %v584_v22 }
 0x10d   :  { %v488_v31 = vmul.f32 %v552_v55, %v456_v30 }
 0x10f   :  { %v498_v32 = vadd.f32 %v553_v60, %v488_v31 }
 0x111   :  { %503 = vst [vmem:[%s840_s3 + $0x20] sm:$0xff] %v498_v32 }

// kernel: pspnet_forward.70
= control target key start
LH: loop header
LB: loop body
LE: loop exit
PB: predicated region body
PF: predicated region fallthrough
CT: control target
= control target key end

     0   :  { %s674_s1 = inlined_call_operand.vmem [shape: bf16[512,128], index: 1, kind: input, shape index: {}]   ;;  %s675_s0 = inlined_call_operand.vmem [shape: bf16[16,512], index: 0, kind: input, shape index: {}]   ;;  %s676_s2 = inlined_call_operand.vmem [shape: f32[8,128], index: 2, kind: input, shape index: {}]   ;;  %s677_s3 = inlined_call_operand.vmem [shape: f32[16,128], index: 3, kind: output, shape index: {}]  }
   0x1   :  { %v496_v0 = vld [vmem:[%s674_s1 + $0x40] sm:$0xff]   ;;  %v500_v4 = vld [vmem:[%s674_s1 + $0x48] sm:$0xff]   ;;  %v504_v8 = vld [vmem:[%s674_s1 + $0x50] sm:$0xff]  }
   0x2   :  { %v497_v1 = vld [vmem:[%s674_s1 + $0xc0] sm:$0xff]   ;;  %452 = vmatprep.subr.bf16.mxu0 %v496_v0  ;;  %v501_v5 = vld [vmem:[%s674_s1 + $0xc8] sm:$0xff]   ;;  %v505_v9 = vld [vmem:[%s674_s1 + $0xd0] sm:$0xff]  }
   0x3   :  { %v498_v2 = vld [vmem:[%s674_s1] sm:$0xff]   ;;  %474 = vmatprep.subr.bf16.mxu1 %v497_v1  ;;  %v502_v6 = vld [vmem:[%s674_s1 + $0x8] sm:$0xff]   ;;  %v506_v10 = vld [vmem:[%s674_s1 + $0x10] sm:$0xff]  }
   0x4   :  { %v499_v3 = vld [vmem:[%s674_s1 + $0x80] sm:$0xff]   ;;  %453 = vmatpush3.bf16.msra.mxu0 %v498_v2  ;;  %v503_v7 = vld [vmem:[%s674_s1 + $0x88] sm:$0xff]   ;;  %v507_v11 = vld [vmem:[%s674_s1 + $0x90] sm:$0xff]  }
   0x5   :  { %475 = vmatpush3.bf16.msra.mxu1 %v499_v3  ;;  %454 = vmatprep.subr.bf16.mxu0 %v500_v4  ;;  %v508_v12 = vld [vmem:[%s674_s1 + $0x58] sm:$0xff]   ;;  %v512_v16 = vld [vmem:[%s674_s1 + $0x60] sm:$0xff]   ;;  %v516_v20 = vld [vmem:[%s674_s1 + $0x68] sm:$0xff]  }
   0x6   :  { %476 = vmatprep.subr.bf16.mxu1 %v501_v5  ;;  %v509_v13 = vld [vmem:[%s674_s1 + $0xd8] sm:$0xff]   ;;  %v513_v17 = vld [vmem:[%s674_s1 + $0xe0] sm:$0xff]   ;;  %v517_v21 = vld [vmem:[%s674_s1 + $0xe8] sm:$0xff]  }
   0x7   :  { %v510_v14 = vld [vmem:[%s674_s1 + $0x18] sm:$0xff]   ;;  %v514_v18 = vld [vmem:[%s674_s1 + $0x20] sm:$0xff]   ;;  %v518_v22 = vld [vmem:[%s674_s1 + $0x28] sm:$0xff]  }
   0x8   :  { %455 = vmatpush3.bf16.msra.mxu0 %v502_v6  ;;  %v511_v15 = vld [vmem:[%s674_s1 + $0x98] sm:$0xff]   ;;  %v515_v19 = vld [vmem:[%s674_s1 + $0xa0] sm:$0xff]   ;;  %v519_v23 = vld [vmem:[%s674_s1 + $0xa8] sm:$0xff]  }
   0x9   :  { %477 = vmatpush3.bf16.msra.mxu1 %v503_v7  ;;  %456 = vmatprep.subr.bf16.mxu0 %v504_v8  ;;  %v520_v24 = vld [vmem:[%s674_s1 + $0x70] sm:$0xff]   ;;  %v524_v28 = vld [vmem:[%s674_s1 + $0x78] sm:$0xff]   ;;  %v450_v45 = vld [vmem:[%s676_s2] ss:$0 sm:$0xff] }
   0xa   :  { %478 = vmatprep.subr.bf16.mxu1 %v505_v9  ;;  %v521_v25 = vld [vmem:[%s674_s1 + $0xf0] sm:$0xff]   ;;  %v525_v29 = vld [vmem:[%s674_s1 + $0xf8] sm:$0xff]   ;;  %v451_v50 = vld [vmem:[%s676_s2 + $0x1] ss:$0 sm:$0xff] }
   0xb   :  { %v522_v26 = vld [vmem:[%s674_s1 + $0x30] sm:$0xff]   ;;  %v526_v30 = vld [vmem:[%s674_s1 + $0x38] sm:$0xff]  }
   0xc   :  { %457 = vmatpush3.bf16.msra.mxu0 %v506_v10  ;;  %v523_v27 = vld [vmem:[%s674_s1 + $0xb0] sm:$0xff]   ;;  %v527_v31 = vld [vmem:[%s674_s1 + $0xb8] sm:$0xff]  }
   0xd   :  { %479 = vmatpush3.bf16.msra.mxu1 %v507_v11  ;;  %458 = vmatprep.subr.bf16.mxu0 %v508_v12  ;;  %v528_v32 = vld [vmem:[%s675_s0] ss:$16 sps:$4 sm:$0xff]   ;;  %v530_v33 = vld [vmem:[%s675_s0 + $0x4] ss:$16 sps:$4 sm:$0xff]   ;;  %v531_v34 = vld [vmem:[%s675_s0 + $0x8] ss:$16 sps:$4 sm:$0xff]  }
   0xe   :  { %480 = vmatprep.subr.bf16.mxu1 %v509_v13  ;;  %v533_v35 = vld [vmem:[%s675_s0 + $0xc] ss:$16 sps:$4 sm:$0xff]   ;;  %335 = vmatprep.mubr.bf16.mxu0 %v530_v33 }
   0xf   :  { %376 = vmatprep.mubr.bf16.mxu1 %v533_v35 }
  0x10   :  { %459 = vmatpush3.bf16.msra.mxu0 %v510_v14 }
  0x11   :  { %481 = vmatpush3.bf16.msra.mxu1 %v511_v15  ;;  %460 = vmatprep.subr.bf16.mxu0 %v512_v16 }
  0x12   :  { %482 = vmatprep.subr.bf16.mxu1 %v513_v17 }
  0x14   :  { %461 = vmatpush3.bf16.msra.mxu0 %v514_v18 }
  0x15   :  { %483 = vmatpush3.bf16.msra.mxu1 %v515_v19  ;;  %462 = vmatprep.subr.bf16.mxu0 %v516_v20 }
  0x16   :  { %484 = vmatprep.subr.bf16.mxu1 %v517_v21 }
  0x18   :  { %463 = vmatpush3.bf16.msra.mxu0 %v518_v22 }
  0x19   :  { %485 = vmatpush3.bf16.msra.mxu1 %v519_v23  ;;  %464 = vmatprep.subr.bf16.mxu0 %v520_v24 }
  0x1a   :  { %486 = vmatprep.subr.bf16.mxu1 %v521_v25 }
  0x1c   :  { %465 = vmatpush3.bf16.msra.mxu0 %v522_v26 }
  0x1d   :  { %487 = vmatpush3.bf16.msra.mxu1 %v523_v27  ;;  %466 = vmatprep.subr.bf16.mxu0 %v524_v28 }
  0x1e   :  { %488 = vmatprep.subr.bf16.mxu1 %v525_v29 }
  0x20   :  { %467 = vmatpush3.bf16.msra.mxu0 %v526_v30 }
  0x21   :  { %489 = vmatpush3.bf16.msra.mxu1 %v527_v31 }
  0x23   :  { %336 = vmatmul.mubr.bf16.vlgmr.msra.gmra.mrb[0].mxu0 %v528_v32 }
  0x24   :  { %377 = vmatmul.mubr.bf16.vlgmr.msra.gmra.mrb[0].mxu1 %v531_v34 }
  0xf6   :  { %v468_v36 = vpop.f32.mrb[0].mxu0 }
  0xf7   :  { %v490_v37 = vpop.f32.mrb[0].mxu1  ;;  %v469_v38 = vpop.f32.mrb[1].mxu0 }
  0xf8   :  { %v470_v39 = vadd.f32 %v469_v38, %v468_v36  ;;  %v491_v40 = vpop.f32.mrb[1].mxu1  ;;  %v471_v41 = vpop.f32.mrb[2].mxu0 }
  0xf9   :  { %v492_v42 = vadd.f32 %v491_v40, %v490_v37  ;;  %v493_v43 = vpop.f32.mrb[2].mxu1  ;;  %v472_v44 = vpop.f32.mrb[3].mxu0 }
  0xfa   :  { %v473_v46 = vadd.f32 %v472_v44, %v471_v41  ;;  %v494_v47 = vpop.f32.mrb[3].mxu1 }
  0xfb   :  { %v379_v48 = vadd.f32 %v492_v42, %v470_v39  ;;  %v495_v49 = vadd.f32 %v494_v47, %v493_v43 }
  0xfd   :  { %v399_v51 = vmul.f32 %v450_v45, %v379_v48  ;;  %v382_v52 = vadd.f32 %v495_v49, %v473_v46 }
  0xff   :  { %v406_v53 = vadd.f32 %v451_v50, %v399_v51  ;;  %v400_v54 = vmul.f32 %v450_v45, %v382_v52 }
 0x101   :  { %408 = vst [vmem:[%s677_s3] sm:$0xff] %v406_v53  ;;  %v407_v55 = vadd.f32 %v451_v50, %v400_v54 }
 0x103   :  { %409 = vst [vmem:[%s677_s3 + $0x8] sm:$0xff] %v407_v55 }

// kernel: pspnet_forward.69
= control target key start
LH: loop header
LB: loop body
LE: loop exit
PB: predicated region body
PF: predicated region fallthrough
CT: control target
= control target key end

     0   :  { %s645_s1 = inlined_call_operand.vmem [shape: bf16[512,128], index: 1, kind: input, shape index: {}]   ;;  %s646_s0 = inlined_call_operand.vmem [shape: bf16[8,512], index: 0, kind: input, shape index: {}]   ;;  %s647_s2 = inlined_call_operand.vmem [shape: f32[8,128], index: 2, kind: input, shape index: {}]   ;;  %s648_s3 = inlined_call_operand.vmem [shape: f32[8,128], index: 3, kind: output, shape index: {}]  }
   0x1   :  { %v478_v0 = vld [vmem:[%s645_s1 + $0x40] sm:$0xff]   ;;  %v482_v4 = vld [vmem:[%s645_s1 + $0x48] sm:$0xff]   ;;  %v486_v8 = vld [vmem:[%s645_s1 + $0x50] sm:$0xff]  }
   0x2   :  { %v479_v1 = vld [vmem:[%s645_s1 + $0xc0] sm:$0xff]   ;;  %434 = vmatprep.subr.bf16.mxu0 %v478_v0  ;;  %v483_v5 = vld [vmem:[%s645_s1 + $0xc8] sm:$0xff]   ;;  %v487_v9 = vld [vmem:[%s645_s1 + $0xd0] sm:$0xff]  }
   0x3   :  { %v480_v2 = vld [vmem:[%s645_s1] sm:$0xff]   ;;  %456 = vmatprep.subr.bf16.mxu1 %v479_v1  ;;  %v484_v6 = vld [vmem:[%s645_s1 + $0x8] sm:$0xff]   ;;  %v488_v10 = vld [vmem:[%s645_s1 + $0x10] sm:$0xff]  }
   0x4   :  { %v481_v3 = vld [vmem:[%s645_s1 + $0x80] sm:$0xff]   ;;  %435 = vmatpush3.bf16.msra.mxu0 %v480_v2  ;;  %v485_v7 = vld [vmem:[%s645_s1 + $0x88] sm:$0xff]   ;;  %v489_v11 = vld [vmem:[%s645_s1 + $0x90] sm:$0xff]  }
   0x5   :  { %457 = vmatpush3.bf16.msra.mxu1 %v481_v3  ;;  %436 = vmatprep.subr.bf16.mxu0 %v482_v4  ;;  %v490_v12 = vld [vmem:[%s645_s1 + $0x58] sm:$0xff]   ;;  %v494_v16 = vld [vmem:[%s645_s1 + $0x60] sm:$0xff]   ;;  %v498_v20 = vld [vmem:[%s645_s1 + $0x68] sm:$0xff]  }
   0x6   :  { %458 = vmatprep.subr.bf16.mxu1 %v483_v5  ;;  %v491_v13 = vld [vmem:[%s645_s1 + $0xd8] sm:$0xff]   ;;  %v495_v17 = vld [vmem:[%s645_s1 + $0xe0] sm:$0xff]   ;;  %v499_v21 = vld [vmem:[%s645_s1 + $0xe8] sm:$0xff]  }
   0x7   :  { %v492_v14 = vld [vmem:[%s645_s1 + $0x18] sm:$0xff]   ;;  %v496_v18 = vld [vmem:[%s645_s1 + $0x20] sm:$0xff]   ;;  %v500_v22 = vld [vmem:[%s645_s1 + $0x28] sm:$0xff]  }
   0x8   :  { %437 = vmatpush3.bf16.msra.mxu0 %v484_v6  ;;  %v493_v15 = vld [vmem:[%s645_s1 + $0x98] sm:$0xff]   ;;  %v497_v19 = vld [vmem:[%s645_s1 + $0xa0] sm:$0xff]   ;;  %v501_v23 = vld [vmem:[%s645_s1 + $0xa8] sm:$0xff]  }
   0x9   :  { %459 = vmatpush3.bf16.msra.mxu1 %v485_v7  ;;  %438 = vmatprep.subr.bf16.mxu0 %v486_v8  ;;  %v502_v24 = vld [vmem:[%s645_s1 + $0x70] sm:$0xff]   ;;  %v506_v28 = vld [vmem:[%s645_s1 + $0x78] sm:$0xff]   ;;  %v21_v32 = vld [vmem:[%s646_s0] sm:$0xff] }
   0xa   :  { %460 = vmatprep.subr.bf16.mxu1 %v487_v9  ;;  %v503_v25 = vld [vmem:[%s645_s1 + $0xf0] sm:$0xff]   ;;  %v507_v29 = vld [vmem:[%s645_s1 + $0xf8] sm:$0xff]   ;;  %v22_v33 = vld [vmem:[%s646_s0 + $0x8] sm:$0xff]  ;;  %v396_v34 = vcombine.low %v21_v32, %v21_v32  ;;  %v397_v35 = vcombine.high %v21_v32, %v21_v32 }
   0xb   :  { %v504_v26 = vld [vmem:[%s645_s1 + $0x30] sm:$0xff]   ;;  %v508_v30 = vld [vmem:[%s645_s1 + $0x38] sm:$0xff]   ;;  %v398_v36 = vcombine.low %v22_v33, %v22_v33  ;;  %v399_v37 = vcombine.high %v22_v33, %v22_v33  ;;  %v432_v46 = vld [vmem:[%s647_s2] ss:$0 sm:$0xff] }
   0xc   :  { %439 = vmatpush3.bf16.msra.mxu0 %v488_v10  ;;  %v505_v27 = vld [vmem:[%s645_s1 + $0xb0] sm:$0xff]   ;;  %v509_v31 = vld [vmem:[%s645_s1 + $0xb8] sm:$0xff]   ;;  %325 = vmatprep.mubr.bf16.mxu0 %v397_v35  ;;  %v433_v50 = vld [vmem:[%s647_s2 + $0x1] ss:$0 sm:$0xff] }
   0xd   :  { %461 = vmatpush3.bf16.msra.mxu1 %v489_v11  ;;  %440 = vmatprep.subr.bf16.mxu0 %v490_v12 }
   0xe   :  { %462 = vmatprep.subr.bf16.mxu1 %v491_v13  ;;  %365 = vmatprep.mubr.bf16.mxu1 %v399_v37 }
  0x10   :  { %441 = vmatpush3.bf16.msra.mxu0 %v492_v14 }
  0x11   :  { %463 = vmatpush3.bf16.msra.mxu1 %v493_v15  ;;  %442 = vmatprep.subr.bf16.mxu0 %v494_v16 }
  0x12   :  { %464 = vmatprep.subr.bf16.mxu1 %v495_v17 }
  0x14   :  { %443 = vmatpush3.bf16.msra.mxu0 %v496_v18 }
  0x15   :  { %465 = vmatpush3.bf16.msra.mxu1 %v497_v19  ;;  %444 = vmatprep.subr.bf16.mxu0 %v498_v20 }
  0x16   :  { %466 = vmatprep.subr.bf16.mxu1 %v499_v21 }
  0x18   :  { %445 = vmatpush3.bf16.msra.mxu0 %v500_v22 }
  0x19   :  { %467 = vmatpush3.bf16.msra.mxu1 %v501_v23  ;;  %446 = vmatprep.subr.bf16.mxu0 %v502_v24 }
  0x1a   :  { %468 = vmatprep.subr.bf16.mxu1 %v503_v25 }
  0x1c   :  { %447 = vmatpush3.bf16.msra.mxu0 %v504_v26 }
  0x1d   :  { %469 = vmatpush3.bf16.msra.mxu1 %v505_v27  ;;  %448 = vmatprep.subr.bf16.mxu0 %v506_v28 }
  0x1e   :  { %470 = vmatprep.subr.bf16.mxu1 %v507_v29 }
  0x20   :  { %449 = vmatpush3.bf16.msra.mxu0 %v508_v30 }
  0x21   :  { %471 = vmatpush3.bf16.msra.mxu1 %v509_v31 }
  0x23   :  { %326 = vmatmul.mubr.bf16.vlgmr.msra.gmra.mrb[0].mxu0 %v396_v34 }
  0x24   :  { %366 = vmatmul.mubr.bf16.vlgmr.msra.gmra.mrb[0].mxu1 %v398_v36 }
  0xf6   :  { %v450_v38 = vpop.f32.mrb[0].mxu0 }
  0xf7   :  { %v472_v39 = vpop.f32.mrb[0].mxu1  ;;  %v451_v40 = vpop.f32.mrb[1].mxu0 }
  0xf8   :  { %v473_v41 = vpop.f32.mrb[1].mxu1  ;;  %v452_v42 = vadd.f32 %v451_v40, %v450_v38  ;;  %v453_v44 = vpop.f32.mrb[2].mxu0 }
  0xf9   :  { %v474_v43 = vadd.f32 %v473_v41, %v472_v39  ;;  %v475_v45 = vpop.f32.mrb[2].mxu1  ;;  %v454_v47 = vpop.f32.mrb[3].mxu0 }
  0xfa   :  { %v476_v48 = vpop.f32.mrb[3].mxu1 }
  0xfb   :  { %v368_v49 = vadd.f32 %v474_v43, %v452_v42 }
  0xfd   :  { %v384_v51 = vmul.f32 %v432_v46, %v368_v49 }
  0xff   :  { %v390_v52 = vadd.f32 %v433_v50, %v384_v51 }
 0x101   :  { %391 = vst [vmem:[%s648_s3] sm:$0xff] %v390_v52 }

// kernel: pspnet_forward.72
= control target key start
LH: loop header
LB: loop body
LE: loop exit
PB: predicated region body
PF: predicated region fallthrough
CT: control target
= control target key end

     0   :  { %s1186_s12 = smov 0   ;;  %s1188_s13 = smov 0   ;;  %s1320_s0 = inlined_call_operand.vmem [shape: bf16[40,9216], index: 0, kind: input, shape index: {}]   ;;  %s1321_s1 = inlined_call_operand.vmem [shape: bf16[9216,128], index: 1, kind: input, shape index: {}]   ;;  %s1322_s2 = inlined_call_operand.vmem [shape: f32[8,128], index: 2, kind: input, shape index: {}]   ;;  %s1323_s3 = inlined_call_operand.vmem [shape: f32[40,128], index: 3, kind: output, shape index: {}]  }
   0x1   :  { %s1190_s14 = smov 0   ;;  %s1192_s15 = smov 0  }
   0x2   :  { %s1194_s16 = smov 0  }
   0x3 LB: > { %s25_s17 = sadd.s32 1, %s1159_s15  ;;  %p48_p1 = scmp.ne.s32.totalorder %s1151_s13, %s1147_s12  ;;  %s1163_s16 = sphi %s1194_s16, %s13_s16   ;;  %s1159_s15 = sphi %s1192_s15, %s1327_s15   ;;  %s1155_s14 = sphi %s1190_s14, %s1326_s14   ;;  %s1151_s13 = sphi %s1188_s13, %s1325_s13   ;;  %s1147_s12 = sphi %s1186_s12, %s1324_s12  }
   0x4   : > { %p26_p0 = scmp.ge.s32.totalorder %s25_s17, 18  ;;  %p49_p2 = scmp.eq.s32.totalorder %s1163_s16, 0 }
   0x5   : > { %s41_s19 = sadd.s32 1, %s1151_s13  ;;  %p907_p5 = scmp.ge.s32.totalorder %s1163_s16, 18 }
   0x6   : > { %s1329_s17 = smov (%p26_p0, %s25_s17), 0  ;;  %p50_p3 = por %p49_p2, %p48_p1 }
   0x7   : > { %s37_s18 = ssub.s32 %s1159_s15, %s1329_s17  ;;  %163 = sbr.rel (%p907_p5) target bundleno = 23 (0x17), region = 20 }
   0x8   : > { %p39_p4 = scmp.eq.s32.totalorder %s37_s18, 0 }
   0xa   : > { %s1221_s20 = scalar_select %p39_p4, %s1151_s13, %s41_s19  }
   0xe   : > { %166 = sbr.rel (!%p50_p3) target bundleno = 23 (0x17), region = 24  ;;  %s168_s21 = sand.u32 (%p50_p3), 1, %s1151_s13  }
   0xf   : > { %s965_s22 = sshll.u32 (%p50_p3), %s1159_s15, 4  ;;  %s1034_s23 = smul.u32 (%p50_p3), 80, %s168_s21 }
  0x10   : > { %s176_s26 = scalar_lea.vmem (%p50_p3), %s1320_s0, %s965_s22 }
  0x11   : > { %v189_v0 = vld [vmem:[%s176_s26] sm:$0xff] (%p50_p3)  ;;  %v191_v1 = vld [vmem:[%s176_s26 + $0x8] sm:$0xff] (%p50_p3)  ;;  %s170_s27 = scalar_lea.vmem (%p50_p3), [#allocation3], %s1034_s23 }
  0x12   : > { %v193_v2 = vld [vmem:[%s176_s26 + $0x120] sm:$0xff] (%p50_p3)  ;;  %v195_v3 = vld [vmem:[%s176_s26 + $0x128] sm:$0xff] (%p50_p3)  ;;  %190 = vst [vmem:[%s170_s27] sm:$0xff] (%p50_p3), %v189_v0  ;;  %192 = vst [vmem:[%s170_s27 + $0x8] sm:$0xff] (%p50_p3), %v191_v1 }
  0x13   : > { %v197_v4 = vld [vmem:[%s176_s26 + $0x240] sm:$0xff] (%p50_p3)  ;;  %v199_v5 = vld [vmem:[%s176_s26 + $0x248] sm:$0xff] (%p50_p3)  ;;  %194 = vst [vmem:[%s170_s27 + $0x10] sm:$0xff] (%p50_p3), %v193_v2  ;;  %196 = vst [vmem:[%s170_s27 + $0x18] sm:$0xff] (%p50_p3), %v195_v3 }
  0x14   : > { %198 = vst [vmem:[%s170_s27 + $0x20] sm:$0xff] (%p50_p3), %v197_v4  ;;  %200 = vst [vmem:[%s170_s27 + $0x28] sm:$0xff] (%p50_p3), %v199_v5  ;;  %v201_v6 = vld [vmem:[%s176_s26 + $0x360] sm:$0xff] (%p50_p3)  ;;  %v203_v7 = vld [vmem:[%s176_s26 + $0x368] sm:$0xff] (%p50_p3) }
  0x15   : > { %v205_v8 = vld [vmem:[%s176_s26 + $0x480] sm:$0xff]  ;;  %202 = vst [vmem:[%s170_s27 + $0x30] sm:$0xff] %v201_v6  ;;  %204 = vst [vmem:[%s170_s27 + $0x38] sm:$0xff] %v203_v7  ;;  %v207_v9 = vld [vmem:[%s176_s26 + $0x488] sm:$0xff] }
  0x16   : > { %206 = vst [vmem:[%s170_s27 + $0x40] sm:$0xff] %v205_v8  ;;  %208 = vst [vmem:[%s170_s27 + $0x48] sm:$0xff] %v207_v9 }
  0x17 PF: > { %p910_p6 = scmp.ge.s32.totalorder %s1163_s16, 1  ;;  %p225_p7 = scmp.lt.s32.totalorder %s1163_s16, 19 }
  0x19   : > { %p226_p8 = pnand %p910_p6, %p225_p7 }
  0x1a   : > { %s232_s28 = sand.u32 (!%p226_p8), 1, %s1147_s12   ;;  %s911_s29 = sshll.u32 (!%p226_p8), %s1155_s14, 6 }
  0x1b   : > { %229 = sbr.rel (%p226_p8) target bundleno = 326 (0x146), region = 51  ;;  %p273_p9 = scmp.lt.s32.totalorder (!%p226_p8), %s911_s29, 1151 }
  0x1c   : > { %s1035_s30 = smul.u32 (!%p226_p8), 80, %s232_s28  ;;  %p913_p10 = scmp.ne.s32.totalorder (!%p226_p8), %s1155_s14, 0 }
  0x1e   : > { %s1238_s8 = scalar_lea.vmem (!%p226_p8), [#allocation3], %s1035_s30 }
  0x22   : > { %s1331_s29 = smov (!%p273_p9, %s911_s29), 1151  ;;  %298 = sbr.rel (%p913_p10) target bundleno = 41 (0x29), region = 59 }
  0x23   : > { %s912_s4 = sshll.u32 %s1331_s29, 2  ;;  %v1165_v10 = vmov (!%p913_p10), 0.0  }
  0x24   : > { %s1236_s7 = scalar_lea.vmem %s1321_s1, %s912_s4  ;;  %299 = vst [vmem:[#allocation2] sm:$0xff] (!%p913_p10), %v1165_v10  ;;  %300 = vst [vmem:[#allocation2 + $0x8] sm:$0xff] (!%p913_p10), %v1165_v10 }
  0x25   : > { %301 = vst [vmem:[#allocation2 + $0x10] sm:$0xff] (!%p913_p10), %v1165_v10  ;;  %302 = vst [vmem:[#allocation2 + $0x18] sm:$0xff] (!%p913_p10), %v1165_v10 }
  0x26   : > { %303 = vst [vmem:[#allocation2 + $0x20] sm:$0xff] (!%p913_p10), %v1165_v10 }
  0x29 PF: > { %v1077_v11 = vld [vmem:[%s1236_s7 + $0x40] sm:$0xff]   ;;  %v1081_v15 = vld [vmem:[%s1236_s7 + $0x48] sm:$0xff]   ;;  %v1085_v19 = vld [vmem:[%s1236_s7 + $0x50] sm:$0xff]   ;;  %p958_p11 = scmp.ne.s32.totalorder %s1155_s14, 17 }
  0x2a   : > { %v1078_v12 = vld [vmem:[%s1236_s7 + $0xc0] sm:$0xff]   ;;  %966 = vmatprep.subr.bf16.mxu0 %v1077_v11  ;;  %v1082_v16 = vld [vmem:[%s1236_s7 + $0xc8] sm:$0xff]   ;;  %v1086_v20 = vld [vmem:[%s1236_s7 + $0xd0] sm:$0xff]  }
  0x2b   : > { %v1079_v13 = vld [vmem:[%s1236_s7] sm:$0xff]   ;;  %1000 = vmatprep.subr.bf16.mxu1 %v1078_v12  ;;  %v1083_v17 = vld [vmem:[%s1236_s7 + $0x8] sm:$0xff]   ;;  %v1087_v21 = vld [vmem:[%s1236_s7 + $0x10] sm:$0xff]  }
  0x2c   : > { %v1080_v14 = vld [vmem:[%s1236_s7 + $0x80] sm:$0xff]   ;;  %967 = vmatpush3.bf16.msra.mxu0 %v1079_v13  ;;  %v1084_v18 = vld [vmem:[%s1236_s7 + $0x88] sm:$0xff]   ;;  %v1088_v22 = vld [vmem:[%s1236_s7 + $0x90] sm:$0xff]  }
  0x2d   : > { %1001 = vmatpush3.bf16.msra.mxu1 %v1080_v14  ;;  %968 = vmatprep.subr.bf16.mxu0 %v1081_v15  ;;  %v1089_v23 = vld [vmem:[%s1236_s7 + $0x58] sm:$0xff]   ;;  %v1093_v27 = vld [vmem:[%s1236_s7 + $0x60] sm:$0xff]   ;;  %v1097_v31 = vld [vmem:[%s1236_s7 + $0x68] sm:$0xff]  }
  0x2e   : > { %1002 = vmatprep.subr.bf16.mxu1 %v1082_v16  ;;  %v1090_v24 = vld [vmem:[%s1236_s7 + $0xd8] sm:$0xff]   ;;  %v1094_v28 = vld [vmem:[%s1236_s7 + $0xe0] sm:$0xff]   ;;  %v1098_v32 = vld [vmem:[%s1236_s7 + $0xe8] sm:$0xff]  }
  0x2f   : > { %v1091_v25 = vld [vmem:[%s1236_s7 + $0x18] sm:$0xff]   ;;  %v1095_v29 = vld [vmem:[%s1236_s7 + $0x20] sm:$0xff]   ;;  %v1099_v33 = vld [vmem:[%s1236_s7 + $0x28] sm:$0xff]  }
  0x30   : > { %969 = vmatpush3.bf16.msra.mxu0 %v1083_v17  ;;  %v1092_v26 = vld [vmem:[%s1236_s7 + $0x98] sm:$0xff]   ;;  %v1096_v30 = vld [vmem:[%s1236_s7 + $0xa0] sm:$0xff]   ;;  %v1100_v34 = vld [vmem:[%s1236_s7 + $0xa8] sm:$0xff]  }
  0x31   : > { %1003 = vmatpush3.bf16.msra.mxu1 %v1084_v18  ;;  %970 = vmatprep.subr.bf16.mxu0 %v1085_v19  ;;  %v1101_v35 = vld [vmem:[%s1236_s7 + $0x70] sm:$0xff]   ;;  %v1105_v39 = vld [vmem:[%s1236_s7 + $0x78] sm:$0xff]   ;;  %v304_v2 = vld [vmem:[#allocation2] sm:$0xff] }
  0x32   : > { %1004 = vmatprep.subr.bf16.mxu1 %v1086_v20  ;;  %v1102_v36 = vld [vmem:[%s1236_s7 + $0xf0] sm:$0xff]   ;;  %v1106_v40 = vld [vmem:[%s1236_s7 + $0xf8] sm:$0xff]   ;;  %v305_v7 = vld [vmem:[#allocation2 + $0x8] sm:$0xff] }
  0x33   : > { %v1103_v37 = vld [vmem:[%s1236_s7 + $0x30] sm:$0xff]   ;;  %v1107_v41 = vld [vmem:[%s1236_s7 + $0x38] sm:$0xff]  }
  0x34   : > { %971 = vmatpush3.bf16.msra.mxu0 %v1087_v21  ;;  %v1104_v38 = vld [vmem:[%s1236_s7 + $0xb0] sm:$0xff]   ;;  %v1108_v42 = vld [vmem:[%s1236_s7 + $0xb8] sm:$0xff]  }
  0x35   : > { %1005 = vmatpush3.bf16.msra.mxu1 %v1088_v22  ;;  %972 = vmatprep.subr.bf16.mxu0 %v1089_v23  ;;  %v1109_v43 = vld [vmem:[%s1238_s8] ss:$16 sps:$4 sm:$0xff]   ;;  %v1111_v44 = vld [vmem:[%s1238_s8 + $0x4] ss:$16 sps:$4 sm:$0xff]   ;;  %v1112_v45 = vld [vmem:[%s1238_s8 + $0x8] ss:$16 sps:$4 sm:$0xff]  }
  0x36   : > { %1006 = vmatprep.subr.bf16.mxu1 %v1090_v24  ;;  %v1114_v46 = vld [vmem:[%s1238_s8 + $0xc] ss:$16 sps:$4 sm:$0xff]   ;;  %661 = vmatprep.mubr.bf16.mxu0 %v1111_v44  ;;  %v1115_v47 = vld [vmem:[%s1238_s8 + $0x24] ss:$16 sps:$4 sm:$0xff]   ;;  %v1119_v51 = vld [vmem:[%s1238_s8 + $0x20] ss:$16 sps:$4 sm:$0xff]  }
  0x37   : > { %717 = vmatprep.mubr.bf16.mxu1 %v1114_v46  ;;  %v1117_v48 = vld [vmem:[%s1238_s8 + $0x2c] ss:$16 sps:$4 sm:$0xff]   ;;  %v317_v49 = vld [vmem:[%s1238_s8 + $0x40] sm:$0xff]  ;;  %v1120_v52 = vld [vmem:[%s1238_s8 + $0x28] ss:$16 sps:$4 sm:$0xff]  }
  0x38   : > { %973 = vmatpush3.bf16.msra.mxu0 %v1091_v25  ;;  %v318_v50 = vld [vmem:[%s1238_s8 + $0x48] sm:$0xff]  ;;  %v923_v53 = vcombine.high %v317_v49, %v317_v49  ;;  %v922_v55 = vcombine.low %v317_v49, %v317_v49  ;;  %v307_v25 = vld [vmem:[#allocation2 + $0x18] sm:$0xff] }
  0x39   : > { %1007 = vmatpush3.bf16.msra.mxu1 %v1092_v26  ;;  %974 = vmatprep.subr.bf16.mxu0 %v1093_v27  ;;  %v925_v54 = vcombine.high %v318_v50, %v318_v50  ;;  %v924_v56 = vcombine.low %v318_v50, %v318_v50  ;;  %v306_v20 = vld [vmem:[#allocation2 + $0x10] sm:$0xff]  ;;  %v960_v44 = vld [vmem:[%s1322_s2 + $0x1] ss:$0 sm:$0xff] (!%p958_p11) }
  0x3a   : > { %1008 = vmatprep.subr.bf16.mxu1 %v1094_v28 }
  0x3c   : > { %975 = vmatpush3.bf16.msra.mxu0 %v1095_v29 }
  0x3d   : > { %1009 = vmatpush3.bf16.msra.mxu1 %v1096_v30  ;;  %976 = vmatprep.subr.bf16.mxu0 %v1097_v31 }
  0x3e   : > { %1010 = vmatprep.subr.bf16.mxu1 %v1098_v32 }
  0x40   : > { %977 = vmatpush3.bf16.msra.mxu0 %v1099_v33 }
  0x41   : > { %1011 = vmatpush3.bf16.msra.mxu1 %v1100_v34  ;;  %978 = vmatprep.subr.bf16.mxu0 %v1101_v35 }
  0x42   : > { %1012 = vmatprep.subr.bf16.mxu1 %v1102_v36 }
  0x44   : > { %979 = vmatpush3.bf16.msra.mxu0 %v1103_v37 }
  0x45   : > { %1013 = vmatpush3.bf16.msra.mxu1 %v1104_v38  ;;  %980 = vmatprep.subr.bf16.mxu0 %v1105_v39  ;;  %v308_v38 = vld [vmem:[#allocation2 + $0x20] sm:$0xff] }
  0x46   : > { %1014 = vmatprep.subr.bf16.mxu1 %v1106_v40 }
  0x48   : > { %981 = vmatpush3.bf16.msra.mxu0 %v1107_v41 }
  0x49   : > { %1015 = vmatpush3.bf16.msra.mxu1 %v1108_v42 }
  0x4b   : > { %662 = vmatmul.mubr.bf16.vlgmr.msra.gmra.mrb[0].mxu0 %v1109_v43  ;;  %v959_v43 = vld [vmem:[%s1322_s2] ss:$0 sm:$0xff] (!%p958_p11) }
  0x4c   : > { %718 = vmatmul.mubr.bf16.vlgmr.msra.gmra.mrb[0].mxu1 %v1112_v45  ;;  %669 = vmatprep.mubr.bf16.mxu0 %v1115_v47 }
  0x4d   : > { %725 = vmatprep.mubr.bf16.mxu1 %v1117_v48 }
  0x53   : > { %670 = vmatmul.mubr.bf16.gmra.mrb[4].mxu0 %v1119_v51 }
  0x54   : > { %726 = vmatmul.mubr.bf16.gmra.mrb[4].mxu1 %v1120_v52  ;;  %677 = vmatprep.mubr.bf16.mxu0 %v923_v53 }
  0x55   : > { %733 = vmatprep.mubr.bf16.mxu1 %v925_v54 }
  0x5b   : > { %678 = vmatmul.mubr.bf16.gmra.mrb[8].mxu0 %v922_v55 }
  0x5c   : > { %734 = vmatmul.mubr.bf16.gmra.mrb[8].mxu1 %v924_v56 }
 0x11e   : > { %v982_v57 = vpop.f32.mrb[0].mxu0 }
 0x11f   : > { %v1016_v58 = vpop.f32.mrb[0].mxu1  ;;  %v983_v59 = vpop.f32.mrb[1].mxu0 }
 0x120   : > { %v984_v60 = vadd.f32 %v983_v59, %v982_v57  ;;  %v1017_v61 = vpop.f32.mrb[1].mxu1  ;;  %v985_v62 = vpop.f32.mrb[2].mxu0 }
 0x121   : > { %v1018_v63 = vadd.f32 %v1017_v61, %v1016_v58  ;;  %v1019_v0 = vpop.f32.mrb[2].mxu1  ;;  %v986_v1 = vpop.f32.mrb[3].mxu0 }
 0x122   : > { %v987_v3 = vadd.f32 %v986_v1, %v985_v62  ;;  %v1020_v4 = vpop.f32.mrb[3].mxu1 }
 0x123   : > { %v720_v5 = vadd.f32 %v1018_v63, %v984_v60  ;;  %v1021_v6 = vadd.f32 %v1020_v4, %v1019_v0 }
 0x125   : > { %v741_v8 = vadd.f32 %v720_v5, %v304_v2  ;;  %v723_v9 = vadd.f32 %v1021_v6, %v987_v3 }
 0x126   : > { %v988_v10 = vpop.f32.mrb[4].mxu0 }
 0x127   : > { %746 = vst [vmem:[#allocation2] sm:$0xff] %v741_v8  ;;  %v742_v11 = vadd.f32 %v723_v9, %v305_v7  ;;  %v1022_v12 = vpop.f32.mrb[4].mxu1  ;;  %v989_v13 = vpop.f32.mrb[5].mxu0 }
 0x128   : > { %v990_v14 = vadd.f32 %v989_v13, %v988_v10  ;;  %v1023_v15 = vpop.f32.mrb[5].mxu1  ;;  %v991_v16 = vpop.f32.mrb[6].mxu0 }
 0x129   : > { %747 = vst [vmem:[#allocation2 + $0x8] sm:$0xff] %v742_v11  ;;  %v1024_v17 = vadd.f32 %v1023_v15, %v1022_v12  ;;  %v1025_v18 = vpop.f32.mrb[6].mxu1  ;;  %v992_v19 = vpop.f32.mrb[7].mxu0 }
 0x12a   : > { %v993_v21 = vadd.f32 %v992_v19, %v991_v16  ;;  %v1026_v22 = vpop.f32.mrb[7].mxu1 }
 0x12b   : > { %v728_v23 = vadd.f32 %v1024_v17, %v990_v14  ;;  %v1027_v24 = vadd.f32 %v1026_v22, %v1025_v18 }
 0x12d   : > { %v743_v26 = vadd.f32 %v728_v23, %v306_v20  ;;  %v731_v27 = vadd.f32 %v1027_v24, %v993_v21 }
 0x12e   : > { %v994_v28 = vpop.f32.mrb[8].mxu0  ;;  %v755_v42 = vld [vmem:[#allocation2] sm:$0xff] (!%p958_p11) }
 0x12f   : > { %748 = vst [vmem:[#allocation2 + $0x10] sm:$0xff] %v743_v26  ;;  %v744_v29 = vadd.f32 %v731_v27, %v307_v25  ;;  %v1028_v30 = vpop.f32.mrb[8].mxu1  ;;  %v995_v31 = vpop.f32.mrb[9].mxu0  ;;  %v765_v45 = vmul.f32 (!%p958_p11), %v959_v43, %v755_v42 }
 0x130   : > { %v996_v32 = vadd.f32 %v995_v31, %v994_v28  ;;  %v1029_v33 = vpop.f32.mrb[9].mxu1  ;;  %v997_v34 = vpop.f32.mrb[10].mxu0  ;;  %v756_v46 = vld [vmem:[#allocation2 + $0x8] sm:$0xff] (!%p958_p11) }
 0x131   : > { %749 = vst [vmem:[#allocation2 + $0x18] sm:$0xff] %v744_v29  ;;  %v1030_v35 = vadd.f32 %v1029_v33, %v1028_v30  ;;  %v1031_v36 = vpop.f32.mrb[10].mxu1  ;;  %v998_v37 = vpop.f32.mrb[11].mxu0  ;;  %754 = sbr.rel (%p958_p11) target bundleno = 326 (0x146), region = 63  ;;  %v766_v49 = vmul.f32 (!%p958_p11), %v959_v43, %v756_v46  ;;  %v775_v53 = vadd.f32 (!%p958_p11), %v960_v44, %v765_v45 }
 0x132   : > { %v1032_v39 = vpop.f32.mrb[11].mxu1 }
 0x133   : > { %v736_v40 = vadd.f32 %v1030_v35, %v996_v32  ;;  %v776_v55 = vadd.f32 (!%p958_p11), %v960_v44, %v766_v49  ;;  %v780_v58 = vmax.f32 (!%p958_p11), %v775_v53, 0.0 }
 0x135   : > { %v745_v41 = vadd.f32 %v736_v40, %v308_v38  ;;  %v781_v60 = vmax.f32 (!%p958_p11), %v776_v55, 0.0  ;;  %785 = vst [vmem:[%s1323_s3] sm:$0xff] (!%p958_p11), %v780_v58 }
 0x136   : > { %v757_v47 = vld [vmem:[#allocation2 + $0x10] sm:$0xff] (!%p958_p11) }
 0x137   : > { %750 = vst [vmem:[#allocation2 + $0x20] sm:$0xff] %v745_v41  ;;  %v767_v50 = vmul.f32 (!%p958_p11), %v959_v43, %v757_v47  ;;  %786 = vst [vmem:[%s1323_s3 + $0x8] sm:$0xff] (!%p958_p11), %v781_v60 }
 0x138   : > { %v758_v48 = vld [vmem:[#allocation2 + $0x18] sm:$0xff] }
 0x139   : > { %v768_v51 = vmul.f32 %v959_v43, %v758_v48  ;;  %v777_v56 = vadd.f32 %v960_v44, %v767_v50 }
 0x13b   : > { %v778_v57 = vadd.f32 %v960_v44, %v768_v51  ;;  %v782_v61 = vmax.f32 %v777_v56, 0.0 }
 0x13d   : > { %v783_v62 = vmax.f32 %v778_v57, 0.0  ;;  %787 = vst [vmem:[%s1323_s3 + $0x10] sm:$0xff] %v782_v61 }
 0x13e   : > { %v759_v52 = vld [vmem:[#allocation2 + $0x20] sm:$0xff] }
 0x13f   : > { %v769_v54 = vmul.f32 %v959_v43, %v759_v52  ;;  %788 = vst [vmem:[%s1323_s3 + $0x18] sm:$0xff] %v783_v62 }
 0x141   : > { %v779_v59 = vadd.f32 %v960_v44, %v769_v54 }
 0x143   : > { %v784_v63 = vmax.f32 %v779_v59, 0.0 }
 0x145   : > { %789 = vst [vmem:[%s1323_s3 + $0x20] sm:$0xff] %v784_v63 }
 0x146 PF: > { %s13_s16 = sadd.s32 1, %s1163_s16   ;;  %s1324_s12 = smov %s1151_s13 }
 0x147   : > { %p10_p12 = scmp.ge.s32.totalorder %s13_s16, 20   ;;  %s1325_s13 = smov %s1221_s20 }
 0x148   : > { %s1326_s14 = smov %s1159_s15  ;;  %s1327_s15 = smov %s1329_s17 }
 0x149   :  { %12 = sbr.rel (!%p10_p12) target bundleno = 3 (0x3), region = 104 }

</bundles_post_ra>
